<compile_context>
chip_gen: v5e
topology: v5e:2x2
jax: 0.10.0
libtpu: 0.0.40
codegen_flags: <defaults>
</compile_context>

<pallas_src>
import functools
import math

import numpy as np
import jax
import jax.numpy as jnp
from jax.experimental import pallas as pl
from jax.experimental.pallas import tpu as pltpu  # noqa: F401

# ----------------------------- model config ---------------------------------
B = 2             # batch
T = 8             # clip_len
C = 3             # RGB
H = W = 16        # spatial
D = 32            # backbone feature dim (self._d)
NHEAD = 8
FF = 2 * D        # dim_feedforward
NUM_CLASSES = 4
NUM_LAYERS = 4
TEMPORAL_STRIDE = 1
LN_EPS = 1e-5
OUT_PAD = 128     # lane-dense output width; real logits occupy the first columns

_IMAGENET_MEAN = (0.485, 0.456, 0.406)
_IMAGENET_STD = (0.229, 0.224, 0.225)


# ------------------------------ fused kernel --------------------------------
def _fused_forward_kernel(
    x_ref,              # (B*T, C*H*W)      raw pixels in [0, 255], bf16
    wbb_ref, bbb_ref,   # backbone projection (normalization pre-folded)
    g_ref,              # (SL, B*T)         0/1 downsample + pad + branch-batch selection
    pos_ref,            # (SL, D)           positional encodings (padded rows zeroed)
    amask_ref,          # (NHEAD*SL, SL)    additive attn mask, pre-tiled per head
    hmask_ref,          # (NHEAD*SL, D)     0/1 per-head column masks, stacked per head
    w_qkv_ref, b_qkv_ref, w_o_ref, b_o_ref,
    ln1_g_ref, ln1_b_ref,
    w_ff1_ref, b_ff1_ref, w_ff2_ref, b_ff2_ref,
    ln2_g_ref, ln2_b_ref,
    p0_ref, p1_ref, p2_ref,   # (B*T, SL)   0/1 repeat_interleave selections
    w_head_ref, b_head_ref,   # fused fc + offset head, padded to (3D, OUT_PAD)
    out_ref,                  # (B*T, OUT_PAD)
    *, nhead, num_layers, n_tok):
    f32 = jnp.float32
    bf16 = jnp.bfloat16

    def mm(a, b):        # a @ b on the MXU: bf16 operands, f32 accumulation
        return jnp.dot(a.astype(bf16), b.astype(bf16),
                       preferred_element_type=f32)

    def mm_t(a, b):      # a @ b.T without materializing a transpose
        return jax.lax.dot_general(a.astype(bf16), b.astype(bf16),
                                   (((1,), (1,)), ((), ())),
                                   preferred_element_type=f32)

    def layernorm(v, g, b):
        mu = jnp.mean(v, axis=-1, keepdims=True)
        var = jnp.mean((v - mu) * (v - mu), axis=-1, keepdims=True)
        return (v - mu) * jax.lax.rsqrt(var + LN_EPS) * g + b

    # backbone projection; normalize() + standarize() folded into wbb/bbb.
    feat = mm(x_ref[...], wbb_ref[...]) + bbb_ref[...]               # (B*T, D)

    # temporal downsample + zero-pad + batch the 3 stride branches via one
    # constant 0/1 selection matmul, then add positions.
    h = jnp.dot(g_ref[...], feat, preferred_element_type=f32) + pos_ref[...]

    amask = amask_ref[...]
    hmask = hmask_ref[...]
    w_qkv = w_qkv_ref[...]; b_qkv = b_qkv_ref[...]
    w_o = w_o_ref[...]; b_o = b_o_ref[...]
    ln1_g = ln1_g_ref[...]; ln1_b = ln1_b_ref[...]
    w_ff1 = w_ff1_ref[...]; b_ff1 = b_ff1_ref[...]
    w_ff2 = w_ff2_ref[...]; b_ff2 = b_ff2_ref[...]
    ln2_g = ln2_g_ref[...]; ln2_b = ln2_b_ref[...]

    d = w_o.shape[0]
    att_scale = 1.0 / math.sqrt(d // nhead)

    # 4 post-norm TransformerEncoderLayers (relu FF, eval -> no dropout).
    # All layers share identical weights (PyTorch deepcopy-at-init semantics),
    # so the same VMEM-resident weights are reused every iteration.
    for _ in range(num_layers):
        qkv = mm(h, w_qkv) + b_qkv                                   # (SL, 3D)
        q2 = qkv[:, :d] * att_scale
        k2 = qkv[:, d:2 * d]
        v2 = qkv[:, 2 * d:]

        # All heads at once: stack the per-head 0/1-masked queries along the row
        # axis -> two large lane-dense MXU ops + one vectorized softmax instead
        # of 8 small per-head matmul/softmax pairs.
        qs = jnp.concatenate([q2] * nhead, axis=0) * hmask           # (H*SL, D)
        s = mm_t(qs, k2) + amask                                     # (H*SL, SL)
        m = jnp.max(s, axis=-1, keepdims=True)
        p = jnp.exp(s - m)
        p = p * pl.reciprocal(jnp.sum(p, axis=-1, keepdims=True), approx=True)
        o = mm(p, v2) * hmask                                        # (H*SL, D)
        # Recombine heads: each feature column is owned by exactly one head, so
        # summing the per-head row blocks yields the concat-of-heads output.
        attn = o[0:n_tok]
        for hh in range(1, nhead):
            attn = attn + o[hh * n_tok:(hh + 1) * n_tok]

        attn = mm(attn, w_o) + b_o
        h = layernorm(h + attn, ln1_g, ln1_b)
        ff = jnp.maximum(mm(h, w_ff1) + b_ff1, 0.0)
        ff = mm(ff, w_ff2) + b_ff2
        h = layernorm(h + ff, ln2_g, ln2_b)

    # repeat_interleave (+ pad-with-last) back to clip_len, then concat the
    # three branches along the feature dim -> (B*T, 3D).
    r = jnp.concatenate(
        [jnp.dot(p0_ref[...], h, preferred_element_type=f32),
         jnp.dot(p1_ref[...], h, preferred_element_type=f32),
         jnp.dot(p2_ref[...], h, preferred_element_type=f32)],
        axis=-1)

    # fused classification + offset heads (padded to 128 lanes -> unmasked store).
    out_ref[...] = mm(r, w_head_ref[...]) + b_head_ref[...]


# --------------------------- static selection tables ------------------------
def _static_tables(batch, clip_len, d, nhead, strides):
    """Constant 0/1 selection matrices and masks consumed by the fused kernel."""
    n_br = len(strides)
    lens = [len(range(0, clip_len, s)) for s in strides]
    n_seq = n_br * batch
    lmax = clip_len
    bt = batch * clip_len
    sl = n_seq * lmax

    g = np.zeros((sl, bt), np.float32)                   # downsample + pad
    amask = np.full((sl, sl), -1e9, np.float32)
    row_valid = np.zeros((sl, 1), np.float32)
    p_mats = [np.zeros((bt, sl), np.float32) for _ in range(n_br)]

    for br, stride in enumerate(strides):
        length = lens[br]
        rep = clip_len // length
        for b in range(batch):
            s = br * batch + b
            r0 = s * lmax
            # keys of this sequence: only the first `length` (valid) positions.
            amask[r0:r0 + lmax, r0:r0 + length] = 0.0
            for l in range(length):
                g[r0 + l, b * clip_len + l * stride] = 1.0
                row_valid[r0 + l, 0] = 1.0
            for t in range(clip_len):
                # repeat_interleave(rep) then pad with the last frame if short.
                j = min(t // rep, length - 1)
                p_mats[br][b * clip_len + t, r0 + j] = 1.0

    hmask = np.zeros((nhead, d), np.float32)
    dh = d // nhead
    for hh in range(nhead):
        hmask[hh, hh * dh:(hh + 1) * dh] = 1.0

    amask_stack = np.tile(amask, (nhead, 1))             # (nhead*sl, sl)
    hmask_stack = np.repeat(hmask, sl, axis=0)           # (nhead*sl, d)
    return g, amask_stack, row_valid, p_mats, hmask_stack


# ------------------------------- forward pass --------------------------------
def rgb_classifier_forward(x, params):
    """x: (B, T, C, H, W) raw pixel values in [0, 255]. Eval mode (no augment)."""
    batch, clip_len, channels, height, width = x.shape
    bt = batch * clip_len
    chw = channels * height * width
    d = params["backbone_w"].shape[1]
    n_logit = params["fc_w"].shape[1]

    # Fold normalize() (x/255) + standarize() (ImageNet mean/std) into the
    # backbone projection:  norm(x) @ W + b  ==  x @ (s*W) + (c @ W + b).
    mean = jnp.array(_IMAGENET_MEAN, jnp.float32)
    std = jnp.array(_IMAGENET_STD, jnp.float32)
    scale = jnp.repeat(1.0 / (255.0 * std), height * width)       # (C*H*W,)
    shift = jnp.repeat(-mean / std, height * width)               # (C*H*W,)
    w_bb = (params["backbone_w"] * scale[:, None]).astype(jnp.bfloat16)
    b_bb = params["backbone_b"] + shift @ params["backbone_w"]

    strides = (TEMPORAL_STRIDE, TEMPORAL_STRIDE * 2, TEMPORAL_STRIDE * 4)
    g_mat, amask_stack, row_valid, p_mats, hmask_stack = _static_tables(
        batch, clip_len, d, NHEAD, strides)
    sl = g_mat.shape[0]

    # Positional encodings for the 3 branches, padded rows zeroed (padded rows
    # are masked out of attention and never selected by the output gather).
    pos_pad = jnp.tile(params["pos"][0], (len(strides) * batch, 1)) * row_valid

    # Fused classification + offset heads, zero-padded to 128 output lanes so
    # the kernel's final store is unmasked / lane-dense.
    lp = params["layer"]
    w_head = jnp.concatenate([params["fc_w"], params["off_w"]], axis=1)
    b_head = jnp.concatenate([params["fc_b"], params["off_b"]], axis=1)
    n_raw = w_head.shape[1]
    w_head = jnp.pad(w_head, ((0, 0), (0, OUT_PAD - n_raw))).astype(jnp.bfloat16)
    b_head = jnp.pad(b_head, ((0, 0), (0, OUT_PAD - n_raw)))

    x_flat = x.reshape(bt, chw).astype(jnp.bfloat16)
    bf = lambda a: a.astype(jnp.bfloat16)   # cast MXU weight operands once here

    out = pl.pallas_call(
        functools.partial(_fused_forward_kernel, nhead=NHEAD,
                          num_layers=NUM_LAYERS, n_tok=sl),
        out_shape=jax.ShapeDtypeStruct((bt, OUT_PAD), jnp.float32),
    )(x_flat, w_bb, b_bb, g_mat, pos_pad, amask_stack, hmask_stack,
      bf(lp["w_qkv"]), lp["b_qkv"], bf(lp["w_o"]), lp["b_o"],
      lp["ln1_g"], lp["ln1_b"],
      bf(lp["w_ff1"]), lp["b_ff1"], bf(lp["w_ff2"]), lp["b_ff2"],
      lp["ln2_g"], lp["ln2_b"],
      p_mats[0], p_mats[1], p_mats[2], w_head, b_head)

    logits = out[:, :n_logit].reshape(batch, clip_len, n_logit)
    offsets = out[:, n_logit].reshape(batch, clip_len)
    return logits, offsets


# ------------------------------- param init ---------------------------------
def init_params(key):
    ks = jax.random.split(key, 12)

    def rnd(k, shape, scale=0.05):
        return jax.random.normal(k, shape, jnp.float32) * scale

    layer = {
        "w_qkv": rnd(ks[0], (D, 3 * D)),
        "b_qkv": jnp.zeros((1, 3 * D), jnp.float32),
        "w_o": rnd(ks[1], (D, D)),
        "b_o": jnp.zeros((1, D), jnp.float32),
        "ln1_g": jnp.ones((1, D), jnp.float32),
        "ln1_b": jnp.zeros((1, D), jnp.float32),
        "w_ff1": rnd(ks[2], (D, FF)),
        "b_ff1": jnp.zeros((1, FF), jnp.float32),
        "w_ff2": rnd(ks[3], (FF, D)),
        "b_ff2": jnp.zeros((1, D), jnp.float32),
        "ln2_g": jnp.ones((1, D), jnp.float32),
        "ln2_b": jnp.zeros((1, D), jnp.float32),
    }
    params = {
        "backbone_w": rnd(ks[4], (C * H * W, D), scale=0.02),
        "backbone_b": jnp.zeros((1, D), jnp.float32),
        "pos": rnd(ks[5], (1, T, D), scale=1.0),   # torch.randn(1, clip_len, d)
        "layer": layer,                            # shared 3x4 layers (deepcopy init)
        "fc_w": rnd(ks[6], (3 * D, NUM_CLASSES + 1)),
        "fc_b": jnp.zeros((1, NUM_CLASSES + 1), jnp.float32),
        "off_w": rnd(ks[7], (3 * D, 1)),
        "off_b": jnp.zeros((1, 1), jnp.float32),
    }
    return params


# ---------------------------------- main -------------------------------------
if __name__ == "__main__":
    key = jax.random.PRNGKey(0)
    k_x, k_p = jax.random.split(key)
    # raw uint8-range pixel values, as expected by normalize()
    x = jax.random.uniform(k_x, (B, T, C, H, W), jnp.float32, 0.0, 255.0)
    params = init_params(k_p)

    logits, offsets = jax.jit(rgb_classifier_forward)(x, params)
    jax.block_until_ready((logits, offsets))

    assert logits.shape == (B, T, NUM_CLASSES + 1), logits.shape
    assert offsets.shape == (B, T), offsets.shape
    assert bool(jnp.all(jnp.isfinite(logits))) and bool(jnp.all(jnp.isfinite(offsets)))
    print("KERNEL_OK")
</pallas_src>

<mosaic_0001>
module attributes {stable_mosaic.version = 11 : i64} {
  func.func @_fused_forward_kernel(%arg0: memref<16x768xbf16, #tpu.memory_space<vmem>>, %arg1: memref<768x32xbf16, #tpu.memory_space<vmem>>, %arg2: memref<1x32xf32, #tpu.memory_space<vmem>>, %arg3: memref<48x16xf32, #tpu.memory_space<vmem>>, %arg4: memref<48x32xf32, #tpu.memory_space<vmem>>, %arg5: memref<384x48xf32, #tpu.memory_space<vmem>>, %arg6: memref<384x32xf32, #tpu.memory_space<vmem>>, %arg7: memref<32x96xbf16, #tpu.memory_space<vmem>>, %arg8: memref<1x96xf32, #tpu.memory_space<vmem>>, %arg9: memref<32x32xbf16, #tpu.memory_space<vmem>>, %arg10: memref<1x32xf32, #tpu.memory_space<vmem>>, %arg11: memref<1x32xf32, #tpu.memory_space<vmem>>, %arg12: memref<1x32xf32, #tpu.memory_space<vmem>>, %arg13: memref<32x64xbf16, #tpu.memory_space<vmem>>, %arg14: memref<1x64xf32, #tpu.memory_space<vmem>>, %arg15: memref<64x32xbf16, #tpu.memory_space<vmem>>, %arg16: memref<1x32xf32, #tpu.memory_space<vmem>>, %arg17: memref<1x32xf32, #tpu.memory_space<vmem>>, %arg18: memref<1x32xf32, #tpu.memory_space<vmem>>, %arg19: memref<16x48xf32, #tpu.memory_space<vmem>>, %arg20: memref<16x48xf32, #tpu.memory_space<vmem>>, %arg21: memref<16x48xf32, #tpu.memory_space<vmem>>, %arg22: memref<96x128xbf16, #tpu.memory_space<vmem>>, %arg23: memref<1x128xf32, #tpu.memory_space<vmem>>, %arg24: memref<16x128xf32, #tpu.memory_space<vmem>>) attributes {dimension_semantics = [], scalar_prefetch = 0 : i64, scratch_operands = 0 : i64, tpu.core_type = #tpu.core_type<tc>} {
    %c0 = arith.constant 0 : index
    %c0_0 = arith.constant 0 : index
    %0 = vector.load %arg0[%c0, %c0_0] : memref<16x768xbf16, #tpu.memory_space<vmem>>, vector<16x768xbf16>
    %c0_1 = arith.constant 0 : index
    %c0_2 = arith.constant 0 : index
    %1 = vector.load %arg1[%c0_1, %c0_2] : memref<768x32xbf16, #tpu.memory_space<vmem>>, vector<768x32xbf16>
    %cst = arith.constant dense<0.000000e+00> : vector<16x32xf32>
    %2 = tpu.matmul %0, %1, %cst {dimension_numbers = #tpu.dot_dimension_numbers<[1], [0], [0], [1], [0, 0, 1, 1], [], []>} : vector<16x768xbf16>, vector<768x32xbf16>, vector<16x32xf32> -> vector<16x32xf32>
    %c0_3 = arith.constant 0 : index
    %c0_4 = arith.constant 0 : index
    %3 = vector.load %arg2[%c0_3, %c0_4] : memref<1x32xf32, #tpu.memory_space<vmem>>, vector<1x32xf32>
    %4 = vector.broadcast %3 : vector<1x32xf32> to vector<16x32xf32>
    %5 = arith.addf %2, %4 : vector<16x32xf32>
    %c0_5 = arith.constant 0 : index
    %c0_6 = arith.constant 0 : index
    %6 = vector.load %arg3[%c0_5, %c0_6] : memref<48x16xf32, #tpu.memory_space<vmem>>, vector<48x16xf32>
    %cst_7 = arith.constant dense<0.000000e+00> : vector<48x32xf32>
    %7 = tpu.matmul %6, %5, %cst_7 {dimension_numbers = #tpu.dot_dimension_numbers<[1], [0], [0], [1], [0, 0, 1, 1], [], []>} : vector<48x16xf32>, vector<16x32xf32>, vector<48x32xf32> -> vector<48x32xf32>
    %c0_8 = arith.constant 0 : index
    %c0_9 = arith.constant 0 : index
    %8 = vector.load %arg4[%c0_8, %c0_9] : memref<48x32xf32, #tpu.memory_space<vmem>>, vector<48x32xf32>
    %9 = arith.addf %7, %8 : vector<48x32xf32>
    %c0_10 = arith.constant 0 : index
    %c0_11 = arith.constant 0 : index
    %10 = vector.load %arg5[%c0_10, %c0_11] : memref<384x48xf32, #tpu.memory_space<vmem>>, vector<384x48xf32>
    %c0_12 = arith.constant 0 : index
    %c0_13 = arith.constant 0 : index
    %11 = vector.load %arg6[%c0_12, %c0_13] : memref<384x32xf32, #tpu.memory_space<vmem>>, vector<384x32xf32>
    %c0_14 = arith.constant 0 : index
    %c0_15 = arith.constant 0 : index
    %12 = vector.load %arg7[%c0_14, %c0_15] : memref<32x96xbf16, #tpu.memory_space<vmem>>, vector<32x96xbf16>
    %c0_16 = arith.constant 0 : index
    %c0_17 = arith.constant 0 : index
    %13 = vector.load %arg8[%c0_16, %c0_17] : memref<1x96xf32, #tpu.memory_space<vmem>>, vector<1x96xf32>
    %c0_18 = arith.constant 0 : index
    %c0_19 = arith.constant 0 : index
    %14 = vector.load %arg9[%c0_18, %c0_19] : memref<32x32xbf16, #tpu.memory_space<vmem>>, vector<32x32xbf16>
    %c0_20 = arith.constant 0 : index
    %c0_21 = arith.constant 0 : index
    %15 = vector.load %arg10[%c0_20, %c0_21] : memref<1x32xf32, #tpu.memory_space<vmem>>, vector<1x32xf32>
    %c0_22 = arith.constant 0 : index
    %c0_23 = arith.constant 0 : index
    %16 = vector.load %arg11[%c0_22, %c0_23] : memref<1x32xf32, #tpu.memory_space<vmem>>, vector<1x32xf32>
    %c0_24 = arith.constant 0 : index
    %c0_25 = arith.constant 0 : index
    %17 = vector.load %arg12[%c0_24, %c0_25] : memref<1x32xf32, #tpu.memory_space<vmem>>, vector<1x32xf32>
    %c0_26 = arith.constant 0 : index
    %c0_27 = arith.constant 0 : index
    %18 = vector.load %arg13[%c0_26, %c0_27] : memref<32x64xbf16, #tpu.memory_space<vmem>>, vector<32x64xbf16>
    %c0_28 = arith.constant 0 : index
    %c0_29 = arith.constant 0 : index
    %19 = vector.load %arg14[%c0_28, %c0_29] : memref<1x64xf32, #tpu.memory_space<vmem>>, vector<1x64xf32>
    %c0_30 = arith.constant 0 : index
    %c0_31 = arith.constant 0 : index
    %20 = vector.load %arg15[%c0_30, %c0_31] : memref<64x32xbf16, #tpu.memory_space<vmem>>, vector<64x32xbf16>
    %c0_32 = arith.constant 0 : index
    %c0_33 = arith.constant 0 : index
    %21 = vector.load %arg16[%c0_32, %c0_33] : memref<1x32xf32, #tpu.memory_space<vmem>>, vector<1x32xf32>
    %c0_34 = arith.constant 0 : index
    %c0_35 = arith.constant 0 : index
    %22 = vector.load %arg17[%c0_34, %c0_35] : memref<1x32xf32, #tpu.memory_space<vmem>>, vector<1x32xf32>
    %c0_36 = arith.constant 0 : index
    %c0_37 = arith.constant 0 : index
    %23 = vector.load %arg18[%c0_36, %c0_37] : memref<1x32xf32, #tpu.memory_space<vmem>>, vector<1x32xf32>
    %24 = arith.truncf %9 : vector<48x32xf32> to vector<48x32xbf16>
    %cst_38 = arith.constant dense<0.000000e+00> : vector<48x96xf32>
    %25 = tpu.matmul %24, %12, %cst_38 {dimension_numbers = #tpu.dot_dimension_numbers<[1], [0], [0], [1], [0, 0, 1, 1], [], []>} : vector<48x32xbf16>, vector<32x96xbf16>, vector<48x96xf32> -> vector<48x96xf32>
    %26 = vector.broadcast %13 : vector<1x96xf32> to vector<48x96xf32>
    %27 = arith.addf %25, %26 : vector<48x96xf32>
    %28 = vector.extract_strided_slice %27 {offsets = [0, 0], sizes = [48, 32], strides = [1, 1]} : vector<48x96xf32> to vector<48x32xf32>
    %cst_39 = arith.constant 5.000000e-01 : f32
    %29 = vector.broadcast %cst_39 : f32 to vector<48x32xf32>
    %30 = arith.mulf %28, %29 : vector<48x32xf32>
    %31 = vector.extract_strided_slice %27 {offsets = [0, 32], sizes = [48, 32], strides = [1, 1]} : vector<48x96xf32> to vector<48x32xf32>
    %32 = vector.extract_strided_slice %27 {offsets = [0, 64], sizes = [48, 32], strides = [1, 1]} : vector<48x96xf32> to vector<48x32xf32>
    %33 = tpu.concatenate %30, %30, %30, %30, %30, %30, %30, %30 in 0 : vector<48x32xf32>, vector<48x32xf32>, vector<48x32xf32>, vector<48x32xf32>, vector<48x32xf32>, vector<48x32xf32>, vector<48x32xf32>, vector<48x32xf32> -> vector<384x32xf32>
    %34 = arith.mulf %33, %11 : vector<384x32xf32>
    %35 = arith.truncf %34 : vector<384x32xf32> to vector<384x32xbf16>
    %36 = arith.truncf %31 : vector<48x32xf32> to vector<48x32xbf16>
    %cst_40 = arith.constant dense<0.000000e+00> : vector<384x48xf32>
    %37 = tpu.matmul %35, %36, %cst_40 {dimension_numbers = #tpu.dot_dimension_numbers<[1], [1], [0], [0], [0, 0, 1, 0], [], []>} : vector<384x32xbf16>, vector<48x32xbf16>, vector<384x48xf32> -> vector<384x48xf32>
    %38 = arith.addf %37, %10 : vector<384x48xf32>
    %cst_41 = arith.constant dense<0xFF800000> : vector<384xf32>
    %39 = vector.multi_reduction <maximumf>, %38, %cst_41 [1] : vector<384x48xf32> to vector<384xf32>
    %40 = vector.shape_cast %39 : vector<384xf32> to vector<384x1xf32>
    %41 = vector.broadcast %40 : vector<384x1xf32> to vector<384x48xf32>
    %42 = arith.subf %38, %41 : vector<384x48xf32>
    %43 = math.exp %42 : vector<384x48xf32>
    %cst_42 = arith.constant dense<0.000000e+00> : vector<384xf32>
    %44 = vector.multi_reduction <add>, %43, %cst_42 [1] : vector<384x48xf32> to vector<384xf32>
    %45 = vector.shape_cast %44 : vector<384xf32> to vector<384x1xf32>
    %46 = tpu.reciprocal %45 {approx = true} : vector<384x1xf32> -> vector<384x1xf32>
    %47 = vector.broadcast %46 : vector<384x1xf32> to vector<384x48xf32>
    %48 = arith.mulf %43, %47 : vector<384x48xf32>
    %49 = arith.truncf %48 : vector<384x48xf32> to vector<384x48xbf16>
    %50 = arith.truncf %32 : vector<48x32xf32> to vector<48x32xbf16>
    %cst_43 = arith.constant dense<0.000000e+00> : vector<384x32xf32>
    %51 = tpu.matmul %49, %50, %cst_43 {dimension_numbers = #tpu.dot_dimension_numbers<[1], [0], [0], [1], [0, 0, 1, 1], [], []>} : vector<384x48xbf16>, vector<48x32xbf16>, vector<384x32xf32> -> vector<384x32xf32>
    %52 = arith.mulf %51, %11 : vector<384x32xf32>
    %53 = vector.extract_strided_slice %52 {offsets = [0, 0], sizes = [48, 32], strides = [1, 1]} : vector<384x32xf32> to vector<48x32xf32>
    %54 = vector.extract_strided_slice %52 {offsets = [48, 0], sizes = [48, 32], strides = [1, 1]} : vector<384x32xf32> to vector<48x32xf32>
    %55 = arith.addf %53, %54 : vector<48x32xf32>
    %56 = vector.extract_strided_slice %52 {offsets = [96, 0], sizes = [48, 32], strides = [1, 1]} : vector<384x32xf32> to vector<48x32xf32>
    %57 = arith.addf %55, %56 : vector<48x32xf32>
    %58 = vector.extract_strided_slice %52 {offsets = [144, 0], sizes = [48, 32], strides = [1, 1]} : vector<384x32xf32> to vector<48x32xf32>
    %59 = arith.addf %57, %58 : vector<48x32xf32>
    %60 = vector.extract_strided_slice %52 {offsets = [192, 0], sizes = [48, 32], strides = [1, 1]} : vector<384x32xf32> to vector<48x32xf32>
    %61 = arith.addf %59, %60 : vector<48x32xf32>
    %62 = vector.extract_strided_slice %52 {offsets = [240, 0], sizes = [48, 32], strides = [1, 1]} : vector<384x32xf32> to vector<48x32xf32>
    %63 = arith.addf %61, %62 : vector<48x32xf32>
    %64 = vector.extract_strided_slice %52 {offsets = [288, 0], sizes = [48, 32], strides = [1, 1]} : vector<384x32xf32> to vector<48x32xf32>
    %65 = arith.addf %63, %64 : vector<48x32xf32>
    %66 = vector.extract_strided_slice %52 {offsets = [336, 0], sizes = [48, 32], strides = [1, 1]} : vector<384x32xf32> to vector<48x32xf32>
    %67 = arith.addf %65, %66 : vector<48x32xf32>
    %68 = arith.truncf %67 : vector<48x32xf32> to vector<48x32xbf16>
    %cst_44 = arith.constant dense<0.000000e+00> : vector<48x32xf32>
    %69 = tpu.matmul %68, %14, %cst_44 {dimension_numbers = #tpu.dot_dimension_numbers<[1], [0], [0], [1], [0, 0, 1, 1], [], []>} : vector<48x32xbf16>, vector<32x32xbf16>, vector<48x32xf32> -> vector<48x32xf32>
    %70 = vector.broadcast %15 : vector<1x32xf32> to vector<48x32xf32>
    %71 = arith.addf %69, %70 : vector<48x32xf32>
    %72 = arith.addf %9, %71 : vector<48x32xf32>
    %cst_45 = arith.constant dense<0.000000e+00> : vector<48xf32>
    %73 = vector.multi_reduction <add>, %72, %cst_45 [1] : vector<48x32xf32> to vector<48xf32>
    %74 = vector.shape_cast %73 : vector<48xf32> to vector<48x1xf32>
    %cst_46 = arith.constant 3.200000e+01 : f32
    %75 = vector.broadcast %cst_46 : f32 to vector<48x1xf32>
    %76 = arith.divf %74, %75 : vector<48x1xf32>
    %77 = vector.broadcast %76 : vector<48x1xf32> to vector<48x32xf32>
    %78 = arith.subf %72, %77 : vector<48x32xf32>
    %79 = vector.broadcast %76 : vector<48x1xf32> to vector<48x32xf32>
    %80 = arith.subf %72, %79 : vector<48x32xf32>
    %81 = arith.mulf %78, %80 : vector<48x32xf32>
    %cst_47 = arith.constant dense<0.000000e+00> : vector<48xf32>
    %82 = vector.multi_reduction <add>, %81, %cst_47 [1] : vector<48x32xf32> to vector<48xf32>
    %83 = vector.shape_cast %82 : vector<48xf32> to vector<48x1xf32>
    %cst_48 = arith.constant 3.200000e+01 : f32
    %84 = vector.broadcast %cst_48 : f32 to vector<48x1xf32>
    %85 = arith.divf %83, %84 : vector<48x1xf32>
    %86 = vector.broadcast %76 : vector<48x1xf32> to vector<48x32xf32>
    %87 = arith.subf %72, %86 : vector<48x32xf32>
    %cst_49 = arith.constant 9.99999974E-6 : f32
    %88 = vector.broadcast %cst_49 : f32 to vector<48x1xf32>
    %89 = arith.addf %85, %88 : vector<48x1xf32>
    %90 = math.rsqrt %89 : vector<48x1xf32>
    %91 = vector.broadcast %90 : vector<48x1xf32> to vector<48x32xf32>
    %92 = arith.mulf %87, %91 : vector<48x32xf32>
    %93 = vector.broadcast %16 : vector<1x32xf32> to vector<48x32xf32>
    %94 = arith.mulf %92, %93 : vector<48x32xf32>
    %95 = vector.broadcast %17 : vector<1x32xf32> to vector<48x32xf32>
    %96 = arith.addf %94, %95 : vector<48x32xf32>
    %97 = arith.truncf %96 : vector<48x32xf32> to vector<48x32xbf16>
    %cst_50 = arith.constant dense<0.000000e+00> : vector<48x64xf32>
    %98 = tpu.matmul %97, %18, %cst_50 {dimension_numbers = #tpu.dot_dimension_numbers<[1], [0], [0], [1], [0, 0, 1, 1], [], []>} : vector<48x32xbf16>, vector<32x64xbf16>, vector<48x64xf32> -> vector<48x64xf32>
    %99 = vector.broadcast %19 : vector<1x64xf32> to vector<48x64xf32>
    %100 = arith.addf %98, %99 : vector<48x64xf32>
    %cst_51 = arith.constant 0.000000e+00 : f32
    %101 = vector.broadcast %cst_51 : f32 to vector<48x64xf32>
    %102 = arith.maximumf %100, %101 : vector<48x64xf32>
    %103 = arith.truncf %102 : vector<48x64xf32> to vector<48x64xbf16>
    %cst_52 = arith.constant dense<0.000000e+00> : vector<48x32xf32>
    %104 = tpu.matmul %103, %20, %cst_52 {dimension_numbers = #tpu.dot_dimension_numbers<[1], [0], [0], [1], [0, 0, 1, 1], [], []>} : vector<48x64xbf16>, vector<64x32xbf16>, vector<48x32xf32> -> vector<48x32xf32>
    %105 = vector.broadcast %21 : vector<1x32xf32> to vector<48x32xf32>
    %106 = arith.addf %104, %105 : vector<48x32xf32>
    %107 = arith.addf %96, %106 : vector<48x32xf32>
    %cst_53 = arith.constant dense<0.000000e+00> : vector<48xf32>
    %108 = vector.multi_reduction <add>, %107, %cst_53 [1] : vector<48x32xf32> to vector<48xf32>
    %109 = vector.shape_cast %108 : vector<48xf32> to vector<48x1xf32>
    %cst_54 = arith.constant 3.200000e+01 : f32
    %110 = vector.broadcast %cst_54 : f32 to vector<48x1xf32>
    %111 = arith.divf %109, %110 : vector<48x1xf32>
    %112 = vector.broadcast %111 : vector<48x1xf32> to vector<48x32xf32>
    %113 = arith.subf %107, %112 : vector<48x32xf32>
    %114 = vector.broadcast %111 : vector<48x1xf32> to vector<48x32xf32>
    %115 = arith.subf %107, %114 : vector<48x32xf32>
    %116 = arith.mulf %113, %115 : vector<48x32xf32>
    %cst_55 = arith.constant dense<0.000000e+00> : vector<48xf32>
    %117 = vector.multi_reduction <add>, %116, %cst_55 [1] : vector<48x32xf32> to vector<48xf32>
    %118 = vector.shape_cast %117 : vector<48xf32> to vector<48x1xf32>
    %cst_56 = arith.constant 3.200000e+01 : f32
    %119 = vector.broadcast %cst_56 : f32 to vector<48x1xf32>
    %120 = arith.divf %118, %119 : vector<48x1xf32>
    %121 = vector.broadcast %111 : vector<48x1xf32> to vector<48x32xf32>
    %122 = arith.subf %107, %121 : vector<48x32xf32>
    %cst_57 = arith.constant 9.99999974E-6 : f32
    %123 = vector.broadcast %cst_57 : f32 to vector<48x1xf32>
    %124 = arith.addf %120, %123 : vector<48x1xf32>
    %125 = math.rsqrt %124 : vector<48x1xf32>
    %126 = vector.broadcast %125 : vector<48x1xf32> to vector<48x32xf32>
    %127 = arith.mulf %122, %126 : vector<48x32xf32>
    %128 = vector.broadcast %22 : vector<1x32xf32> to vector<48x32xf32>
    %129 = arith.mulf %127, %128 : vector<48x32xf32>
    %130 = vector.broadcast %23 : vector<1x32xf32> to vector<48x32xf32>
    %131 = arith.addf %129, %130 : vector<48x32xf32>
    %132 = arith.truncf %131 : vector<48x32xf32> to vector<48x32xbf16>
    %cst_58 = arith.constant dense<0.000000e+00> : vector<48x96xf32>
    %133 = tpu.matmul %132, %12, %cst_58 {dimension_numbers = #tpu.dot_dimension_numbers<[1], [0], [0], [1], [0, 0, 1, 1], [], []>} : vector<48x32xbf16>, vector<32x96xbf16>, vector<48x96xf32> -> vector<48x96xf32>
    %134 = vector.broadcast %13 : vector<1x96xf32> to vector<48x96xf32>
    %135 = arith.addf %133, %134 : vector<48x96xf32>
    %136 = vector.extract_strided_slice %135 {offsets = [0, 0], sizes = [48, 32], strides = [1, 1]} : vector<48x96xf32> to vector<48x32xf32>
    %cst_59 = arith.constant 5.000000e-01 : f32
    %137 = vector.broadcast %cst_59 : f32 to vector<48x32xf32>
    %138 = arith.mulf %136, %137 : vector<48x32xf32>
    %139 = vector.extract_strided_slice %135 {offsets = [0, 32], sizes = [48, 32], strides = [1, 1]} : vector<48x96xf32> to vector<48x32xf32>
    %140 = vector.extract_strided_slice %135 {offsets = [0, 64], sizes = [48, 32], strides = [1, 1]} : vector<48x96xf32> to vector<48x32xf32>
    %141 = tpu.concatenate %138, %138, %138, %138, %138, %138, %138, %138 in 0 : vector<48x32xf32>, vector<48x32xf32>, vector<48x32xf32>, vector<48x32xf32>, vector<48x32xf32>, vector<48x32xf32>, vector<48x32xf32>, vector<48x32xf32> -> vector<384x32xf32>
    %142 = arith.mulf %141, %11 : vector<384x32xf32>
    %143 = arith.truncf %142 : vector<384x32xf32> to vector<384x32xbf16>
    %144 = arith.truncf %139 : vector<48x32xf32> to vector<48x32xbf16>
    %cst_60 = arith.constant dense<0.000000e+00> : vector<384x48xf32>
    %145 = tpu.matmul %143, %144, %cst_60 {dimension_numbers = #tpu.dot_dimension_numbers<[1], [1], [0], [0], [0, 0, 1, 0], [], []>} : vector<384x32xbf16>, vector<48x32xbf16>, vector<384x48xf32> -> vector<384x48xf32>
    %146 = arith.addf %145, %10 : vector<384x48xf32>
    %cst_61 = arith.constant dense<0xFF800000> : vector<384xf32>
    %147 = vector.multi_reduction <maximumf>, %146, %cst_61 [1] : vector<384x48xf32> to vector<384xf32>
    %148 = vector.shape_cast %147 : vector<384xf32> to vector<384x1xf32>
    %149 = vector.broadcast %148 : vector<384x1xf32> to vector<384x48xf32>
    %150 = arith.subf %146, %149 : vector<384x48xf32>
    %151 = math.exp %150 : vector<384x48xf32>
    %cst_62 = arith.constant dense<0.000000e+00> : vector<384xf32>
    %152 = vector.multi_reduction <add>, %151, %cst_62 [1] : vector<384x48xf32> to vector<384xf32>
    %153 = vector.shape_cast %152 : vector<384xf32> to vector<384x1xf32>
    %154 = tpu.reciprocal %153 {approx = true} : vector<384x1xf32> -> vector<384x1xf32>
    %155 = vector.broadcast %154 : vector<384x1xf32> to vector<384x48xf32>
    %156 = arith.mulf %151, %155 : vector<384x48xf32>
    %157 = arith.truncf %156 : vector<384x48xf32> to vector<384x48xbf16>
    %158 = arith.truncf %140 : vector<48x32xf32> to vector<48x32xbf16>
    %cst_63 = arith.constant dense<0.000000e+00> : vector<384x32xf32>
    %159 = tpu.matmul %157, %158, %cst_63 {dimension_numbers = #tpu.dot_dimension_numbers<[1], [0], [0], [1], [0, 0, 1, 1], [], []>} : vector<384x48xbf16>, vector<48x32xbf16>, vector<384x32xf32> -> vector<384x32xf32>
    %160 = arith.mulf %159, %11 : vector<384x32xf32>
    %161 = vector.extract_strided_slice %160 {offsets = [0, 0], sizes = [48, 32], strides = [1, 1]} : vector<384x32xf32> to vector<48x32xf32>
    %162 = vector.extract_strided_slice %160 {offsets = [48, 0], sizes = [48, 32], strides = [1, 1]} : vector<384x32xf32> to vector<48x32xf32>
    %163 = arith.addf %161, %162 : vector<48x32xf32>
    %164 = vector.extract_strided_slice %160 {offsets = [96, 0], sizes = [48, 32], strides = [1, 1]} : vector<384x32xf32> to vector<48x32xf32>
    %165 = arith.addf %163, %164 : vector<48x32xf32>
    %166 = vector.extract_strided_slice %160 {offsets = [144, 0], sizes = [48, 32], strides = [1, 1]} : vector<384x32xf32> to vector<48x32xf32>
    %167 = arith.addf %165, %166 : vector<48x32xf32>
    %168 = vector.extract_strided_slice %160 {offsets = [192, 0], sizes = [48, 32], strides = [1, 1]} : vector<384x32xf32> to vector<48x32xf32>
    %169 = arith.addf %167, %168 : vector<48x32xf32>
    %170 = vector.extract_strided_slice %160 {offsets = [240, 0], sizes = [48, 32], strides = [1, 1]} : vector<384x32xf32> to vector<48x32xf32>
    %171 = arith.addf %169, %170 : vector<48x32xf32>
    %172 = vector.extract_strided_slice %160 {offsets = [288, 0], sizes = [48, 32], strides = [1, 1]} : vector<384x32xf32> to vector<48x32xf32>
    %173 = arith.addf %171, %172 : vector<48x32xf32>
    %174 = vector.extract_strided_slice %160 {offsets = [336, 0], sizes = [48, 32], strides = [1, 1]} : vector<384x32xf32> to vector<48x32xf32>
    %175 = arith.addf %173, %174 : vector<48x32xf32>
    %176 = arith.truncf %175 : vector<48x32xf32> to vector<48x32xbf16>
    %cst_64 = arith.constant dense<0.000000e+00> : vector<48x32xf32>
    %177 = tpu.matmul %176, %14, %cst_64 {dimension_numbers = #tpu.dot_dimension_numbers<[1], [0], [0], [1], [0, 0, 1, 1], [], []>} : vector<48x32xbf16>, vector<32x32xbf16>, vector<48x32xf32> -> vector<48x32xf32>
    %178 = vector.broadcast %15 : vector<1x32xf32> to vector<48x32xf32>
    %179 = arith.addf %177, %178 : vector<48x32xf32>
    %180 = arith.addf %131, %179 : vector<48x32xf32>
    %cst_65 = arith.constant dense<0.000000e+00> : vector<48xf32>
    %181 = vector.multi_reduction <add>, %180, %cst_65 [1] : vector<48x32xf32> to vector<48xf32>
    %182 = vector.shape_cast %181 : vector<48xf32> to vector<48x1xf32>
    %cst_66 = arith.constant 3.200000e+01 : f32
    %183 = vector.broadcast %cst_66 : f32 to vector<48x1xf32>
    %184 = arith.divf %182, %183 : vector<48x1xf32>
    %185 = vector.broadcast %184 : vector<48x1xf32> to vector<48x32xf32>
    %186 = arith.subf %180, %185 : vector<48x32xf32>
    %187 = vector.broadcast %184 : vector<48x1xf32> to vector<48x32xf32>
    %188 = arith.subf %180, %187 : vector<48x32xf32>
    %189 = arith.mulf %186, %188 : vector<48x32xf32>
    %cst_67 = arith.constant dense<0.000000e+00> : vector<48xf32>
    %190 = vector.multi_reduction <add>, %189, %cst_67 [1] : vector<48x32xf32> to vector<48xf32>
    %191 = vector.shape_cast %190 : vector<48xf32> to vector<48x1xf32>
    %cst_68 = arith.constant 3.200000e+01 : f32
    %192 = vector.broadcast %cst_68 : f32 to vector<48x1xf32>
    %193 = arith.divf %191, %192 : vector<48x1xf32>
    %194 = vector.broadcast %184 : vector<48x1xf32> to vector<48x32xf32>
    %195 = arith.subf %180, %194 : vector<48x32xf32>
    %cst_69 = arith.constant 9.99999974E-6 : f32
    %196 = vector.broadcast %cst_69 : f32 to vector<48x1xf32>
    %197 = arith.addf %193, %196 : vector<48x1xf32>
    %198 = math.rsqrt %197 : vector<48x1xf32>
    %199 = vector.broadcast %198 : vector<48x1xf32> to vector<48x32xf32>
    %200 = arith.mulf %195, %199 : vector<48x32xf32>
    %201 = vector.broadcast %16 : vector<1x32xf32> to vector<48x32xf32>
    %202 = arith.mulf %200, %201 : vector<48x32xf32>
    %203 = vector.broadcast %17 : vector<1x32xf32> to vector<48x32xf32>
    %204 = arith.addf %202, %203 : vector<48x32xf32>
    %205 = arith.truncf %204 : vector<48x32xf32> to vector<48x32xbf16>
    %cst_70 = arith.constant dense<0.000000e+00> : vector<48x64xf32>
    %206 = tpu.matmul %205, %18, %cst_70 {dimension_numbers = #tpu.dot_dimension_numbers<[1], [0], [0], [1], [0, 0, 1, 1], [], []>} : vector<48x32xbf16>, vector<32x64xbf16>, vector<48x64xf32> -> vector<48x64xf32>
    %207 = vector.broadcast %19 : vector<1x64xf32> to vector<48x64xf32>
    %208 = arith.addf %206, %207 : vector<48x64xf32>
    %cst_71 = arith.constant 0.000000e+00 : f32
    %209 = vector.broadcast %cst_71 : f32 to vector<48x64xf32>
    %210 = arith.maximumf %208, %209 : vector<48x64xf32>
    %211 = arith.truncf %210 : vector<48x64xf32> to vector<48x64xbf16>
    %cst_72 = arith.constant dense<0.000000e+00> : vector<48x32xf32>
    %212 = tpu.matmul %211, %20, %cst_72 {dimension_numbers = #tpu.dot_dimension_numbers<[1], [0], [0], [1], [0, 0, 1, 1], [], []>} : vector<48x64xbf16>, vector<64x32xbf16>, vector<48x32xf32> -> vector<48x32xf32>
    %213 = vector.broadcast %21 : vector<1x32xf32> to vector<48x32xf32>
    %214 = arith.addf %212, %213 : vector<48x32xf32>
    %215 = arith.addf %204, %214 : vector<48x32xf32>
    %cst_73 = arith.constant dense<0.000000e+00> : vector<48xf32>
    %216 = vector.multi_reduction <add>, %215, %cst_73 [1] : vector<48x32xf32> to vector<48xf32>
    %217 = vector.shape_cast %216 : vector<48xf32> to vector<48x1xf32>
    %cst_74 = arith.constant 3.200000e+01 : f32
    %218 = vector.broadcast %cst_74 : f32 to vector<48x1xf32>
    %219 = arith.divf %217, %218 : vector<48x1xf32>
    %220 = vector.broadcast %219 : vector<48x1xf32> to vector<48x32xf32>
    %221 = arith.subf %215, %220 : vector<48x32xf32>
    %222 = vector.broadcast %219 : vector<48x1xf32> to vector<48x32xf32>
    %223 = arith.subf %215, %222 : vector<48x32xf32>
    %224 = arith.mulf %221, %223 : vector<48x32xf32>
    %cst_75 = arith.constant dense<0.000000e+00> : vector<48xf32>
    %225 = vector.multi_reduction <add>, %224, %cst_75 [1] : vector<48x32xf32> to vector<48xf32>
    %226 = vector.shape_cast %225 : vector<48xf32> to vector<48x1xf32>
    %cst_76 = arith.constant 3.200000e+01 : f32
    %227 = vector.broadcast %cst_76 : f32 to vector<48x1xf32>
    %228 = arith.divf %226, %227 : vector<48x1xf32>
    %229 = vector.broadcast %219 : vector<48x1xf32> to vector<48x32xf32>
    %230 = arith.subf %215, %229 : vector<48x32xf32>
    %cst_77 = arith.constant 9.99999974E-6 : f32
    %231 = vector.broadcast %cst_77 : f32 to vector<48x1xf32>
    %232 = arith.addf %228, %231 : vector<48x1xf32>
    %233 = math.rsqrt %232 : vector<48x1xf32>
    %234 = vector.broadcast %233 : vector<48x1xf32> to vector<48x32xf32>
    %235 = arith.mulf %230, %234 : vector<48x32xf32>
    %236 = vector.broadcast %22 : vector<1x32xf32> to vector<48x32xf32>
    %237 = arith.mulf %235, %236 : vector<48x32xf32>
    %238 = vector.broadcast %23 : vector<1x32xf32> to vector<48x32xf32>
    %239 = arith.addf %237, %238 : vector<48x32xf32>
    %240 = arith.truncf %239 : vector<48x32xf32> to vector<48x32xbf16>
    %cst_78 = arith.constant dense<0.000000e+00> : vector<48x96xf32>
    %241 = tpu.matmul %240, %12, %cst_78 {dimension_numbers = #tpu.dot_dimension_numbers<[1], [0], [0], [1], [0, 0, 1, 1], [], []>} : vector<48x32xbf16>, vector<32x96xbf16>, vector<48x96xf32> -> vector<48x96xf32>
    %242 = vector.broadcast %13 : vector<1x96xf32> to vector<48x96xf32>
    %243 = arith.addf %241, %242 : vector<48x96xf32>
    %244 = vector.extract_strided_slice %243 {offsets = [0, 0], sizes = [48, 32], strides = [1, 1]} : vector<48x96xf32> to vector<48x32xf32>
    %cst_79 = arith.constant 5.000000e-01 : f32
    %245 = vector.broadcast %cst_79 : f32 to vector<48x32xf32>
    %246 = arith.mulf %244, %245 : vector<48x32xf32>
    %247 = vector.extract_strided_slice %243 {offsets = [0, 32], sizes = [48, 32], strides = [1, 1]} : vector<48x96xf32> to vector<48x32xf32>
    %248 = vector.extract_strided_slice %243 {offsets = [0, 64], sizes = [48, 32], strides = [1, 1]} : vector<48x96xf32> to vector<48x32xf32>
    %249 = tpu.concatenate %246, %246, %246, %246, %246, %246, %246, %246 in 0 : vector<48x32xf32>, vector<48x32xf32>, vector<48x32xf32>, vector<48x32xf32>, vector<48x32xf32>, vector<48x32xf32>, vector<48x32xf32>, vector<48x32xf32> -> vector<384x32xf32>
    %250 = arith.mulf %249, %11 : vector<384x32xf32>
    %251 = arith.truncf %250 : vector<384x32xf32> to vector<384x32xbf16>
    %252 = arith.truncf %247 : vector<48x32xf32> to vector<48x32xbf16>
    %cst_80 = arith.constant dense<0.000000e+00> : vector<384x48xf32>
    %253 = tpu.matmul %251, %252, %cst_80 {dimension_numbers = #tpu.dot_dimension_numbers<[1], [1], [0], [0], [0, 0, 1, 0], [], []>} : vector<384x32xbf16>, vector<48x32xbf16>, vector<384x48xf32> -> vector<384x48xf32>
    %254 = arith.addf %253, %10 : vector<384x48xf32>
    %cst_81 = arith.constant dense<0xFF800000> : vector<384xf32>
    %255 = vector.multi_reduction <maximumf>, %254, %cst_81 [1] : vector<384x48xf32> to vector<384xf32>
    %256 = vector.shape_cast %255 : vector<384xf32> to vector<384x1xf32>
    %257 = vector.broadcast %256 : vector<384x1xf32> to vector<384x48xf32>
    %258 = arith.subf %254, %257 : vector<384x48xf32>
    %259 = math.exp %258 : vector<384x48xf32>
    %cst_82 = arith.constant dense<0.000000e+00> : vector<384xf32>
    %260 = vector.multi_reduction <add>, %259, %cst_82 [1] : vector<384x48xf32> to vector<384xf32>
    %261 = vector.shape_cast %260 : vector<384xf32> to vector<384x1xf32>
    %262 = tpu.reciprocal %261 {approx = true} : vector<384x1xf32> -> vector<384x1xf32>
    %263 = vector.broadcast %262 : vector<384x1xf32> to vector<384x48xf32>
    %264 = arith.mulf %259, %263 : vector<384x48xf32>
    %265 = arith.truncf %264 : vector<384x48xf32> to vector<384x48xbf16>
    %266 = arith.truncf %248 : vector<48x32xf32> to vector<48x32xbf16>
    %cst_83 = arith.constant dense<0.000000e+00> : vector<384x32xf32>
    %267 = tpu.matmul %265, %266, %cst_83 {dimension_numbers = #tpu.dot_dimension_numbers<[1], [0], [0], [1], [0, 0, 1, 1], [], []>} : vector<384x48xbf16>, vector<48x32xbf16>, vector<384x32xf32> -> vector<384x32xf32>
    %268 = arith.mulf %267, %11 : vector<384x32xf32>
    %269 = vector.extract_strided_slice %268 {offsets = [0, 0], sizes = [48, 32], strides = [1, 1]} : vector<384x32xf32> to vector<48x32xf32>
    %270 = vector.extract_strided_slice %268 {offsets = [48, 0], sizes = [48, 32], strides = [1, 1]} : vector<384x32xf32> to vector<48x32xf32>
    %271 = arith.addf %269, %270 : vector<48x32xf32>
    %272 = vector.extract_strided_slice %268 {offsets = [96, 0], sizes = [48, 32], strides = [1, 1]} : vector<384x32xf32> to vector<48x32xf32>
    %273 = arith.addf %271, %272 : vector<48x32xf32>
    %274 = vector.extract_strided_slice %268 {offsets = [144, 0], sizes = [48, 32], strides = [1, 1]} : vector<384x32xf32> to vector<48x32xf32>
    %275 = arith.addf %273, %274 : vector<48x32xf32>
    %276 = vector.extract_strided_slice %268 {offsets = [192, 0], sizes = [48, 32], strides = [1, 1]} : vector<384x32xf32> to vector<48x32xf32>
    %277 = arith.addf %275, %276 : vector<48x32xf32>
    %278 = vector.extract_strided_slice %268 {offsets = [240, 0], sizes = [48, 32], strides = [1, 1]} : vector<384x32xf32> to vector<48x32xf32>
    %279 = arith.addf %277, %278 : vector<48x32xf32>
    %280 = vector.extract_strided_slice %268 {offsets = [288, 0], sizes = [48, 32], strides = [1, 1]} : vector<384x32xf32> to vector<48x32xf32>
    %281 = arith.addf %279, %280 : vector<48x32xf32>
    %282 = vector.extract_strided_slice %268 {offsets = [336, 0], sizes = [48, 32], strides = [1, 1]} : vector<384x32xf32> to vector<48x32xf32>
    %283 = arith.addf %281, %282 : vector<48x32xf32>
    %284 = arith.truncf %283 : vector<48x32xf32> to vector<48x32xbf16>
    %cst_84 = arith.constant dense<0.000000e+00> : vector<48x32xf32>
    %285 = tpu.matmul %284, %14, %cst_84 {dimension_numbers = #tpu.dot_dimension_numbers<[1], [0], [0], [1], [0, 0, 1, 1], [], []>} : vector<48x32xbf16>, vector<32x32xbf16>, vector<48x32xf32> -> vector<48x32xf32>
    %286 = vector.broadcast %15 : vector<1x32xf32> to vector<48x32xf32>
    %287 = arith.addf %285, %286 : vector<48x32xf32>
    %288 = arith.addf %239, %287 : vector<48x32xf32>
    %cst_85 = arith.constant dense<0.000000e+00> : vector<48xf32>
    %289 = vector.multi_reduction <add>, %288, %cst_85 [1] : vector<48x32xf32> to vector<48xf32>
    %290 = vector.shape_cast %289 : vector<48xf32> to vector<48x1xf32>
    %cst_86 = arith.constant 3.200000e+01 : f32
    %291 = vector.broadcast %cst_86 : f32 to vector<48x1xf32>
    %292 = arith.divf %290, %291 : vector<48x1xf32>
    %293 = vector.broadcast %292 : vector<48x1xf32> to vector<48x32xf32>
    %294 = arith.subf %288, %293 : vector<48x32xf32>
    %295 = vector.broadcast %292 : vector<48x1xf32> to vector<48x32xf32>
    %296 = arith.subf %288, %295 : vector<48x32xf32>
    %297 = arith.mulf %294, %296 : vector<48x32xf32>
    %cst_87 = arith.constant dense<0.000000e+00> : vector<48xf32>
    %298 = vector.multi_reduction <add>, %297, %cst_87 [1] : vector<48x32xf32> to vector<48xf32>
    %299 = vector.shape_cast %298 : vector<48xf32> to vector<48x1xf32>
    %cst_88 = arith.constant 3.200000e+01 : f32
    %300 = vector.broadcast %cst_88 : f32 to vector<48x1xf32>
    %301 = arith.divf %299, %300 : vector<48x1xf32>
    %302 = vector.broadcast %292 : vector<48x1xf32> to vector<48x32xf32>
    %303 = arith.subf %288, %302 : vector<48x32xf32>
    %cst_89 = arith.constant 9.99999974E-6 : f32
    %304 = vector.broadcast %cst_89 : f32 to vector<48x1xf32>
    %305 = arith.addf %301, %304 : vector<48x1xf32>
    %306 = math.rsqrt %305 : vector<48x1xf32>
    %307 = vector.broadcast %306 : vector<48x1xf32> to vector<48x32xf32>
    %308 = arith.mulf %303, %307 : vector<48x32xf32>
    %309 = vector.broadcast %16 : vector<1x32xf32> to vector<48x32xf32>
    %310 = arith.mulf %308, %309 : vector<48x32xf32>
    %311 = vector.broadcast %17 : vector<1x32xf32> to vector<48x32xf32>
    %312 = arith.addf %310, %311 : vector<48x32xf32>
    %313 = arith.truncf %312 : vector<48x32xf32> to vector<48x32xbf16>
    %cst_90 = arith.constant dense<0.000000e+00> : vector<48x64xf32>
    %314 = tpu.matmul %313, %18, %cst_90 {dimension_numbers = #tpu.dot_dimension_numbers<[1], [0], [0], [1], [0, 0, 1, 1], [], []>} : vector<48x32xbf16>, vector<32x64xbf16>, vector<48x64xf32> -> vector<48x64xf32>
    %315 = vector.broadcast %19 : vector<1x64xf32> to vector<48x64xf32>
    %316 = arith.addf %314, %315 : vector<48x64xf32>
    %cst_91 = arith.constant 0.000000e+00 : f32
    %317 = vector.broadcast %cst_91 : f32 to vector<48x64xf32>
    %318 = arith.maximumf %316, %317 : vector<48x64xf32>
    %319 = arith.truncf %318 : vector<48x64xf32> to vector<48x64xbf16>
    %cst_92 = arith.constant dense<0.000000e+00> : vector<48x32xf32>
    %320 = tpu.matmul %319, %20, %cst_92 {dimension_numbers = #tpu.dot_dimension_numbers<[1], [0], [0], [1], [0, 0, 1, 1], [], []>} : vector<48x64xbf16>, vector<64x32xbf16>, vector<48x32xf32> -> vector<48x32xf32>
    %321 = vector.broadcast %21 : vector<1x32xf32> to vector<48x32xf32>
    %322 = arith.addf %320, %321 : vector<48x32xf32>
    %323 = arith.addf %312, %322 : vector<48x32xf32>
    %cst_93 = arith.constant dense<0.000000e+00> : vector<48xf32>
    %324 = vector.multi_reduction <add>, %323, %cst_93 [1] : vector<48x32xf32> to vector<48xf32>
    %325 = vector.shape_cast %324 : vector<48xf32> to vector<48x1xf32>
    %cst_94 = arith.constant 3.200000e+01 : f32
    %326 = vector.broadcast %cst_94 : f32 to vector<48x1xf32>
    %327 = arith.divf %325, %326 : vector<48x1xf32>
    %328 = vector.broadcast %327 : vector<48x1xf32> to vector<48x32xf32>
    %329 = arith.subf %323, %328 : vector<48x32xf32>
    %330 = vector.broadcast %327 : vector<48x1xf32> to vector<48x32xf32>
    %331 = arith.subf %323, %330 : vector<48x32xf32>
    %332 = arith.mulf %329, %331 : vector<48x32xf32>
    %cst_95 = arith.constant dense<0.000000e+00> : vector<48xf32>
    %333 = vector.multi_reduction <add>, %332, %cst_95 [1] : vector<48x32xf32> to vector<48xf32>
    %334 = vector.shape_cast %333 : vector<48xf32> to vector<48x1xf32>
    %cst_96 = arith.constant 3.200000e+01 : f32
    %335 = vector.broadcast %cst_96 : f32 to vector<48x1xf32>
    %336 = arith.divf %334, %335 : vector<48x1xf32>
    %337 = vector.broadcast %327 : vector<48x1xf32> to vector<48x32xf32>
    %338 = arith.subf %323, %337 : vector<48x32xf32>
    %cst_97 = arith.constant 9.99999974E-6 : f32
    %339 = vector.broadcast %cst_97 : f32 to vector<48x1xf32>
    %340 = arith.addf %336, %339 : vector<48x1xf32>
    %341 = math.rsqrt %340 : vector<48x1xf32>
    %342 = vector.broadcast %341 : vector<48x1xf32> to vector<48x32xf32>
    %343 = arith.mulf %338, %342 : vector<48x32xf32>
    %344 = vector.broadcast %22 : vector<1x32xf32> to vector<48x32xf32>
    %345 = arith.mulf %343, %344 : vector<48x32xf32>
    %346 = vector.broadcast %23 : vector<1x32xf32> to vector<48x32xf32>
    %347 = arith.addf %345, %346 : vector<48x32xf32>
    %348 = arith.truncf %347 : vector<48x32xf32> to vector<48x32xbf16>
    %cst_98 = arith.constant dense<0.000000e+00> : vector<48x96xf32>
    %349 = tpu.matmul %348, %12, %cst_98 {dimension_numbers = #tpu.dot_dimension_numbers<[1], [0], [0], [1], [0, 0, 1, 1], [], []>} : vector<48x32xbf16>, vector<32x96xbf16>, vector<48x96xf32> -> vector<48x96xf32>
    %350 = vector.broadcast %13 : vector<1x96xf32> to vector<48x96xf32>
    %351 = arith.addf %349, %350 : vector<48x96xf32>
    %352 = vector.extract_strided_slice %351 {offsets = [0, 0], sizes = [48, 32], strides = [1, 1]} : vector<48x96xf32> to vector<48x32xf32>
    %cst_99 = arith.constant 5.000000e-01 : f32
    %353 = vector.broadcast %cst_99 : f32 to vector<48x32xf32>
    %354 = arith.mulf %352, %353 : vector<48x32xf32>
    %355 = vector.extract_strided_slice %351 {offsets = [0, 32], sizes = [48, 32], strides = [1, 1]} : vector<48x96xf32> to vector<48x32xf32>
    %356 = vector.extract_strided_slice %351 {offsets = [0, 64], sizes = [48, 32], strides = [1, 1]} : vector<48x96xf32> to vector<48x32xf32>
    %357 = tpu.concatenate %354, %354, %354, %354, %354, %354, %354, %354 in 0 : vector<48x32xf32>, vector<48x32xf32>, vector<48x32xf32>, vector<48x32xf32>, vector<48x32xf32>, vector<48x32xf32>, vector<48x32xf32>, vector<48x32xf32> -> vector<384x32xf32>
    %358 = arith.mulf %357, %11 : vector<384x32xf32>
    %359 = arith.truncf %358 : vector<384x32xf32> to vector<384x32xbf16>
    %360 = arith.truncf %355 : vector<48x32xf32> to vector<48x32xbf16>
    %cst_100 = arith.constant dense<0.000000e+00> : vector<384x48xf32>
    %361 = tpu.matmul %359, %360, %cst_100 {dimension_numbers = #tpu.dot_dimension_numbers<[1], [1], [0], [0], [0, 0, 1, 0], [], []>} : vector<384x32xbf16>, vector<48x32xbf16>, vector<384x48xf32> -> vector<384x48xf32>
    %362 = arith.addf %361, %10 : vector<384x48xf32>
    %cst_101 = arith.constant dense<0xFF800000> : vector<384xf32>
    %363 = vector.multi_reduction <maximumf>, %362, %cst_101 [1] : vector<384x48xf32> to vector<384xf32>
    %364 = vector.shape_cast %363 : vector<384xf32> to vector<384x1xf32>
    %365 = vector.broadcast %364 : vector<384x1xf32> to vector<384x48xf32>
    %366 = arith.subf %362, %365 : vector<384x48xf32>
    %367 = math.exp %366 : vector<384x48xf32>
    %cst_102 = arith.constant dense<0.000000e+00> : vector<384xf32>
    %368 = vector.multi_reduction <add>, %367, %cst_102 [1] : vector<384x48xf32> to vector<384xf32>
    %369 = vector.shape_cast %368 : vector<384xf32> to vector<384x1xf32>
    %370 = tpu.reciprocal %369 {approx = true} : vector<384x1xf32> -> vector<384x1xf32>
    %371 = vector.broadcast %370 : vector<384x1xf32> to vector<384x48xf32>
    %372 = arith.mulf %367, %371 : vector<384x48xf32>
    %373 = arith.truncf %372 : vector<384x48xf32> to vector<384x48xbf16>
    %374 = arith.truncf %356 : vector<48x32xf32> to vector<48x32xbf16>
    %cst_103 = arith.constant dense<0.000000e+00> : vector<384x32xf32>
    %375 = tpu.matmul %373, %374, %cst_103 {dimension_numbers = #tpu.dot_dimension_numbers<[1], [0], [0], [1], [0, 0, 1, 1], [], []>} : vector<384x48xbf16>, vector<48x32xbf16>, vector<384x32xf32> -> vector<384x32xf32>
    %376 = arith.mulf %375, %11 : vector<384x32xf32>
    %377 = vector.extract_strided_slice %376 {offsets = [0, 0], sizes = [48, 32], strides = [1, 1]} : vector<384x32xf32> to vector<48x32xf32>
    %378 = vector.extract_strided_slice %376 {offsets = [48, 0], sizes = [48, 32], strides = [1, 1]} : vector<384x32xf32> to vector<48x32xf32>
    %379 = arith.addf %377, %378 : vector<48x32xf32>
    %380 = vector.extract_strided_slice %376 {offsets = [96, 0], sizes = [48, 32], strides = [1, 1]} : vector<384x32xf32> to vector<48x32xf32>
    %381 = arith.addf %379, %380 : vector<48x32xf32>
    %382 = vector.extract_strided_slice %376 {offsets = [144, 0], sizes = [48, 32], strides = [1, 1]} : vector<384x32xf32> to vector<48x32xf32>
    %383 = arith.addf %381, %382 : vector<48x32xf32>
    %384 = vector.extract_strided_slice %376 {offsets = [192, 0], sizes = [48, 32], strides = [1, 1]} : vector<384x32xf32> to vector<48x32xf32>
    %385 = arith.addf %383, %384 : vector<48x32xf32>
    %386 = vector.extract_strided_slice %376 {offsets = [240, 0], sizes = [48, 32], strides = [1, 1]} : vector<384x32xf32> to vector<48x32xf32>
    %387 = arith.addf %385, %386 : vector<48x32xf32>
    %388 = vector.extract_strided_slice %376 {offsets = [288, 0], sizes = [48, 32], strides = [1, 1]} : vector<384x32xf32> to vector<48x32xf32>
    %389 = arith.addf %387, %388 : vector<48x32xf32>
    %390 = vector.extract_strided_slice %376 {offsets = [336, 0], sizes = [48, 32], strides = [1, 1]} : vector<384x32xf32> to vector<48x32xf32>
    %391 = arith.addf %389, %390 : vector<48x32xf32>
    %392 = arith.truncf %391 : vector<48x32xf32> to vector<48x32xbf16>
    %cst_104 = arith.constant dense<0.000000e+00> : vector<48x32xf32>
    %393 = tpu.matmul %392, %14, %cst_104 {dimension_numbers = #tpu.dot_dimension_numbers<[1], [0], [0], [1], [0, 0, 1, 1], [], []>} : vector<48x32xbf16>, vector<32x32xbf16>, vector<48x32xf32> -> vector<48x32xf32>
    %394 = vector.broadcast %15 : vector<1x32xf32> to vector<48x32xf32>
    %395 = arith.addf %393, %394 : vector<48x32xf32>
    %396 = arith.addf %347, %395 : vector<48x32xf32>
    %cst_105 = arith.constant dense<0.000000e+00> : vector<48xf32>
    %397 = vector.multi_reduction <add>, %396, %cst_105 [1] : vector<48x32xf32> to vector<48xf32>
    %398 = vector.shape_cast %397 : vector<48xf32> to vector<48x1xf32>
    %cst_106 = arith.constant 3.200000e+01 : f32
    %399 = vector.broadcast %cst_106 : f32 to vector<48x1xf32>
    %400 = arith.divf %398, %399 : vector<48x1xf32>
    %401 = vector.broadcast %400 : vector<48x1xf32> to vector<48x32xf32>
    %402 = arith.subf %396, %401 : vector<48x32xf32>
    %403 = vector.broadcast %400 : vector<48x1xf32> to vector<48x32xf32>
    %404 = arith.subf %396, %403 : vector<48x32xf32>
    %405 = arith.mulf %402, %404 : vector<48x32xf32>
    %cst_107 = arith.constant dense<0.000000e+00> : vector<48xf32>
    %406 = vector.multi_reduction <add>, %405, %cst_107 [1] : vector<48x32xf32> to vector<48xf32>
    %407 = vector.shape_cast %406 : vector<48xf32> to vector<48x1xf32>
    %cst_108 = arith.constant 3.200000e+01 : f32
    %408 = vector.broadcast %cst_108 : f32 to vector<48x1xf32>
    %409 = arith.divf %407, %408 : vector<48x1xf32>
    %410 = vector.broadcast %400 : vector<48x1xf32> to vector<48x32xf32>
    %411 = arith.subf %396, %410 : vector<48x32xf32>
    %cst_109 = arith.constant 9.99999974E-6 : f32
    %412 = vector.broadcast %cst_109 : f32 to vector<48x1xf32>
    %413 = arith.addf %409, %412 : vector<48x1xf32>
    %414 = math.rsqrt %413 : vector<48x1xf32>
    %415 = vector.broadcast %414 : vector<48x1xf32> to vector<48x32xf32>
    %416 = arith.mulf %411, %415 : vector<48x32xf32>
    %417 = vector.broadcast %16 : vector<1x32xf32> to vector<48x32xf32>
    %418 = arith.mulf %416, %417 : vector<48x32xf32>
    %419 = vector.broadcast %17 : vector<1x32xf32> to vector<48x32xf32>
    %420 = arith.addf %418, %419 : vector<48x32xf32>
    %421 = arith.truncf %420 : vector<48x32xf32> to vector<48x32xbf16>
    %cst_110 = arith.constant dense<0.000000e+00> : vector<48x64xf32>
    %422 = tpu.matmul %421, %18, %cst_110 {dimension_numbers = #tpu.dot_dimension_numbers<[1], [0], [0], [1], [0, 0, 1, 1], [], []>} : vector<48x32xbf16>, vector<32x64xbf16>, vector<48x64xf32> -> vector<48x64xf32>
    %423 = vector.broadcast %19 : vector<1x64xf32> to vector<48x64xf32>
    %424 = arith.addf %422, %423 : vector<48x64xf32>
    %cst_111 = arith.constant 0.000000e+00 : f32
    %425 = vector.broadcast %cst_111 : f32 to vector<48x64xf32>
    %426 = arith.maximumf %424, %425 : vector<48x64xf32>
    %427 = arith.truncf %426 : vector<48x64xf32> to vector<48x64xbf16>
    %cst_112 = arith.constant dense<0.000000e+00> : vector<48x32xf32>
    %428 = tpu.matmul %427, %20, %cst_112 {dimension_numbers = #tpu.dot_dimension_numbers<[1], [0], [0], [1], [0, 0, 1, 1], [], []>} : vector<48x64xbf16>, vector<64x32xbf16>, vector<48x32xf32> -> vector<48x32xf32>
    %429 = vector.broadcast %21 : vector<1x32xf32> to vector<48x32xf32>
    %430 = arith.addf %428, %429 : vector<48x32xf32>
    %431 = arith.addf %420, %430 : vector<48x32xf32>
    %cst_113 = arith.constant dense<0.000000e+00> : vector<48xf32>
    %432 = vector.multi_reduction <add>, %431, %cst_113 [1] : vector<48x32xf32> to vector<48xf32>
    %433 = vector.shape_cast %432 : vector<48xf32> to vector<48x1xf32>
    %cst_114 = arith.constant 3.200000e+01 : f32
    %434 = vector.broadcast %cst_114 : f32 to vector<48x1xf32>
    %435 = arith.divf %433, %434 : vector<48x1xf32>
    %436 = vector.broadcast %435 : vector<48x1xf32> to vector<48x32xf32>
    %437 = arith.subf %431, %436 : vector<48x32xf32>
    %438 = vector.broadcast %435 : vector<48x1xf32> to vector<48x32xf32>
    %439 = arith.subf %431, %438 : vector<48x32xf32>
    %440 = arith.mulf %437, %439 : vector<48x32xf32>
    %cst_115 = arith.constant dense<0.000000e+00> : vector<48xf32>
    %441 = vector.multi_reduction <add>, %440, %cst_115 [1] : vector<48x32xf32> to vector<48xf32>
    %442 = vector.shape_cast %441 : vector<48xf32> to vector<48x1xf32>
    %cst_116 = arith.constant 3.200000e+01 : f32
    %443 = vector.broadcast %cst_116 : f32 to vector<48x1xf32>
    %444 = arith.divf %442, %443 : vector<48x1xf32>
    %445 = vector.broadcast %435 : vector<48x1xf32> to vector<48x32xf32>
    %446 = arith.subf %431, %445 : vector<48x32xf32>
    %cst_117 = arith.constant 9.99999974E-6 : f32
    %447 = vector.broadcast %cst_117 : f32 to vector<48x1xf32>
    %448 = arith.addf %444, %447 : vector<48x1xf32>
    %449 = math.rsqrt %448 : vector<48x1xf32>
    %450 = vector.broadcast %449 : vector<48x1xf32> to vector<48x32xf32>
    %451 = arith.mulf %446, %450 : vector<48x32xf32>
    %452 = vector.broadcast %22 : vector<1x32xf32> to vector<48x32xf32>
    %453 = arith.mulf %451, %452 : vector<48x32xf32>
    %454 = vector.broadcast %23 : vector<1x32xf32> to vector<48x32xf32>
    %455 = arith.addf %453, %454 : vector<48x32xf32>
    %c0_118 = arith.constant 0 : index
    %c0_119 = arith.constant 0 : index
    %456 = vector.load %arg19[%c0_118, %c0_119] : memref<16x48xf32, #tpu.memory_space<vmem>>, vector<16x48xf32>
    %cst_120 = arith.constant dense<0.000000e+00> : vector<16x32xf32>
    %457 = tpu.matmul %456, %455, %cst_120 {dimension_numbers = #tpu.dot_dimension_numbers<[1], [0], [0], [1], [0, 0, 1, 1], [], []>} : vector<16x48xf32>, vector<48x32xf32>, vector<16x32xf32> -> vector<16x32xf32>
    %c0_121 = arith.constant 0 : index
    %c0_122 = arith.constant 0 : index
    %458 = vector.load %arg20[%c0_121, %c0_122] : memref<16x48xf32, #tpu.memory_space<vmem>>, vector<16x48xf32>
    %cst_123 = arith.constant dense<0.000000e+00> : vector<16x32xf32>
    %459 = tpu.matmul %458, %455, %cst_123 {dimension_numbers = #tpu.dot_dimension_numbers<[1], [0], [0], [1], [0, 0, 1, 1], [], []>} : vector<16x48xf32>, vector<48x32xf32>, vector<16x32xf32> -> vector<16x32xf32>
    %c0_124 = arith.constant 0 : index
    %c0_125 = arith.constant 0 : index
    %460 = vector.load %arg21[%c0_124, %c0_125] : memref<16x48xf32, #tpu.memory_space<vmem>>, vector<16x48xf32>
    %cst_126 = arith.constant dense<0.000000e+00> : vector<16x32xf32>
    %461 = tpu.matmul %460, %455, %cst_126 {dimension_numbers = #tpu.dot_dimension_numbers<[1], [0], [0], [1], [0, 0, 1, 1], [], []>} : vector<16x48xf32>, vector<48x32xf32>, vector<16x32xf32> -> vector<16x32xf32>
    %462 = tpu.concatenate %457, %459, %461 in 1 : vector<16x32xf32>, vector<16x32xf32>, vector<16x32xf32> -> vector<16x96xf32>
    %c0_127 = arith.constant 0 : index
    %c0_128 = arith.constant 0 : index
    %463 = vector.load %arg22[%c0_127, %c0_128] : memref<96x128xbf16, #tpu.memory_space<vmem>>, vector<96x128xbf16>
    %464 = arith.truncf %462 : vector<16x96xf32> to vector<16x96xbf16>
    %cst_129 = arith.constant dense<0.000000e+00> : vector<16x128xf32>
    %465 = tpu.matmul %464, %463, %cst_129 {dimension_numbers = #tpu.dot_dimension_numbers<[1], [0], [0], [1], [0, 0, 1, 1], [], []>} : vector<16x96xbf16>, vector<96x128xbf16>, vector<16x128xf32> -> vector<16x128xf32>
    %c0_130 = arith.constant 0 : index
    %c0_131 = arith.constant 0 : index
    %466 = vector.load %arg23[%c0_130, %c0_131] : memref<1x128xf32, #tpu.memory_space<vmem>>, vector<1x128xf32>
    %467 = vector.broadcast %466 : vector<1x128xf32> to vector<16x128xf32>
    %468 = arith.addf %465, %467 : vector<16x128xf32>
    %c0_132 = arith.constant 0 : index
    %c0_133 = arith.constant 0 : index
    %469 = vector.load %arg24[%c0_132, %c0_133] : memref<16x128xf32, #tpu.memory_space<vmem>>, vector<16x128xf32>
    tpu.vector_store %arg24[%c0_132, %c0_133], %468 {strides = array<i32>} : memref<16x128xf32, #tpu.memory_space<vmem>>, vector<16x128xf32>,
    return
  }
}

</mosaic_0001>

<bundles_post_ra>
// kernel: mul.9
= control target key start
LH: loop header
LB: loop body
LE: loop exit
PB: predicated region body
PF: predicated region fallthrough
CT: control target
= control target key end

     0   :  { %s40_s0 = inlined_call_operand.vmem [shape: f32[3,256], index: 0, kind: input, shape index: {}]   ;;  %s41_s1 = inlined_call_operand.vmem [shape: f32[768], index: 1, kind: output, shape index: {}]  }
   0x1   :  { %v16_v0 = vld [vmem:[%s40_s0 + $0x4] sm:$0xf]  ;;  %v8_v1 = vld [vmem:[%s40_s0] sm:$0xf] }
   0x2   :  { %7 = vst [vmem:[#allocation0 + $0x8] sm:$0xf] %v16_v0 }
   0x3   :  { %9 = vst [vmem:[#allocation0] sm:$0xf] %v8_v1 }
   0x9   :  { %v13_v2 = vld [vmem:[#allocation0 + $0x8] sm:$0x7]  }
   0xa   :  { %v10_v3 = vld [vmem:[#allocation0] sm:$0x7]   ;;  %17 = vst [vmem:[%s41_s1 + $0x1] ss:$2 sm:$0x7] %v13_v2  }
   0xb   :  { %11 = vst [vmem:[%s41_s1] ss:$2 sm:$0x7] %v10_v3  }

// kernel: squeeze.3
= control target key start
LH: loop header
LB: loop body
LE: loop exit
PB: predicated region body
PF: predicated region fallthrough
CT: control target
= control target key end

     0   :  { %s80_s0 = inlined_call_operand.vmem [shape: f32[16], index: 0, kind: input, shape index: {}]   ;;  %s81_s1 = inlined_call_operand.hbm [shape: f32[2,8], index: 1, kind: output, shape index: {}]  }
   0x1   :  { %v5_v0 = vld [vmem:[%s80_s0] sm:$0x1] }
   0x2   :  { %2 = vsyncpa [#allocation1], 0  ;;  %6 = vst [vmem:[#allocation3] sm:$0x1] %v5_v0  ;;  %vm8_vm0 = vcmask 64512   ;;  %s62_s0 = smov 120  }
   0x3   :  { %s63_s8 = smov [#allocation0]   ;;  %s27_s1 = sshll.u32 %s81_s1, 4  ;;  %s28_s1 = int_to_ptr.hbm [resolvable:$true] %s27_s1 }
   0x4   :  { %s25_s9 = sshll.u32 %s63_s8, 4  ;;  %s26_s9 = int_to_ptr.vmem [resolvable:$true] %s25_s9 }
   0x9   :  { %v10_v1 = vld [vmem:[#allocation3] sm:$0x1]  }
   0xa   :  { %v7_v2 = vld [vmem:[#allocation3] sm:$0x1]   ;;  %11 = vrot.lane.b32.xlu0 %v10_v1, %s62_s0 }
   0xb   :  { %9 = vst.msk [vmem:[#allocation2] sm:$0x1] %vm8_vm0, %v7_v2  }
  0x7c   :  { %v12_v3 = vpop.permute.xlu0 %11  }
  0x7d   :  { %15 = vst.msk [vmem:[#allocation2 + $0x1] sm:$0x1] %vm8_vm0, %v12_v3  }
  0x84   :  { %v18_v4 = vld [vmem:[#allocation2] sm:$0x3] }
  0x85   :  { %21 = vst [vmem:[#allocation0] sm:$0x3] %v18_v4 }
  0x86   :  { %30 = dma.vmem_to_hbm [thread:$0]  %s26_s9, 32, %s28_s1, [#allocation1]  }
  0x87   :  { %60 = dma.done.wait [#allocation1], 32  }
  0x88   :  { %61 = vsyncadd [#allocation1], 4294967264 }
  0x89   :  { %33 = vsyncpa [#allocation1], 1 }

// kernel: rgb_classifier_forward.1
= control target key start
LH: loop header
LB: loop body
LE: loop exit
PB: predicated region body
PF: predicated region fallthrough
CT: control target
= control target key end

     0   :  { %vm598_vm0 = vcmask 130048   ;;  %vm794_vm1 = vcmask 261120   ;;  %vm1128_vm2 = vcmask 392192   ;;  %s16170_s1 = inlined_call_operand.vmem [shape: bf16[768,32], index: 1, kind: input, shape index: {}]   ;;  %s16171_s2 = inlined_call_operand.vmem [shape: f32[1,32], index: 2, kind: input, shape index: {}]   ;;  %s16172_s0 = inlined_call_operand.vmem [shape: bf16[16,768], index: 0, kind: input, shape index: {}]   ;;  %s16173_s3 = inlined_call_operand.vmem [shape: f32[48,16], index: 3, kind: input, shape index: {}]   ;;  %s16174_s8 = inlined_call_operand.vmem [shape: f32[1,96], index: 8, kind: input, shape index: {}]   ;;  %s16175_s7 = inlined_call_operand.vmem [shape: bf16[32,96], index: 7, kind: input, shape index: {}]   ;;  %s16176_s4 = inlined_call_operand.vmem [shape: f32[48,32], index: 4, kind: input, shape index: {}]   ;;  %s16177_s6 = inlined_call_operand.vmem [shape: f32[384,32], index: 6, kind: input, shape index: {}]   ;;  %s16178_s5 = inlined_call_operand.vmem [shape: f32[384,48], index: 5, kind: input, shape index: {}]   ;;  %s16179_s10 = inlined_call_operand.vmem [shape: f32[1,32], index: 10, kind: input, shape index: {}]   ;;  %s16180_s9 = inlined_call_operand.vmem [shape: bf16[32,32], index: 9, kind: input, shape index: {}]   ;;  %s16181_s11 = inlined_call_operand.vmem [shape: f32[1,32], index: 11, kind: input, shape index: {}]   ;;  %s16182_s12 = inlined_call_operand.vmem [shape: f32[1,32], index: 12, kind: input, shape index: {}]   ;;  %s16183_s14 = inlined_call_operand.vmem [shape: f32[1,64], index: 14, kind: input, shape index: {}]   ;;  %s16184_s13 = inlined_call_operand.vmem [shape: bf16[32,64], index: 13, kind: input, shape index: {}]   ;;  %s16185_s16 = inlined_call_operand.vmem [shape: f32[1,32], index: 16, kind: input, shape index: {}]   ;;  %s16186_s15 = inlined_call_operand.vmem [shape: bf16[64,32], index: 15, kind: input, shape index: {}]   ;;  %s16187_s17 = inlined_call_operand.vmem [shape: f32[1,32], index: 17, kind: input, shape index: {}]   ;;  %s16188_s18 = inlined_call_operand.vmem [shape: f32[1,32], index: 18, kind: input, shape index: {}]   ;;  %s16189_s19 = inlined_call_operand.vmem [shape: f32[16,48], index: 19, kind: input, shape index: {}]   ;;  %s16190_s20 = inlined_call_operand.vmem [shape: f32[16,48], index: 20, kind: input, shape index: {}]   ;;  %s16191_s21 = inlined_call_operand.vmem [shape: f32[16,48], index: 21, kind: input, shape index: {}]   ;;  %s16192_s23 = inlined_call_operand.vmem [shape: f32[1,128], index: 23, kind: input, shape index: {}]   ;;  %s16193_s22 = inlined_call_operand.vmem [shape: bf16[96,128], index: 22, kind: input, shape index: {}]   ;;  %s16194_s24 = inlined_call_operand.vmem [shape: f32[16,128], index: 24, kind: output, shape index: {}]  }
   0x1   :  { %16223 = sst [smem:[#allocation9_spill]] %s16170_s1 }
   0x2   :  { %16224 = sst [smem:[#allocation10_spill]] %s16171_s2 }
   0x3   :  { %16225 = sst [smem:[#allocation11_spill]] %s16172_s0 }
   0x4   :  { %16226 = sst [smem:[#allocation12_spill]] %s16173_s3 }
   0x5   :  { %16227 = sst [smem:[#allocation13_spill]] %s16174_s8 }
   0x6   :  { %16228 = sst [smem:[#allocation14_spill]] %s16175_s7 }
   0x7   :  { %16229 = sst [smem:[#allocation15_spill]] %s16176_s4 }
   0x8   :  { %16230 = sst [smem:[#allocation16_spill]] %s16177_s6 }
   0x9   :  { %16231 = sst [smem:[#allocation17_spill]] %s16178_s5 }
   0xa   :  { %s16232_s27 = sld [smem:[#allocation9_spill]] }
   0xb   :  { %s16233_s1 = sld [smem:[#allocation11_spill]] }
   0xc   :  { %s16234_s7 = sld [smem:[#allocation10_spill]] }
   0xd   :  { %s16235_s28 = sld [smem:[#allocation12_spill]] }
   0xe   :  { %s16237_s6 = sld [smem:[#allocation15_spill]] }
   0xf   :  { %s16244_s29 = sld [smem:[#allocation13_spill]] }
  0x10   :  { %v8014_v0 = vld [vmem:[%s16232_s27 + $0x38] sm:$0xff]  ;;  %v8013_v4 = vld [vmem:[%s16232_s27 + $0x30] sm:$0xff]  ;;  %v8012_v8 = vld [vmem:[%s16232_s27 + $0x28] sm:$0xff]  ;;  %s16245_s3 = sld [smem:[#allocation16_spill]] }
  0x11   :  { %v8022_v1 = vld [vmem:[%s16232_s27 + $0x78] sm:$0xff]  ;;  %502 = vmatpush.bf16.msra.mxu0 %v8014_v0  ;;  %v8021_v5 = vld [vmem:[%s16232_s27 + $0x70] sm:$0xff]  ;;  %v8020_v9 = vld [vmem:[%s16232_s27 + $0x68] sm:$0xff]  ;;  %s16253_s26 = sld [smem:[#allocation17_spill]] }
  0x12   :  { %v8030_v2 = vld [vmem:[%s16232_s27 + $0xb8] sm:$0xff]  ;;  %516 = vmatpush.bf16.msra.mxu1 %v8022_v1  ;;  %v8029_v6 = vld [vmem:[%s16232_s27 + $0xb0] sm:$0xff]  ;;  %v8028_v10 = vld [vmem:[%s16232_s27 + $0xa8] sm:$0xff] }
  0x13   :  { %v8038_v3 = vld [vmem:[%s16232_s27 + $0xf8] sm:$0xff]  ;;  %530 = vmatpush.bf16.msra.mxu2 %v8030_v2  ;;  %v8037_v7 = vld [vmem:[%s16232_s27 + $0xf0] sm:$0xff]  ;;  %v8036_v11 = vld [vmem:[%s16232_s27 + $0xe8] sm:$0xff] }
  0x14   :  { %544 = vmatpush.bf16.msra.mxu3 %v8038_v3  ;;  %v8011_v12 = vld [vmem:[%s16232_s27 + $0x20] sm:$0xff]  ;;  %v8010_v16 = vld [vmem:[%s16232_s27 + $0x18] sm:$0xff]  ;;  %v8009_v20 = vld [vmem:[%s16232_s27 + $0x10] sm:$0xff] }
  0x15   :  { %503 = vmatpush.bf16.msra.mxu0 %v8013_v4  ;;  %v8019_v13 = vld [vmem:[%s16232_s27 + $0x60] sm:$0xff]  ;;  %v8018_v17 = vld [vmem:[%s16232_s27 + $0x58] sm:$0xff]  ;;  %v8017_v21 = vld [vmem:[%s16232_s27 + $0x50] sm:$0xff] }
  0x16   :  { %517 = vmatpush.bf16.msra.mxu1 %v8021_v5  ;;  %v8027_v14 = vld [vmem:[%s16232_s27 + $0xa0] sm:$0xff]  ;;  %v8026_v18 = vld [vmem:[%s16232_s27 + $0x98] sm:$0xff]  ;;  %v8025_v22 = vld [vmem:[%s16232_s27 + $0x90] sm:$0xff] }
  0x17   :  { %531 = vmatpush.bf16.msra.mxu2 %v8029_v6  ;;  %v8035_v15 = vld [vmem:[%s16232_s27 + $0xe0] sm:$0xff]  ;;  %v8034_v19 = vld [vmem:[%s16232_s27 + $0xd8] sm:$0xff]  ;;  %v8033_v23 = vld [vmem:[%s16232_s27 + $0xd0] sm:$0xff] }
  0x18   :  { %545 = vmatpush.bf16.msra.mxu3 %v8037_v7  ;;  %v8008_v24 = vld [vmem:[%s16232_s27 + $0x8] sm:$0xff]  ;;  %v8007_v28 = vld [vmem:[%s16232_s27] sm:$0xff]  ;;  %v8004_v31 = vld [vmem:[%s16233_s1 + $0x14] sm:$0xf0] }
  0x19   :  { %504 = vmatpush.bf16.msra.mxu0 %v8012_v8  ;;  %v8016_v25 = vld [vmem:[%s16232_s27 + $0x48] sm:$0xff]  ;;  %v8015_v29 = vld [vmem:[%s16232_s27 + $0x40] sm:$0xff]  ;;  %v7472_v33 = vld [vmem:[%s16233_s1 + $0x18] sm:$0xf0] }
  0x1a   :  { %518 = vmatpush.bf16.msra.mxu1 %v8020_v9  ;;  %v8024_v26 = vld [vmem:[%s16232_s27 + $0x88] sm:$0xff]  ;;  %v7470_v30 = vld [vmem:[%s16233_s1] sm:$0xf]  ;;  %v8001_v32 = vld [vmem:[%s16233_s1 + $0x4] sm:$0xf] }
  0x1b   :  { %532 = vmatpush.bf16.msra.mxu2 %v8028_v10  ;;  %v8032_v27 = vld [vmem:[%s16232_s27 + $0xc8] sm:$0xff]  ;;  %v8046_v34 = vld [vmem:[%s16232_s27 + $0x138] sm:$0xff]  ;;  %v8023_v36 = vld [vmem:[%s16232_s27 + $0x80] sm:$0xff]  ;;  %v7471_v40 = vor.u32 %v8004_v31, %v7470_v30  ;;  %v7475_v43 = vor.u32 %v8001_v32, %v7472_v33 }
  0x1c   :  { %546 = vmatpush.bf16.msra.mxu3 %v8036_v11  ;;  %v8054_v35 = vld [vmem:[%s16232_s27 + $0x178] sm:$0xff]  ;;  %v8031_v37 = vld [vmem:[%s16232_s27 + $0xc0] sm:$0xff]  ;;  %v7478_v38 = vld [vmem:[%s16233_s1 + $0x8] sm:$0xf] }
  0x1d   :  { %505 = vmatpush.bf16.msra.mxu0 %v8011_v12  ;;  %v8005_v39 = vld [vmem:[%s16233_s1 + $0x1c] sm:$0xf0]  ;;  %v8002_v41 = vld [vmem:[%s16233_s1 + $0xc] sm:$0xf]  ;;  %v7480_v42 = vld [vmem:[%s16233_s1 + $0x20] sm:$0xf0] }
  0x1e   :  { %519 = vmatpush.bf16.msra.mxu1 %v8019_v13  ;;  %v8045_v44 = vld [vmem:[%s16232_s27 + $0x130] sm:$0xff]  ;;  %v7479_v46 = vor.u32 %v8005_v39, %v7478_v38  ;;  %v7483_v47 = vor.u32 %v8002_v41, %v7480_v42  ;;  %v8044_v48 = vld [vmem:[%s16232_s27 + $0x128] sm:$0xff]  ;;  %v8043_v50 = vld [vmem:[%s16232_s27 + $0x120] sm:$0xff] }
  0x1f   :  { %533 = vmatpush.bf16.msra.mxu2 %v8027_v14  ;;  %v8053_v45 = vld [vmem:[%s16232_s27 + $0x170] sm:$0xff]  ;;  %v8052_v49 = vld [vmem:[%s16232_s27 + $0x168] sm:$0xff]  ;;  %v8051_v51 = vld [vmem:[%s16232_s27 + $0x160] sm:$0xff] }
  0x20   :  { %547 = vmatpush.bf16.msra.mxu3 %v8035_v15  ;;  %v8042_v52 = vld [vmem:[%s16232_s27 + $0x118] sm:$0xff]  ;;  %v8041_v54 = vld [vmem:[%s16232_s27 + $0x110] sm:$0xff]  ;;  %v8040_v56 = vld [vmem:[%s16232_s27 + $0x108] sm:$0xff] }
  0x21   :  { %506 = vmatpush.bf16.msra.mxu0 %v8010_v16  ;;  %v8050_v53 = vld [vmem:[%s16232_s27 + $0x158] sm:$0xff]  ;;  %v8049_v55 = vld [vmem:[%s16232_s27 + $0x150] sm:$0xff]  ;;  %v8048_v57 = vld [vmem:[%s16232_s27 + $0x148] sm:$0xff] }
  0x22   :  { %520 = vmatpush.bf16.msra.mxu1 %v8018_v17  ;;  %v8039_v58 = vld [vmem:[%s16232_s27 + $0x100] sm:$0xff]  ;;  %v7486_v60 = vld [vmem:[%s16233_s1 + $0x10] sm:$0xf]  ;;  %v8006_v61 = vld [vmem:[%s16233_s1 + $0x24] sm:$0xf0] }
  0x23   :  { %534 = vmatpush.bf16.msra.mxu2 %v8026_v18  ;;  %v8047_v59 = vld [vmem:[%s16232_s27 + $0x140] sm:$0xff]  ;;  %v8003_v62 = vld [vmem:[%s16233_s1 + $0x14] sm:$0xf]  ;;  %v7488_v63 = vld [vmem:[%s16233_s1 + $0x28] sm:$0xf0]  ;;  %v7487_v0 = vor.u32 %v8006_v61, %v7486_v60  ;;  %s16236_s1 = sld [smem:[#allocation14_spill]] }
  0x24   :  { %548 = vmatpush.bf16.msra.mxu3 %v8034_v19  ;;  %v7491_v1 = vor.u32 %v8003_v62, %v7488_v63  ;;  %v8085_v5 = vld [vmem:[%s16234_s7] ss:$0 sm:$0xff]  ;;  %v589_v30 = vld [vmem:[%s16235_s28 + $0x18] sm:$0xff]  ;;  %v591_v32 = vld [vmem:[%s16235_s28 + $0x28] sm:$0xff]  ;;  %s9404_s7 = smov 96  }
  0x25   :  { %507 = vmatpush.bf16.msra.mxu0 %v8009_v20  ;;  %v590_v31 = vld [vmem:[%s16235_s28 + $0x20] sm:$0xff]  ;;  %v706_v61 = vld [vmem:[%s16245_s3 + $0x30] sm:$0xff] }
  0x26   :  { %521 = vmatpush.bf16.msra.mxu1 %v8017_v21  ;;  %v700_v60 = vld [vmem:[%s16245_s3] sm:$0xff]  ;;  %v718_v63 = vld [vmem:[%s16245_s3 + $0x90] sm:$0xff] }
  0x27   :  { %535 = vmatpush.bf16.msra.mxu2 %v8025_v22  ;;  %v712_v62 = vld [vmem:[%s16245_s3 + $0x60] sm:$0xff] }
  0x28   :  { %549 = vmatpush.bf16.msra.mxu3 %v8033_v23 }
  0x29   :  { %508 = vmatpush.bf16.msra.mxu0 %v8008_v24  ;;  %v8056_v33 = vld [vmem:[%s16236_s1 + $0x8] sm:$0xff] }
  0x2a   :  { %522 = vmatpush.bf16.msra.mxu1 %v8016_v25 }
  0x2b   :  { %536 = vmatpush.bf16.msra.mxu2 %v8024_v26 }
  0x2c   :  { %550 = vmatpush.bf16.msra.mxu3 %v8032_v27  ;;  %v586_v27 = vld [vmem:[%s16235_s28] sm:$0xff] }
  0x2d   :  { %509 = vmatpush.bf16.msra.mxu0 %v8007_v28  ;;  %v587_v28 = vld [vmem:[%s16235_s28 + $0x8] sm:$0xff] }
  0x2e   :  { %523 = vmatpush.bf16.msra.mxu1 %v8015_v29  ;;  %v588_v29 = vld [vmem:[%s16235_s28 + $0x10] sm:$0xff] }
  0x2f   :  { %537 = vmatpush.bf16.msra.mxu2 %v8023_v36  ;;  %v592_v36 = vld [vmem:[%s16237_s6] sm:$0xff] }
  0x30   :  { %551 = vmatpush.bf16.msra.mxu3 %v8031_v37  ;;  %510 = vmatmul.bf16.vlgmr.msra.gmra.mxu0 %v7471_v40  ;;  %v593_v37 = vld [vmem:[%s16237_s6 + $0x8] sm:$0xff] }
  0x31   :  { %558 = vmatpush.bf16.msrb.mxu0 %v8046_v34  ;;  %524 = vmatmul.bf16.vlgmr.msra.gmra.mxu1 %v7475_v43  ;;  %v8055_v34 = vld [vmem:[%s16236_s1] sm:$0xff]  ;;  %v594_v43 = vld [vmem:[%s16237_s6 + $0x10] sm:$0xff] }
  0x32   :  { %572 = vmatpush.bf16.msrb.mxu1 %v8054_v35  ;;  %538 = vmatmul.bf16.vlgmr.msra.gmra.mxu2 %v7479_v46 }
  0x33   :  { %552 = vmatmul.bf16.vlgmr.msra.gmra.mxu3 %v7483_v47 }
  0x34   :  { %810 = vmatpush.bf16.msrb.mxu3 %v8056_v33 }
  0x35   :  { %559 = vmatpush.bf16.msrb.mxu0 %v8045_v44  ;;  %v595_v44 = vld [vmem:[%s16237_s6 + $0x18] sm:$0xff] }
  0x36   :  { %573 = vmatpush.bf16.msrb.mxu1 %v8053_v45 }
  0x38   :  { %811 = vmatpush.bf16.msrb.mxu3 %v8055_v34 }
  0x39   :  { %560 = vmatpush.bf16.msrb.mxu0 %v8044_v48 }
  0x3a   :  { %574 = vmatpush.bf16.msrb.mxu1 %v8052_v49 }
  0x3d   :  { %561 = vmatpush.bf16.msrb.mxu0 %v8043_v50  ;;  %v596_v50 = vld [vmem:[%s16237_s6 + $0x20] sm:$0xff] }
  0x3e   :  { %575 = vmatpush.bf16.msrb.mxu1 %v8051_v51  ;;  %v597_v51 = vld [vmem:[%s16237_s6 + $0x28] sm:$0xff]  ;;  %s9405_s6 = smov 64  }
  0x41   :  { %562 = vmatpush.bf16.msrb.mxu0 %v8042_v52 }
  0x42   :  { %576 = vmatpush.bf16.msrb.mxu1 %v8050_v53 }
  0x45   :  { %563 = vmatpush.bf16.msrb.mxu0 %v8041_v54 }
  0x46   :  { %577 = vmatpush.bf16.msrb.mxu1 %v8049_v55 }
  0x49   :  { %564 = vmatpush.bf16.msrb.mxu0 %v8040_v56  ;;  %v9782_v56 = vld [vmem:[%s16244_s29] ss:$0 sm:$0xff] }
  0x4a   :  { %578 = vmatpush.bf16.msrb.mxu1 %v8048_v57 }
  0x4d   :  { %565 = vmatpush.bf16.msrb.mxu0 %v8039_v58 }
  0x4e   :  { %579 = vmatpush.bf16.msrb.mxu1 %v8047_v59 }
  0x50   :  { %566 = vmatmul.bf16.vlgmr.msrb.gmra.mxu0 %v7487_v0 }
  0x51   :  { %580 = vmatmul.bf16.vlgmr.msrb.gmra.mxu1 %v7491_v1  ;;  %v724_v1 = vld [vmem:[%s16245_s3 + $0xc0] sm:$0xff] }
  0xad   :  { %v511_v2 = vpop.f32.mrf.mxu0 }
  0xae   :  { %v525_v3 = vpop.f32.mrf.mxu1  ;;  %v512_v9 = vadd.f32 %v8085_v5, %v511_v2  ;;  %v730_v2 = vld [vmem:[%s16245_s3 + $0xf0] sm:$0xff] }
  0xb0   :  { %v526_v11 = vadd.f32 %v525_v3, %v512_v9  ;;  %v736_v3 = vld [vmem:[%s16245_s3 + $0x120] sm:$0xff] }
  0xb5   :  { %v539_v4 = vpop.f32.mrf.mxu2  ;;  %v513_v6 = vpop.f32.mrf.mxu0 }
  0xb6   :  { %v527_v7 = vpop.f32.mrf.mxu1  ;;  %v553_v8 = vpop.f32.mrf.mxu3  ;;  %v514_v10 = vadd.f32 %v8085_v5, %v513_v6  ;;  %v540_v16 = vadd.f32 %v539_v4, %v526_v11  ;;  %v701_v5 = vld [vmem:[%s16245_s3 + $0x8] sm:$0xff]  ;;  %v707_v6 = vld [vmem:[%s16245_s3 + $0x38] sm:$0xff] }
  0xb7   :  { %v719_v11 = vld [vmem:[%s16245_s3 + $0x98] sm:$0xff] }
  0xb8   :  { %v528_v12 = vadd.f32 %v527_v7, %v514_v10  ;;  %v554_v19 = vadd.f32 %v553_v8, %v540_v16  ;;  %v742_v7 = vld [vmem:[%s16245_s3 + $0x150] sm:$0xff]  ;;  %v713_v10 = vld [vmem:[%s16245_s3 + $0x68] sm:$0xff] }
  0xbd   :  { %v541_v13 = vpop.f32.mrf.mxu2 }
  0xbe   :  { %v542_v17 = vadd.f32 %v541_v13, %v528_v12  ;;  %v555_v18 = vpop.f32.mrf.mxu3  ;;  %v725_v12 = vld [vmem:[%s16245_s3 + $0xc8] sm:$0xff] }
  0xc0   :  { %v556_v20 = vadd.f32 %v555_v18, %v542_v17  ;;  %v731_v17 = vld [vmem:[%s16245_s3 + $0xf8] sm:$0xff]  ;;  %v737_v18 = vld [vmem:[%s16245_s3 + $0x128] sm:$0xff] }
  0xcd   :  { %v567_v14 = vpop.f32.mrf.mxu0 }
  0xce   :  { %v581_v15 = vpop.f32.mrf.mxu1  ;;  %v568_v22 = vadd.f32 %v567_v14, %v554_v19  ;;  %v743_v19 = vld [vmem:[%s16245_s3 + $0x158] sm:$0xff] }
  0xd0   :  { %v582_v26 = vadd.f32 %v581_v15, %v568_v22 }
  0xd5   :  { %v569_v21 = vpop.f32.mrf.mxu0 }
  0xd6   :  { %v570_v23 = vadd.f32 %v569_v21, %v556_v20  ;;  %v583_v24 = vpop.f32.mrf.mxu1 }
  0xd8   :  { %v584_v25 = vadd.f32 %v583_v24, %v570_v23 }
  0xda   :  { %631 = vmatpush.msrb.mxu2 %v584_v25 }
  0xdc   :  { %632 = vmatpush.msrb.mxu2 %v582_v26 }
  0xdd   :  { %7684 = vmatmul.msk.f32.vlgmr.msrb.gmra.mxu2 %vm598_vm0, %v586_v27 }
  0xe5   :  { %7685 = vmatmul.msk.f32.gmra.mxu2 %vm598_vm0, %v587_v28 }
  0xed   :  { %7686 = vmatmul.msk.f32.gmra.mxu2 %vm598_vm0, %v588_v29 }
  0xf5   :  { %7687 = vmatmul.msk.f32.gmra.mxu2 %vm598_vm0, %v589_v30 }
  0xfd   :  { %7688 = vmatmul.msk.f32.gmra.mxu2 %vm598_vm0, %v590_v31 }
 0x105   :  { %7689 = vmatmul.msk.f32.gmra.mxu2 %vm598_vm0, %v591_v32  ;;  %v747_v32 = vld [vmem:[%s16245_s3 + $0x178] sm:$0xff] }
 0x160   :  { %v634_v35 = vpop.f32.mrf.mxu2 }
 0x161   :  { %v9746_v39 = vadd.f32 %v634_v35, %v592_v36 }
 0x163   :  { %16238 = vst [vmem:[#allocation2_spill] sm:$0xff] %v9746_v39 }
 0x168   :  { %v637_v38 = vpop.f32.mrf.mxu2 }
 0x169   :  { %v9748_v40 = vadd.f32 %v637_v38, %v593_v37  ;;  %v705_v38 = vld [vmem:[%s16245_s3 + $0x28] sm:$0xff]  ;;  %v746_v37 = vld [vmem:[%s16245_s3 + $0x170] sm:$0xff] }
 0x16b   :  { %16239 = vst [vmem:[#allocation3_spill] sm:$0xff] %v9748_v40  ;;  %v776_v41 = vpack.c.bf16 %v9748_v40, %v9746_v39 }
 0x16d   :  { %7698 = vmatmul.msk.bf16.vlgmr.msrb.gmra.mxu3 %vm794_vm1, %v776_v41  ;;  %v740_v41 = vld [vmem:[%s16245_s3 + $0x140] sm:$0xff] }
 0x170   :  { %v640_v42 = vpop.f32.mrf.mxu2 }
 0x171   :  { %v9759_v46 = vadd.f32 %v640_v42, %v594_v43  ;;  %v722_v42 = vld [vmem:[%s16245_s3 + $0xb0] sm:$0xff] }
 0x173   :  { %16240 = vst [vmem:[#allocation4_spill] sm:$0xff] %v9759_v46 }
 0x178   :  { %v643_v45 = vpop.f32.mrf.mxu2 }
 0x179   :  { %v9761_v47 = vadd.f32 %v643_v45, %v595_v44  ;;  %v702_v45 = vld [vmem:[%s16245_s3 + $0x10] sm:$0xff] }
 0x17b   :  { %16241 = vst [vmem:[#allocation5_spill] sm:$0xff] %v9761_v47  ;;  %v777_v48 = vpack.c.bf16 %v9761_v47, %v9759_v46 }
 0x17d   :  { %7699 = vmatmul.msk.bf16.gmra.mxu3 %vm794_vm1, %v777_v48  ;;  %v708_v48 = vld [vmem:[%s16245_s3 + $0x40] sm:$0xff] }
 0x180   :  { %v646_v49 = vpop.f32.mrf.mxu2 }
 0x181   :  { %v9772_v53 = vadd.f32 %v646_v49, %v596_v50  ;;  %v714_v49 = vld [vmem:[%s16245_s3 + $0x70] sm:$0xff]  ;;  %v720_v50 = vld [vmem:[%s16245_s3 + $0xa0] sm:$0xff] }
 0x183   :  { %16242 = vst [vmem:[#allocation6_spill] sm:$0xff] %v9772_v53 }
 0x188   :  { %v649_v52 = vpop.f32.mrf.mxu2 }
 0x189   :  { %v9774_v54 = vadd.f32 %v649_v52, %v597_v51  ;;  %v726_v52 = vld [vmem:[%s16245_s3 + $0xd0] sm:$0xff] }
 0x18b   :  { %16243 = vst [vmem:[#allocation7_spill] sm:$0xff] %v9774_v54  ;;  %v778_v55 = vpack.c.bf16 %v9774_v54, %v9772_v53 }
 0x18d   :  { %7700 = vmatmul.msk.bf16.gmra.mxu3 %vm794_vm1, %v778_v55  ;;  %v732_v55 = vld [vmem:[%s16245_s3 + $0x100] sm:$0xff] }
 0x1f0   :  { %v813_v57 = vpop.f32.mrf.mxu3 }
 0x1f1   :  { %v814_v58 = vadd.f32 %v9782_v56, %v813_v57  ;;  %v738_v57 = vld [vmem:[%s16245_s3 + $0x130] sm:$0xff] }
 0x1f3   :  { %v828_v59 = vmul.f32 0.5, %v814_v58 }
 0x1f5   :  { %v9816_v8 = vmul.f32 %v828_v59, %v700_v60  ;;  %v9818_v9 = vmul.f32 %v828_v59, %v706_v61  ;;  %v9831_v15 = vmul.f32 %v828_v59, %v712_v62  ;;  %v9833_v16 = vmul.f32 %v828_v59, %v718_v63  ;;  %v709_v60 = vld [vmem:[%s16245_s3 + $0x48] sm:$0xff]  ;;  %v744_v61 = vld [vmem:[%s16245_s3 + $0x160] sm:$0xff]  ;;  %v715_v63 = vld [vmem:[%s16245_s3 + $0x78] sm:$0xff] }
 0x1f6   :  { %v9844_v20 = vmul.f32 %v828_v59, %v724_v1  ;;  %v9846_v21 = vmul.f32 %v828_v59, %v730_v2  ;;  %v9848_v22 = vmul.f32 %v828_v59, %v736_v3  ;;  %v9850_v23 = vmul.f32 %v828_v59, %v742_v7  ;;  %v703_v59 = vld [vmem:[%s16245_s3 + $0x18] sm:$0xff] }
 0x1f7   :  { %v727_v1 = vld [vmem:[%s16245_s3 + $0xd8] sm:$0xff] }
 0x1f8   :  { %v815_v0 = vpop.f32.mrf.mxu3  ;;  %v739_v7 = vld [vmem:[%s16245_s3 + $0x138] sm:$0xff] }
 0x1f9   :  { %v816_v4 = vadd.f32 %v9782_v56, %v815_v0  ;;  %v721_v0 = vld [vmem:[%s16245_s3 + $0xa8] sm:$0xff] }
 0x1fb   :  { %v829_v13 = vmul.f32 0.5, %v816_v4  ;;  %v9829_v14 = vpack.c.bf16 %v816_v4, %v814_v58 }
 0x1fd   :  { %912 = vrot.lane.b32.xlu1 %v9829_v14, %s9404_s7  ;;  %v9854_v24 = vmul.f32 %v829_v13, %v701_v5  ;;  %v9856_v25 = vmul.f32 %v829_v13, %v707_v6  ;;  %v9858_v26 = vmul.f32 %v829_v13, %v713_v10  ;;  %v9860_v27 = vmul.f32 %v829_v13, %v719_v11  ;;  %v733_v6 = vld [vmem:[%s16245_s3 + $0x108] sm:$0xff] }
 0x1fe   :  { %v9862_v28 = vmul.f32 %v829_v13, %v725_v12  ;;  %v9864_v29 = vmul.f32 %v829_v13, %v731_v17  ;;  %v9866_v30 = vmul.f32 %v829_v13, %v737_v18  ;;  %v9868_v31 = vmul.f32 %v829_v13, %v743_v19  ;;  %v745_v10 = vld [vmem:[%s16245_s3 + $0x168] sm:$0xff] }
 0x200   :  { %v818_v36 = vpop.f32.mrf.mxu3 }
 0x201   :  { %v9887_v43 = vadd.f32 %v9782_v56, %v818_v36 }
 0x203   :  { %v830_v44 = vmul.f32 0.5, %v9887_v43 }
 0x205   :  { %v9923_v62 = vmul.f32 %v830_v44, %v702_v45  ;;  %v9935_v3 = vmul.f32 %v830_v44, %v708_v48  ;;  %v9937_v4 = vmul.f32 %v830_v44, %v714_v49  ;;  %v9939_v5 = vmul.f32 %v830_v44, %v720_v50 }
 0x206   :  { %v9950_v11 = vmul.f32 %v830_v44, %v726_v52  ;;  %v9952_v12 = vmul.f32 %v830_v44, %v732_v55  ;;  %v9954_v13 = vmul.f32 %v830_v44, %v738_v57  ;;  %v9956_v17 = vmul.f32 %v830_v44, %v744_v61  ;;  %v717_v55 = vld [vmem:[%s16245_s3 + $0x88] sm:$0xff] }
 0x208   :  { %v820_v51 = vpop.f32.mrf.mxu3  ;;  %16246 = vst [vmem:[#allocation8_spill] sm:$0xff] %v9956_v17 }
 0x209   :  { %v9912_v58 = vadd.f32 %v9782_v56, %v820_v51 }
 0x20b   :  { %v831_v2 = vmul.f32 0.5, %v9912_v58 }
 0x20d   :  { %v9958_v18 = vmul.f32 %v831_v2, %v703_v59  ;;  %v9960_v19 = vmul.f32 %v831_v2, %v709_v60  ;;  %v9962_v36 = vmul.f32 %v831_v2, %v715_v63  ;;  %v9964_v45 = vmul.f32 %v831_v2, %v721_v0  ;;  %v734_v63 = vld [vmem:[%s16245_s3 + $0x110] sm:$0xff]  ;;  %v711_v60 = vld [vmem:[%s16245_s3 + $0x58] sm:$0xff] }
 0x20e   :  { %v9966_v48 = vmul.f32 %v831_v2, %v727_v1  ;;  %v9968_v49 = vmul.f32 %v831_v2, %v733_v6  ;;  %v9970_v50 = vmul.f32 %v831_v2, %v739_v7  ;;  %v9972_v51 = vmul.f32 %v831_v2, %v745_v10  ;;  %v704_v6 = vld [vmem:[%s16245_s3 + $0x20] sm:$0xff]  ;;  %v710_v7 = vld [vmem:[%s16245_s3 + $0x50] sm:$0xff] }
 0x20f   :  { %v716_v10 = vld [vmem:[%s16245_s3 + $0x80] sm:$0xff] }
 0x210   :  { %v823_v59 = vpop.f32.mrf.mxu3 }
 0x211   :  { %v824_v1 = vadd.f32 %v9782_v56, %v823_v59  ;;  %v728_v59 = vld [vmem:[%s16245_s3 + $0xe0] sm:$0xff] }
 0x213   :  { %v832_v2 = vmul.f32 0.5, %v824_v1 }
 0x215   :  { %v838_v57 = vmul.f32 %v832_v2, %v704_v6  ;;  %v844_v35 = vmul.f32 %v832_v2, %v710_v7  ;;  %v850_v33 = vmul.f32 %v832_v2, %v716_v10  ;;  %v10033_v44 = vmul.f32 %v832_v2, %v722_v42  ;;  %v735_v6 = vld [vmem:[%s16245_s3 + $0x118] sm:$0xff]  ;;  %v741_v7 = vld [vmem:[%s16245_s3 + $0x148] sm:$0xff] }
 0x216   :  { %v10044_v54 = vmul.f32 %v832_v2, %v728_v59  ;;  %v10046_v53 = vmul.f32 %v832_v2, %v734_v63  ;;  %v10050_v42 = vmul.f32 %v832_v2, %v746_v37 }
 0x218   :  { %v825_v0 = vpop.f32.mrf.mxu3 }
 0x219   :  { %v826_v61 = vadd.f32 %v9782_v56, %v825_v0  ;;  %v723_v56 = vld [vmem:[%s16245_s3 + $0xb8] sm:$0xff]  ;;  %v729_v0 = vld [vmem:[%s16245_s3 + $0xe8] sm:$0xff] }
 0x21b   :  { %v833_v34 = vmul.f32 0.5, %v826_v61  ;;  %v10031_v52 = vpack.c.bf16 %v826_v61, %v824_v1  ;;  %v10048_v61 = vmul.f32 %v832_v2, %v740_v41 }
 0x21d   :  { %916 = vrot.lane.b32.xlu0 %v10031_v52, %s9404_s7  ;;  %v839_v1 = vmul.f32 %v833_v34, %v705_v38  ;;  %v845_v10 = vmul.f32 %v833_v34, %v711_v60  ;;  %v851_v47 = vmul.f32 %v833_v34, %v717_v55  ;;  %v10054_v46 = vmul.f32 %v833_v34, %v723_v56 }
 0x21e   :  { %v10056_v40 = vmul.f32 %v833_v34, %v729_v0  ;;  %v10058_v39 = vmul.f32 %v833_v34, %v735_v6  ;;  %v10060_v59 = vmul.f32 %v833_v34, %v741_v7  ;;  %v10062_v63 = vmul.f32 %v833_v34, %v747_v32 }
 0x21f   :  { %v884_v41 = vpack.c.bf16 %v839_v1, %v838_v57  ;;  %v887_v17 = vpack.c.bf16 %v845_v10, %v844_v35  ;;  %v890_v37 = vpack.c.bf16 %v851_v47, %v850_v33  ;;  %v893_v2 = vpack.c.bf16 %v10054_v46, %v10033_v44  ;;  %v660_v44 = vld [vmem:[%s16253_s26 + $0x40] sm:$0xff] }
 0x220   :  { %v896_v38 = vpack.c.bf16 %v10056_v40, %v10044_v54  ;;  %v899_v55 = vpack.c.bf16 %v10058_v39, %v10046_v53  ;;  %v902_v60 = vpack.c.bf16 %v10060_v59, %v10048_v61  ;;  %v905_v56 = vpack.c.bf16 %v10062_v63, %v10050_v42 }
 0x221   :  { %v907_v32 = vpack.c.bf16 %v9912_v58, %v9887_v43  ;;  %v16247_v6 = vpack.c.bf16 %v9854_v24, %v9816_v8  ;;  %v16248_v43 = vpack.c.bf16 %v9958_v18, %v9923_v62  ;;  %v16249_v58 = vpack.c.bf16 %v9856_v25, %v9818_v9  ;;  %v652_v9 = vld [vmem:[%s16253_s26] sm:$0xff]  ;;  %v654_v18 = vld [vmem:[%s16253_s26 + $0x10] sm:$0xff] }
 0x222   :  { %v16250_v7 = vpack.c.bf16 %v9960_v19, %v9935_v3  ;;  %v16251_v8 = vpack.c.bf16 %v9858_v26, %v9831_v15  ;;  %v16252_v24 = vpack.c.bf16 %v9962_v36, %v9937_v4  ;;  %v653_v15 = vld [vmem:[%s16253_s26 + $0x8] sm:$0xff]  ;;  %v16254_v1 = vpack.c.bf16 %v9860_v27, %v9833_v16 }
 0x223   :  { %v16256_v46 = vpack.c.bf16 %v9862_v28, %v9844_v20  ;;  %v16259_v54 = vpack.c.bf16 %v9968_v49, %v9952_v12  ;;  %v16260_v53 = vpack.c.bf16 %v9866_v30, %v9848_v22  ;;  %v666_v22 = vld [vmem:[%s16253_s26 + $0x70] sm:$0xff] }
 0x225   :  { %914 = vrot.lane.b32.xlu0 %v907_v32, %s9404_s7 }
 0x26f   :  { %v913_v57 = vpop.permute.xlu1 %912 }
 0x270   :  { %v991_v0 = vsel %vm794_vm1, %v913_v57, 0 }
 0x28f   :  { %v917_v47 = vpop.permute.xlu0 %916 }
 0x290   :  { %v997_v33 = vsel %vm794_vm1, %v917_v47, 0 }
 0x291   :  { %1004 = vmatpush.bf16.xpose.msra.mxu0 %v997_v33 }
 0x297   :  { %v915_v34 = vpop.permute.xlu0 %914 }
 0x298   :  { %v994_v35 = vsel %vm794_vm1, %v915_v34, 0  ;;  %v656_v34 = vld [vmem:[%s16253_s26 + $0x20] sm:$0xff] }
 0x299   :  { %1005 = vmatpush.bf16.xpose.msra.mxu0 %v994_v35  ;;  %v16255_v35 = vpack.c.bf16 %v9964_v45, %v9939_v5  ;;  %v658_v5 = vld [vmem:[%s16253_s26 + $0x30] sm:$0xff] }
 0x2a1   :  { %1006 = vmatpush.bf16.xpose.msra.mxu0 %v991_v0  ;;  %v657_v0 = vld [vmem:[%s16253_s26 + $0x28] sm:$0xff] }
 0x2a8   :  { %7701 = vmatmul.msk.bf16.vlgmr.msra.gmra.mxu0 %vm794_vm1, %v16247_v6 }
 0x2b8   :  { %7702 = vmatmul.msk.bf16.gmra.mxu0 %vm794_vm1, %v16248_v43 }
 0x2c8   :  { %7703 = vmatmul.msk.bf16.gmra.mxu0 %vm794_vm1, %v884_v41  ;;  %v655_v41 = vld [vmem:[%s16253_s26 + $0x18] sm:$0xff] }
 0x2d8   :  { %7704 = vmatmul.msk.bf16.gmra.mxu0 %vm794_vm1, %v16249_v58 }
 0x2e8   :  { %7705 = vmatmul.msk.bf16.gmra.mxu0 %vm794_vm1, %v16250_v7 }
 0x2f8   :  { %7706 = vmatmul.msk.bf16.gmra.mxu0 %vm794_vm1, %v887_v17 }
 0x308   :  { %7707 = vmatmul.msk.bf16.gmra.mxu0 %vm794_vm1, %v16251_v8 }
 0x318   :  { %7708 = vmatmul.msk.bf16.gmra.mxu0 %vm794_vm1, %v16252_v24  ;;  %v659_v24 = vld [vmem:[%s16253_s26 + $0x38] sm:$0xff] }
 0x325   :  { %v1008_v25 = vpop.f32.mrf.mxu0 }
 0x326   :  { %v1009_v62 = vadd.f32 %v1008_v25, %v652_v9 }
 0x328   :  { %7709 = vmatmul.msk.bf16.gmra.mxu0 %vm794_vm1, %v890_v37  ;;  %v1129_v3 = vsel %vm1128_vm2, %v1009_v62, -inf }
 0x329   :  { %1130 = vmax.xlane.f32.xlu1 %v1129_v3  ;;  %v16257_v3 = vpack.c.bf16 %v9966_v48, %v9950_v11 }
 0x32d   :  { %v1010_v26 = vpop.f32.mrf.mxu0 }
 0x32e   :  { %v1011_v4 = vadd.f32 %v1010_v26, %v653_v15 }
 0x330   :  { %v1132_v17 = vsel %vm1128_vm2, %v1011_v4, -inf }
 0x331   :  { %1133 = vmax.xlane.f32.xlu2 %v1132_v17  ;;  %v16258_v17 = vpack.c.bf16 %v9864_v29, %v9846_v21 }
 0x335   :  { %v1013_v19 = vpop.f32.mrf.mxu0 }
 0x336   :  { %v10118_v36 = vadd.f32 %v1013_v19, %v654_v18 }
 0x338   :  { %7710 = vmatmul.msk.bf16.gmra.mxu0 %vm794_vm1, %v16254_v1  ;;  %v1135_v10 = vsel %vm1128_vm2, %v10118_v36, -inf }
 0x339   :  { %1136 = vmax.xlane.f32.xlu2 %v1135_v10 }
 0x33d   :  { %v1015_v37 = vpop.f32.mrf.mxu0 }
 0x33e   :  { %v1016_v47 = vadd.f32 %v1015_v37, %v655_v41 }
 0x340   :  { %v1138_v33 = vsel %vm1128_vm2, %v1016_v47, -inf }
 0x341   :  { %1139 = vmax.xlane.f32.xlu0 %v1138_v33 }
 0x345   :  { %v1018_v16 = vpop.f32.mrf.mxu0 }
 0x346   :  { %v1019_v27 = vadd.f32 %v1018_v16, %v656_v34 }
 0x348   :  { %7711 = vmatmul.msk.bf16.gmra.mxu0 %vm794_vm1, %v16255_v35  ;;  %v1141_v57 = vsel %vm1128_vm2, %v1019_v27, -inf }
 0x349   :  { %1142 = vmax.xlane.f32.xlu2 %v1141_v57 }
 0x34d   :  { %v1020_v6 = vpop.f32.mrf.mxu0 }
 0x34e   :  { %v10141_v43 = vadd.f32 %v1020_v6, %v657_v0 }
 0x350   :  { %v1144_v58 = vsel %vm1128_vm2, %v10141_v43, -inf }
 0x351   :  { %1145 = vmax.xlane.f32.xlu2 %v1144_v58 }
 0x355   :  { %v1023_v45 = vpop.f32.mrf.mxu0  ;;  %1683 = vrot.lane.b32.xlu0 %v907_v32, %s9405_s6 }
 0x356   :  { %v10149_v7 = vadd.f32 %v1023_v45, %v658_v5  ;;  %v16261_v45 = vpack.c.bf16 %v9970_v50, %v9954_v13 }
 0x358   :  { %7712 = vmatmul.msk.bf16.gmra.mxu0 %vm794_vm1, %v893_v2  ;;  %v1147_v8 = vsel %vm1128_vm2, %v10149_v7, -inf }
 0x359   :  { %1148 = vmax.xlane.f32.xlu2 %v1147_v8 }
 0x35d   :  { %v1025_v9 = vpop.f32.mrf.mxu0 }
 0x35e   :  { %v10160_v25 = vadd.f32 %v1025_v9, %v659_v24  ;;  %v661_v24 = vld [vmem:[%s16253_s26 + $0x48] sm:$0xff] }
 0x360   :  { %v1150_v32 = vsel %vm1128_vm2, %v10160_v25, -inf }
 0x361   :  { %1151 = vmax.xlane.f32.xlu2 %v1150_v32 }
 0x365   :  { %v1028_v2 = vpop.f32.mrf.mxu0 }
 0x366   :  { %v10175_v15 = vadd.f32 %v1028_v2, %v660_v44 }
 0x368   :  { %7713 = vmatmul.msk.bf16.gmra.mxu0 %vm794_vm1, %v16256_v46  ;;  %v1153_v26 = vsel %vm1128_vm2, %v10175_v15, -inf }
 0x36d   :  { %v1030_v20 = vpop.f32.mrf.mxu0 }
 0x36e   :  { %v10253_v46 = vadd.f32 %v1030_v20, %v661_v24 }
 0x370   :  { %v1156_v50 = vsel %vm1128_vm2, %v10253_v46, -inf }
 0x375   :  { %v10183_v28 = vpop.f32.mrf.mxu0 }
 0x378   :  { %7714 = vmatmul.msk.bf16.gmra.mxu0 %vm794_vm1, %v16257_v3 }
 0x37d   :  { %v10189_v18 = vpop.f32.mrf.mxu0 }
 0x37f   :  { %1154 = vmax.xlane.f32.xlu0 %v1153_v26 }
 0x385   :  { %v10199_v29 = vpop.f32.mrf.mxu0 }
 0x388   :  { %7715 = vmatmul.msk.bf16.gmra.mxu0 %vm794_vm1, %v896_v38 }
 0x398   :  { %7716 = vmatmul.msk.bf16.gmra.mxu0 %vm794_vm1, %v16258_v17 }
 0x39c   :  { %v1131_v11 = vpop.xlane.xlu1 %1130 }
 0x39d   :  { %v1273_v48 = vsub.f32 %v1009_v62, %v1131_v11 }
 0x39f   :  { %v1321_v19 = vmul.f32 1.442695, %v1273_v48 }
 0x3a1   :  { %8095 = vpow2.f32 %v1321_v19 }
 0x3a4   :  { %v1134_v1 = vpop.xlane.xlu2 %1133 }
 0x3a5   :  { %v1274_v10 = vsub.f32 %v1011_v4, %v1134_v1  ;;  %v1040_v4 = vpop.f32.mrf.mxu0 }
 0x3a7   :  { %v10191_v41 = vpop.eup %8095  ;;  %v1323_v40 = vmul.f32 1.442695, %v1274_v10  ;;  %v16262_v10 = vpack.c.bf16 %v9868_v31, %v9850_v23 }
 0x3a8   :  { %7717 = vmatmul.msk.bf16.gmra.mxu0 %vm794_vm1, %v16259_v54  ;;  %v1417_v21 = vsel %vm1128_vm2, %v10191_v41, 0.0 }
 0x3a9   :  { %8097 = vpow2.f32 %v1323_v40  ;;  %1418 = vadd.xlane.f32.xlu2 %v1417_v21 }
 0x3ac   :  { %v1137_v37 = vpop.xlane.xlu2 %1136 }
 0x3ad   :  { %v1043_v35 = vpop.f32.mrf.mxu0  ;;  %v1275_v9 = vsub.f32 %v10118_v36, %v1137_v37  ;;  %v662_v36 = vld [vmem:[%s16253_s26 + $0x50] sm:$0xff] }
 0x3ae   :  { %v10239_v5 = vadd.f32 %v1043_v35, %v666_v22  ;;  %v10268_v26 = vadd.f32 %v10183_v28, %v662_v36  ;;  %v663_v28 = vld [vmem:[%s16253_s26 + $0x58] sm:$0xff] }
 0x3af   :  { %v10201_v38 = vpop.eup %8097  ;;  %v1325_v44 = vmul.f32 1.442695, %v1275_v9  ;;  %v10285_v19 = vadd.f32 %v10189_v18, %v663_v28  ;;  %v670_v9 = vld [vmem:[%s16253_s26 + $0x90] sm:$0xff] }
 0x3b0   :  { %v1420_v62 = vsel %vm1128_vm2, %v10201_v38, 0.0  ;;  %v1159_v59 = vsel %vm1128_vm2, %v10268_v26, -inf }
 0x3b1   :  { %1421 = vadd.xlane.f32.xlu1 %v1420_v62  ;;  %v1162_v18 = vsel %vm1128_vm2, %v10285_v19, -inf  ;;  %v664_v62 = vld [vmem:[%s16253_s26 + $0x60] sm:$0xff] }
 0x3b2   :  { %v10304_v31 = vadd.f32 %v10199_v29, %v664_v62 }
 0x3b4   :  { %v1140_v33 = vpop.xlane.xlu0 %1139 }
 0x3b5   :  { %v1276_v34 = vsub.f32 %v1016_v47, %v1140_v33  ;;  %v10217_v39 = vpop.f32.mrf.mxu0 }
 0x3b7   :  { %v1327_v12 = vmul.f32 1.442695, %v1276_v34 }
 0x3b8   :  { %7718 = vmatmul.msk.bf16.gmra.mxu0 %vm794_vm1, %v899_v55 }
 0x3b9   :  { %8099 = vpow2.f32 %v1327_v12  ;;  %v1165_v12 = vsel %vm1128_vm2, %v10304_v31, -inf }
 0x3bc   :  { %v1143_v49 = vpop.xlane.xlu2 %1142 }
 0x3bd   :  { %v1277_v16 = vsub.f32 %v1019_v27, %v1143_v49  ;;  %v665_v27 = vld [vmem:[%s16253_s26 + $0x68] sm:$0xff]  ;;  %v10237_v30 = vpop.f32.mrf.mxu0 }
 0x3bf   :  { %v10209_v57 = vpop.eup %8099  ;;  %v1329_v0 = vmul.f32 1.442695, %v1277_v16 }
 0x3c0   :  { %v1426_v6 = vsel %vm1128_vm2, %v10209_v57, 0.0 }
 0x3c1   :  { %8101 = vpow2.f32 %v1329_v0  ;;  %1427 = vadd.xlane.f32.xlu0 %v1426_v6  ;;  %1685 = vrot.lane.b32.xlu2 %v10031_v52, %s9405_s6  ;;  %v10230_v52 = vadd.f32 %v1040_v4, %v665_v27  ;;  %v16263_v0 = vld [vmem:[#allocation8_spill] sm:$0xff] }
 0x3c2   :  { %8103 = vpow2.f32 %v1325_v44  ;;  %v16264_v6 = vpack.c.bf16 %v9972_v51, %v16263_v0 }
 0x3c3   :  { %v1168_v58 = vsel %vm1128_vm2, %v10230_v52, -inf }
 0x3c4   :  { %v1146_v32 = vpop.xlane.xlu2 %1145 }
 0x3c5   :  { %v10247_v8 = vpop.f32.mrf.mxu0  ;;  %v1278_v13 = vsub.f32 %v10141_v43, %v1146_v32 }
 0x3c7   :  { %v10215_v47 = vpop.eup %8101  ;;  %v1331_v3 = vmul.f32 1.442695, %v1278_v13  ;;  %v1684_v1 = vpop.permute.xlu0 %1683 }
 0x3c8   :  { %7719 = vmatmul.msk.bf16.gmra.mxu0 %vm794_vm1, %v16260_v53  ;;  %v1429_v55 = vsel %vm1128_vm2, %v10215_v47, 0.0  ;;  %v10270_v43 = vpop.eup %8103  ;;  %v668_v53 = vld [vmem:[%s16253_s26 + $0x80] sm:$0xff] }
 0x3c9   :  { %1430 = vadd.xlane.f32.xlu0 %v1429_v55  ;;  %8105 = vpow2.f32 %v1331_v3  ;;  %v10333_v55 = vadd.f32 %v10237_v30, %v668_v53 }
 0x3ca   :  { %1681 = vrot.lane.b32.xlu1 %v9829_v14, %s9405_s6  ;;  %v1171_v14 = vsel %vm1128_vm2, %v10239_v5, -inf }
 0x3cc   :  { %v1149_v20 = vpop.xlane.xlu2 %1148 }
 0x3cd   :  { %v10255_v2 = vpop.f32.mrf.mxu0  ;;  %v1279_v61 = vsub.f32 %v10149_v7, %v1149_v20 }
 0x3ce   :  { %v10359_v44 = vadd.f32 %v10255_v2, %v670_v9 }
 0x3cf   :  { %v1333_v11 = vmul.f32 1.442695, %v1279_v61  ;;  %v10282_v48 = vpop.eup %8105 }
 0x3d0   :  { %v1432_v40 = vsel %vm1128_vm2, %v10282_v48, 0.0 }
 0x3d1   :  { %1169 = vmax.xlane.f32.xlu0 %v1168_v58  ;;  %8107 = vpow2.f32 %v1333_v11  ;;  %v1177_v58 = vsel %vm1128_vm2, %v10333_v55, -inf }
 0x3d4   :  { %v1152_v7 = vpop.xlane.xlu2 %1151 }
 0x3d5   :  { %v10272_v17 = vpop.f32.mrf.mxu0  ;;  %v1280_v21 = vsub.f32 %v10160_v25, %v1152_v7  ;;  %v667_v25 = vld [vmem:[%s16253_s26 + $0x78] sm:$0xff] }
 0x3d6   :  { %v10317_v29 = vadd.f32 %v10217_v39, %v667_v25 }
 0x3d7   :  { %v10301_v4 = vpop.eup %8107  ;;  %v1335_v23 = vmul.f32 1.442695, %v1280_v21 }
 0x3d8   :  { %7720 = vmatmul.msk.bf16.gmra.mxu0 %vm794_vm1, %v16261_v45  ;;  %v1435_v33 = vsel %vm1128_vm2, %v10301_v4, 0.0  ;;  %v669_v45 = vld [vmem:[%s16253_s26 + $0x88] sm:$0xff] }
 0x3d9   :  { %1172 = vmax.xlane.f32.xlu0 %v1171_v14  ;;  %8109 = vpow2.f32 %v1335_v23  ;;  %v10347_v14 = vadd.f32 %v10247_v8, %v669_v45  ;;  %v1183_v8 = vsel %vm1128_vm2, %v10359_v44, -inf }
 0x3db   :  { %v1180_v24 = vsel %vm1128_vm2, %v10347_v14, -inf }
 0x3dd   :  { %v10293_v54 = vpop.f32.mrf.mxu0 }
 0x3df   :  { %v10319_v35 = vpop.eup %8109 }
 0x3e0   :  { %v1438_v39 = vsel %vm1128_vm2, %v10319_v35, 0.0 }
 0x3e5   :  { %v10314_v49 = vpop.f32.mrf.mxu0 }
 0x3e8   :  { %7721 = vmatmul.msk.bf16.gmra.mxu0 %vm794_vm1, %v902_v60  ;;  %v1423_v60 = vsel %vm1128_vm2, %v10270_v43, 0.0 }
 0x3ea   :  { %1157 = vmax.xlane.f32.xlu2 %v1156_v50 }
 0x3ed   :  { %v10335_v27 = vpop.f32.mrf.mxu0 }
 0x3f2   :  { %1160 = vmax.xlane.f32.xlu2 %v1159_v59  ;;  %v1155_v37 = vpop.xlane.xlu0 %1154 }
 0x3f3   :  { %v1281_v34 = vsub.f32 %v10175_v15, %v1155_v37  ;;  %v1174_v15 = vsel %vm1128_vm2, %v10317_v29, -inf  ;;  %v676_v37 = vld [vmem:[%s16253_s26 + $0xc0] sm:$0xff] }
 0x3f4   :  { %1424 = vadd.xlane.f32.xlu1 %v1423_v60 }
 0x3f5   :  { %v1337_v16 = vmul.f32 1.442695, %v1281_v34  ;;  %v1065_v30 = vpop.f32.mrf.mxu0 }
 0x3f7   :  { %8111 = vpow2.f32 %v1337_v16 }
 0x3f8   :  { %7722 = vmatmul.msk.bf16.gmra.mxu0 %vm794_vm1, %v16262_v10 }
 0x3fa   :  { %1433 = vadd.xlane.f32.xlu2 %v1432_v40 }
 0x3fc   :  { %1163 = vmax.xlane.f32.xlu1 %v1162_v18 }
 0x3fd   :  { %v10337_v51 = vpop.eup %8111 }
 0x3fe   :  { %v1441_v22 = vsel %vm1128_vm2, %v10337_v51, 0.0 }
 0x402   :  { %1436 = vadd.xlane.f32.xlu2 %v1435_v33  ;;  %v1068_v33 = vpop.f32.mrf.mxu0 }
 0x403   :  { %v10387_v25 = vadd.f32 %v1068_v33, %v676_v37 }
 0x404   :  { %1166 = vmax.xlane.f32.xlu1 %v1165_v12 }
 0x408   :  { %7723 = vmatmul.msk.bf16.gmra.mxu0 %vm794_vm1, %v16264_v6  ;;  %v1201_v6 = vsel %vm1128_vm2, %v10387_v25, -inf }
 0x40a   :  { %1175 = vmax.xlane.f32.xlu2 %v1174_v15 }
 0x40c   :  { %1439 = vadd.xlane.f32.xlu1 %v1438_v39 }
 0x412   :  { %1178 = vmax.xlane.f32.xlu2 %v1177_v58 }
 0x414   :  { %1442 = vadd.xlane.f32.xlu1 %v1441_v22 }
 0x418   :  { %7724 = vmatmul.msk.bf16.gmra.mxu0 %vm794_vm1, %v905_v56 }
 0x41c   :  { %1181 = vmax.xlane.f32.xlu1 %v1180_v24  ;;  %v1419_v32 = vpop.xlane.xlu2 %1418 }
 0x424   :  { %1184 = vmax.xlane.f32.xlu1 %v1183_v8  ;;  %v1686_v13 = vpop.permute.xlu2 %1685  ;;  %v1422_v42 = vpop.xlane.xlu1 %1421  ;;  %v671_v8 = vld [vmem:[%s16253_s26 + $0x98] sm:$0xff] }
 0x425   :  { %1767 = vmatpush.bf16.msra.mxu1 %v1686_v13  ;;  %8113 = vrcp.f32 %v1422_v42 }
 0x426   :  { %8115 = vrcp.f32 %v1419_v32 }
 0x429   :  { %1768 = vmatpush.bf16.msra.mxu1 %v1684_v1 }
 0x42b   :  { %v8114_v56 = vpop.eup %8113 }
 0x42c   :  { %v8116_v50 = vpop.eup %8115  ;;  %v1610_v36 = vmul.f32 %v8114_v56, %v10201_v38 }
 0x42d   :  { %v1609_v3 = vmul.f32 %v8116_v50, %v10191_v41 }
 0x42f   :  { %v1657_v61 = vpack.c.bf16 %v1610_v36, %v1609_v3  ;;  %v672_v36 = vld [vmem:[%s16253_s26 + $0xa0] sm:$0xff] }
 0x434   :  { %v1428_v63 = vpop.xlane.xlu0 %1427 }
 0x43c   :  { %v1431_v20 = vpop.xlane.xlu0 %1430  ;;  %v1682_v2 = vpop.permute.xlu1 %1681 }
 0x43d   :  { %1769 = vmatpush.bf16.msra.mxu1 %v1682_v2 }
 0x440   :  { %7725 = vmatmul.msk.bf16.vlgmr.msra.gmra.mxu1 %vm1128_vm2, %v1657_v61 }
 0x444   :  { %v1170_v59 = vpop.xlane.xlu0 %1169 }
 0x445   :  { %v1286_v60 = vsub.f32 %v10230_v52, %v1170_v59  ;;  %v675_v52 = vld [vmem:[%s16253_s26 + $0xb8] sm:$0xff] }
 0x446   :  { %v10379_v21 = vadd.f32 %v1065_v30, %v675_v52 }
 0x447   :  { %v1347_v28 = vmul.f32 1.442695, %v1286_v60 }
 0x448   :  { %v1198_v23 = vsel %vm1128_vm2, %v10379_v21, -inf }
 0x449   :  { %8117 = vpow2.f32 %v1347_v28 }
 0x44c   :  { %v1173_v11 = vpop.xlane.xlu0 %1172 }
 0x44d   :  { %v1287_v1 = vsub.f32 %v10239_v5, %v1173_v11 }
 0x44f   :  { %v10368_v7 = vpop.eup %8117  ;;  %v1349_v10 = vmul.f32 1.442695, %v1287_v1 }
 0x450   :  { %v1456_v41 = vsel %vm1128_vm2, %v10368_v7, 0.0 }
 0x451   :  { %8119 = vpow2.f32 %v1349_v10  ;;  %1457 = vadd.xlane.f32.xlu1 %v1456_v41 }
 0x457   :  { %v10372_v38 = vpop.eup %8119 }
 0x458   :  { %v1459_v40 = vsel %vm1128_vm2, %v10372_v38, 0.0 }
 0x459   :  { %1460 = vadd.xlane.f32.xlu1 %v1459_v40 }
 0x45d   :  { %v1158_v5 = vpop.xlane.xlu2 %1157 }
 0x45e   :  { %v1282_v18 = vsub.f32 %v10253_v46, %v1158_v5 }
 0x460   :  { %v1339_v62 = vmul.f32 1.442695, %v1282_v18 }
 0x461   :  { %1199 = vmax.xlane.f32.xlu1 %v1198_v23 }
 0x462   :  { %8121 = vpow2.f32 %v1339_v62 }
 0x463   :  { %8123 = vrcp.f32 %v1428_v63 }
 0x465   :  { %v1161_v34 = vpop.xlane.xlu2 %1160 }
 0x466   :  { %v1283_v12 = vsub.f32 %v10268_v26, %v1161_v34  ;;  %v1070_v34 = vpop.f32.mrf.mxu0 }
 0x467   :  { %v1425_v16 = vpop.xlane.xlu1 %1424 }
 0x468   :  { %v10390_v0 = vpop.eup %8121  ;;  %v1341_v46 = vmul.f32 1.442695, %v1283_v12  ;;  %8125 = vrcp.f32 %v1425_v16 }
 0x469   :  { %1202 = vmax.xlane.f32.xlu1 %v1201_v6  ;;  %v1444_v15 = vsel %vm1128_vm2, %v10390_v0, 0.0  ;;  %v8124_v53 = vpop.eup %8123 }
 0x46a   :  { %8127 = vpow2.f32 %v1341_v46  ;;  %1445 = vadd.xlane.f32.xlu0 %v1444_v15  ;;  %v1612_v45 = vmul.f32 %v8124_v53, %v10209_v57  ;;  %v10408_v57 = vadd.f32 %v10272_v17, %v671_v8 }
 0x46c   :  { %v1186_v56 = vsel %vm1128_vm2, %v10408_v57, -inf }
 0x46d   :  { %v1434_v39 = vpop.xlane.xlu2 %1433 }
 0x46e   :  { %v8126_v58 = vpop.eup %8125  ;;  %8129 = vrcp.f32 %v1434_v39 }
 0x46f   :  { %v1164_v22 = vpop.xlane.xlu1 %1163  ;;  %v1611_v26 = vmul.f32 %v8126_v58, %v10270_v43  ;;  %v677_v58 = vld [vmem:[%s16253_s26 + $0xc8] sm:$0xff] }
 0x470   :  { %v10398_v30 = vpop.eup %8127  ;;  %v1284_v24 = vsub.f32 %v10285_v19, %v1164_v22  ;;  %v1073_v22 = vpop.f32.mrf.mxu0 }
 0x471   :  { %v1447_v9 = vsel %vm1128_vm2, %v10398_v30, 0.0  ;;  %v1658_v32 = vpack.c.bf16 %v1612_v45, %v1611_v26 }
 0x472   :  { %v1343_v13 = vmul.f32 1.442695, %v1284_v24  ;;  %1448 = vadd.xlane.f32.xlu0 %v1447_v9  ;;  %v678_v9 = vld [vmem:[%s16253_s26 + $0xd0] sm:$0xff] }
 0x473   :  { %7726 = vmatmul.msk.bf16.gmra.mxu1 %vm1128_vm2, %v1658_v32 }
 0x474   :  { %8131 = vpow2.f32 %v1343_v13  ;;  %v8130_v63 = vpop.eup %8129  ;;  %v10479_v13 = vadd.f32 %v1073_v22, %v678_v9 }
 0x475   :  { %v1437_v43 = vpop.xlane.xlu2 %1436  ;;  %8133 = vrcp.f32 %v1431_v20  ;;  %v1614_v61 = vmul.f32 %v8130_v63, %v10282_v48  ;;  %v673_v48 = vld [vmem:[%s16253_s26 + $0xa8] sm:$0xff]  ;;  %v679_v63 = vld [vmem:[%s16253_s26 + $0xd8] sm:$0xff] }
 0x476   :  { %v10438_v40 = vadd.f32 %v10314_v49, %v673_v48  ;;  %v674_v49 = vld [vmem:[%s16253_s26 + $0xb0] sm:$0xff] }
 0x477   :  { %v1167_v19 = vpop.xlane.xlu1 %1166  ;;  %v10453_v12 = vadd.f32 %v10335_v27, %v674_v49 }
 0x478   :  { %v1285_v42 = vsub.f32 %v10304_v31, %v1167_v19  ;;  %v10421_v31 = vadd.f32 %v10293_v54, %v672_v36  ;;  %v1192_v37 = vsel %vm1128_vm2, %v10438_v40, -inf  ;;  %v1075_v19 = vpop.f32.mrf.mxu0 }
 0x479   :  { %v1195_v27 = vsel %vm1128_vm2, %v10453_v12, -inf }
 0x47a   :  { %v10413_v50 = vpop.eup %8131  ;;  %v1345_v3 = vmul.f32 1.442695, %v1285_v42  ;;  %1187 = vmax.xlane.f32.xlu0 %v1186_v56  ;;  %v1189_v1 = vsel %vm1128_vm2, %v10421_v31, -inf  ;;  %v10490_v56 = vadd.f32 %v1075_v19, %v679_v63 }
 0x47b   :  { %v1450_v17 = vsel %vm1128_vm2, %v10413_v50, 0.0  ;;  %v8134_v2 = vpop.eup %8133 }
 0x47c   :  { %8135 = vpow2.f32 %v1345_v3  ;;  %1451 = vadd.xlane.f32.xlu2 %v1450_v17  ;;  %v1613_v28 = vmul.f32 %v8134_v2, %v10215_v47  ;;  %v1210_v36 = vsel %vm1128_vm2, %v10490_v56, -inf  ;;  %v680_v3 = vld [vmem:[%s16253_s26 + $0xe0] sm:$0xff] }
 0x47d   :  { %v1176_v20 = vpop.xlane.xlu2 %1175 }
 0x47e   :  { %v1288_v59 = vsub.f32 %v10317_v29, %v1176_v20  ;;  %v1659_v10 = vpack.c.bf16 %v1614_v61, %v1613_v28 }
 0x47f   :  { %v1440_v60 = vpop.xlane.xlu1 %1439 }
 0x480   :  { %v1351_v11 = vmul.f32 1.442695, %v1288_v59  ;;  %v1078_v17 = vpop.f32.mrf.mxu0 }
 0x481   :  { %v10497_v2 = vadd.f32 %v1078_v17, %v680_v3 }
 0x482   :  { %v10428_v41 = vpop.eup %8135  ;;  %8137 = vpow2.f32 %v1351_v11  ;;  %1190 = vmax.xlane.f32.xlu0 %v1189_v1 }
 0x483   :  { %7727 = vmatmul.msk.bf16.gmra.mxu1 %vm1128_vm2, %v1659_v10  ;;  %v1453_v54 = vsel %vm1128_vm2, %v10428_v41, 0.0  ;;  %8139 = vrcp.f32 %v1440_v60  ;;  %v1213_v20 = vsel %vm1128_vm2, %v10497_v2, -inf }
 0x484   :  { %1454 = vadd.xlane.f32.xlu2 %v1453_v54  ;;  %8141 = vrcp.f32 %v1437_v43 }
 0x485   :  { %v1179_v47 = vpop.xlane.xlu2 %1178 }
 0x486   :  { %v1289_v29 = vsub.f32 %v10333_v55, %v1179_v47 }
 0x487   :  { %v10440_v52 = vpop.xlane.xlu1 %1442 }
 0x488   :  { %v10442_v5 = vpop.eup %8137  ;;  %v1353_v18 = vmul.f32 1.442695, %v1289_v29  ;;  %v10501_v61 = vpop.f32.mrf.mxu0 }
 0x489   :  { %v1462_v62 = vsel %vm1128_vm2, %v10442_v5, 0.0  ;;  %v8140_v23 = vpop.eup %8139 }
 0x48a   :  { %8143 = vpow2.f32 %v1353_v18  ;;  %1463 = vadd.xlane.f32.xlu0 %v1462_v62  ;;  %v8142_v33 = vpop.eup %8141  ;;  %v1616_v55 = vmul.f32 %v8140_v23, %v10319_v35 }
 0x48b   :  { %v1615_v46 = vmul.f32 %v8142_v33, %v10301_v4  ;;  %v10467_v4 = vadd.f32 %v1070_v34, %v677_v58 }
 0x48c   :  { %1193 = vmax.xlane.f32.xlu2 %v1192_v37 }
 0x48d   :  { %v1660_v39 = vpack.c.bf16 %v1616_v55, %v1615_v46  ;;  %v1204_v45 = vsel %vm1128_vm2, %v10467_v4, -inf }
 0x48f   :  { %v1182_v16 = vpop.xlane.xlu1 %1181 }
 0x490   :  { %v10456_v6 = vpop.eup %8143  ;;  %v1290_v15 = vsub.f32 %v10347_v14, %v1182_v16  ;;  %v10505_v60 = vpop.f32.mrf.mxu0 }
 0x491   :  { %v1465_v53 = vsel %vm1128_vm2, %v10456_v6, 0.0 }
 0x492   :  { %v1355_v35 = vmul.f32 1.442695, %v1290_v15  ;;  %1466 = vadd.xlane.f32.xlu0 %v1465_v53 }
 0x493   :  { %7728 = vmatmul.msk.bf16.gmra.mxu1 %vm1128_vm2, %v1660_v39  ;;  %v685_v39 = vld [vmem:[%s16253_s26 + $0x108] sm:$0xff] }
 0x494   :  { %8145 = vpow2.f32 %v1355_v35  ;;  %1196 = vmax.xlane.f32.xlu2 %v1195_v27 }
 0x497   :  { %v1185_v14 = vpop.xlane.xlu1 %1184 }
 0x498   :  { %v1291_v26 = vsub.f32 %v10359_v44, %v1185_v14  ;;  %v1207_v44 = vsel %vm1128_vm2, %v10479_v13, -inf  ;;  %v10509_v11 = vpop.f32.mrf.mxu0 }
 0x49a   :  { %v10472_v24 = vpop.eup %8145  ;;  %v1357_v32 = vmul.f32 1.442695, %v1291_v26  ;;  %1205 = vmax.xlane.f32.xlu0 %v1204_v45  ;;  %v686_v26 = vld [vmem:[%s16253_s26 + $0x110] sm:$0xff] }
 0x49b   :  { %v1468_v8 = vsel %vm1128_vm2, %v10472_v24, 0.0 }
 0x49c   :  { %8147 = vpow2.f32 %v1357_v32  ;;  %1469 = vadd.xlane.f32.xlu2 %v1468_v8 }
 0x4a0   :  { %v10513_v47 = vpop.f32.mrf.mxu0 }
 0x4a2   :  { %v10483_v43 = vpop.eup %8147  ;;  %1208 = vmax.xlane.f32.xlu0 %v1207_v44 }
 0x4a3   :  { %v1471_v42 = vsel %vm1128_vm2, %v10483_v43, 0.0 }
 0x4a4   :  { %1472 = vadd.xlane.f32.xlu2 %v1471_v42 }
 0x4a8   :  { %v1090_v16 = vpop.f32.mrf.mxu0 }
 0x4a9   :  { %v10534_v58 = vadd.f32 %v1090_v16, %v685_v39 }
 0x4ab   :  { %v1228_v22 = vsel %vm1128_vm2, %v10534_v58, -inf }
 0x4ac   :  { %1211 = vmax.xlane.f32.xlu2 %v1210_v36 }
 0x4b0   :  { %v1093_v45 = vpop.f32.mrf.mxu0 }
 0x4b1   :  { %v10544_v32 = vadd.f32 %v1093_v45, %v686_v26  ;;  %v8961_v45 = vld [vmem:[%s16245_s3] sm:$0xff] }
 0x4b4   :  { %1214 = vmax.xlane.f32.xlu2 %v1213_v20  ;;  %v1231_v20 = vsel %vm1128_vm2, %v10544_v32, -inf }
 0x4bd   :  { %v10516_v62 = vpop.f32.mrf.mxu1 }
 0x4c4   :  { %v10503_v59 = vpop.xlane.xlu1 %1457 }
 0x4c5   :  { %v10526_v15 = vpop.f32.mrf.mxu1 }
 0x4cc   :  { %v10507_v28 = vpop.xlane.xlu1 %1460 }
 0x4d4   :  { %v1200_v1 = vpop.xlane.xlu1 %1199 }
 0x4d5   :  { %v1296_v10 = vsub.f32 %v10379_v21, %v1200_v1 }
 0x4d7   :  { %v1367_v54 = vmul.f32 1.442695, %v1296_v10 }
 0x4d9   :  { %8149 = vpow2.f32 %v1367_v54 }
 0x4da   :  { %8151 = vrcp.f32 %v10440_v52 }
 0x4dc   :  { %v1203_v48 = vpop.xlane.xlu1 %1202 }
 0x4dd   :  { %v1297_v29 = vsub.f32 %v10387_v25, %v1203_v48  ;;  %v1446_v18 = vpop.xlane.xlu0 %1445 }
 0x4de   :  { %8153 = vrcp.f32 %v1446_v18 }
 0x4df   :  { %v10518_v23 = vpop.eup %8149  ;;  %v1369_v37 = vmul.f32 1.442695, %v1297_v29 }
 0x4e0   :  { %v1486_v33 = vsel %vm1128_vm2, %v10518_v23, 0.0  ;;  %v8152_v21 = vpop.eup %8151 }
 0x4e1   :  { %8155 = vpow2.f32 %v1369_v37  ;;  %1487 = vadd.xlane.f32.xlu2 %v1486_v33  ;;  %v1617_v55 = vmul.f32 %v8152_v21, %v10337_v51  ;;  %v681_v37 = vld [vmem:[%s16253_s26 + $0xe8] sm:$0xff] }
 0x4e4   :  { %v8154_v49 = vpop.eup %8153 }
 0x4e5   :  { %v1449_v52 = vpop.xlane.xlu0 %1448  ;;  %v1618_v34 = vmul.f32 %v8154_v49, %v10390_v0 }
 0x4e6   :  { %8157 = vrcp.f32 %v1449_v52 }
 0x4e7   :  { %v10524_v25 = vpop.eup %8155  ;;  %v1661_v46 = vpack.c.bf16 %v1618_v34, %v1617_v55 }
 0x4e8   :  { %v1489_v53 = vsel %vm1128_vm2, %v10524_v25, 0.0 }
 0x4e9   :  { %7729 = vmatmul.msk.bf16.gmra.mxu1 %vm1128_vm2, %v1661_v46  ;;  %1490 = vadd.xlane.f32.xlu2 %v1489_v53 }
 0x4ec   :  { %v8158_v9 = vpop.eup %8157 }
 0x4ed   :  { %v1188_v51 = vpop.xlane.xlu0 %1187  ;;  %v1619_v42 = vmul.f32 %v8158_v9, %v10398_v30  ;;  %v1891_v9 = vmul.f32 %v8961_v45, %v10516_v62  ;;  %v683_v62 = vld [vmem:[%s16253_s26 + $0xf8] sm:$0xff] }
 0x4ee   :  { %v1292_v0 = vsub.f32 %v10408_v57, %v1188_v51 }
 0x4ef   :  { %v1452_v35 = vpop.xlane.xlu2 %1451 }
 0x4f0   :  { %v1359_v27 = vmul.f32 1.442695, %v1292_v0  ;;  %8159 = vrcp.f32 %v1452_v35  ;;  %v10537_v14 = vpop.f32.mrf.mxu1 }
 0x4f1   :  { %1229 = vmax.xlane.f32.xlu2 %v1228_v22 }
 0x4f2   :  { %8161 = vpow2.f32 %v1359_v27 }
 0x4f5   :  { %v1191_v8 = vpop.xlane.xlu0 %1190 }
 0x4f6   :  { %v8160_v57 = vpop.eup %8159  ;;  %v1293_v44 = vsub.f32 %v10421_v31, %v1191_v8 }
 0x4f7   :  { %v1455_v19 = vpop.xlane.xlu2 %1454  ;;  %v1620_v63 = vmul.f32 %v8160_v57, %v10413_v50 }
 0x4f8   :  { %v10549_v36 = vpop.eup %8161  ;;  %v1361_v3 = vmul.f32 1.442695, %v1293_v44  ;;  %v10551_v17 = vpop.f32.mrf.mxu1 }
 0x4f9   :  { %1232 = vmax.xlane.f32.xlu2 %v1231_v20  ;;  %v1474_v1 = vsel %vm1128_vm2, %v10549_v36, 0.0  ;;  %v1662_v10 = vpack.c.bf16 %v1620_v63, %v1619_v42  ;;  %v10613_v20 = vadd.f32 %v10509_v11, %v683_v62 }
 0x4fa   :  { %8163 = vpow2.f32 %v1361_v3  ;;  %1475 = vadd.xlane.f32.xlu1 %v1474_v1 }
 0x4fb   :  { %7730 = vmatmul.msk.bf16.gmra.mxu1 %vm1128_vm2, %v1662_v10  ;;  %8165 = vrcp.f32 %v1455_v19 }
 0x4fc   :  { %8167 = vrcp.f32 %v10503_v59  ;;  %v10570_v59 = vadd.f32 %v10501_v61, %v681_v37  ;;  %v682_v61 = vld [vmem:[%s16253_s26 + $0xf0] sm:$0xff] }
 0x4fd   :  { %v1464_v30 = vpop.xlane.xlu0 %1463 }
 0x4fe   :  { %v1216_v46 = vsel %vm1128_vm2, %v10570_v59, -inf }
 0x4ff   :  { %v1194_v50 = vpop.xlane.xlu2 %1193 }
 0x500   :  { %v10559_v31 = vpop.eup %8163  ;;  %v1294_v54 = vsub.f32 %v10438_v40, %v1194_v50  ;;  %v10562_v48 = vpop.f32.mrf.mxu1 }
 0x501   :  { %v1477_v29 = vsel %vm1128_vm2, %v10559_v31, 0.0  ;;  %v8166_v18 = vpop.eup %8165 }
 0x502   :  { %v1363_v33 = vmul.f32 1.442695, %v1294_v54  ;;  %1478 = vadd.xlane.f32.xlu1 %v1477_v29  ;;  %v8168_v21 = vpop.eup %8167  ;;  %v1621_v40 = vmul.f32 %v8166_v18, %v10428_v41  ;;  %v10588_v41 = vadd.f32 %v10505_v60, %v682_v61  ;;  %v8962_v60 = vld [vmem:[%s16245_s3 + $0x30] sm:$0xff] }
 0x503   :  { %v1622_v55 = vmul.f32 %v8168_v21, %v10368_v7 }
 0x504   :  { %8169 = vpow2.f32 %v1363_v33 }
 0x505   :  { %v1467_v49 = vpop.xlane.xlu0 %1466  ;;  %v1663_v53 = vpack.c.bf16 %v1622_v55, %v1621_v40  ;;  %8171 = vrcp.f32 %v1464_v30 }
 0x507   :  { %v1197_v52 = vpop.xlane.xlu2 %1196 }
 0x508   :  { %v1295_v34 = vsub.f32 %v10453_v12, %v1197_v52  ;;  %v10575_v16 = vpop.f32.mrf.mxu1  ;;  %v687_v52 = vld [vmem:[%s16253_s26 + $0x118] sm:$0xff] }
 0x50a   :  { %v10579_v39 = vpop.eup %8169  ;;  %v1365_v51 = vmul.f32 1.442695, %v1295_v34  ;;  %1217 = vmax.xlane.f32.xlu1 %v1216_v46 }
 0x50b   :  { %7731 = vmatmul.msk.bf16.gmra.mxu1 %vm1128_vm2, %v1663_v53  ;;  %v1480_v7 = vsel %vm1128_vm2, %v10579_v39, 0.0  ;;  %v8172_v26 = vpop.eup %8171 }
 0x50c   :  { %8173 = vpow2.f32 %v1365_v51  ;;  %1481 = vadd.xlane.f32.xlu0 %v1480_v7  ;;  %v1624_v63 = vmul.f32 %v8172_v26, %v10442_v5  ;;  %v1222_v5 = vsel %vm1128_vm2, %v10613_v20, -inf }
 0x50d   :  { %v1206_v12 = vpop.xlane.xlu0 %1205  ;;  %8175 = vrcp.f32 %v10507_v28  ;;  %v1219_v28 = vsel %vm1128_vm2, %v10588_v41, -inf }
 0x50e   :  { %v1298_v0 = vsub.f32 %v10467_v4, %v1206_v12 }
 0x50f   :  { %v1470_v35 = vpop.xlane.xlu2 %1469 }
 0x510   :  { %v1371_v27 = vmul.f32 1.442695, %v1298_v0  ;;  %v1786_v22 = vpop.f32.mrf.mxu1 }
 0x511   :  { %v1897_v8 = vmul.f32 %v8962_v60, %v1786_v22 }
 0x512   :  { %v10601_v57 = vpop.eup %8173  ;;  %8177 = vpow2.f32 %v1371_v27  ;;  %1220 = vmax.xlane.f32.xlu1 %v1219_v28  ;;  %v690_v28 = vld [vmem:[%s16253_s26 + $0x130] sm:$0xff] }
 0x513   :  { %v10603_v4 = vadd.f32 %v1897_v8, %v1891_v9  ;;  %v1483_v44 = vsel %vm1128_vm2, %v10601_v57, 0.0  ;;  %v8176_v19 = vpop.eup %8175  ;;  %v689_v9 = vld [vmem:[%s16253_s26 + $0x128] sm:$0xff] }
 0x514   :  { %1484 = vadd.xlane.f32.xlu0 %v1483_v44  ;;  %v1623_v10 = vmul.f32 %v8176_v19, %v10372_v38  ;;  %v1095_v38 = vpop.f32.mrf.mxu0 }
 0x515   :  { %v1209_v42 = vpop.xlane.xlu0 %1208  ;;  %v10641_v34 = vadd.f32 %v1095_v38, %v687_v52  ;;  %v8963_v38 = vld [vmem:[%s16245_s3 + $0x10] sm:$0xff] }
 0x516   :  { %v1299_v3 = vsub.f32 %v10479_v13, %v1209_v42  ;;  %v1664_v29 = vpack.c.bf16 %v1624_v63, %v1623_v10  ;;  %v684_v13 = vld [vmem:[%s16253_s26 + $0x100] sm:$0xff] }
 0x517   :  { %v10615_v1 = vpop.xlane.xlu2 %1472  ;;  %v10629_v11 = vadd.f32 %v10513_v47, %v684_v13  ;;  %v1234_v7 = vsel %vm1128_vm2, %v10641_v34, -inf }
 0x518   :  { %v10618_v30 = vpop.eup %8177  ;;  %v1373_v50 = vmul.f32 1.442695, %v1299_v3 }
 0x519   :  { %v1492_v54 = vsel %vm1128_vm2, %v10618_v30, 0.0 }
 0x51a   :  { %8179 = vpow2.f32 %v1373_v50  ;;  %1493 = vadd.xlane.f32.xlu1 %v1492_v54  ;;  %v10686_v50 = vpop.f32.mrf.mxu1 }
 0x51b   :  { %7732 = vmatmul.msk.bf16.gmra.mxu1 %vm1128_vm2, %v1664_v29  ;;  %8181 = vrcp.f32 %v1470_v35  ;;  %v688_v35 = vld [vmem:[%s16253_s26 + $0x120] sm:$0xff] }
 0x51c   :  { %1223 = vmax.xlane.f32.xlu0 %v1222_v5  ;;  %8183 = vrcp.f32 %v1467_v49  ;;  %v1225_v49 = vsel %vm1128_vm2, %v10629_v11, -inf  ;;  %v1098_v61 = vpop.f32.mrf.mxu0 }
 0x51f   :  { %v1212_v18 = vpop.xlane.xlu2 %1211 }
 0x520   :  { %v10631_v37 = vpop.eup %8179  ;;  %v1300_v33 = vsub.f32 %v10490_v56, %v1212_v18  ;;  %v1893_v18 = vmul.f32 %v8963_v38, %v10537_v14  ;;  %v696_v38 = vld [vmem:[%s16253_s26 + $0x160] sm:$0xff] }
 0x521   :  { %v1495_v21 = vsel %vm1128_vm2, %v10631_v37, 0.0  ;;  %v8182_v40 = vpop.eup %8181 }
 0x522   :  { %v1375_v55 = vmul.f32 1.442695, %v1300_v33  ;;  %1496 = vadd.xlane.f32.xlu1 %v1495_v21  ;;  %v8184_v47 = vpop.eup %8183  ;;  %v1626_v56 = vmul.f32 %v8182_v40, %v10472_v24  ;;  %v10656_v24 = vadd.f32 %v1098_v61, %v688_v35  ;;  %v8964_v21 = vld [vmem:[%s16245_s3 + $0x40] sm:$0xff] }
 0x523   :  { %v1625_v53 = vmul.f32 %v8184_v47, %v10456_v6 }
 0x524   :  { %8185 = vpow2.f32 %v1375_v55  ;;  %1226 = vmax.xlane.f32.xlu0 %v1225_v49  ;;  %v1100_v26 = vpop.f32.mrf.mxu0 }
 0x525   :  { %v1665_v12 = vpack.c.bf16 %v1626_v56, %v1625_v53  ;;  %v10667_v60 = vadd.f32 %v1100_v26, %v689_v9  ;;  %v695_v26 = vld [vmem:[%s16253_s26 + $0x158] sm:$0xff] }
 0x527   :  { %v1215_v46 = vpop.xlane.xlu2 %1214  ;;  %v1240_v8 = vsel %vm1128_vm2, %v10667_v60, -inf }
 0x528   :  { %v1301_v51 = vsub.f32 %v10497_v2, %v1215_v46  ;;  %v1237_v2 = vsel %vm1128_vm2, %v10656_v24, -inf }
 0x52a   :  { %v10648_v0 = vpop.eup %8185  ;;  %v1377_v27 = vmul.f32 1.442695, %v1301_v51  ;;  %1235 = vmax.xlane.f32.xlu1 %v1234_v7 }
 0x52b   :  { %7733 = vmatmul.msk.bf16.gmra.mxu1 %vm1128_vm2, %v1665_v12  ;;  %v1498_v6 = vsel %vm1128_vm2, %v10648_v0, 0.0 }
 0x52c   :  { %8187 = vpow2.f32 %v1377_v27  ;;  %1499 = vadd.xlane.f32.xlu0 %v1498_v6  ;;  %v1103_v44 = vpop.f32.mrf.mxu0 }
 0x52d   :  { %v10674_v19 = vadd.f32 %v1103_v44, %v690_v28 }
 0x52f   :  { %v1243_v62 = vsel %vm1128_vm2, %v10674_v19, -inf }
 0x532   :  { %v10660_v22 = vpop.eup %8187  ;;  %1238 = vmax.xlane.f32.xlu1 %v1237_v2 }
 0x533   :  { %v1501_v45 = vsel %vm1128_vm2, %v10660_v22, 0.0 }
 0x534   :  { %1502 = vadd.xlane.f32.xlu0 %v1501_v45  ;;  %v10678_v42 = vpop.f32.mrf.mxu0  ;;  %v8965_v45 = vld [vmem:[%s16245_s3 + $0x20] sm:$0xff] }
 0x53c   :  { %1241 = vmax.xlane.f32.xlu0 %v1240_v8  ;;  %v10682_v3 = vpop.f32.mrf.mxu0 }
 0x544   :  { %1244 = vmax.xlane.f32.xlu0 %v1243_v62  ;;  %v10688_v54 = vpop.f32.mrf.mxu0 }
 0x554   :  { %v10680_v63 = vpop.xlane.xlu2 %1487 }
 0x55c   :  { %v10684_v10 = vpop.xlane.xlu2 %1490 }
 0x564   :  { %v1230_v29 = vpop.xlane.xlu2 %1229 }
 0x565   :  { %v1306_v5 = vsub.f32 %v10534_v58, %v1230_v29  ;;  %v10701_v58 = vpop.f32.mrf.mxu0 }
 0x566   :  { %v1791_v13 = vpop.f32.mrf.mxu1 }
 0x567   :  { %v1387_v33 = vmul.f32 1.442695, %v1306_v5  ;;  %v1899_v40 = vmul.f32 %v8964_v21, %v1791_v13 }
 0x569   :  { %8189 = vpow2.f32 %v1387_v33  ;;  %v10698_v52 = vadd.f32 %v1899_v40, %v1893_v18 }
 0x56a   :  { %8191 = vrcp.f32 %v10615_v1 }
 0x56c   :  { %v1233_v55 = vpop.xlane.xlu2 %1232 }
 0x56d   :  { %v1307_v49 = vsub.f32 %v10544_v32, %v1233_v55  ;;  %v1476_v47 = vpop.xlane.xlu1 %1475  ;;  %v1115_v35 = vpop.f32.mrf.mxu0 }
 0x56e   :  { %8193 = vrcp.f32 %v1476_v47  ;;  %v10706_v46 = vpop.f32.mrf.mxu1  ;;  %v10729_v28 = vadd.f32 %v1115_v35, %v695_v26 }
 0x56f   :  { %v10704_v56 = vpop.eup %8189  ;;  %v1389_v14 = vmul.f32 1.442695, %v1307_v49 }
 0x570   :  { %v1516_v53 = vsel %vm1128_vm2, %v10704_v56, 0.0  ;;  %v8192_v61 = vpop.eup %8191  ;;  %v1258_v13 = vsel %vm1128_vm2, %v10729_v28, -inf }
 0x571   :  { %8195 = vpow2.f32 %v1389_v14  ;;  %1517 = vadd.xlane.f32.xlu0 %v1516_v53  ;;  %v1627_v7 = vmul.f32 %v8192_v61, %v10483_v43  ;;  %v1895_v43 = vmul.f32 %v8965_v45, %v10562_v48 }
 0x574   :  { %v8194_v51 = vpop.eup %8193 }
 0x575   :  { %v1479_v1 = vpop.xlane.xlu1 %1478  ;;  %v1628_v12 = vmul.f32 %v8194_v51, %v10549_v36  ;;  %v8966_v36 = vld [vmem:[%s16245_s3 + $0x50] sm:$0xff]  ;;  %v1118_v18 = vpop.f32.mrf.mxu0 }
 0x576   :  { %8197 = vrcp.f32 %v1479_v1  ;;  %v10739_v21 = vadd.f32 %v1118_v18, %v696_v38  ;;  %v8968_v38 = vld [vmem:[%s16245_s3 + $0x70] sm:$0xff] }
 0x577   :  { %v10712_v32 = vpop.eup %8195  ;;  %v1666_v27 = vpack.c.bf16 %v1628_v12, %v1627_v7  ;;  %v8967_v7 = vld [vmem:[%s16245_s3 + $0x60] sm:$0xff] }
 0x578   :  { %v1796_v6 = vpop.f32.mrf.mxu1  ;;  %v1519_v2 = vsel %vm1128_vm2, %v10712_v32, 0.0  ;;  %v1261_v1 = vsel %vm1128_vm2, %v10739_v21, -inf }
 0x579   :  { %v1901_v9 = vmul.f32 %v8966_v36, %v1796_v6  ;;  %1520 = vadd.xlane.f32.xlu0 %v1519_v2  ;;  %7734 = vmatmul.msk.bf16.gmra.mxu1 %vm1128_vm2, %v1666_v27 }
 0x57b   :  { %v10727_v8 = vadd.f32 %v1901_v9, %v1895_v43 }
 0x57c   :  { %v8198_v33 = vpop.eup %8197 }
 0x57d   :  { %v1218_v44 = vpop.xlane.xlu1 %1217  ;;  %v1629_v49 = vmul.f32 %v8198_v33, %v10559_v31 }
 0x57e   :  { %v1302_v62 = vsub.f32 %v10570_v59, %v1218_v44 }
 0x57f   :  { %v1482_v29 = vpop.xlane.xlu0 %1481 }
 0x580   :  { %v1379_v5 = vmul.f32 1.442695, %v1302_v62  ;;  %8199 = vrcp.f32 %v1482_v29  ;;  %v10732_v48 = vpop.f32.mrf.mxu1 }
 0x581   :  { %1259 = vmax.xlane.f32.xlu0 %v1258_v13 }
 0x582   :  { %8201 = vpow2.f32 %v1379_v5 }
 0x585   :  { %v1221_v40 = vpop.xlane.xlu1 %1220 }
 0x586   :  { %v8200_v59 = vpop.eup %8199  ;;  %v1303_v55 = vsub.f32 %v10588_v41, %v1221_v40 }
 0x587   :  { %v1630_v47 = vmul.f32 %v8200_v59, %v10579_v39  ;;  %v1485_v14 = vpop.xlane.xlu0 %1484 }
 0x588   :  { %v10744_v53 = vpop.eup %8201  ;;  %v1381_v61 = vmul.f32 1.442695, %v1303_v55  ;;  %v1801_v51 = vpop.f32.mrf.mxu1 }
 0x589   :  { %v1903_v12 = vmul.f32 %v8967_v7, %v1801_v51  ;;  %1262 = vmax.xlane.f32.xlu0 %v1261_v1  ;;  %v1504_v41 = vsel %vm1128_vm2, %v10744_v53, 0.0  ;;  %v1667_v31 = vpack.c.bf16 %v1630_v47, %v1629_v49 }
 0x58a   :  { %8203 = vpow2.f32 %v1381_v61  ;;  %1505 = vadd.xlane.f32.xlu2 %v1504_v41 }
 0x58b   :  { %v10754_v39 = vadd.f32 %v10603_v4, %v1903_v12  ;;  %7735 = vmatmul.msk.bf16.gmra.mxu1 %vm1128_vm2, %v1667_v31  ;;  %8205 = vrcp.f32 %v1485_v14  ;;  %v691_v4 = vld [vmem:[%s16253_s26 + $0x138] sm:$0xff] }
 0x58c   :  { %8207 = vrcp.f32 %v10680_v63  ;;  %v10769_v63 = vadd.f32 %v10678_v42, %v691_v4 }
 0x58d   :  { %v1494_v35 = vpop.xlane.xlu1 %1493 }
 0x58e   :  { %v1246_v33 = vsel %vm1128_vm2, %v10769_v63, -inf }
 0x58f   :  { %v1224_v27 = vpop.xlane.xlu0 %1223 }
 0x590   :  { %v10758_v6 = vpop.eup %8203  ;;  %v1304_v2 = vsub.f32 %v10613_v20, %v1224_v27  ;;  %v10761_v26 = vpop.f32.mrf.mxu1 }
 0x591   :  { %v1507_v45 = vsel %vm1128_vm2, %v10758_v6, 0.0  ;;  %v8206_v43 = vpop.eup %8205 }
 0x592   :  { %v1383_v36 = vmul.f32 1.442695, %v1304_v2  ;;  %1508 = vadd.xlane.f32.xlu2 %v1507_v45  ;;  %v8208_v9 = vpop.eup %8207  ;;  %v1631_v44 = vmul.f32 %v8206_v43, %v10601_v57  ;;  %v692_v57 = vld [vmem:[%s16253_s26 + $0x140] sm:$0xff] }
 0x593   :  { %v1632_v62 = vmul.f32 %v8208_v9, %v10518_v23  ;;  %v10791_v55 = vadd.f32 %v10682_v3, %v692_v57 }
 0x594   :  { %8209 = vpow2.f32 %v1383_v36  ;;  %v8969_v36 = vld [vmem:[%s16245_s3 + $0x80] sm:$0xff] }
 0x595   :  { %v1497_v20 = vpop.xlane.xlu1 %1496  ;;  %v1668_v40 = vpack.c.bf16 %v1632_v62, %v1631_v44  ;;  %8211 = vrcp.f32 %v1494_v35  ;;  %v1249_v1 = vsel %vm1128_vm2, %v10791_v55, -inf  ;;  %v694_v44 = vld [vmem:[%s16253_s26 + $0x150] sm:$0xff] }
 0x596   :  { %v10831_v62 = vadd.f32 %v10701_v58, %v694_v44 }
 0x597   :  { %v1227_v29 = vpop.xlane.xlu0 %1226 }
 0x598   :  { %v1305_v5 = vsub.f32 %v10629_v11, %v1227_v29  ;;  %v1806_v13 = vpop.f32.mrf.mxu1  ;;  %v1255_v58 = vsel %vm1128_vm2, %v10831_v62, -inf }
 0x599   :  { %v1905_v18 = vmul.f32 %v8968_v38, %v1806_v13 }
 0x59a   :  { %v10779_v42 = vpop.eup %8209  ;;  %v1385_v23 = vmul.f32 1.442695, %v1305_v5  ;;  %1247 = vmax.xlane.f32.xlu2 %v1246_v33  ;;  %v697_v33 = vld [vmem:[%s16253_s26 + $0x168] sm:$0xff] }
 0x59b   :  { %v10785_v11 = vadd.f32 %v10698_v52, %v1905_v18  ;;  %7736 = vmatmul.msk.bf16.gmra.mxu1 %vm1128_vm2, %v1668_v40  ;;  %v1510_v59 = vsel %vm1128_vm2, %v10779_v42, 0.0  ;;  %v8212_v52 = vpop.eup %8211 }
 0x59c   :  { %8213 = vpow2.f32 %v1385_v23  ;;  %1511 = vadd.xlane.f32.xlu1 %v1510_v59 }
 0x59d   :  { %v1236_v49 = vpop.xlane.xlu1 %1235  ;;  %8215 = vrcp.f32 %v10684_v10  ;;  %v1634_v10 = vmul.f32 %v8212_v52, %v10618_v30  ;;  %v698_v52 = vld [vmem:[%s16253_s26 + $0x170] sm:$0xff] }
 0x59e   :  { %v1308_v47 = vsub.f32 %v10641_v34, %v1236_v49  ;;  %v693_v34 = vld [vmem:[%s16253_s26 + $0x148] sm:$0xff] }
 0x59f   :  { %v1500_v14 = vpop.xlane.xlu0 %1499  ;;  %v10809_v35 = vadd.f32 %v10688_v54, %v693_v34 }
 0x5a0   :  { %v1391_v61 = vmul.f32 1.442695, %v1308_v47  ;;  %v10795_v51 = vpop.f32.mrf.mxu1 }
 0x5a2   :  { %v10799_v7 = vpop.eup %8213  ;;  %8217 = vpow2.f32 %v1391_v61  ;;  %1250 = vmax.xlane.f32.xlu2 %v1249_v1 }
 0x5a3   :  { %v1513_v3 = vsel %vm1128_vm2, %v10799_v7, 0.0  ;;  %v8216_v12 = vpop.eup %8215 }
 0x5a4   :  { %1514 = vadd.xlane.f32.xlu1 %v1513_v3  ;;  %v1633_v27 = vmul.f32 %v8216_v12, %v10524_v25  ;;  %v1252_v25 = vsel %vm1128_vm2, %v10809_v35, -inf }
 0x5a5   :  { %v1239_v41 = vpop.xlane.xlu1 %1238 }
 0x5a6   :  { %v1309_v31 = vsub.f32 %v10656_v24, %v1239_v41  ;;  %v1669_v24 = vpack.c.bf16 %v1634_v10, %v1633_v27  ;;  %v699_v10 = vld [vmem:[%s16253_s26 + $0x178] sm:$0xff] }
 0x5a7   :  { %v10812_v2 = vpop.xlane.xlu0 %1502 }
 0x5a8   :  { %v10814_v45 = vpop.eup %8217  ;;  %v1393_v43 = vmul.f32 1.442695, %v1309_v31  ;;  %v1811_v4 = vpop.f32.mrf.mxu1 }
 0x5a9   :  { %v1907_v9 = vmul.f32 %v8969_v36, %v1811_v4  ;;  %v1522_v30 = vsel %vm1128_vm2, %v10814_v45, 0.0  ;;  %v8970_v36 = vld [vmem:[%s16245_s3 + $0x90] sm:$0xff] }
 0x5aa   :  { %8219 = vpow2.f32 %v1393_v43  ;;  %1523 = vadd.xlane.f32.xlu2 %v1522_v30 }
 0x5ab   :  { %v10822_v54 = vadd.f32 %v10727_v8, %v1907_v9  ;;  %7737 = vmatmul.msk.bf16.gmra.mxu1 %vm1128_vm2, %v1669_v24  ;;  %8221 = vrcp.f32 %v1500_v14  ;;  %v1120_v8 = vpop.f32.mrf.mxu0 }
 0x5ac   :  { %1253 = vmax.xlane.f32.xlu1 %v1252_v25  ;;  %8223 = vrcp.f32 %v1497_v20  ;;  %v10843_v57 = vadd.f32 %v1120_v8, %v697_v33 }
 0x5ae   :  { %v1264_v47 = vsel %vm1128_vm2, %v10843_v57, -inf }
 0x5af   :  { %v1242_v29 = vpop.xlane.xlu0 %1241 }
 0x5b0   :  { %v10833_v5 = vpop.eup %8219  ;;  %v1310_v13 = vsub.f32 %v10667_v60, %v1242_v29  ;;  %v10873_v43 = vpop.f32.mrf.mxu1 }
 0x5b1   :  { %v1525_v38 = vsel %vm1128_vm2, %v10833_v5, 0.0  ;;  %v8222_v18 = vpop.eup %8221 }
 0x5b2   :  { %v1395_v40 = vmul.f32 1.442695, %v1310_v13  ;;  %1526 = vadd.xlane.f32.xlu2 %v1525_v38  ;;  %v8224_v20 = vpop.eup %8223  ;;  %v1636_v60 = vmul.f32 %v8222_v18, %v10648_v0 }
 0x5b3   :  { %v1635_v23 = vmul.f32 %v8224_v20, %v10631_v37  ;;  %v1123_v1 = vpop.f32.mrf.mxu0 }
 0x5b4   :  { %8225 = vpow2.f32 %v1395_v40  ;;  %1256 = vmax.xlane.f32.xlu1 %v1255_v58  ;;  %v10858_v0 = vadd.f32 %v1123_v1, %v698_v52 }
 0x5b5   :  { %v1670_v14 = vpack.c.bf16 %v1636_v60, %v1635_v23 }
 0x5b7   :  { %v1245_v59 = vpop.xlane.xlu0 %1244 }
 0x5b8   :  { %v1311_v49 = vsub.f32 %v10674_v19, %v1245_v59  ;;  %v1267_v19 = vsel %vm1128_vm2, %v10858_v0, -inf }
 0x5ba   :  { %v10850_v61 = vpop.eup %8225  ;;  %v1397_v3 = vmul.f32 1.442695, %v1311_v49  ;;  %1265 = vmax.xlane.f32.xlu2 %v1264_v47 }
 0x5bb   :  { %7738 = vmatmul.msk.bf16.gmra.mxu1 %vm1128_vm2, %v1670_v14  ;;  %v1528_v37 = vsel %vm1128_vm2, %v10850_v61, 0.0  ;;  %v1125_v41 = vpop.f32.mrf.mxu0 }
 0x5bc   :  { %8227 = vpow2.f32 %v1397_v3  ;;  %1529 = vadd.xlane.f32.xlu1 %v1528_v37  ;;  %v10869_v31 = vadd.f32 %v1125_v41, %v699_v10  ;;  %v8972_v41 = vld [vmem:[%s16245_s3 + $0xb0] sm:$0xff] }
 0x5bd   :  { %8229 = vrcp.f32 %v10812_v2 }
 0x5be   :  { %v1270_v27 = vsel %vm1128_vm2, %v10869_v31, -inf }
 0x5c2   :  { %v10862_v12 = vpop.eup %8227  ;;  %1268 = vmax.xlane.f32.xlu2 %v1267_v19 }
 0x5c3   :  { %v1531_v34 = vsel %vm1128_vm2, %v10862_v12, 0.0  ;;  %v8230_v29 = vpop.eup %8229 }
 0x5c4   :  { %1532 = vadd.xlane.f32.xlu1 %v1531_v34  ;;  %v1637_v13 = vmul.f32 %v8230_v29, %v10660_v22 }
 0x5cc   :  { %1271 = vmax.xlane.f32.xlu1 %v1270_v27 }
 0x5e4   :  { %v1518_v44 = vpop.xlane.xlu0 %1517 }
 0x5ec   :  { %v10890_v2 = vpop.xlane.xlu0 %1520 }
 0x5f4   :  { %v1260_v47 = vpop.xlane.xlu0 %1259 }
 0x5f6   :  { %v1816_v4 = vpop.f32.mrf.mxu1 }
 0x5f7   :  { %v1909_v9 = vmul.f32 %v8970_v36, %v1816_v4 }
 0x5f9   :  { %v10879_v30 = vadd.f32 %v10754_v39, %v1909_v9  ;;  %v8971_v39 = vld [vmem:[%s16245_s3 + $0xa0] sm:$0xff] }
 0x5fc   :  { %v1263_v36 = vpop.xlane.xlu0 %1262 }
 0x5fd   :  { %v1506_v24 = vpop.xlane.xlu2 %1505 }
 0x5fe   :  { %8231 = vrcp.f32 %v1506_v24  ;;  %v10882_v25 = vpop.f32.mrf.mxu1 }
 0x604   :  { %v8232_v8 = vpop.eup %8231 }
 0x605   :  { %v1638_v38 = vmul.f32 %v8232_v8, %v10744_v53  ;;  %v1509_v18 = vpop.xlane.xlu2 %1508 }
 0x606   :  { %8233 = vrcp.f32 %v1509_v18 }
 0x607   :  { %v1671_v33 = vpack.c.bf16 %v1638_v38, %v1637_v13  ;;  %v1317_v38 = vsub.f32 %v10739_v21, %v1263_v36  ;;  %v8973_v21 = vld [vmem:[%s16245_s3 + $0xc0] sm:$0xff] }
 0x608   :  { %v1821_v40 = vpop.f32.mrf.mxu1 }
 0x609   :  { %v1911_v58 = vmul.f32 %v8971_v39, %v1821_v40  ;;  %7739 = vmatmul.msk.bf16.gmra.mxu1 %vm1128_vm2, %v1671_v33 }
 0x60b   :  { %v10893_v20 = vadd.f32 %v10785_v11, %v1911_v58  ;;  %v1409_v58 = vmul.f32 1.442695, %v1317_v38 }
 0x60c   :  { %v8234_v49 = vpop.eup %8233 }
 0x60d   :  { %v1248_v60 = vpop.xlane.xlu2 %1247  ;;  %v1639_v3 = vmul.f32 %v8234_v49, %v10758_v6 }
 0x60e   :  { %v1312_v22 = vsub.f32 %v10769_v63, %v1248_v60  ;;  %v1316_v63 = vsub.f32 %v10729_v28, %v1260_v47 }
 0x60f   :  { %v1512_v53 = vpop.xlane.xlu1 %1511 }
 0x610   :  { %v1399_v23 = vmul.f32 1.442695, %v1312_v22  ;;  %8235 = vrcp.f32 %v1512_v53  ;;  %v10896_v59 = vpop.f32.mrf.mxu1 }
 0x612   :  { %8237 = vpow2.f32 %v1399_v23 }
 0x615   :  { %v1251_v14 = vpop.xlane.xlu2 %1250 }
 0x616   :  { %v8236_v52 = vpop.eup %8235  ;;  %v1313_v1 = vsub.f32 %v10791_v55, %v1251_v14 }
 0x617   :  { %v1640_v11 = vmul.f32 %v8236_v52, %v10779_v42  ;;  %v1515_v37 = vpop.xlane.xlu1 %1514  ;;  %v1407_v42 = vmul.f32 1.442695, %v1316_v63 }
 0x618   :  { %v10901_v19 = vpop.eup %8237  ;;  %v1401_v34 = vmul.f32 1.442695, %v1313_v1  ;;  %v1826_v10 = vpop.f32.mrf.mxu1 }
 0x619   :  { %v1913_v27 = vmul.f32 %v8972_v41, %v1826_v10  ;;  %v1534_v4 = vsel %vm1128_vm2, %v10901_v19, 0.0  ;;  %v1672_v55 = vpack.c.bf16 %v1640_v11, %v1639_v3 }
 0x61a   :  { %8239 = vpow2.f32 %v1401_v34  ;;  %1535 = vadd.xlane.f32.xlu0 %v1534_v4 }
 0x61b   :  { %v10910_v6 = vadd.f32 %v10822_v54, %v1913_v27  ;;  %7740 = vmatmul.msk.bf16.gmra.mxu1 %vm1128_vm2, %v1672_v55  ;;  %8241 = vrcp.f32 %v1515_v37 }
 0x61c   :  { %8243 = vrcp.f32 %v1518_v44 }
 0x61d   :  { %v1524_v28 = vpop.xlane.xlu2 %1523  ;;  %8245 = vpow2.f32 %v1407_v42 }
 0x61f   :  { %v1254_v9 = vpop.xlane.xlu1 %1253 }
 0x620   :  { %v10913_v24 = vpop.eup %8239  ;;  %v1314_v29 = vsub.f32 %v10809_v35, %v1254_v9  ;;  %v10916_v8 = vpop.f32.mrf.mxu1 }
 0x621   :  { %v1537_v13 = vsel %vm1128_vm2, %v10913_v24, 0.0  ;;  %v8242_v54 = vpop.eup %8241 }
 0x622   :  { %v1403_v18 = vmul.f32 1.442695, %v1314_v29  ;;  %1538 = vadd.xlane.f32.xlu0 %v1537_v13  ;;  %v8244_v33 = vpop.eup %8243  ;;  %v1641_v44 = vmul.f32 %v8242_v54, %v10799_v7  ;;  %v8974_v29 = vld [vmem:[%s16245_s3 + $0xd0] sm:$0xff] }
 0x623   :  { %v10922_v39 = vpop.eup %8245  ;;  %v1642_v35 = vmul.f32 %v8244_v33, %v10704_v56 }
 0x624   :  { %8247 = vpow2.f32 %v1403_v18  ;;  %v1546_v49 = vsel %vm1128_vm2, %v10922_v39, 0.0 }
 0x625   :  { %v1527_v40 = vpop.xlane.xlu2 %1526  ;;  %v1673_v47 = vpack.c.bf16 %v1642_v35, %v1641_v44  ;;  %8249 = vpow2.f32 %v1409_v58 }
 0x626   :  { %8251 = vrcp.f32 %v1524_v28 }
 0x627   :  { %v1257_v60 = vpop.xlane.xlu1 %1256 }
 0x628   :  { %v1315_v22 = vsub.f32 %v10831_v62, %v1257_v60  ;;  %v1831_v53 = vpop.f32.mrf.mxu1 }
 0x629   :  { %v1915_v23 = vmul.f32 %v8973_v21, %v1831_v53 }
 0x62a   :  { %v10931_v7 = vpop.eup %8247  ;;  %v1405_v14 = vmul.f32 1.442695, %v1315_v22  ;;  %1547 = vadd.xlane.f32.xlu0 %v1546_v49 }
 0x62b   :  { %v10934_v56 = vadd.f32 %v10879_v30, %v1915_v23  ;;  %7741 = vmatmul.msk.bf16.gmra.mxu1 %vm1128_vm2, %v1673_v47  ;;  %v1540_v62 = vsel %vm1128_vm2, %v10931_v7, 0.0  ;;  %v10941_v11 = vpop.eup %8249  ;;  %v8975_v23 = vld [vmem:[%s16245_s3 + $0xe0] sm:$0xff] }
 0x62c   :  { %8253 = vpow2.f32 %v1405_v14  ;;  %1541 = vadd.xlane.f32.xlu2 %v1540_v62  ;;  %v8252_v30 = vpop.eup %8251  ;;  %v1549_v10 = vsel %vm1128_vm2, %v10941_v11, 0.0 }
 0x62d   :  { %v1266_v52 = vpop.xlane.xlu2 %1265  ;;  %8255 = vrcp.f32 %v10890_v2 }
 0x62e   :  { %v1318_v1 = vsub.f32 %v10843_v57, %v1266_v52  ;;  %v1644_v57 = vmul.f32 %v8252_v30, %v10814_v45  ;;  %v8976_v30 = vld [vmem:[%s16245_s3 + $0xf0] sm:$0xff] }
 0x62f   :  { %v1530_v3 = vpop.xlane.xlu1 %1529 }
 0x630   :  { %v1411_v37 = vmul.f32 1.442695, %v1318_v1  ;;  %v10943_v63 = vpop.f32.mrf.mxu1 }
 0x632   :  { %v10945_v34 = vpop.eup %8253  ;;  %8257 = vpow2.f32 %v1411_v37 }
 0x633   :  { %v1543_v41 = vsel %vm1128_vm2, %v10945_v34, 0.0  ;;  %v8256_v27 = vpop.eup %8255 }
 0x634   :  { %1550 = vadd.xlane.f32.xlu2 %v1549_v10  ;;  %1544 = vadd.xlane.f32.xlu1 %v1543_v41  ;;  %v1643_v55 = vmul.f32 %v8256_v27, %v10712_v32 }
 0x635   :  { %v1269_v2 = vpop.xlane.xlu2 %1268 }
 0x636   :  { %v1319_v4 = vsub.f32 %v10858_v0, %v1269_v2  ;;  %v1674_v54 = vpack.c.bf16 %v1644_v57, %v1643_v55 }
 0x637   :  { %v1533_v42 = vpop.xlane.xlu1 %1532 }
 0x638   :  { %v10954_v28 = vpop.eup %8257  ;;  %v1413_v36 = vmul.f32 1.442695, %v1319_v4  ;;  %v1836_v9 = vpop.f32.mrf.mxu1 }
 0x639   :  { %v1917_v13 = vmul.f32 %v8974_v29, %v1836_v9  ;;  %v1552_v45 = vsel %vm1128_vm2, %v10954_v28, 0.0 }
 0x63a   :  { %8259 = vpow2.f32 %v1413_v36  ;;  %v8977_v36 = vld [vmem:[%s16245_s3 + $0x100] sm:$0xff] }
 0x63b   :  { %v1959_v38 = vadd.f32 %v10893_v20, %v1917_v13  ;;  %7742 = vmatmul.msk.bf16.gmra.mxu1 %vm1128_vm2, %v1674_v54  ;;  %8261 = vrcp.f32 %v1530_v3 }
 0x63c   :  { %1553 = vadd.xlane.f32.xlu1 %v1552_v45  ;;  %8263 = vrcp.f32 %v1527_v40 }
 0x63f   :  { %v1272_v32 = vpop.xlane.xlu1 %1271 }
 0x640   :  { %v10963_v0 = vpop.eup %8259  ;;  %v1320_v18 = vsub.f32 %v10869_v31, %v1272_v32  ;;  %v10975_v40 = vpop.f32.mrf.mxu1 }
 0x641   :  { %v1555_v33 = vsel %vm1128_vm2, %v10963_v0, 0.0  ;;  %v8262_v44 = vpop.eup %8261 }
 0x642   :  { %v1415_v58 = vmul.f32 1.442695, %v1320_v18  ;;  %1556 = vadd.xlane.f32.xlu0 %v1555_v33  ;;  %v8264_v20 = vpop.eup %8263  ;;  %v1646_v35 = vmul.f32 %v8262_v44, %v10850_v61  ;;  %v8978_v44 = vld [vmem:[%s16245_s3 + $0x110] sm:$0xff] }
 0x643   :  { %v1645_v60 = vmul.f32 %v8264_v20, %v10833_v5 }
 0x644   :  { %8265 = vpow2.f32 %v1415_v58 }
 0x645   :  { %v1675_v22 = vpack.c.bf16 %v1646_v35, %v1645_v60  ;;  %8267 = vrcp.f32 %v1533_v42 }
 0x64a   :  { %v10970_v53 = vpop.eup %8265 }
 0x64b   :  { %7743 = vmatmul.msk.bf16.gmra.mxu1 %vm1128_vm2, %v1675_v22  ;;  %v1558_v31 = vsel %vm1128_vm2, %v10970_v53, 0.0  ;;  %v8268_v14 = vpop.eup %8267 }
 0x64c   :  { %1559 = vadd.xlane.f32.xlu2 %v1558_v31  ;;  %v1647_v52 = vmul.f32 %v8268_v14, %v10862_v12 }
 0x686   :  { %v1841_v21 = vpop.f32.mrf.mxu1 }
 0x687   :  { %v1919_v49 = vmul.f32 %v8975_v23, %v1841_v21 }
 0x689   :  { %v1961_v61 = vadd.f32 %v10910_v6, %v1919_v49 }
 0x68d   :  { %v1536_v5 = vpop.xlane.xlu0 %1535 }
 0x68e   :  { %8269 = vrcp.f32 %v1536_v5  ;;  %v10981_v47 = vpop.f32.mrf.mxu1 }
 0x694   :  { %v8270_v62 = vpop.eup %8269 }
 0x695   :  { %v1648_v1 = vmul.f32 %v8270_v62, %v10901_v19  ;;  %v1539_v6 = vpop.xlane.xlu0 %1538 }
 0x696   :  { %8271 = vrcp.f32 %v1539_v6 }
 0x697   :  { %v1676_v3 = vpack.c.bf16 %v1648_v1, %v1647_v52 }
 0x698   :  { %v1846_v37 = vpop.f32.mrf.mxu1 }
 0x699   :  { %v1921_v10 = vmul.f32 %v8976_v30, %v1846_v37  ;;  %7744 = vmatmul.msk.bf16.gmra.mxu1 %vm1128_vm2, %v1676_v3  ;;  %v8058_v3 = vld [vmem:[%s16180_s9 + $0x8] sm:$0xff] }
 0x69a   :  { %2014 = vmatpush.bf16.msra.mxu2 %v8058_v3  ;;  %3678 = vmatpush.bf16.msrb.mxu1 %v8058_v3 }
 0x69b   :  { %v10990_v41 = vadd.f32 %v10934_v56, %v1921_v10  ;;  %v11033_v10 = vld [vmem:[%s16245_s3 + $0x38] sm:$0xff] }
 0x69c   :  { %v8272_v12 = vpop.eup %8271  ;;  %v1898_v6 = vmul.f32 %v11033_v10, %v10686_v50  ;;  %v11054_v50 = vld [vmem:[%s16245_s3 + $0x98] sm:$0xff] }
 0x69d   :  { %v1649_v2 = vmul.f32 %v8272_v12, %v10913_v24  ;;  %v1548_v29 = vpop.xlane.xlu0 %1547 }
 0x69f   :  { %v1542_v27 = vpop.xlane.xlu2 %1541 }
 0x6a0   :  { %8273 = vrcp.f32 %v1542_v27  ;;  %v10992_v57 = vpop.f32.mrf.mxu1  ;;  %v11040_v27 = vld [vmem:[%s16245_s3 + $0x8] sm:$0xff] }
 0x6a1   :  { %v1892_v12 = vmul.f32 %v11040_v27, %v10526_v15  ;;  %v11061_v15 = vld [vmem:[%s16245_s3 + $0xc8] sm:$0xff] }
 0x6a6   :  { %v8274_v19 = vpop.eup %8273 }
 0x6a7   :  { %v1650_v4 = vmul.f32 %v8274_v19, %v10931_v7  ;;  %v1545_v42 = vpop.xlane.xlu1 %1544  ;;  %v1551_v20 = vpop.xlane.xlu2 %1550  ;;  %v11047_v19 = vld [vmem:[%s16245_s3 + $0x68] sm:$0xff] }
 0x6a8   :  { %v1851_v55 = vpop.f32.mrf.mxu1  ;;  %8275 = vrcp.f32 %v1545_v42 }
 0x6a9   :  { %v1923_v9 = vmul.f32 %v8977_v36, %v1851_v55  ;;  %v1677_v56 = vpack.c.bf16 %v1650_v4, %v1649_v2  ;;  %8277 = vrcp.f32 %v1548_v29  ;;  %v1904_v2 = vmul.f32 %v11047_v19, %v10761_v26 }
 0x6aa   :  { %v1940_v4 = vadd.f32 %v1898_v6, %v1892_v12  ;;  %v1910_v55 = vmul.f32 %v11054_v50, %v10882_v25  ;;  %v8996_v12 = vld [vmem:[%s16245_s3 + $0x138] sm:$0xff] }
 0x6ab   :  { %v10999_v13 = vadd.f32 %v1959_v38, %v1923_v9  ;;  %7745 = vmatmul.msk.bf16.gmra.mxu1 %vm1128_vm2, %v1677_v56  ;;  %v1916_v9 = vmul.f32 %v11061_v15, %v10943_v63  ;;  %v11068_v56 = vld [vmem:[%s16245_s3 + $0xf8] sm:$0xff]  ;;  %v11081_v63 = vld [vmem:[%s16245_s3 + $0x128] sm:$0xff] }
 0x6ac   :  { %v1946_v36 = vadd.f32 %v1940_v4, %v1904_v2  ;;  %v1922_v29 = vmul.f32 %v11068_v56, %v10992_v57  ;;  %v11087_v57 = vld [vmem:[%s16245_s3 + $0x150] sm:$0xff]  ;;  %v11134_v4 = vld [vmem:[%s16245_s3 + $0x160] sm:$0xff] }
 0x6ae   :  { %v8276_v24 = vpop.eup %8275  ;;  %v1952_v26 = vadd.f32 %v1946_v36, %v1910_v55 }
 0x6af   :  { %v8278_v45 = vpop.eup %8277  ;;  %v1651_v7 = vmul.f32 %v8276_v24, %v10945_v34  ;;  %v1554_v33 = vpop.xlane.xlu1 %1553  ;;  %v11075_v24 = vld [vmem:[%s16245_s3 + $0x120] sm:$0xff] }
 0x6b0   :  { %v11002_v54 = vpop.f32.mrf.mxu1  ;;  %v1652_v32 = vmul.f32 %v8278_v45, %v10922_v39  ;;  %8279 = vrcp.f32 %v1554_v33  ;;  %v1958_v25 = vadd.f32 %v1952_v26, %v1916_v9 }
 0x6b1   :  { %8281 = vrcp.f32 %v1551_v20 }
 0x6b2   :  { %v1678_v58 = vpack.c.bf16 %v1652_v32, %v1651_v7  ;;  %v1964_v32 = vadd.f32 %v1958_v25, %v1922_v29 }
 0x6b5   :  { %v1557_v23 = vpop.xlane.xlu0 %1556 }
 0x6b6   :  { %v8280_v60 = vpop.eup %8279 }
 0x6b7   :  { %v8282_v22 = vpop.eup %8281  ;;  %v1654_v34 = vmul.f32 %v8280_v60, %v10954_v28  ;;  %v8989_v60 = vld [vmem:[%s16245_s3 + $0x48] sm:$0xff] }
 0x6b8   :  { %v1856_v18 = vpop.f32.mrf.mxu1  ;;  %v1653_v39 = vmul.f32 %v8282_v22, %v10941_v11  ;;  %v1900_v22 = vmul.f32 %v8989_v60, %v10706_v46  ;;  %v8992_v46 = vld [vmem:[%s16245_s3 + $0xa8] sm:$0xff] }
 0x6b9   :  { %v1925_v38 = vmul.f32 %v8978_v44, %v1856_v18 }
 0x6ba   :  { %v1679_v21 = vpack.c.bf16 %v1654_v34, %v1653_v39 }
 0x6bb   :  { %v11009_v35 = vadd.f32 %v1961_v61, %v1925_v38  ;;  %7746 = vmatmul.msk.bf16.gmra.mxu1 %vm1128_vm2, %v1678_v58  ;;  %v11094_v58 = vld [vmem:[%s16245_s3 + $0x158] sm:$0xff] }
 0x6bf   :  { %v1560_v31 = vpop.xlane.xlu2 %1559 }
 0x6c0   :  { %8283 = vrcp.f32 %v1560_v31  ;;  %v11018_v52 = vpop.f32.mrf.mxu1 }
 0x6c1   :  { %8285 = vrcp.f32 %v1557_v23 }
 0x6c6   :  { %v8284_v49 = vpop.eup %8283 }
 0x6c7   :  { %v8286_v61 = vpop.eup %8285  ;;  %v1656_v5 = vmul.f32 %v8284_v49, %v10970_v53  ;;  %v8057_v53 = vld [vmem:[%s16180_s9] sm:$0xff] }
 0x6c8   :  { %v1655_v14 = vmul.f32 %v8286_v61, %v10963_v0  ;;  %v1861_v28 = vpop.f32.mrf.mxu1  ;;  %2015 = vmatpush.bf16.msra.mxu2 %v8057_v53  ;;  %3679 = vmatpush.bf16.msrb.mxu1 %v8057_v53 }
 0x6c9   :  { %v1927_v45 = vmul.f32 %v11075_v24, %v1861_v28 }
 0x6ca   :  { %v1680_v62 = vpack.c.bf16 %v1656_v5, %v1655_v14  ;;  %v1912_v5 = vmul.f32 %v8992_v46, %v10896_v59  ;;  %v11125_v59 = vld [vmem:[%s16245_s3 + $0x130] sm:$0xff] }
 0x6cb   :  { %7747 = vmatmul.msk.bf16.gmra.mxu1 %vm1128_vm2, %v1679_v21  ;;  %v1969_v44 = vadd.f32 %v10990_v41, %v1927_v45  ;;  %v8990_v41 = vld [vmem:[%s16245_s3 + $0x18] sm:$0xff] }
 0x6cc   :  { %v1894_v31 = vmul.f32 %v8990_v41, %v10551_v17  ;;  %v8991_v21 = vld [vmem:[%s16245_s3 + $0x78] sm:$0xff] }
 0x6cd   :  { %v1906_v23 = vmul.f32 %v8991_v21, %v10795_v51  ;;  %v8993_v17 = vld [vmem:[%s16245_s3 + $0xd8] sm:$0xff]  ;;  %v8994_v51 = vld [vmem:[%s16245_s3 + $0x108] sm:$0xff] }
 0x6ce   :  { %v1942_v61 = vadd.f32 %v1900_v22, %v1894_v31  ;;  %v1918_v28 = vmul.f32 %v8993_v17, %v10975_v40  ;;  %v1924_v3 = vmul.f32 %v8994_v51, %v11002_v54  ;;  %v9006_v31 = vld [vmem:[%s16245_s3 + $0x148] sm:$0xff]  ;;  %v16265_v51 = vld [vmem:[#allocation2_spill] sm:$0xff] }
 0x6d0   :  { %v1863_v11 = vpop.f32.mrf.mxu1 }
 0x6d1   :  { %v1928_v7 = vmul.f32 %v11081_v63, %v1863_v11 }
 0x6d3   :  { %v1970_v38 = vadd.f32 %v1964_v32, %v1928_v7  ;;  %v9001_v7 = vld [vmem:[%s16245_s3 + $0x88] sm:$0xff] }
 0x6d4   :  { %v1908_v32 = vmul.f32 %v9001_v7, %v10873_v43  ;;  %v9004_v43 = vld [vmem:[%s16245_s3 + $0x118] sm:$0xff] }
 0x6db   :  { %7748 = vmatmul.msk.bf16.gmra.mxu1 %vm1128_vm2, %v1680_v62  ;;  %v1948_v62 = vadd.f32 %v1942_v61, %v1906_v23  ;;  %v9007_v23 = vld [vmem:[%s16245_s3 + $0x170] sm:$0xff] }
 0x6dd   :  { %v1954_v11 = vadd.f32 %v1948_v62, %v1912_v5 }
 0x6df   :  { %v1960_v53 = vadd.f32 %v1954_v11, %v1918_v28 }
 0x6e1   :  { %v1966_v2 = vadd.f32 %v1960_v53, %v1924_v3 }
 0x716   :  { %v1866_v1 = vpop.f32.mrf.mxu1 }
 0x717   :  { %v1929_v6 = vmul.f32 %v11125_v59, %v1866_v1  ;;  %v11141_v1 = vld [vmem:[%s16245_s3 + $0x168] sm:$0xff] }
 0x71e   :  { %v1868_v37 = vpop.f32.mrf.mxu1 }
 0x71f   :  { %v1930_v40 = vmul.f32 %v8996_v12, %v1868_v37  ;;  %v8999_v37 = vld [vmem:[%s16245_s3 + $0x58] sm:$0xff]  ;;  %v16266_v12 = vld [vmem:[#allocation3_spill] sm:$0xff] }
 0x720   :  { %v1902_v26 = vmul.f32 %v8999_v37, %v10732_v48  ;;  %v9002_v48 = vld [vmem:[%s16245_s3 + $0xb8] sm:$0xff] }
 0x721   :  { %v1972_v36 = vadd.f32 %v1966_v2, %v1930_v40 }
 0x728   :  { %v11026_v0 = vpop.f32.mrf.mxu1 }
 0x730   :  { %v11028_v30 = vpop.f32.mrf.mxu1 }
 0x738   :  { %v1876_v42 = vpop.f32.mrf.mxu1 }
 0x739   :  { %v1933_v18 = vmul.f32 %v11087_v57, %v1876_v42  ;;  %v1971_v42 = vadd.f32 %v10999_v13, %v1929_v6  ;;  %v9000_v13 = vld [vmem:[%s16245_s3 + $0x28] sm:$0xff] }
 0x73a   :  { %v1896_v45 = vmul.f32 %v9000_v13, %v10575_v16  ;;  %v9003_v16 = vld [vmem:[%s16245_s3 + $0xe8] sm:$0xff] }
 0x73b   :  { %v1975_v34 = vadd.f32 %v1969_v44, %v1933_v18  ;;  %v1914_v44 = vmul.f32 %v9002_v48, %v10916_v8  ;;  %v1920_v60 = vmul.f32 %v9003_v16, %v10981_v47  ;;  %v9005_v8 = vld [vmem:[%s16245_s3 + $0x140] sm:$0xff]  ;;  %v1932_v47 = vmul.f32 %v9006_v31, %v11028_v30 }
 0x73c   :  { %v1931_v41 = vmul.f32 %v9005_v8, %v11026_v0  ;;  %v9008_v0 = vld [vmem:[%s16245_s3 + $0x178] sm:$0xff]  ;;  %v8087_v30 = vld [vmem:[%s16179_s10] ss:$0 sm:$0xff] }
 0x73e   :  { %v1973_v61 = vadd.f32 %v11009_v35, %v1931_v41 }
 0x740   :  { %v1878_v33 = vpop.f32.mrf.mxu1 }
 0x741   :  { %v1934_v20 = vmul.f32 %v11094_v58, %v1878_v33  ;;  %v1944_v33 = vadd.f32 %v1902_v26, %v1896_v45 }
 0x743   :  { %v1976_v39 = vadd.f32 %v1970_v38, %v1934_v20  ;;  %v1950_v20 = vadd.f32 %v1944_v33, %v1908_v32  ;;  %v16269_v32 = vld [vmem:[#allocation6_spill] sm:$0xff] }
 0x745   :  { %v1981_v49 = vpack.c.bf16 %v1976_v39, %v1975_v34  ;;  %v1956_v22 = vadd.f32 %v1950_v20, %v1914_v44  ;;  %v1926_v34 = vmul.f32 %v9004_v43, %v11018_v52 }
 0x747   :  { %7757 = vmatmul.msk.bf16.vlgmr.msra.gmra.mxu2 %vm794_vm1, %v1981_v49  ;;  %v1962_v39 = vadd.f32 %v1956_v22, %v1920_v60  ;;  %v9406_v60 = vmov 32.0  }
 0x748   :  { %v1881_v14 = vpop.f32.mrf.mxu1  ;;  %8287 = vrcp.f32 %v9406_v60 }
 0x749   :  { %v1935_v54 = vmul.f32 %v11134_v4, %v1881_v14  ;;  %v1968_v21 = vadd.f32 %v1962_v39, %v1926_v34 }
 0x74b   :  { %v1977_v29 = vadd.f32 %v1971_v42, %v1935_v54  ;;  %v1974_v46 = vadd.f32 %v1968_v21, %v1932_v47  ;;  %v16267_v42 = vld [vmem:[#allocation4_spill] sm:$0xff] }
 0x74e   :  { %v8288_v22 = vpop.eup %8287 }
 0x74f   :  { %v2057_v43 = vmul.f32 32.0, %v8288_v22  ;;  %vm2061_vm3 = vweird.f32 %v8288_v22 }
 0x750   :  { %v1883_v55 = vpop.f32.mrf.mxu1 }
 0x751   :  { %v1936_v9 = vmul.f32 %v11141_v1, %v1883_v55  ;;  %v2058_v34 = vsub.f32 1.0, %v2057_v43 }
 0x753   :  { %v1978_v25 = vadd.f32 %v1972_v36, %v1936_v9  ;;  %v2059_v39 = vmul.f32 %v8288_v22, %v2058_v34 }
 0x755   :  { %v1982_v18 = vpack.c.bf16 %v1978_v25, %v1977_v29  ;;  %v16268_v29 = vld [vmem:[#allocation5_spill] sm:$0xff]  ;;  %v2060_v8 = vadd.f32 %v8288_v22, %v2059_v39 }
 0x757   :  { %7758 = vmatmul.msk.bf16.gmra.mxu2 %vm794_vm1, %v1982_v18  ;;  %v11200_v41 = vsel %vm2061_vm3, %v8288_v22, %v2060_v8 }
 0x758   :  { %v1886_v38 = vpop.f32.mrf.mxu1  ;;  %16271 = vst [vmem:[#allocation8_spill] sm:$0xff] %v11200_v41 }
 0x759   :  { %v1937_v49 = vmul.f32 %v9007_v23, %v1886_v38  ;;  %v16270_v38 = vld [vmem:[#allocation7_spill] sm:$0xff] }
 0x75b   :  { %v1979_v14 = vadd.f32 %v1973_v61, %v1937_v49 }
 0x760   :  { %v1888_v52 = vpop.f32.mrf.mxu1 }
 0x761   :  { %v1938_v5 = vmul.f32 %v9008_v0, %v1888_v52 }
 0x763   :  { %v1980_v62 = vadd.f32 %v1974_v46, %v1938_v5 }
 0x765   :  { %v1983_v17 = vpack.c.bf16 %v1980_v62, %v1979_v14 }
 0x767   :  { %7759 = vmatmul.msk.bf16.gmra.mxu2 %vm794_vm1, %v1983_v17 }
 0x7ca   :  { %v2017_v28 = vpop.f32.mrf.mxu2 }
 0x7cb   :  { %v2018_v11 = vadd.f32 %v8087_v30, %v2017_v28 }
 0x7cd   :  { %v2032_v3 = vadd.f32 %v2018_v11, %v16265_v51 }
 0x7cf   :  { %v2038_v35 = vsel %vm794_vm1, %v2032_v3, 0.0 }
 0x7d0   :  { %2039 = vadd.xlane.f32.xlu1 %v2038_v35 }
 0x7d2   :  { %v2019_v53 = vpop.f32.mrf.mxu2 }
 0x7d3   :  { %v2020_v6 = vadd.f32 %v8087_v30, %v2019_v53 }
 0x7d5   :  { %v2033_v40 = vadd.f32 %v2020_v6, %v16266_v12 }
 0x7d7   :  { %v2041_v2 = vsel %vm794_vm1, %v2033_v40, 0.0 }
 0x7d8   :  { %2042 = vadd.xlane.f32.xlu0 %v2041_v2 }
 0x7da   :  { %v2022_v54 = vpop.f32.mrf.mxu2 }
 0x7db   :  { %v2023_v55 = vadd.f32 %v8087_v30, %v2022_v54 }
 0x7dd   :  { %v2034_v36 = vadd.f32 %v2023_v55, %v16267_v42 }
 0x7df   :  { %v2044_v9 = vsel %vm794_vm1, %v2034_v36, 0.0 }
 0x7e0   :  { %2045 = vadd.xlane.f32.xlu2 %v2044_v9 }
 0x7e2   :  { %v2024_v37 = vpop.f32.mrf.mxu2 }
 0x7e3   :  { %v2025_v26 = vadd.f32 %v8087_v30, %v2024_v37 }
 0x7e5   :  { %v2035_v25 = vadd.f32 %v2025_v26, %v16268_v29  ;;  %v8060_v26 = vld [vmem:[%s16184_s13 + $0x8] sm:$0xff] }
 0x7e6   :  { %2228 = vmatpush.bf16.msra.mxu3 %v8060_v26  ;;  %3864 = vmatpush.bf16.msrb.mxu0 %v8060_v26 }
 0x7e7   :  { %v2047_v13 = vsel %vm794_vm1, %v2035_v25, 0.0 }
 0x7e8   :  { %2048 = vadd.xlane.f32.xlu1 %v2047_v13 }
 0x7ea   :  { %v2027_v45 = vpop.f32.mrf.mxu2 }
 0x7eb   :  { %v2028_v7 = vadd.f32 %v8087_v30, %v2027_v45  ;;  %v8059_v45 = vld [vmem:[%s16184_s13] sm:$0xff] }
 0x7ec   :  { %2229 = vmatpush.bf16.msra.mxu3 %v8059_v45  ;;  %3865 = vmatpush.bf16.msrb.mxu0 %v8059_v45 }
 0x7ed   :  { %v2036_v18 = vadd.f32 %v2028_v7, %v16269_v32  ;;  %v9009_v7 = vld [vmem:[%s16236_s1 + $0x8] sm:$0xff] }
 0x7ef   :  { %v2050_v33 = vsel %vm794_vm1, %v2036_v18, 0.0 }
 0x7f0   :  { %2051 = vadd.xlane.f32.xlu0 %v2050_v33  ;;  %2490 = vmatpush.bf16.msrb.mxu3 %v9009_v7  ;;  %v9010_v33 = vld [vmem:[%s16236_s1] sm:$0xff] }
 0x7f1   :  { %4092 = vmatpush.bf16.msra.mxu0 %v9009_v7 }
 0x7f2   :  { %v2029_v48 = vpop.f32.mrf.mxu2 }
 0x7f3   :  { %v2030_v44 = vadd.f32 %v8087_v30, %v2029_v48 }
 0x7f4   :  { %2491 = vmatpush.bf16.msrb.mxu3 %v9010_v33 }
 0x7f5   :  { %v2037_v20 = vadd.f32 %v2030_v44, %v16270_v38  ;;  %4093 = vmatpush.bf16.msra.mxu0 %v9010_v33 }
 0x7f7   :  { %v2053_v16 = vsel %vm794_vm1, %v2037_v20, 0.0 }
 0x7f8   :  { %2054 = vadd.xlane.f32.xlu2 %v2053_v16 }
 0x843   :  { %v2040_v31 = vpop.xlane.xlu1 %2039 }
 0x844   :  { %v2063_v47 = vmul.f32 %v11200_v41, %v2040_v31 }
 0x846   :  { %v11203_v21 = vsub.f32 %v2032_v3, %v2063_v47 }
 0x848   :  { %v2075_v23 = vmul.f32 %v11203_v21, %v11203_v21 }
 0x84a   :  { %v2081_v49 = vsel %vm794_vm1, %v2075_v23, 0.0 }
 0x84b   :  { %v2043_v52 = vpop.xlane.xlu0 %2042  ;;  %2082 = vadd.xlane.f32.xlu1 %v2081_v49 }
 0x84c   :  { %v2064_v61 = vmul.f32 %v11200_v41, %v2043_v52 }
 0x84e   :  { %v11209_v46 = vsub.f32 %v2033_v40, %v2064_v61 }
 0x850   :  { %v2076_v0 = vmul.f32 %v11209_v46, %v11209_v46 }
 0x852   :  { %v2084_v5 = vsel %vm794_vm1, %v2076_v0, 0.0 }
 0x853   :  { %v2046_v14 = vpop.xlane.xlu2 %2045  ;;  %2085 = vadd.xlane.f32.xlu0 %v2084_v5 }
 0x854   :  { %v2065_v62 = vmul.f32 %v11200_v41, %v2046_v14  ;;  %v11257_v14 = vld [vmem:[%s16181_s11] ss:$0 sm:$0xff] }
 0x856   :  { %v11215_v17 = vsub.f32 %v2034_v36, %v2065_v62 }
 0x858   :  { %v2077_v30 = vmul.f32 %v11215_v17, %v11215_v17 }
 0x85a   :  { %v2087_v28 = vsel %vm794_vm1, %v2077_v30, 0.0 }
 0x85b   :  { %2088 = vadd.xlane.f32.xlu2 %v2087_v28  ;;  %v2049_v11 = vpop.xlane.xlu1 %2048 }
 0x85c   :  { %v2066_v51 = vmul.f32 %v11200_v41, %v2049_v11 }
 0x85e   :  { %v11221_v3 = vsub.f32 %v2035_v25, %v2066_v51 }
 0x860   :  { %v2078_v35 = vmul.f32 %v11221_v3, %v11221_v3 }
 0x862   :  { %v2090_v53 = vsel %vm794_vm1, %v2078_v35, 0.0 }
 0x863   :  { %v2052_v6 = vpop.xlane.xlu0 %2051  ;;  %2091 = vadd.xlane.f32.xlu1 %v2090_v53 }
 0x864   :  { %v2067_v12 = vmul.f32 %v11200_v41, %v2052_v6 }
 0x866   :  { %v11227_v40 = vsub.f32 %v2036_v18, %v2067_v12  ;;  %v11265_v12 = vld [vmem:[%s16182_s12] ss:$0 sm:$0xff] }
 0x868   :  { %v2079_v2 = vmul.f32 %v11227_v40, %v11227_v40 }
 0x86a   :  { %v2093_v54 = vsel %vm794_vm1, %v2079_v2, 0.0 }
 0x86b   :  { %v2055_v55 = vpop.xlane.xlu2 %2054  ;;  %2094 = vadd.xlane.f32.xlu0 %v2093_v54 }
 0x86c   :  { %v2068_v42 = vmul.f32 %v11200_v41, %v2055_v55 }
 0x86e   :  { %v11233_v36 = vsub.f32 %v2037_v20, %v2068_v42 }
 0x870   :  { %v2080_v9 = vmul.f32 %v11233_v36, %v11233_v36 }
 0x872   :  { %v2096_v37 = vsel %vm794_vm1, %v2080_v9, 0.0 }
 0x873   :  { %2097 = vadd.xlane.f32.xlu2 %v2096_v37 }
 0x8be   :  { %v2083_v29 = vpop.xlane.xlu1 %2082 }
 0x8bf   :  { %v2099_v25 = vmul.f32 %v2083_v29, %v11200_v41 }
 0x8c1   :  { %v2105_v13 = vadd.f32 1e-05, %v2099_v25 }
 0x8c3   :  { %8289 = vrsqrt.f32 %v2105_v13  ;;  %vm2117_vm5 = vweird.f32 %v2105_v13 }
 0x8c6   :  { %v2086_v32 = vpop.xlane.xlu0 %2085 }
 0x8c7   :  { %v2100_v18 = vmul.f32 %v2086_v32, %v11200_v41 }
 0x8c9   :  { %v8290_v48 = vpop.eup %8289  ;;  %v2106_v44 = vadd.f32 1e-05, %v2100_v18 }
 0x8ca   :  { %v2112_v38 = vmul.f32 %v8290_v48, %v2105_v13  ;;  %vm2118_vm4 = vweird.f32 %v8290_v48 }
 0x8cb   :  { %8291 = vrsqrt.f32 %v2106_v44  ;;  %vm2119_vm6 = vmor %vm2117_vm5, %vm2118_vm4  ;;  %vm2127_vm8 = vweird.f32 %v2106_v44 }
 0x8cc   :  { %v2113_v20 = vmul.f32 %v8290_v48, %v2112_v38 }
 0x8ce   :  { %v2114_v16 = vmul.f32 0.5, %v2113_v20  ;;  %v2089_v60 = vpop.xlane.xlu2 %2088 }
 0x8cf   :  { %v2101_v22 = vmul.f32 %v2089_v60, %v11200_v41 }
 0x8d0   :  { %v2115_v43 = vsub.f32 1.5, %v2114_v16 }
 0x8d1   :  { %v8292_v34 = vpop.eup %8291  ;;  %v2107_v39 = vadd.f32 1e-05, %v2101_v22 }
 0x8d2   :  { %v2116_v8 = vmul.f32 %v8290_v48, %v2115_v43  ;;  %v2122_v31 = vmul.f32 %v8292_v34, %v2106_v44  ;;  %vm2128_vm7 = vweird.f32 %v8292_v34 }
 0x8d3   :  { %8293 = vrsqrt.f32 %v2107_v39  ;;  %vm2129_vm9 = vmor %vm2127_vm8, %vm2128_vm7  ;;  %vm2137_vm11 = vweird.f32 %v2107_v39  ;;  %vm2282_vm8 = vcmask 523264  }
 0x8d4   :  { %v2123_v47 = vmul.f32 %v8292_v34, %v2122_v31  ;;  %v2120_v23 = vsel %vm2119_vm6, %v8290_v48, %v2116_v8 }
 0x8d5   :  { %v2171_v62 = vmul.f32 %v2120_v23, %v11203_v21 }
 0x8d6   :  { %v2124_v49 = vmul.f32 0.5, %v2123_v47  ;;  %v2092_v52 = vpop.xlane.xlu1 %2091 }
 0x8d7   :  { %v2102_v61 = vmul.f32 %v2092_v52, %v11200_v41  ;;  %v2180_v53 = vmul.f32 %v11257_v14, %v2171_v62 }
 0x8d8   :  { %v2125_v0 = vsub.f32 1.5, %v2124_v49 }
 0x8d9   :  { %v8294_v5 = vpop.eup %8293  ;;  %v2108_v30 = vadd.f32 1e-05, %v2102_v61  ;;  %v11270_v26 = vadd.f32 %v11265_v12, %v2180_v53 }
 0x8da   :  { %v2126_v28 = vmul.f32 %v8292_v34, %v2125_v0  ;;  %v2132_v11 = vmul.f32 %v8294_v5, %v2107_v39  ;;  %vm2138_vm10 = vweird.f32 %v8294_v5 }
 0x8db   :  { %8295 = vrsqrt.f32 %v2108_v30  ;;  %vm2139_vm12 = vmor %vm2137_vm11, %vm2138_vm10  ;;  %vm2147_vm14 = vweird.f32 %v2108_v30 }
 0x8dc   :  { %v2130_v51 = vsel %vm2129_vm9, %v8292_v34, %v2126_v28  ;;  %v2133_v35 = vmul.f32 %v8294_v5, %v2132_v11 }
 0x8dd   :  { %v2172_v6 = vmul.f32 %v2130_v51, %v11209_v46 }
 0x8de   :  { %v2134_v2 = vmul.f32 0.5, %v2133_v35  ;;  %v2095_v54 = vpop.xlane.xlu0 %2094 }
 0x8df   :  { %v2181_v21 = vmul.f32 %v11257_v14, %v2172_v6  ;;  %v2103_v55 = vmul.f32 %v2095_v54, %v11200_v41 }
 0x8e0   :  { %v2135_v42 = vsub.f32 1.5, %v2134_v2 }
 0x8e1   :  { %v8296_v9 = vpop.eup %8295  ;;  %v2109_v37 = vadd.f32 1e-05, %v2103_v55  ;;  %v11273_v29 = vadd.f32 %v11265_v12, %v2181_v21 }
 0x8e2   :  { %v2136_v46 = vmul.f32 %v8294_v5, %v2135_v42  ;;  %v2142_v25 = vmul.f32 %v8296_v9, %v2108_v30  ;;  %vm2148_vm13 = vweird.f32 %v8296_v9  ;;  %v8090_v42 = vld [vmem:[%s16183_s14] ss:$0 sm:$0xff] }
 0x8e3   :  { %8297 = vrsqrt.f32 %v2109_v37  ;;  %v2195_v13 = vpack.c.bf16 %v11273_v29, %v11270_v26  ;;  %vm2149_vm15 = vmor %vm2147_vm14, %vm2148_vm13  ;;  %vm2157_vm3 = vweird.f32 %v2109_v37 }
 0x8e4   :  { %v2143_v45 = vmul.f32 %v8296_v9, %v2142_v25  ;;  %v2140_v7 = vsel %vm2139_vm12, %v8294_v5, %v2136_v46 }
 0x8e5   :  { %7768 = vmatmul.msk.bf16.vlgmr.msra.gmra.mxu3 %vm794_vm1, %v2195_v13  ;;  %v2173_v20 = vmul.f32 %v2140_v7, %v11215_v17 }
 0x8e6   :  { %v2144_v32 = vmul.f32 0.5, %v2143_v45  ;;  %v2098_v18 = vpop.xlane.xlu2 %2097 }
 0x8e7   :  { %v2104_v33 = vmul.f32 %v2098_v18, %v11200_v41  ;;  %v2182_v39 = vmul.f32 %v11257_v14, %v2173_v20 }
 0x8e8   :  { %v2145_v48 = vsub.f32 1.5, %v2144_v32 }
 0x8e9   :  { %v8298_v44 = vpop.eup %8297  ;;  %v2110_v38 = vadd.f32 1e-05, %v2104_v33  ;;  %v11284_v49 = vadd.f32 %v11265_v12, %v2182_v39 }
 0x8ea   :  { %v2146_v16 = vmul.f32 %v8296_v9, %v2145_v48  ;;  %v2152_v60 = vmul.f32 %v8298_v44, %v2109_v37  ;;  %vm2158_vm0 = vweird.f32 %v8298_v44 }
 0x8eb   :  { %8299 = vrsqrt.f32 %v2110_v38  ;;  %vm2159_vm4 = vmor %vm2157_vm3, %vm2158_vm0  ;;  %vm2167_vm6 = vweird.f32 %v2110_v38 }
 0x8ec   :  { %v2150_v22 = vsel %vm2149_vm15, %v8296_v9, %v2146_v16  ;;  %v2153_v43 = vmul.f32 %v8298_v44, %v2152_v60 }
 0x8ed   :  { %v2174_v34 = vmul.f32 %v2150_v22, %v11221_v3 }
 0x8ee   :  { %v2154_v8 = vmul.f32 0.5, %v2153_v43 }
 0x8ef   :  { %v2183_v31 = vmul.f32 %v11257_v14, %v2174_v34 }
 0x8f0   :  { %v2155_v47 = vsub.f32 1.5, %v2154_v8  ;;  %v8091_v8 = vld [vmem:[%s16185_s16] ss:$0 sm:$0xff] }
 0x8f1   :  { %v8300_v23 = vpop.eup %8299  ;;  %v11287_v17 = vadd.f32 %v11265_v12, %v2183_v31 }
 0x8f2   :  { %v2156_v52 = vmul.f32 %v8298_v44, %v2155_v47  ;;  %v2162_v61 = vmul.f32 %v8300_v23, %v2110_v38  ;;  %vm2168_vm5 = vweird.f32 %v8300_v23 }
 0x8f3   :  { %v2196_v0 = vpack.c.bf16 %v11287_v17, %v11284_v49  ;;  %vm2169_vm7 = vmor %vm2167_vm6, %vm2168_vm5 }
 0x8f4   :  { %v2163_v3 = vmul.f32 %v8300_v23, %v2162_v61  ;;  %v2160_v5 = vsel %vm2159_vm4, %v8298_v44, %v2156_v52 }
 0x8f5   :  { %7769 = vmatmul.msk.bf16.gmra.mxu3 %vm794_vm1, %v2196_v0  ;;  %v2175_v28 = vmul.f32 %v2160_v5, %v11227_v40  ;;  %v11308_v40 = vld [vmem:[%s16186_s15 + $0x18] sm:$0xff] }
 0x8f6   :  { %v2164_v62 = vmul.f32 0.5, %v2163_v3  ;;  %2296 = vmatpush.bf16.msrb.mxu2 %v11308_v40  ;;  %3904 = vmatpush.bf16.msra.mxu1 %v11308_v40 }
 0x8f7   :  { %v2184_v53 = vmul.f32 %v11257_v14, %v2175_v28 }
 0x8f8   :  { %v2165_v30 = vsub.f32 1.5, %v2164_v62 }
 0x8f9   :  { %v11297_v2 = vadd.f32 %v11265_v12, %v2184_v53 }
 0x8fa   :  { %v2166_v11 = vmul.f32 %v8300_v23, %v2165_v30 }
 0x8fc   :  { %v2170_v51 = vsel %vm2169_vm7, %v8300_v23, %v2166_v11 }
 0x8fd   :  { %v2176_v35 = vmul.f32 %v2170_v51, %v11233_v36  ;;  %v11315_v36 = vld [vmem:[%s16186_s15 + $0x10] sm:$0xff] }
 0x8fe   :  { %2297 = vmatpush.bf16.msrb.mxu2 %v11315_v36  ;;  %3905 = vmatpush.bf16.msra.mxu1 %v11315_v36 }
 0x8ff   :  { %v2185_v6 = vmul.f32 %v11257_v14, %v2176_v35  ;;  %v11322_v14 = vld [vmem:[%s16186_s15 + $0x8] sm:$0xff] }
 0x901   :  { %v11300_v54 = vadd.f32 %v11265_v12, %v2185_v6  ;;  %v11329_v12 = vld [vmem:[%s16186_s15] sm:$0xff] }
 0x902   :  { %2298 = vmatpush.bf16.msrb.mxu2 %v11322_v14  ;;  %3906 = vmatpush.bf16.msra.mxu1 %v11322_v14 }
 0x903   :  { %v2197_v21 = vpack.c.bf16 %v11300_v54, %v11297_v2 }
 0x905   :  { %7770 = vmatmul.msk.bf16.gmra.mxu3 %vm794_vm1, %v2197_v21 }
 0x906   :  { %2299 = vmatpush.bf16.msrb.mxu2 %v11329_v12  ;;  %3907 = vmatpush.bf16.msra.mxu1 %v11329_v12 }
 0x968   :  { %v2231_v55 = vpop.f32.mrf.mxu3 }
 0x969   :  { %v2232_v9 = vadd.f32 %v8090_v42, %v2231_v55 }
 0x96b   :  { %v2246_v25 = vmax.f32 %v2232_v9, 0.0 }
 0x970   :  { %v2233_v37 = vpop.f32.mrf.mxu3 }
 0x971   :  { %v2234_v46 = vadd.f32 %v8090_v42, %v2233_v37 }
 0x973   :  { %v2247_v13 = vmax.f32 %v2234_v46, 0.0 }
 0x975   :  { %v2252_v45 = vpack.c.bf16 %v2247_v13, %v2246_v25 }
 0x977   :  { %7787 = vmatmul.msk.bf16.vlgmr.msrb.gmra.mxu2 %vm2282_vm8, %v2252_v45 }
 0x978   :  { %v2236_v7 = vpop.f32.mrf.mxu3 }
 0x979   :  { %v2237_v32 = vadd.f32 %v8090_v42, %v2236_v7 }
 0x97b   :  { %v2248_v48 = vmax.f32 %v2237_v32, 0.0 }
 0x980   :  { %v2238_v18 = vpop.f32.mrf.mxu3 }
 0x981   :  { %v2239_v33 = vadd.f32 %v8090_v42, %v2238_v18 }
 0x983   :  { %v2249_v44 = vmax.f32 %v2239_v33, 0.0 }
 0x985   :  { %v2253_v38 = vpack.c.bf16 %v2249_v44, %v2248_v48 }
 0x987   :  { %7788 = vmatmul.msk.bf16.gmra.mxu2 %vm2282_vm8, %v2253_v38 }
 0x988   :  { %v2241_v20 = vpop.f32.mrf.mxu3 }
 0x989   :  { %v2242_v16 = vadd.f32 %v8090_v42, %v2241_v20 }
 0x98b   :  { %v2250_v43 = vmax.f32 %v2242_v16, 0.0 }
 0x990   :  { %v2243_v60 = vpop.f32.mrf.mxu3 }
 0x991   :  { %v2244_v22 = vadd.f32 %v8090_v42, %v2243_v60 }
 0x993   :  { %v2251_v34 = vmax.f32 %v2244_v22, 0.0 }
 0x995   :  { %v2254_v39 = vpack.c.bf16 %v2251_v34, %v2250_v43 }
 0x997   :  { %7789 = vmatmul.msk.bf16.gmra.mxu2 %vm2282_vm8, %v2254_v39 }
 0x9fa   :  { %v2301_v31 = vpop.f32.mrf.mxu2 }
 0x9fb   :  { %v2302_v47 = vadd.f32 %v8091_v8, %v2301_v31 }
 0x9fd   :  { %v2316_v23 = vadd.f32 %v2302_v47, %v11270_v26 }
 0x9ff   :  { %v2322_v52 = vsel %vm794_vm1, %v2316_v23, 0.0 }
 0xa00   :  { %2323 = vadd.xlane.f32.xlu1 %v2322_v52 }
 0xa02   :  { %v2303_v61 = vpop.f32.mrf.mxu2 }
 0xa03   :  { %v2304_v0 = vadd.f32 %v8091_v8, %v2303_v61 }
 0xa05   :  { %v2317_v3 = vadd.f32 %v2304_v0, %v11273_v29 }
 0xa07   :  { %v2325_v5 = vsel %vm794_vm1, %v2317_v3, 0.0 }
 0xa08   :  { %2326 = vadd.xlane.f32.xlu0 %v2325_v5 }
 0xa0a   :  { %v2306_v62 = vpop.f32.mrf.mxu2 }
 0xa0b   :  { %v2307_v30 = vadd.f32 %v8091_v8, %v2306_v62 }
 0xa0d   :  { %v2318_v28 = vadd.f32 %v2307_v30, %v11284_v49 }
 0xa0f   :  { %v2328_v11 = vsel %vm794_vm1, %v2318_v28, 0.0 }
 0xa10   :  { %2329 = vadd.xlane.f32.xlu2 %v2328_v11 }
 0xa12   :  { %v2308_v51 = vpop.f32.mrf.mxu2 }
 0xa13   :  { %v2309_v35 = vadd.f32 %v8091_v8, %v2308_v51 }
 0xa15   :  { %v2319_v26 = vadd.f32 %v2309_v35, %v11287_v17 }
 0xa17   :  { %v2331_v53 = vsel %vm794_vm1, %v2319_v26, 0.0 }
 0xa18   :  { %2332 = vadd.xlane.f32.xlu1 %v2331_v53 }
 0xa1a   :  { %v2311_v6 = vpop.f32.mrf.mxu2 }
 0xa1b   :  { %v2312_v21 = vadd.f32 %v8091_v8, %v2311_v6 }
 0xa1d   :  { %v2320_v29 = vadd.f32 %v2312_v21, %v11297_v2 }
 0xa1f   :  { %v2334_v55 = vsel %vm794_vm1, %v2320_v29, 0.0 }
 0xa20   :  { %2335 = vadd.xlane.f32.xlu0 %v2334_v55 }
 0xa22   :  { %v2313_v42 = vpop.f32.mrf.mxu2 }
 0xa23   :  { %v2314_v9 = vadd.f32 %v8091_v8, %v2313_v42 }
 0xa25   :  { %v2321_v49 = vadd.f32 %v2314_v9, %v11300_v54 }
 0xa27   :  { %v2337_v37 = vsel %vm794_vm1, %v2321_v49, 0.0 }
 0xa28   :  { %2338 = vadd.xlane.f32.xlu2 %v2337_v37 }
 0xa73   :  { %v2324_v46 = vpop.xlane.xlu1 %2323 }
 0xa74   :  { %v2340_v17 = vmul.f32 %v2324_v46, %v11200_v41 }
 0xa76   :  { %v11355_v25 = vsub.f32 %v2316_v23, %v2340_v17 }
 0xa78   :  { %v2352_v13 = vmul.f32 %v11355_v25, %v11355_v25 }
 0xa7a   :  { %v2358_v2 = vsel %vm794_vm1, %v2352_v13, 0.0 }
 0xa7b   :  { %v2327_v45 = vpop.xlane.xlu0 %2326  ;;  %2359 = vadd.xlane.f32.xlu1 %v2358_v2 }
 0xa7c   :  { %v2341_v7 = vmul.f32 %v2327_v45, %v11200_v41 }
 0xa7e   :  { %v11361_v32 = vsub.f32 %v2317_v3, %v2341_v7 }
 0xa80   :  { %v2353_v54 = vmul.f32 %v11361_v32, %v11361_v32 }
 0xa82   :  { %v2361_v18 = vsel %vm794_vm1, %v2353_v54, 0.0 }
 0xa83   :  { %2362 = vadd.xlane.f32.xlu0 %v2361_v18  ;;  %v2330_v33 = vpop.xlane.xlu2 %2329 }
 0xa84   :  { %v2342_v48 = vmul.f32 %v2330_v33, %v11200_v41  ;;  %v11397_v33 = vld [vmem:[%s16187_s17] ss:$0 sm:$0xff] }
 0xa86   :  { %v11367_v44 = vsub.f32 %v2318_v28, %v2342_v48 }
 0xa88   :  { %v2354_v38 = vmul.f32 %v11367_v44, %v11367_v44 }
 0xa8a   :  { %v2364_v20 = vsel %vm794_vm1, %v2354_v38, 0.0 }
 0xa8b   :  { %2365 = vadd.xlane.f32.xlu2 %v2364_v20  ;;  %v2333_v16 = vpop.xlane.xlu1 %2332 }
 0xa8c   :  { %v2343_v60 = vmul.f32 %v2333_v16, %v11200_v41 }
 0xa8e   :  { %v11373_v22 = vsub.f32 %v2319_v26, %v2343_v60 }
 0xa90   :  { %v2355_v43 = vmul.f32 %v11373_v22, %v11373_v22 }
 0xa92   :  { %v2367_v34 = vsel %vm794_vm1, %v2355_v43, 0.0 }
 0xa93   :  { %v2336_v39 = vpop.xlane.xlu0 %2335  ;;  %2368 = vadd.xlane.f32.xlu1 %v2367_v34 }
 0xa94   :  { %v2344_v8 = vmul.f32 %v2336_v39, %v11200_v41 }
 0xa96   :  { %v11379_v31 = vsub.f32 %v2320_v29, %v2344_v8  ;;  %v11405_v8 = vld [vmem:[%s16188_s18] ss:$0 sm:$0xff] }
 0xa98   :  { %v2356_v47 = vmul.f32 %v11379_v31, %v11379_v31 }
 0xa9a   :  { %v2370_v23 = vsel %vm794_vm1, %v2356_v47, 0.0 }
 0xa9b   :  { %2371 = vadd.xlane.f32.xlu0 %v2370_v23  ;;  %v2339_v52 = vpop.xlane.xlu2 %2338 }
 0xa9c   :  { %v2345_v61 = vmul.f32 %v2339_v52, %v11200_v41 }
 0xa9e   :  { %v11385_v0 = vsub.f32 %v2321_v49, %v2345_v61 }
 0xaa0   :  { %v2357_v3 = vmul.f32 %v11385_v0, %v11385_v0 }
 0xaa2   :  { %v2373_v5 = vsel %vm794_vm1, %v2357_v3, 0.0 }
 0xaa3   :  { %2374 = vadd.xlane.f32.xlu2 %v2373_v5 }
 0xaee   :  { %v2360_v62 = vpop.xlane.xlu1 %2359 }
 0xaef   :  { %v2376_v30 = vmul.f32 %v2360_v62, %v11200_v41 }
 0xaf1   :  { %v2382_v28 = vadd.f32 1e-05, %v2376_v30 }
 0xaf3   :  { %8301 = vrsqrt.f32 %v2382_v28  ;;  %vm2394_vm10 = vweird.f32 %v2382_v28 }
 0xaf6   :  { %v2363_v11 = vpop.xlane.xlu0 %2362 }
 0xaf7   :  { %v2377_v51 = vmul.f32 %v2363_v11, %v11200_v41 }
 0xaf9   :  { %v8302_v35 = vpop.eup %8301  ;;  %v2383_v26 = vadd.f32 1e-05, %v2377_v51 }
 0xafa   :  { %v2389_v53 = vmul.f32 %v8302_v35, %v2382_v28  ;;  %vm2395_vm9 = vweird.f32 %v8302_v35 }
 0xafb   :  { %8303 = vrsqrt.f32 %v2383_v26  ;;  %vm2396_vm11 = vmor %vm2394_vm10, %vm2395_vm9  ;;  %vm2404_vm13 = vweird.f32 %v2383_v26 }
 0xafc   :  { %v2390_v6 = vmul.f32 %v8302_v35, %v2389_v53 }
 0xafe   :  { %v2391_v21 = vmul.f32 0.5, %v2390_v6  ;;  %v2366_v29 = vpop.xlane.xlu2 %2365 }
 0xaff   :  { %v2378_v55 = vmul.f32 %v2366_v29, %v11200_v41 }
 0xb00   :  { %v2392_v42 = vsub.f32 1.5, %v2391_v21 }
 0xb01   :  { %v8304_v9 = vpop.eup %8303  ;;  %v2384_v49 = vadd.f32 1e-05, %v2378_v55 }
 0xb02   :  { %v2393_v37 = vmul.f32 %v8302_v35, %v2392_v42  ;;  %v2399_v46 = vmul.f32 %v8304_v9, %v2383_v26  ;;  %vm2405_vm12 = vweird.f32 %v8304_v9 }
 0xb03   :  { %8305 = vrsqrt.f32 %v2384_v49  ;;  %vm2406_vm14 = vmor %vm2404_vm13, %vm2405_vm12  ;;  %vm2414_vm0 = vweird.f32 %v2384_v49 }
 0xb04   :  { %v2400_v17 = vmul.f32 %v8304_v9, %v2399_v46  ;;  %v2397_v13 = vsel %vm2396_vm11, %v8302_v35, %v2393_v37 }
 0xb05   :  { %v2448_v48 = vmul.f32 %v2397_v13, %v11355_v25 }
 0xb06   :  { %v2401_v2 = vmul.f32 0.5, %v2400_v17  ;;  %v2369_v45 = vpop.xlane.xlu1 %2368 }
 0xb07   :  { %v2379_v7 = vmul.f32 %v2369_v45, %v11200_v41  ;;  %v2457_v34 = vmul.f32 %v11397_v33, %v2448_v48 }
 0xb08   :  { %v2402_v54 = vsub.f32 1.5, %v2401_v2 }
 0xb09   :  { %v8306_v18 = vpop.eup %8305  ;;  %v2385_v38 = vadd.f32 1e-05, %v2379_v7  ;;  %v11410_v62 = vadd.f32 %v11405_v8, %v2457_v34 }
 0xb0a   :  { %v2403_v20 = vmul.f32 %v8304_v9, %v2402_v54  ;;  %v2409_v16 = vmul.f32 %v8306_v18, %v2384_v49  ;;  %vm2415_vm15 = vweird.f32 %v8306_v18 }
 0xb0b   :  { %8307 = vrsqrt.f32 %v2385_v38  ;;  %16272 = vst [vmem:[#allocation2_spill] sm:$0xff] %v11410_v62  ;;  %vm2416_vm3 = vmor %vm2414_vm0, %vm2415_vm15  ;;  %vm2424_vm5 = vweird.f32 %v2385_v38 }
 0xb0c   :  { %v2407_v60 = vsel %vm2406_vm14, %v8304_v9, %v2403_v20  ;;  %v2410_v43 = vmul.f32 %v8306_v18, %v2409_v16 }
 0xb0d   :  { %v2449_v39 = vmul.f32 %v2407_v60, %v11361_v32 }
 0xb0e   :  { %v2411_v47 = vmul.f32 0.5, %v2410_v43  ;;  %v2372_v23 = vpop.xlane.xlu0 %2371 }
 0xb0f   :  { %v2458_v25 = vmul.f32 %v11397_v33, %v2449_v39  ;;  %v2380_v52 = vmul.f32 %v2372_v23, %v11200_v41 }
 0xb10   :  { %v2412_v61 = vsub.f32 1.5, %v2411_v47 }
 0xb11   :  { %v8308_v3 = vpop.eup %8307  ;;  %v2386_v5 = vadd.f32 1e-05, %v2380_v52  ;;  %v11413_v30 = vadd.f32 %v11405_v8, %v2458_v25 }
 0xb12   :  { %v2413_v32 = vmul.f32 %v8306_v18, %v2412_v61  ;;  %v2419_v28 = vmul.f32 %v8308_v3, %v2385_v38  ;;  %vm2425_vm4 = vweird.f32 %v8308_v3 }
 0xb13   :  { %16273 = vst [vmem:[#allocation3_spill] sm:$0xff] %v11413_v30  ;;  %8309 = vrsqrt.f32 %v2386_v5  ;;  %v2472_v11 = vpack.c.bf16 %v11413_v30, %v11410_v62  ;;  %vm2426_vm6 = vmor %vm2424_vm5, %vm2425_vm4  ;;  %vm2434_vm9 = vweird.f32 %v2386_v5 }
 0xb14   :  { %v2420_v51 = vmul.f32 %v8308_v3, %v2419_v28  ;;  %v2417_v35 = vsel %vm2416_vm3, %v8306_v18, %v2413_v32 }
 0xb15   :  { %7790 = vmatmul.msk.bf16.vlgmr.msrb.gmra.mxu3 %vm794_vm1, %v2472_v11  ;;  %v2450_v42 = vmul.f32 %v2417_v35, %v11367_v44  ;;  %v9013_v35 = vld [vmem:[%s16245_s3 + $0x30] sm:$0xff] }
 0xb16   :  { %v2421_v26 = vmul.f32 0.5, %v2420_v51  ;;  %v2375_v53 = vpop.xlane.xlu2 %2374 }
 0xb17   :  { %v2381_v6 = vmul.f32 %v2375_v53, %v11200_v41  ;;  %v2459_v13 = vmul.f32 %v11397_v33, %v2450_v42 }
 0xb18   :  { %v2422_v21 = vsub.f32 1.5, %v2421_v26 }
 0xb19   :  { %v8310_v29 = vpop.eup %8309  ;;  %v2387_v55 = vadd.f32 1e-05, %v2381_v6  ;;  %v11424_v18 = vadd.f32 %v11405_v8, %v2459_v13 }
 0xb1a   :  { %v2423_v9 = vmul.f32 %v8308_v3, %v2422_v21  ;;  %v2429_v37 = vmul.f32 %v8310_v29, %v2386_v5  ;;  %vm2435_vm7 = vweird.f32 %v8310_v29  ;;  %v9014_v21 = vld [vmem:[%s16245_s3 + $0x60] sm:$0xff] }
 0xb1b   :  { %8311 = vrsqrt.f32 %v2387_v55  ;;  %16274 = vst [vmem:[#allocation4_spill] sm:$0xff] %v11424_v18  ;;  %vm2436_vm10 = vmor %vm2434_vm9, %vm2435_vm7  ;;  %vm2444_vm12 = vweird.f32 %v2387_v55 }
 0xb1c   :  { %v2427_v49 = vsel %vm2426_vm6, %v8308_v3, %v2423_v9  ;;  %v2430_v46 = vmul.f32 %v8310_v29, %v2429_v37  ;;  %v9016_v9 = vld [vmem:[%s16245_s3 + $0xc0] sm:$0xff] }
 0xb1d   :  { %v2451_v17 = vmul.f32 %v2427_v49, %v11373_v22  ;;  %v9017_v49 = vld [vmem:[%s16245_s3 + $0xf0] sm:$0xff] }
 0xb1e   :  { %v2431_v2 = vmul.f32 0.5, %v2430_v46 }
 0xb1f   :  { %v2460_v45 = vmul.f32 %v11397_v33, %v2451_v17 }
 0xb20   :  { %v2432_v7 = vsub.f32 1.5, %v2431_v2 }
 0xb21   :  { %v8312_v54 = vpop.eup %8311  ;;  %v11427_v44 = vadd.f32 %v11405_v8, %v2460_v45 }
 0xb22   :  { %v2433_v48 = vmul.f32 %v8310_v29, %v2432_v7  ;;  %v2439_v38 = vmul.f32 %v8312_v54, %v2387_v55  ;;  %vm2445_vm11 = vweird.f32 %v8312_v54  ;;  %v9015_v55 = vld [vmem:[%s16245_s3 + $0x90] sm:$0xff] }
 0xb23   :  { %16275 = vst [vmem:[#allocation5_spill] sm:$0xff] %v11427_v44  ;;  %v2473_v20 = vpack.c.bf16 %v11427_v44, %v11424_v18  ;;  %vm2446_vm13 = vmor %vm2444_vm12, %vm2445_vm11 }
 0xb24   :  { %v2440_v22 = vmul.f32 %v8312_v54, %v2439_v38  ;;  %v2437_v16 = vsel %vm2436_vm10, %v8310_v29, %v2433_v48 }
 0xb25   :  { %7791 = vmatmul.msk.bf16.gmra.mxu3 %vm794_vm1, %v2473_v20  ;;  %v2452_v34 = vmul.f32 %v2437_v16, %v11379_v31 }
 0xb26   :  { %v2441_v60 = vmul.f32 0.5, %v2440_v22 }
 0xb27   :  { %v2461_v25 = vmul.f32 %v11397_v33, %v2452_v34  ;;  %v9018_v34 = vld [vmem:[%s16245_s3 + $0x10] sm:$0xff] }
 0xb28   :  { %v2442_v43 = vsub.f32 1.5, %v2441_v60 }
 0xb29   :  { %v11437_v61 = vadd.f32 %v11405_v8, %v2461_v25 }
 0xb2a   :  { %v2443_v39 = vmul.f32 %v8312_v54, %v2442_v43 }
 0xb2b   :  { %16276 = vst [vmem:[#allocation6_spill] sm:$0xff] %v11437_v61 }
 0xb2c   :  { %v2447_v47 = vsel %vm2446_vm13, %v8312_v54, %v2443_v39 }
 0xb2d   :  { %v2453_v23 = vmul.f32 %v2447_v47, %v11385_v0  ;;  %v11448_v0 = vld [vmem:[%s16244_s29] ss:$0 sm:$0xff] }
 0xb2e   :  { %v9019_v47 = vld [vmem:[%s16245_s3 + $0x40] sm:$0xff] }
 0xb2f   :  { %v2462_v52 = vmul.f32 %v11397_v33, %v2453_v23 }
 0xb31   :  { %v11440_v3 = vadd.f32 %v11405_v8, %v2462_v52  ;;  %v9012_v8 = vld [vmem:[%s16245_s3] sm:$0xff] }
 0xb33   :  { %16277 = vst [vmem:[#allocation7_spill] sm:$0xff] %v11440_v3  ;;  %v2474_v5 = vpack.c.bf16 %v11440_v3, %v11437_v61 }
 0xb35   :  { %7792 = vmatmul.msk.bf16.gmra.mxu3 %vm794_vm1, %v2474_v5  ;;  %v9020_v5 = vld [vmem:[%s16245_s3 + $0x70] sm:$0xff] }
 0xb98   :  { %v2493_v31 = vpop.f32.mrf.mxu3 }
 0xb99   :  { %v2494_v32 = vadd.f32 %v11448_v0, %v2493_v31 }
 0xb9b   :  { %v2508_v33 = vmul.f32 0.5, %v2494_v32 }
 0xb9d   :  { %v11455_v51 = vmul.f32 %v9012_v8, %v2508_v33  ;;  %v11460_v26 = vmul.f32 %v9013_v35, %v2508_v33  ;;  %v11467_v29 = vmul.f32 %v9014_v21, %v2508_v33  ;;  %v11472_v42 = vmul.f32 %v9015_v55, %v2508_v33  ;;  %v9023_v8 = vld [vmem:[%s16245_s3 + $0x100] sm:$0xff]  ;;  %v9024_v55 = vld [vmem:[%s16245_s3 + $0x18] sm:$0xff] }
 0xb9e   :  { %v11477_v37 = vmul.f32 %v9016_v9, %v2508_v33  ;;  %v11482_v46 = vmul.f32 %v9017_v49, %v2508_v33  ;;  %v11485_v17 = vmul.f32 %v11075_v24, %v2508_v33  ;;  %v11488_v13 = vmul.f32 %v11087_v57, %v2508_v33  ;;  %v9025_v49 = vld [vmem:[%s16245_s3 + $0x48] sm:$0xff] }
 0xba0   :  { %v2495_v28 = vpop.f32.mrf.mxu3 }
 0xba1   :  { %v2496_v11 = vadd.f32 %v11448_v0, %v2495_v28  ;;  %v9022_v28 = vld [vmem:[%s16245_s3 + $0xd0] sm:$0xff] }
 0xba3   :  { %v2509_v53 = vmul.f32 0.5, %v2496_v11  ;;  %v11462_v6 = vpack.c.bf16 %v2496_v11, %v2494_v32  ;;  %v9021_v32 = vld [vmem:[%s16245_s3 + $0xa0] sm:$0xff] }
 0xba5   :  { %2592 = vrot.lane.b32.xlu2 %v11462_v6, %s9404_s7  ;;  %v11493_v2 = vmul.f32 %v11040_v27, %v2509_v53  ;;  %v11496_v45 = vmul.f32 %v11033_v10, %v2509_v53  ;;  %v11499_v7 = vmul.f32 %v11047_v19, %v2509_v53  ;;  %v11502_v54 = vmul.f32 %v11054_v50, %v2509_v53  ;;  %v9041_v19 = vld [vmem:[%s16245_s3 + $0x88] sm:$0xff] }
 0xba6   :  { %v11505_v24 = vmul.f32 %v11061_v15, %v2509_v53  ;;  %v11508_v57 = vmul.f32 %v11068_v56, %v2509_v53  ;;  %v11511_v48 = vmul.f32 %v11081_v63, %v2509_v53  ;;  %v11514_v27 = vmul.f32 %v11094_v58, %v2509_v53  ;;  %v9031_v63 = vld [vmem:[%s16245_s3 + $0x20] sm:$0xff] }
 0xba8   :  { %v2498_v56 = vpop.f32.mrf.mxu3 }
 0xba9   :  { %v2499_v22 = vadd.f32 %v11448_v0, %v2498_v56 }
 0xbab   :  { %v2510_v16 = vmul.f32 0.5, %v2499_v22 }
 0xbad   :  { %v11537_v39 = vmul.f32 %v9018_v34, %v2510_v16  ;;  %v11542_v23 = vmul.f32 %v9019_v47, %v2510_v16  ;;  %v11549_v31 = vmul.f32 %v9020_v5, %v2510_v16  ;;  %v11554_v33 = vmul.f32 %v9021_v32, %v2510_v16  ;;  %v9029_v34 = vld [vmem:[%s16245_s3 + $0x108] sm:$0xff]  ;;  %v9030_v5 = vld [vmem:[%s16245_s3 + $0x138] sm:$0xff] }
 0xbae   :  { %v11559_v11 = vmul.f32 %v9022_v28, %v2510_v16  ;;  %v11564_v35 = vmul.f32 %v9023_v8, %v2510_v16  ;;  %v11567_v53 = vmul.f32 %v11125_v59, %v2510_v16  ;;  %v11570_v21 = vmul.f32 %v11134_v4, %v2510_v16  ;;  %v9026_v59 = vld [vmem:[%s16245_s3 + $0x78] sm:$0xff] }
 0xbb0   :  { %v2500_v60 = vpop.f32.mrf.mxu3 }
 0xbb1   :  { %v2501_v43 = vadd.f32 %v11448_v0, %v2500_v60  ;;  %v9028_v60 = vld [vmem:[%s16245_s3 + $0xd8] sm:$0xff] }
 0xbb3   :  { %v2511_v25 = vmul.f32 0.5, %v2501_v43  ;;  %v11544_v52 = vpack.c.bf16 %v2501_v43, %v2499_v22  ;;  %v9027_v22 = vld [vmem:[%s16245_s3 + $0xa8] sm:$0xff] }
 0xbb5   :  { %2594 = vrot.lane.b32.xlu0 %v11544_v52, %s9404_s7  ;;  %v11577_v9 = vmul.f32 %v9024_v55, %v2511_v25  ;;  %v11582_v56 = vmul.f32 %v9025_v49, %v2511_v25  ;;  %v11587_v4 = vmul.f32 %v9026_v59, %v2511_v25  ;;  %v11592_v16 = vmul.f32 %v9027_v22, %v2511_v25  ;;  %v9040_v55 = vld [vmem:[%s16245_s3 + $0x58] sm:$0xff] }
 0xbb6   :  { %v11597_v43 = vmul.f32 %v9028_v60, %v2511_v25  ;;  %v11602_v47 = vmul.f32 %v9029_v34, %v2511_v25  ;;  %v11607_v32 = vmul.f32 %v9030_v5, %v2511_v25  ;;  %v11610_v28 = vmul.f32 %v11141_v1, %v2511_v25  ;;  %v9032_v1 = vld [vmem:[%s16245_s3 + $0x50] sm:$0xff] }
 0xbb8   :  { %v2503_v22 = vpop.f32.mrf.mxu3 }
 0xbb9   :  { %v2504_v5 = vadd.f32 %v11448_v0, %v2503_v22  ;;  %v9033_v22 = vld [vmem:[%s16245_s3 + $0x80] sm:$0xff] }
 0xbbb   :  { %v2512_v20 = vmul.f32 0.5, %v2504_v5 }
 0xbbd   :  { %v2518_v60 = vmul.f32 %v9031_v63, %v2512_v20  ;;  %v11636_v59 = vmul.f32 %v9032_v1, %v2512_v20  ;;  %v2530_v34 = vmul.f32 %v9033_v22, %v2512_v20  ;;  %v9035_v63 = vld [vmem:[%s16245_s3 + $0xe0] sm:$0xff] }
 0xbbe   :  { %v11651_v1 = vmul.f32 %v9035_v63, %v2512_v20  ;;  %v9037_v22 = vld [vmem:[%s16245_s3 + $0x140] sm:$0xff]  ;;  %v9039_v63 = vld [vmem:[%s16245_s3 + $0x28] sm:$0xff] }
 0xbbf   :  { %v11661_v49 = vmul.f32 %v9037_v22, %v2512_v20 }
 0xbc0   :  { %v2505_v38 = vpop.f32.mrf.mxu3 }
 0xbc1   :  { %v2506_v58 = vadd.f32 %v11448_v0, %v2505_v38  ;;  %v9034_v0 = vld [vmem:[%s16245_s3 + $0xb0] sm:$0xff] }
 0xbc2   :  { %v11646_v38 = vmul.f32 %v9034_v0, %v2512_v20  ;;  %v9038_v0 = vld [vmem:[%s16245_s3 + $0x170] sm:$0xff] }
 0xbc3   :  { %v2513_v25 = vmul.f32 0.5, %v2506_v58  ;;  %v11638_v15 = vpack.c.bf16 %v2506_v58, %v2504_v5  ;;  %v9036_v58 = vld [vmem:[%s16245_s3 + $0x110] sm:$0xff]  ;;  %v11666_v50 = vmul.f32 %v9038_v0, %v2512_v20 }
 0xbc4   :  { %v11656_v5 = vmul.f32 %v9036_v58, %v2512_v20  ;;  %v9042_v20 = vld [vmem:[%s16245_s3 + $0xb8] sm:$0xff] }
 0xbc5   :  { %2596 = vrot.lane.b32.xlu1 %v11638_v15, %s9404_s7  ;;  %v2519_v58 = vmul.f32 %v9039_v63, %v2513_v25  ;;  %v2525_v22 = vmul.f32 %v9040_v55, %v2513_v25  ;;  %v2531_v8 = vmul.f32 %v9041_v19, %v2513_v25  ;;  %v11682_v0 = vmul.f32 %v9042_v20, %v2513_v25  ;;  %v9043_v63 = vld [vmem:[%s16245_s3 + $0xe8] sm:$0xff]  ;;  %v9044_v55 = vld [vmem:[%s16245_s3 + $0x118] sm:$0xff] }
 0xbc6   :  { %v11687_v10 = vmul.f32 %v9043_v63, %v2513_v25  ;;  %v11692_v41 = vmul.f32 %v9044_v55, %v2513_v25  ;;  %v9045_v19 = vld [vmem:[%s16245_s3 + $0x148] sm:$0xff]  ;;  %v9046_v20 = vld [vmem:[%s16245_s3 + $0x178] sm:$0xff] }
 0xbc7   :  { %v11697_v3 = vmul.f32 %v9045_v19, %v2513_v25  ;;  %v11702_v61 = vmul.f32 %v9046_v20, %v2513_v25  ;;  %v2564_v63 = vpack.c.bf16 %v2519_v58, %v2518_v60  ;;  %v2567_v44 = vpack.c.bf16 %v2525_v22, %v11636_v59  ;;  %v9047_v22 = vld [vmem:[%s16180_s9 + $0x8] sm:$0xff]  ;;  %v9048_v25 = vld [vmem:[%s16180_s9] sm:$0xff] }
 0xbc8   :  { %v2570_v18 = vpack.c.bf16 %v2531_v8, %v2530_v34  ;;  %v2573_v55 = vpack.c.bf16 %v11682_v0, %v11646_v38  ;;  %v2576_v30 = vpack.c.bf16 %v11687_v10, %v11651_v1  ;;  %v2579_v19 = vpack.c.bf16 %v11692_v41, %v11656_v5 }
 0xbc9   :  { %v2582_v62 = vpack.c.bf16 %v11697_v3, %v11661_v49  ;;  %v16286_v0 = vpack.c.bf16 %v11505_v24, %v11477_v37  ;;  %v16288_v37 = vpack.c.bf16 %v11508_v57, %v11482_v46  ;;  %v16289_v1 = vpack.c.bf16 %v11602_v47, %v11564_v35  ;;  %v9061_v49 = vld [vmem:[%s16253_s26 + $0x50] sm:$0xff] }
 0xbca   :  { %v16290_v5 = vpack.c.bf16 %v11511_v48, %v11485_v17  ;;  %v9059_v48 = vld [vmem:[%s16253_s26 + $0x70] sm:$0xff] }
 0xbff   :  { %v2593_v34 = vpop.permute.xlu2 %2592 }
 0xc00   :  { %v2671_v58 = vsel %vm794_vm1, %v2593_v34, 0 }
 0xc27   :  { %v2595_v8 = vpop.permute.xlu0 %2594 }
 0xc28   :  { %v2674_v59 = vsel %vm794_vm1, %v2595_v8, 0 }
 0xc37   :  { %v2597_v20 = vpop.permute.xlu1 %2596 }
 0xc38   :  { %v2677_v60 = vsel %vm794_vm1, %v2597_v20, 0  ;;  %v16278_v20 = vpack.c.bf16 %v11493_v2, %v11455_v51  ;;  %v16280_v51 = vpack.c.bf16 %v11496_v45, %v11460_v26  ;;  %v9049_v26 = vld [vmem:[%s16253_s26] sm:$0xff] }
 0xc39   :  { %2684 = vmatpush.bf16.xpose.msra.mxu2 %v2677_v60  ;;  %v16279_v60 = vpack.c.bf16 %v11577_v9, %v11537_v39 }
 0xc41   :  { %2685 = vmatpush.bf16.xpose.msra.mxu2 %v2674_v59  ;;  %v9053_v59 = vld [vmem:[%s16253_s26 + $0x20] sm:$0xff] }
 0xc49   :  { %2686 = vmatpush.bf16.xpose.msra.mxu2 %v2671_v58 }
 0xc50   :  { %7793 = vmatmul.msk.bf16.vlgmr.msra.gmra.mxu2 %vm794_vm1, %v16278_v20  ;;  %v9054_v20 = vld [vmem:[%s16253_s26 + $0x28] sm:$0xff] }
 0xc51   :  { %5280 = vmatpush.bf16.msrb.mxu2 %v9047_v22 }
 0xc55   :  { %5281 = vmatpush.bf16.msrb.mxu2 %v9048_v25 }
 0xc59   :  { %5506 = vmatpush.bf16.msra.mxu2 %v11308_v40  ;;  %v16281_v40 = vpack.c.bf16 %v11582_v56, %v11542_v23 }
 0xc5d   :  { %5507 = vmatpush.bf16.msra.mxu2 %v11315_v36  ;;  %v16282_v36 = vpack.c.bf16 %v11499_v7, %v11467_v29  ;;  %v9050_v29 = vld [vmem:[%s16253_s26 + $0x8] sm:$0xff] }
 0xc60   :  { %7794 = vmatmul.msk.bf16.gmra.mxu2 %vm794_vm1, %v16279_v60 }
 0xc61   :  { %5508 = vmatpush.bf16.msra.mxu2 %v11322_v14  ;;  %v16283_v14 = vpack.c.bf16 %v11587_v4, %v11549_v31  ;;  %v9051_v31 = vld [vmem:[%s16253_s26 + $0x10] sm:$0xff] }
 0xc65   :  { %5509 = vmatpush.bf16.msra.mxu2 %v11329_v12 }
 0xc70   :  { %7795 = vmatmul.msk.bf16.gmra.mxu2 %vm794_vm1, %v2564_v63  ;;  %v9052_v63 = vld [vmem:[%s16253_s26 + $0x18] sm:$0xff] }
 0xc80   :  { %7796 = vmatmul.msk.bf16.gmra.mxu2 %vm794_vm1, %v16280_v51  ;;  %v9055_v51 = vld [vmem:[%s16253_s26 + $0x30] sm:$0xff] }
 0xc90   :  { %7797 = vmatmul.msk.bf16.gmra.mxu2 %vm794_vm1, %v16281_v40 }
 0xca0   :  { %7798 = vmatmul.msk.bf16.gmra.mxu2 %vm794_vm1, %v2567_v44 }
 0xcb0   :  { %7799 = vmatmul.msk.bf16.gmra.mxu2 %vm794_vm1, %v16282_v36 }
 0xcc0   :  { %7800 = vmatmul.msk.bf16.gmra.mxu2 %vm794_vm1, %v16283_v14 }
 0xcd0   :  { %7801 = vmatmul.msk.bf16.gmra.mxu2 %vm794_vm1, %v2570_v18  ;;  %v16284_v18 = vpack.c.bf16 %v11502_v54, %v11472_v42  ;;  %v16285_v54 = vpack.c.bf16 %v11592_v16, %v11554_v33 }
 0xcd3   :  { %v2688_v12 = vpop.f32.mrf.mxu2 }
 0xcd4   :  { %v2689_v2 = vadd.f32 %v9049_v26, %v2688_v12  ;;  %v9056_v12 = vld [vmem:[%s16253_s26 + $0x38] sm:$0xff] }
 0xcd6   :  { %v2808_v44 = vsel %vm1128_vm2, %v2689_v2, -inf }
 0xcd7   :  { %2809 = vmax.xlane.f32.xlu0 %v2808_v44 }
 0xcdb   :  { %v2690_v45 = vpop.f32.mrf.mxu2 }
 0xcdc   :  { %v2691_v7 = vadd.f32 %v9050_v29, %v2690_v45 }
 0xcde   :  { %v2811_v39 = vsel %vm1128_vm2, %v2691_v7, -inf }
 0xcdf   :  { %2812 = vmax.xlane.f32.xlu1 %v2811_v39 }
 0xce0   :  { %7802 = vmatmul.msk.bf16.gmra.mxu2 %vm794_vm1, %v16284_v18 }
 0xce3   :  { %v2693_v23 = vpop.f32.mrf.mxu2 }
 0xce4   :  { %v11770_v9 = vadd.f32 %v9051_v31, %v2693_v23 }
 0xce6   :  { %v2814_v56 = vsel %vm1128_vm2, %v11770_v9, -inf }
 0xce7   :  { %2815 = vmax.xlane.f32.xlu2 %v2814_v56 }
 0xceb   :  { %v2695_v4 = vpop.f32.mrf.mxu2 }
 0xcec   :  { %v2696_v25 = vadd.f32 %v9052_v63, %v2695_v4 }
 0xcee   :  { %v2817_v42 = vsel %vm1128_vm2, %v2696_v25, -inf }
 0xcef   :  { %2818 = vmax.xlane.f32.xlu0 %v2817_v42 }
 0xcf0   :  { %7803 = vmatmul.msk.bf16.gmra.mxu2 %vm794_vm1, %v16285_v54 }
 0xcf3   :  { %v2698_v8 = vpop.f32.mrf.mxu2 }
 0xcf4   :  { %v2699_v34 = vadd.f32 %v9053_v59, %v2698_v8 }
 0xcf6   :  { %v2820_v58 = vsel %vm1128_vm2, %v2699_v34, -inf }
 0xcf7   :  { %2821 = vmax.xlane.f32.xlu1 %v2820_v58 }
 0xcfb   :  { %v2700_v22 = vpop.f32.mrf.mxu2 }
 0xcfc   :  { %v11789_v60 = vadd.f32 %v9054_v20, %v2700_v22 }
 0xcfe   :  { %v2823_v33 = vsel %vm1128_vm2, %v11789_v60, -inf }
 0xcff   :  { %2824 = vmax.xlane.f32.xlu2 %v2823_v33 }
 0xd00   :  { %7804 = vmatmul.msk.bf16.gmra.mxu2 %vm794_vm1, %v2573_v55  ;;  %v16287_v55 = vpack.c.bf16 %v11597_v43, %v11559_v11 }
 0xd03   :  { %v2703_v16 = vpop.f32.mrf.mxu2 }
 0xd04   :  { %v11800_v40 = vadd.f32 %v9055_v51, %v2703_v16 }
 0xd06   :  { %v2826_v36 = vsel %vm1128_vm2, %v11800_v40, -inf }
 0xd07   :  { %2827 = vmax.xlane.f32.xlu0 %v2826_v36 }
 0xd0b   :  { %v2705_v14 = vpop.f32.mrf.mxu2 }
 0xd0c   :  { %v11807_v26 = vadd.f32 %v9056_v12, %v2705_v14 }
 0xd0e   :  { %v2829_v38 = vsel %vm1128_vm2, %v11807_v26, -inf }
 0xd0f   :  { %2830 = vmax.xlane.f32.xlu1 %v2829_v38 }
 0xd10   :  { %7805 = vmatmul.msk.bf16.gmra.mxu2 %vm794_vm1, %v16286_v0 }
 0xd13   :  { %v2708_v44 = vpop.f32.mrf.mxu2 }
 0xd1b   :  { %v11825_v45 = vpop.f32.mrf.mxu2 }
 0xd20   :  { %7806 = vmatmul.msk.bf16.gmra.mxu2 %vm794_vm1, %v16287_v55 }
 0xd23   :  { %v11827_v29 = vpop.f32.mrf.mxu2 }
 0xd28   :  { %3364 = vrot.lane.b32.xlu1 %v11638_v15, %s9405_s6  ;;  %v9057_v15 = vld [vmem:[%s16253_s26 + $0x40] sm:$0xff] }
 0xd29   :  { %v11838_v10 = vadd.f32 %v9057_v15, %v2708_v44  ;;  %v9060_v44 = vld [vmem:[%s16253_s26 + $0x48] sm:$0xff] }
 0xd2b   :  { %v11833_v24 = vpop.f32.mrf.mxu2  ;;  %v2832_v46 = vsel %vm1128_vm2, %v11838_v10, -inf }
 0xd30   :  { %7807 = vmatmul.msk.bf16.gmra.mxu2 %vm794_vm1, %v2576_v30 }
 0xd33   :  { %v11846_v57 = vpop.f32.mrf.mxu2 }
 0xd3b   :  { %v2720_v56 = vpop.f32.mrf.mxu2 }
 0xd40   :  { %7808 = vmatmul.msk.bf16.gmra.mxu2 %vm794_vm1, %v16288_v37  ;;  %v11916_v37 = vadd.f32 %v9060_v44, %v11825_v45 }
 0xd42   :  { %v2835_v15 = vsel %vm1128_vm2, %v11916_v37, -inf }
 0xd43   :  { %v2723_v42 = vpop.f32.mrf.mxu2 }
 0xd44   :  { %v11894_v33 = vadd.f32 %v9059_v48, %v2723_v42  ;;  %v9064_v42 = vld [vmem:[%s16253_s26 + $0x78] sm:$0xff] }
 0xd46   :  { %v2850_v14 = vsel %vm1128_vm2, %v11894_v33, -inf }
 0xd4a   :  { %v2810_v11 = vpop.xlane.xlu0 %2809 }
 0xd4b   :  { %v2952_v43 = vsub.f32 %v2689_v2, %v2810_v11  ;;  %v11866_v41 = vpop.f32.mrf.mxu2 }
 0xd4d   :  { %v3000_v30 = vmul.f32 1.442695, %v2952_v43 }
 0xd4f   :  { %8313 = vpow2.f32 %v3000_v30 }
 0xd50   :  { %7809 = vmatmul.msk.bf16.gmra.mxu2 %vm794_vm1, %v16289_v1  ;;  %v9062_v1 = vld [vmem:[%s16253_s26 + $0x58] sm:$0xff] }
 0xd52   :  { %v2813_v39 = vpop.xlane.xlu1 %2812  ;;  %2833 = vmax.xlane.f32.xlu1 %v2832_v46  ;;  %v11935_v46 = vadd.f32 %v9062_v1, %v11833_v24 }
 0xd53   :  { %v2953_v2 = vsub.f32 %v2691_v7, %v2813_v39  ;;  %v11883_v20 = vpop.f32.mrf.mxu2 }
 0xd55   :  { %v11848_v18 = vpop.eup %8313  ;;  %v3002_v23 = vmul.f32 1.442695, %v2953_v2 }
 0xd56   :  { %v3096_v31 = vsel %vm1128_vm2, %v11848_v18, 0.0 }
 0xd57   :  { %8315 = vpow2.f32 %v3002_v23  ;;  %3097 = vadd.xlane.f32.xlu2 %v3096_v31  ;;  %v2841_v31 = vsel %vm1128_vm2, %v11935_v46, -inf }
 0xd5a   :  { %v2816_v16 = vpop.xlane.xlu2 %2815 }
 0xd5b   :  { %v11896_v51 = vpop.f32.mrf.mxu2  ;;  %v2954_v36 = vsub.f32 %v11770_v9, %v2816_v16 }
 0xd5d   :  { %v11852_v35 = vpop.eup %8315  ;;  %v3004_v12 = vmul.f32 1.442695, %v2954_v36 }
 0xd5e   :  { %v3099_v47 = vsel %vm1128_vm2, %v11852_v35, 0.0 }
 0xd5f   :  { %3100 = vadd.xlane.f32.xlu0 %v3099_v47 }
 0xd60   :  { %7810 = vmatmul.msk.bf16.gmra.mxu2 %vm794_vm1, %v2579_v19 }
 0xd62   :  { %v2819_v7 = vpop.xlane.xlu0 %2818 }
 0xd63   :  { %v2955_v4 = vsub.f32 %v2696_v25, %v2819_v7 }
 0xd65   :  { %v3006_v63 = vmul.f32 1.442695, %v2955_v4 }
 0xd67   :  { %8317 = vpow2.f32 %v3006_v63  ;;  %v16293_v63 = vpack.c.bf16 %v11610_v28, %v11570_v21  ;;  %v9065_v28 = vld [vmem:[%s16253_s26 + $0x80] sm:$0xff] }
 0xd6a   :  { %v2822_v54 = vpop.xlane.xlu1 %2821 }
 0xd6b   :  { %v2956_v8 = vsub.f32 %v2699_v34, %v2822_v54  ;;  %v11974_v54 = vadd.f32 %v9064_v42, %v11866_v41 }
 0xd6d   :  { %v11860_v59 = vpop.eup %8317  ;;  %v3008_v58 = vmul.f32 1.442695, %v2956_v8  ;;  %v2853_v21 = vsel %vm1128_vm2, %v11974_v54, -inf }
 0xd6e   :  { %v3105_v22 = vsel %vm1128_vm2, %v11860_v59, 0.0 }
 0xd6f   :  { %8319 = vpow2.f32 %v3008_v58  ;;  %3106 = vadd.xlane.f32.xlu1 %v3105_v22  ;;  %3362 = vrot.lane.b32.xlu2 %v11544_v52, %s9405_s6  ;;  %v9058_v52 = vld [vmem:[%s16253_s26 + $0x68] sm:$0xff]  ;;  %v11986_v22 = vadd.f32 %v9065_v28, %v11883_v20 }
 0xd70   :  { %7811 = vmatmul.msk.bf16.gmra.mxu2 %vm794_vm1, %v16290_v5  ;;  %v11881_v34 = vadd.f32 %v9058_v52, %v2720_v56  ;;  %8321 = vpow2.f32 %v3004_v12  ;;  %v9067_v12 = vld [vmem:[%s16253_s26 + $0x90] sm:$0xff] }
 0xd71   :  { %v2856_v41 = vsel %vm1128_vm2, %v11986_v22, -inf }
 0xd72   :  { %v2847_v17 = vsel %vm1128_vm2, %v11881_v34, -inf  ;;  %v2825_v38 = vpop.xlane.xlu2 %2824 }
 0xd73   :  { %3360 = vrot.lane.b32.xlu0 %v11462_v6, %s9405_s6  ;;  %v16291_v6 = vpack.c.bf16 %v11607_v32, %v11567_v53  ;;  %v11901_v53 = vpop.f32.mrf.mxu2  ;;  %v2957_v55 = vsub.f32 %v11789_v60, %v2825_v38  ;;  %v11924_v60 = vadd.f32 %v9061_v49, %v11827_v29  ;;  %v16292_v29 = vpack.c.bf16 %v11514_v27, %v11488_v13  ;;  %v9063_v13 = vld [vmem:[%s16253_s26 + $0x60] sm:$0xff] }
 0xd74   :  { %v11954_v27 = vadd.f32 %v9063_v13, %v11846_v57 }
 0xd75   :  { %v11874_v19 = vpop.eup %8319  ;;  %v2838_v30 = vsel %vm1128_vm2, %v11924_v60, -inf }
 0xd76   :  { %v3108_v25 = vsel %vm1128_vm2, %v11874_v19, 0.0  ;;  %v11907_v0 = vpop.eup %8321  ;;  %v2844_v7 = vsel %vm1128_vm2, %v11954_v27, -inf }
 0xd77   :  { %3109 = vadd.xlane.f32.xlu1 %v3108_v25  ;;  %v3102_v9 = vsel %vm1128_vm2, %v11907_v0, 0.0  ;;  %v16294_v25 = vpack.c.bf16 %v11702_v61, %v11666_v50  ;;  %v9066_v61 = vld [vmem:[%s16253_s26 + $0x88] sm:$0xff] }
 0xd78   :  { %v12003_v50 = vadd.f32 %v9066_v61, %v11896_v51 }
 0xd7a   :  { %v2828_v43 = vpop.xlane.xlu0 %2827 }
 0xd7b   :  { %v11918_v11 = vpop.f32.mrf.mxu2  ;;  %v2958_v45 = vsub.f32 %v11800_v40, %v2828_v43  ;;  %v9068_v43 = vld [vmem:[%s16184_s13 + $0x8] sm:$0xff] }
 0xd7d   :  { %v3012_v2 = vmul.f32 1.442695, %v2958_v45 }
 0xd7f   :  { %2848 = vmax.xlane.f32.xlu1 %v2847_v17 }
 0xd80   :  { %7812 = vmatmul.msk.bf16.gmra.mxu2 %vm794_vm1, %v16291_v6 }
 0xd82   :  { %v2831_v32 = vpop.xlane.xlu1 %2830 }
 0xd83   :  { %v11941_v39 = vpop.f32.mrf.mxu2  ;;  %v2959_v40 = vsub.f32 %v11807_v26, %v2831_v32  ;;  %v12011_v32 = vadd.f32 %v9067_v12, %v11901_v53 }
 0xd85   :  { %v3014_v24 = vmul.f32 1.442695, %v2959_v40 }
 0xd87   :  { %2851 = vmax.xlane.f32.xlu1 %v2850_v14 }
 0xd8b   :  { %v11958_v47 = vpop.f32.mrf.mxu2 }
 0xd90   :  { %7813 = vmatmul.msk.bf16.gmra.mxu2 %vm794_vm1, %v2582_v62  ;;  %v3010_v62 = vmul.f32 1.442695, %v2957_v55  ;;  %v2862_v55 = vsel %vm1128_vm2, %v12011_v32, -inf }
 0xd92   :  { %8323 = vpow2.f32 %v3010_v62 }
 0xd93   :  { %8325 = vpow2.f32 %v3012_v2  ;;  %v11978_v58 = vpop.f32.mrf.mxu2 }
 0xd94   :  { %8327 = vpow2.f32 %v3014_v24 }
 0xd98   :  { %3103 = vadd.xlane.f32.xlu2 %v3102_v9  ;;  %v11944_v23 = vpop.eup %8323 }
 0xd99   :  { %v3111_v56 = vsel %vm1128_vm2, %v11944_v23, 0.0  ;;  %v11956_v26 = vpop.eup %8325 }
 0xd9a   :  { %v3365_v3 = vpop.permute.xlu1 %3364  ;;  %v3114_v4 = vsel %vm1128_vm2, %v11956_v26, 0.0  ;;  %v11968_v57 = vpop.eup %8327 }
 0xd9b   :  { %3446 = vmatpush.bf16.msra.mxu3 %v3365_v3  ;;  %v3117_v8 = vsel %vm1128_vm2, %v11968_v57, 0.0  ;;  %v2745_v5 = vpop.f32.mrf.mxu2 }
 0xd9d   :  { %2836 = vmax.xlane.f32.xlu0 %v2835_v15  ;;  %v9069_v15 = vld [vmem:[%s16184_s13] sm:$0xff] }
 0xda0   :  { %7814 = vmatmul.msk.bf16.gmra.mxu2 %vm794_vm1, %v16292_v29  ;;  %2839 = vmax.xlane.f32.xlu2 %v2838_v30 }
 0xda5   :  { %2842 = vmax.xlane.f32.xlu0 %v2841_v31 }
 0xda8   :  { %3112 = vadd.xlane.f32.xlu2 %v3111_v56 }
 0xdad   :  { %2845 = vmax.xlane.f32.xlu0 %v2844_v7 }
 0xdb0   :  { %7815 = vmatmul.msk.bf16.gmra.mxu2 %vm794_vm1, %v16293_v63  ;;  %3115 = vadd.xlane.f32.xlu2 %v3114_v4  ;;  %v2748_v63 = vpop.f32.mrf.mxu2 }
 0xdb5   :  { %3118 = vadd.xlane.f32.xlu0 %v3117_v8 }
 0xdb8   :  { %2854 = vmax.xlane.f32.xlu2 %v2853_v21 }
 0xdc0   :  { %7816 = vmatmul.msk.bf16.gmra.mxu2 %vm794_vm1, %v16294_v25  ;;  %2857 = vmax.xlane.f32.xlu2 %v2856_v41  ;;  %v9073_v41 = vld [vmem:[%s16253_s26 + $0xc0] sm:$0xff] }
 0xdc1   :  { %v12051_v25 = vadd.f32 %v9073_v41, %v2748_v63 }
 0xdc5   :  { %v2834_v52 = vpop.xlane.xlu1 %2833 }
 0xdc6   :  { %v2960_v17 = vsub.f32 %v11838_v10, %v2834_v52  ;;  %v2859_v10 = vsel %vm1128_vm2, %v12003_v50, -inf }
 0xdc8   :  { %v3016_v6 = vmul.f32 1.442695, %v2960_v17 }
 0xdca   :  { %8329 = vpow2.f32 %v3016_v6  ;;  %v3098_v48 = vpop.xlane.xlu2 %3097 }
 0xdd0   :  { %v11995_v16 = vpop.eup %8329 }
 0xdd1   :  { %v3120_v20 = vsel %vm1128_vm2, %v11995_v16, 0.0 }
 0xdd2   :  { %3121 = vadd.xlane.f32.xlu0 %v3120_v20  ;;  %v3363_v36 = vpop.permute.xlu2 %3362  ;;  %v3101_v14 = vpop.xlane.xlu0 %3100 }
 0xdd3   :  { %3447 = vmatpush.bf16.msra.mxu3 %v3363_v36  ;;  %8331 = vrcp.f32 %v3101_v14 }
 0xdd4   :  { %8333 = vrcp.f32 %v3098_v48 }
 0xdd9   :  { %v8332_v38 = vpop.eup %8331 }
 0xdda   :  { %2860 = vmax.xlane.f32.xlu0 %v2859_v10  ;;  %v8334_v51 = vpop.eup %8333  ;;  %v3289_v44 = vmul.f32 %v8332_v38, %v11852_v35  ;;  %v9071_v35 = vld [vmem:[%s16236_s1] sm:$0xff] }
 0xddb   :  { %v3288_v62 = vmul.f32 %v8334_v51, %v11848_v18  ;;  %v9070_v18 = vld [vmem:[%s16236_s1 + $0x8] sm:$0xff] }
 0xddd   :  { %v3336_v49 = vpack.c.bf16 %v3289_v44, %v3288_v62 }
 0xde2   :  { %2863 = vmax.xlane.f32.xlu0 %v2862_v55  ;;  %v3107_v9 = vpop.xlane.xlu1 %3106 }
 0xde5   :  { %v3361_v3 = vpop.permute.xlu0 %3360 }
 0xde6   :  { %3448 = vmatpush.bf16.msra.mxu3 %v3361_v3 }
 0xde9   :  { %7817 = vmatmul.msk.bf16.vlgmr.msra.gmra.mxu3 %vm1128_vm2, %v3336_v49 }
 0xdea   :  { %5466 = vmatpush.bf16.msrb.mxu3 %v9068_v43  ;;  %v3110_v53 = vpop.xlane.xlu1 %3109 }
 0xdee   :  { %5467 = vmatpush.bf16.msrb.mxu3 %v9069_v15 }
 0xdf2   :  { %5694 = vmatpush.bf16.msra.mxu3 %v9070_v18  ;;  %v2849_v45 = vpop.xlane.xlu1 %2848 }
 0xdf3   :  { %v2965_v30 = vsub.f32 %v11881_v34, %v2849_v45  ;;  %v9072_v34 = vld [vmem:[%s16253_s26 + $0xb8] sm:$0xff] }
 0xdf4   :  { %v12043_v7 = vadd.f32 %v9072_v34, %v2745_v5 }
 0xdf5   :  { %v3026_v1 = vmul.f32 1.442695, %v2965_v30 }
 0xdf6   :  { %5695 = vmatpush.bf16.msra.mxu3 %v9071_v35  ;;  %v2877_v4 = vsel %vm1128_vm2, %v12043_v7, -inf }
 0xdf7   :  { %8335 = vpow2.f32 %v3026_v1 }
 0xdfa   :  { %v2852_v29 = vpop.xlane.xlu1 %2851 }
 0xdfb   :  { %v2966_v2 = vsub.f32 %v11894_v33, %v2852_v29 }
 0xdfd   :  { %v12032_v40 = vpop.eup %8335  ;;  %v3028_v31 = vmul.f32 1.442695, %v2966_v2 }
 0xdfe   :  { %v3135_v24 = vsel %vm1128_vm2, %v12032_v40, 0.0 }
 0xdff   :  { %8337 = vpow2.f32 %v3028_v31  ;;  %3136 = vadd.xlane.f32.xlu0 %v3135_v24  ;;  %v9075_v31 = vld [vmem:[%s16253_s26 + $0xa0] sm:$0xff] }
 0xe00   :  { %8339 = vrcp.f32 %v3107_v9  ;;  %v12093_v24 = vadd.f32 %v9075_v31, %v11941_v39 }
 0xe02   :  { %v2868_v39 = vsel %vm1128_vm2, %v12093_v24, -inf }
 0xe05   :  { %v12036_v56 = vpop.eup %8337 }
 0xe06   :  { %v3138_v13 = vsel %vm1128_vm2, %v12036_v56, 0.0  ;;  %v8340_v42 = vpop.eup %8339 }
 0xe07   :  { %3139 = vadd.xlane.f32.xlu0 %v3138_v13  ;;  %v3291_v6 = vmul.f32 %v8340_v42, %v11860_v59 }
 0xe0b   :  { %v3104_v33 = vpop.xlane.xlu2 %3103 }
 0xe0c   :  { %8341 = vrcp.f32 %v3104_v33 }
 0xe0f   :  { %2878 = vmax.xlane.f32.xlu0 %v2877_v4 }
 0xe10   :  { %v2837_v8 = vpop.xlane.xlu0 %2836 }
 0xe11   :  { %v2961_v21 = vsub.f32 %v11916_v37, %v2837_v8  ;;  %v2880_v37 = vsel %vm1128_vm2, %v12051_v25, -inf }
 0xe12   :  { %v8342_v28 = vpop.eup %8341 }
 0xe13   :  { %v3018_v5 = vmul.f32 1.442695, %v2961_v21  ;;  %v2840_v52 = vpop.xlane.xlu2 %2839  ;;  %v3290_v17 = vmul.f32 %v8342_v28, %v11907_v0 }
 0xe14   :  { %v2962_v48 = vsub.f32 %v11924_v60, %v2840_v52 }
 0xe15   :  { %8343 = vpow2.f32 %v3018_v5  ;;  %v3337_v20 = vpack.c.bf16 %v3291_v6, %v3290_v17  ;;  %v2750_v5 = vpop.f32.mrf.mxu2 }
 0xe16   :  { %v3020_v36 = vmul.f32 1.442695, %v2962_v48  ;;  %8345 = vrcp.f32 %v3110_v53 }
 0xe17   :  { %2881 = vmax.xlane.f32.xlu0 %v2880_v37  ;;  %7818 = vmatmul.msk.bf16.gmra.mxu3 %vm1128_vm2, %v3337_v20 }
 0xe18   :  { %v2843_v61 = vpop.xlane.xlu0 %2842  ;;  %8347 = vpow2.f32 %v3020_v36 }
 0xe19   :  { %v2963_v14 = vsub.f32 %v11935_v46, %v2843_v61  ;;  %v9079_v61 = vld [vmem:[%s16253_s26 + $0xd0] sm:$0xff] }
 0xe1b   :  { %v12060_v10 = vpop.eup %8343  ;;  %v3022_v0 = vmul.f32 1.442695, %v2963_v14  ;;  %v3113_v59 = vpop.xlane.xlu2 %3112 }
 0xe1c   :  { %8349 = vrcp.f32 %v3113_v59  ;;  %v3123_v60 = vsel %vm1128_vm2, %v12060_v10, 0.0  ;;  %v8346_v12 = vpop.eup %8345 }
 0xe1d   :  { %8351 = vpow2.f32 %v3022_v0  ;;  %3124 = vadd.xlane.f32.xlu1 %v3123_v60  ;;  %v3292_v44 = vmul.f32 %v8346_v12, %v11874_v19  ;;  %v9074_v19 = vld [vmem:[%s16253_s26 + $0x98] sm:$0xff]  ;;  %v2753_v20 = vpop.f32.mrf.mxu2 }
 0xe1e   :  { %v12064_v55 = vpop.eup %8347  ;;  %v12136_v14 = vadd.f32 %v9079_v61, %v2753_v20 }
 0xe1f   :  { %v3126_v53 = vsel %vm1128_vm2, %v12064_v55, 0.0 }
 0xe20   :  { %v2846_v38 = vpop.xlane.xlu0 %2845  ;;  %v2886_v59 = vsel %vm1128_vm2, %v12136_v14, -inf }
 0xe21   :  { %v2964_v51 = vsub.f32 %v11954_v27, %v2846_v38 }
 0xe22   :  { %v8350_v9 = vpop.eup %8349 }
 0xe23   :  { %v12067_v46 = vpop.eup %8351  ;;  %v3293_v62 = vmul.f32 %v8350_v9, %v11944_v23  ;;  %v3024_v3 = vmul.f32 1.442695, %v2964_v51  ;;  %v3116_v49 = vpop.xlane.xlu2 %3115  ;;  %v12080_v23 = vadd.f32 %v9074_v19, %v11918_v11 }
 0xe24   :  { %v3129_v43 = vsel %vm1128_vm2, %v12067_v46, 0.0 }
 0xe25   :  { %8353 = vpow2.f32 %v3024_v3  ;;  %3130 = vadd.xlane.f32.xlu2 %v3129_v43  ;;  %3127 = vadd.xlane.f32.xlu1 %v3126_v53  ;;  %v3338_v15 = vpack.c.bf16 %v3293_v62, %v3292_v44  ;;  %v2865_v1 = vsel %vm1128_vm2, %v12080_v23, -inf  ;;  %v2755_v9 = vpop.f32.mrf.mxu2  ;;  %v9081_v53 = vld [vmem:[%s16253_s26 + $0xe0] sm:$0xff] }
 0xe27   :  { %7819 = vmatmul.msk.bf16.gmra.mxu3 %vm1128_vm2, %v3338_v15 }
 0xe28   :  { %v3119_v27 = vpop.xlane.xlu0 %3118 }
 0xe29   :  { %8355 = vrcp.f32 %v3119_v27 }
 0xe2a   :  { %8357 = vrcp.f32 %v3116_v49 }
 0xe2b   :  { %v12082_v18 = vpop.eup %8353  ;;  %v2855_v35 = vpop.xlane.xlu2 %2854 }
 0xe2c   :  { %v2967_v45 = vsub.f32 %v11974_v54, %v2855_v35  ;;  %v3132_v30 = vsel %vm1128_vm2, %v12082_v18, 0.0  ;;  %v9076_v54 = vld [vmem:[%s16253_s26 + $0xa8] sm:$0xff] }
 0xe2d   :  { %3133 = vadd.xlane.f32.xlu2 %v3132_v30  ;;  %2866 = vmax.xlane.f32.xlu1 %v2865_v1  ;;  %v12099_v13 = vadd.f32 %v9076_v54, %v11958_v47  ;;  %v2758_v3 = vpop.f32.mrf.mxu2 }
 0xe2e   :  { %v3030_v2 = vmul.f32 1.442695, %v2967_v45  ;;  %v12159_v15 = vadd.f32 %v9081_v53, %v2758_v3 }
 0xe2f   :  { %v8356_v29 = vpop.eup %8355  ;;  %v2871_v42 = vsel %vm1128_vm2, %v12099_v13, -inf }
 0xe30   :  { %v8358_v11 = vpop.eup %8357  ;;  %v3295_v34 = vmul.f32 %v8356_v29, %v11968_v57  ;;  %8359 = vpow2.f32 %v3030_v2  ;;  %v2892_v27 = vsel %vm1128_vm2, %v12159_v15, -inf }
 0xe31   :  { %v3294_v33 = vmul.f32 %v8358_v11, %v11956_v26  ;;  %v9077_v26 = vld [vmem:[%s16253_s26 + $0xb0] sm:$0xff] }
 0xe32   :  { %v12113_v47 = vadd.f32 %v9077_v26, %v11978_v58  ;;  %v9078_v58 = vld [vmem:[%s16253_s26 + $0xc8] sm:$0xff] }
 0xe33   :  { %v2858_v4 = vpop.xlane.xlu2 %2857  ;;  %v3339_v8 = vpack.c.bf16 %v3295_v34, %v3294_v33  ;;  %v12128_v6 = vadd.f32 %v9078_v58, %v2750_v5  ;;  %v9082_v58 = vld [vmem:[%s16253_s26 + $0x108] sm:$0xff] }
 0xe34   :  { %v2968_v63 = vsub.f32 %v11986_v22, %v2858_v4  ;;  %v2874_v22 = vsel %vm1128_vm2, %v12113_v47, -inf }
 0xe35   :  { %2872 = vmax.xlane.f32.xlu2 %v2871_v42  ;;  %2869 = vmax.xlane.f32.xlu1 %v2868_v39  ;;  %v2883_v48 = vsel %vm1128_vm2, %v12128_v6, -inf  ;;  %v12161_v19 = vpop.f32.mrf.mxu2 }
 0xe36   :  { %v3032_v21 = vmul.f32 1.442695, %v2968_v63  ;;  %v12115_v57 = vpop.eup %8359 }
 0xe37   :  { %7820 = vmatmul.msk.bf16.gmra.mxu3 %vm1128_vm2, %v3339_v8  ;;  %v3141_v28 = vsel %vm1128_vm2, %v12115_v57, 0.0 }
 0xe38   :  { %8361 = vpow2.f32 %v3032_v21 }
 0xe3d   :  { %2875 = vmax.xlane.f32.xlu2 %v2874_v22  ;;  %3142 = vadd.xlane.f32.xlu1 %v3141_v28  ;;  %v12167_v45 = vpop.f32.mrf.mxu2 }
 0xe3e   :  { %v12121_v41 = vpop.eup %8361 }
 0xe3f   :  { %v3144_v52 = vsel %vm1128_vm2, %v12121_v41, 0.0 }
 0xe45   :  { %v3122_v17 = vpop.xlane.xlu0 %3121  ;;  %3145 = vadd.xlane.f32.xlu1 %v3144_v52  ;;  %v12171_v1 = vpop.f32.mrf.mxu2 }
 0xe4d   :  { %v2861_v37 = vpop.xlane.xlu0 %2860  ;;  %2884 = vmax.xlane.f32.xlu1 %v2883_v48  ;;  %v12176_v34 = vpop.f32.mrf.mxu2 }
 0xe4e   :  { %v2969_v36 = vsub.f32 %v12003_v50, %v2861_v37 }
 0xe50   :  { %v3034_v0 = vmul.f32 1.442695, %v2969_v36 }
 0xe52   :  { %8363 = vpow2.f32 %v3034_v0 }
 0xe55   :  { %v2864_v60 = vpop.xlane.xlu0 %2863  ;;  %2887 = vmax.xlane.f32.xlu1 %v2886_v59  ;;  %v2770_v26 = vpop.f32.mrf.mxu2 }
 0xe56   :  { %v2970_v12 = vsub.f32 %v12011_v32, %v2864_v60  ;;  %v9080_v32 = vld [vmem:[%s16253_s26 + $0xd8] sm:$0xff]  ;;  %v12194_v48 = vadd.f32 %v9082_v58, %v2770_v26  ;;  %v9083_v60 = vld [vmem:[%s16253_s26 + $0x110] sm:$0xff] }
 0xe57   :  { %v12152_v49 = vadd.f32 %v9080_v32, %v2755_v9 }
 0xe58   :  { %v12141_v38 = vpop.eup %8363  ;;  %v3036_v51 = vmul.f32 1.442695, %v2970_v12 }
 0xe59   :  { %v3147_v50 = vsel %vm1128_vm2, %v12141_v38, 0.0  ;;  %v2889_v43 = vsel %vm1128_vm2, %v12152_v49, -inf }
 0xe5a   :  { %8365 = vpow2.f32 %v3036_v51  ;;  %3148 = vadd.xlane.f32.xlu2 %v3147_v50 }
 0xe5d   :  { %v2773_v36 = vpop.f32.mrf.mxu2 }
 0xe5e   :  { %v12205_v12 = vadd.f32 %v9083_v60, %v2773_v36  ;;  %v9085_v36 = vld [vmem:[%s16245_s3] sm:$0xff] }
 0xe60   :  { %v12145_v44 = vpop.eup %8365  ;;  %v2910_v32 = vsel %vm1128_vm2, %v12205_v12, -inf }
 0xe61   :  { %v3150_v62 = vsel %vm1128_vm2, %v12145_v44, 0.0 }
 0xe62   :  { %3151 = vadd.xlane.f32.xlu2 %v3150_v62 }
 0xe6a   :  { %2890 = vmax.xlane.f32.xlu2 %v2889_v43 }
 0xe6c   :  { %v12174_v31 = vpop.f32.mrf.mxu3 }
 0xe72   :  { %v12165_v35 = vpop.xlane.xlu0 %3136  ;;  %2893 = vmax.xlane.f32.xlu2 %v2892_v27 }
 0xe7a   :  { %v12169_v30 = vpop.xlane.xlu0 %3139 }
 0xe82   :  { %v2879_v29 = vpop.xlane.xlu0 %2878 }
 0xe83   :  { %v2975_v2 = vsub.f32 %v12043_v7, %v2879_v29  ;;  %v12183_v7 = vpop.f32.mrf.mxu3 }
 0xe85   :  { %v3046_v11 = vmul.f32 1.442695, %v2975_v2 }
 0xe87   :  { %8367 = vpow2.f32 %v3046_v11 }
 0xe88   :  { %8369 = vrcp.f32 %v3122_v17 }
 0xe8a   :  { %v2882_v54 = vpop.xlane.xlu0 %2881 }
 0xe8b   :  { %v2976_v33 = vsub.f32 %v12051_v25, %v2882_v54 }
 0xe8d   :  { %v12179_v4 = vpop.eup %8367  ;;  %v3048_v63 = vmul.f32 1.442695, %v2976_v33 }
 0xe8e   :  { %v3165_v42 = vsel %vm1128_vm2, %v12179_v4, 0.0  ;;  %v8370_v8 = vpop.eup %8369 }
 0xe8f   :  { %8371 = vpow2.f32 %v3048_v63  ;;  %3166 = vadd.xlane.f32.xlu2 %v3165_v42  ;;  %v3296_v28 = vmul.f32 %v8370_v8, %v11995_v16  ;;  %v2907_v16 = vsel %vm1128_vm2, %v12194_v48, -inf }
 0xe90   :  { %v3125_v39 = vpop.xlane.xlu1 %3124 }
 0xe91   :  { %8373 = vrcp.f32 %v3125_v39 }
 0xe95   :  { %v12185_v21 = vpop.eup %8371 }
 0xe96   :  { %v3168_v25 = vsel %vm1128_vm2, %v12185_v21, 0.0 }
 0xe97   :  { %v8374_v22 = vpop.eup %8373  ;;  %3169 = vadd.xlane.f32.xlu2 %v3168_v25 }
 0xe98   :  { %v3297_v5 = vmul.f32 %v8374_v22, %v12060_v10  ;;  %v3128_v52 = vpop.xlane.xlu1 %3127  ;;  %v3131_v17 = vpop.xlane.xlu2 %3130 }
 0xe99   :  { %8375 = vrcp.f32 %v3128_v52 }
 0xe9a   :  { %v12196_v20 = vpop.f32.mrf.mxu3  ;;  %v3340_v37 = vpack.c.bf16 %v3297_v5, %v3296_v28  ;;  %8377 = vrcp.f32 %v3131_v17 }
 0xe9c   :  { %7821 = vmatmul.msk.bf16.gmra.mxu3 %vm1128_vm2, %v3340_v37 }
 0xe9f   :  { %2908 = vmax.xlane.f32.xlu2 %v2907_v16  ;;  %v8376_v59 = vpop.eup %8375 }
 0xea0   :  { %v2867_v10 = vpop.xlane.xlu1 %2866  ;;  %v3134_v61 = vpop.xlane.xlu2 %3133  ;;  %v3298_v62 = vmul.f32 %v8376_v59, %v12064_v55 }
 0xea1   :  { %v2971_v0 = vsub.f32 %v12080_v23, %v2867_v10  ;;  %v8378_v9 = vpop.eup %8377  ;;  %v9086_v10 = vld [vmem:[%s16245_s3 + $0x30] sm:$0xff] }
 0xea2   :  { %v12207_v51 = vpop.f32.mrf.mxu3  ;;  %v3299_v3 = vmul.f32 %v8378_v9, %v12067_v46  ;;  %v9088_v9 = vld [vmem:[%s16253_s26 + $0xf8] sm:$0xff] }
 0xea3   :  { %v3038_v50 = vmul.f32 1.442695, %v2971_v0 }
 0xea4   :  { %v3341_v2 = vpack.c.bf16 %v3299_v3, %v3298_v62 }
 0xea5   :  { %8379 = vpow2.f32 %v3038_v50  ;;  %v12269_v50 = vadd.f32 %v9088_v9, %v12171_v1 }
 0xea6   :  { %8381 = vrcp.f32 %v3134_v61 }
 0xea7   :  { %2911 = vmax.xlane.f32.xlu2 %v2910_v32 }
 0xea8   :  { %v2870_v23 = vpop.xlane.xlu1 %2869  ;;  %v2873_v43 = vpop.xlane.xlu2 %2872 }
 0xea9   :  { %v2972_v53 = vsub.f32 %v12093_v24, %v2870_v23  ;;  %v2973_v27 = vsub.f32 %v12099_v13, %v2873_v43 }
 0xeaa   :  { %v12215_v29 = vpop.f32.mrf.mxu3 }
 0xeab   :  { %v12217_v11 = vpop.eup %8379  ;;  %v3040_v54 = vmul.f32 1.442695, %v2972_v53  ;;  %v3042_v33 = vmul.f32 1.442695, %v2973_v27 }
 0xeac   :  { %7822 = vmatmul.msk.bf16.gmra.mxu3 %vm1128_vm2, %v3341_v2  ;;  %v3153_v55 = vsel %vm1128_vm2, %v12217_v11, 0.0  ;;  %v8382_v63 = vpop.eup %8381 }
 0xead   :  { %8383 = vpow2.f32 %v3040_v54  ;;  %3154 = vadd.xlane.f32.xlu0 %v3153_v55  ;;  %v3300_v28 = vmul.f32 %v8382_v63, %v12082_v18  ;;  %v3570_v18 = vmul.f32 %v9085_v36, %v12174_v31  ;;  %v9087_v31 = vld [vmem:[%s16253_s26 + $0xf0] sm:$0xff] }
 0xeae   :  { %8385 = vpow2.f32 %v3042_v33  ;;  %v12263_v59 = vadd.f32 %v9087_v31, %v12167_v45  ;;  %v2901_v45 = vsel %vm1128_vm2, %v12269_v50, -inf }
 0xeaf   :  { %8387 = vrcp.f32 %v12165_v35 }
 0xeb0   :  { %v3143_v46 = vpop.xlane.xlu1 %3142  ;;  %v2876_v24 = vpop.xlane.xlu2 %2875 }
 0xeb1   :  { %v2974_v13 = vsub.f32 %v12113_v47, %v2876_v24  ;;  %v9084_v47 = vld [vmem:[%s16253_s26 + $0xe8] sm:$0xff] }
 0xeb2   :  { %v12224_v42 = vpop.f32.mrf.mxu3  ;;  %v12239_v5 = vadd.f32 %v9084_v47, %v12161_v19 }
 0xeb3   :  { %v12226_v39 = vpop.eup %8383  ;;  %v3044_v8 = vmul.f32 1.442695, %v2974_v13 }
 0xeb4   :  { %v12228_v26 = vpop.eup %8385  ;;  %v3156_v25 = vsel %vm1128_vm2, %v12226_v39, 0.0 }
 0xeb5   :  { %v8388_v22 = vpop.eup %8387  ;;  %8389 = vpow2.f32 %v3044_v8  ;;  %3157 = vadd.xlane.f32.xlu0 %v3156_v25  ;;  %v3159_v35 = vsel %vm1128_vm2, %v12228_v26, 0.0 }
 0xeb6   :  { %3160 = vadd.xlane.f32.xlu1 %v3159_v35  ;;  %v3301_v52 = vmul.f32 %v8388_v22, %v12032_v40  ;;  %v2895_v40 = vsel %vm1128_vm2, %v12239_v5, -inf  ;;  %8391 = vrcp.f32 %v3143_v46  ;;  %v9090_v22 = vld [vmem:[%s16253_s26 + $0x118] sm:$0xff] }
 0xeb7   :  { %8393 = vrcp.f32 %v12169_v30  ;;  %v2898_v30 = vsel %vm1128_vm2, %v12263_v59, -inf }
 0xeb8   :  { %v3146_v17 = vpop.xlane.xlu1 %3145  ;;  %v3342_v37 = vpack.c.bf16 %v3301_v52, %v3300_v28 }
 0xeba   :  { %v3465_v58 = vpop.f32.mrf.mxu3 }
 0xebb   :  { %v12242_v16 = vpop.eup %8389  ;;  %v3576_v61 = vmul.f32 %v9086_v10, %v3465_v58 }
 0xebc   :  { %7823 = vmatmul.msk.bf16.gmra.mxu3 %vm1128_vm2, %v3342_v37  ;;  %v3162_v19 = vsel %vm1128_vm2, %v12242_v16, 0.0  ;;  %v8392_v3 = vpop.eup %8391 }
 0xebd   :  { %v12256_v0 = vadd.f32 %v3576_v61, %v3570_v18  ;;  %2896 = vmax.xlane.f32.xlu0 %v2895_v40  ;;  %v8394_v23 = vpop.eup %8393  ;;  %v3303_v43 = vmul.f32 %v8392_v3, %v12115_v57 }
 0xebe   :  { %3163 = vadd.xlane.f32.xlu1 %v3162_v19  ;;  %v3302_v53 = vmul.f32 %v8394_v23, %v12036_v56 }
 0xec0   :  { %v2885_v60 = vpop.xlane.xlu1 %2884  ;;  %v3343_v54 = vpack.c.bf16 %v3303_v43, %v3302_v53 }
 0xec1   :  { %v2977_v62 = vsub.f32 %v12128_v6, %v2885_v60  ;;  %v9089_v6 = vld [vmem:[%s16253_s26 + $0x100] sm:$0xff] }
 0xec2   :  { %v12282_v27 = vadd.f32 %v9089_v6, %v12176_v34 }
 0xec3   :  { %v3050_v32 = vmul.f32 1.442695, %v2977_v62 }
 0xec4   :  { %v2904_v56 = vsel %vm1128_vm2, %v12282_v27, -inf }
 0xec5   :  { %8395 = vpow2.f32 %v3050_v32  ;;  %2899 = vmax.xlane.f32.xlu0 %v2898_v30  ;;  %v9093_v30 = vld [vmem:[%s16253_s26 + $0x130] sm:$0xff] }
 0xec6   :  { %2902 = vmax.xlane.f32.xlu1 %v2901_v45 }
 0xec8   :  { %v2888_v1 = vpop.xlane.xlu1 %2887 }
 0xec9   :  { %v2978_v2 = vsub.f32 %v12136_v14, %v2888_v1  ;;  %v2775_v14 = vpop.f32.mrf.mxu2 }
 0xeca   :  { %v12300_v35 = vadd.f32 %v9090_v22, %v2775_v14 }
 0xecb   :  { %v12285_v33 = vpop.eup %8395  ;;  %v3052_v55 = vmul.f32 1.442695, %v2978_v2 }
 0xecc   :  { %7824 = vmatmul.msk.bf16.gmra.mxu3 %vm1128_vm2, %v3343_v54  ;;  %v3171_v57 = vsel %vm1128_vm2, %v12285_v33, 0.0  ;;  %v2913_v52 = vsel %vm1128_vm2, %v12300_v35, -inf }
 0xecd   :  { %8397 = vpow2.f32 %v3052_v55  ;;  %3172 = vadd.xlane.f32.xlu0 %v3171_v57  ;;  %v3149_v46 = vpop.xlane.xlu2 %3148 }
 0xece   :  { %2905 = vmax.xlane.f32.xlu1 %v2904_v56  ;;  %8399 = vrcp.f32 %v3149_v46  ;;  %v12348_v56 = vpop.f32.mrf.mxu3 }
 0xecf   :  { %8401 = vrcp.f32 %v3146_v17 }
 0xed1   :  { %v2778_v17 = vpop.f32.mrf.mxu2 }
 0xed3   :  { %v12292_v34 = vpop.eup %8397 }
 0xed4   :  { %v8400_v24 = vpop.eup %8399  ;;  %v3174_v13 = vsel %vm1128_vm2, %v12292_v34, 0.0 }
 0xed5   :  { %v8402_v63 = vpop.eup %8401  ;;  %3175 = vadd.xlane.f32.xlu0 %v3174_v13  ;;  %v3152_v8 = vpop.xlane.xlu2 %3151  ;;  %v3305_v25 = vmul.f32 %v8400_v24, %v12141_v38  ;;  %v9091_v38 = vld [vmem:[%s16253_s26 + $0x120] sm:$0xff] }
 0xed6   :  { %v3304_v28 = vmul.f32 %v8402_v63, %v12121_v41  ;;  %v12310_v36 = vadd.f32 %v9091_v38, %v2778_v17 }
 0xed8   :  { %v3344_v47 = vpack.c.bf16 %v3305_v25, %v3304_v28  ;;  %v2916_v41 = vsel %vm1128_vm2, %v12310_v36, -inf }
 0xed9   :  { %v2780_v31 = vpop.f32.mrf.mxu2 }
 0xedc   :  { %7825 = vmatmul.msk.bf16.gmra.mxu3 %vm1128_vm2, %v3344_v47 }
 0xedd   :  { %2914 = vmax.xlane.f32.xlu0 %v2913_v52  ;;  %v2891_v58 = vpop.xlane.xlu2 %2890 }
 0xede   :  { %v2979_v37 = vsub.f32 %v12152_v49, %v2891_v58 }
 0xee0   :  { %v3054_v18 = vmul.f32 1.442695, %v2979_v37 }
 0xee1   :  { %v2783_v62 = vpop.f32.mrf.mxu2 }
 0xee2   :  { %8403 = vpow2.f32 %v3054_v18  ;;  %v12333_v23 = vadd.f32 %v9093_v30, %v2783_v62  ;;  %v9098_v30 = vld [vmem:[%s16245_s3 + $0x50] sm:$0xff] }
 0xee4   :  { %v2922_v43 = vsel %vm1128_vm2, %v12333_v23, -inf }
 0xee5   :  { %2917 = vmax.xlane.f32.xlu0 %v2916_v41  ;;  %v2894_v10 = vpop.xlane.xlu2 %2893 }
 0xee6   :  { %v2980_v61 = vsub.f32 %v12159_v15, %v2894_v10  ;;  %v9092_v15 = vld [vmem:[%s16253_s26 + $0x128] sm:$0xff] }
 0xee7   :  { %v12326_v3 = vadd.f32 %v9092_v15, %v2780_v31  ;;  %v9096_v31 = vld [vmem:[%s16253_s26 + $0x158] sm:$0xff] }
 0xee8   :  { %v12315_v40 = vpop.eup %8403  ;;  %v3056_v19 = vmul.f32 1.442695, %v2980_v61 }
 0xee9   :  { %v3177_v49 = vsel %vm1128_vm2, %v12315_v40, 0.0  ;;  %v2919_v32 = vsel %vm1128_vm2, %v12326_v3, -inf  ;;  %v12335_v45 = vpop.f32.mrf.mxu2 }
 0xeea   :  { %8405 = vpow2.f32 %v3056_v19  ;;  %3178 = vadd.xlane.f32.xlu1 %v3177_v49 }
 0xef0   :  { %v12319_v60 = vpop.eup %8405 }
 0xef1   :  { %v3180_v9 = vsel %vm1128_vm2, %v12319_v60, 0.0  ;;  %v12341_v1 = vpop.f32.mrf.mxu2 }
 0xef2   :  { %3181 = vadd.xlane.f32.xlu1 %v3180_v9 }
 0xef9   :  { %v12345_v2 = vpop.f32.mrf.mxu2 }
 0xefa   :  { %2920 = vmax.xlane.f32.xlu1 %v2919_v32 }
 0xf01   :  { %v12350_v14 = vpop.f32.mrf.mxu2 }
 0xf02   :  { %2923 = vmax.xlane.f32.xlu1 %v2922_v43  ;;  %v12339_v53 = vpop.xlane.xlu2 %3166 }
 0xf09   :  { %v2795_v37 = vpop.f32.mrf.mxu2 }
 0xf0a   :  { %v12343_v6 = vpop.xlane.xlu2 %3169  ;;  %v12377_v49 = vadd.f32 %v9096_v31, %v2795_v37 }
 0xf0c   :  { %v2937_v62 = vsel %vm1128_vm2, %v12377_v49, -inf }
 0xf11   :  { %v2798_v15 = vpop.f32.mrf.mxu2 }
 0xf12   :  { %v2909_v54 = vpop.xlane.xlu2 %2908 }
 0xf13   :  { %v2985_v55 = vsub.f32 %v12194_v48, %v2909_v54  ;;  %v9094_v48 = vld [vmem:[%s16245_s3 + $0x10] sm:$0xff] }
 0xf14   :  { %v3572_v28 = vmul.f32 %v9094_v48, %v12196_v20 }
 0xf15   :  { %v3066_v57 = vmul.f32 1.442695, %v2985_v55 }
 0xf17   :  { %8407 = vpow2.f32 %v3066_v57 }
 0xf18   :  { %8409 = vrcp.f32 %v3152_v8 }
 0xf1a   :  { %v2912_v46 = vpop.xlane.xlu2 %2911 }
 0xf1b   :  { %v2986_v24 = vsub.f32 %v12205_v12, %v2912_v46  ;;  %v9095_v12 = vld [vmem:[%s16245_s3 + $0x40] sm:$0xff] }
 0xf1d   :  { %v12353_v13 = vpop.eup %8407  ;;  %v3068_v63 = vmul.f32 1.442695, %v2986_v24  ;;  %v9099_v24 = vld [vmem:[%s16253_s26 + $0x160] sm:$0xff] }
 0xf1e   :  { %v3195_v25 = vsel %vm1128_vm2, %v12353_v13, 0.0  ;;  %v8410_v17 = vpop.eup %8409 }
 0xf1f   :  { %8411 = vpow2.f32 %v3068_v63  ;;  %v3470_v22 = vpop.f32.mrf.mxu3  ;;  %3196 = vadd.xlane.f32.xlu1 %v3195_v25  ;;  %v3306_v20 = vmul.f32 %v8410_v17, %v12145_v44  ;;  %v12393_v63 = vadd.f32 %v9099_v24, %v2798_v15 }
 0xf20   :  { %v3578_v47 = vmul.f32 %v9095_v12, %v3470_v22  ;;  %v3155_v52 = vpop.xlane.xlu0 %3154 }
 0xf21   :  { %8413 = vrcp.f32 %v3155_v52 }
 0xf22   :  { %v12364_v8 = vadd.f32 %v3578_v47, %v3572_v28 }
 0xf25   :  { %v12366_v58 = vpop.eup %8411 }
 0xf26   :  { %v3198_v38 = vsel %vm1128_vm2, %v12366_v58, 0.0 }
 0xf27   :  { %v8414_v18 = vpop.eup %8413  ;;  %v12370_v41 = vpop.f32.mrf.mxu3  ;;  %3199 = vadd.xlane.f32.xlu1 %v3198_v38 }
 0xf28   :  { %v3307_v10 = vmul.f32 %v8414_v18, %v12217_v11  ;;  %v3158_v61 = vpop.xlane.xlu0 %3157  ;;  %v9097_v11 = vld [vmem:[%s16245_s3 + $0x20] sm:$0xff] }
 0xf29   :  { %v3161_v19 = vpop.xlane.xlu1 %3160  ;;  %8415 = vrcp.f32 %v3158_v61  ;;  %v3574_v32 = vmul.f32 %v9097_v11, %v12215_v29 }
 0xf2a   :  { %v3345_v9 = vpack.c.bf16 %v3307_v10, %v3306_v20  ;;  %8417 = vrcp.f32 %v3161_v19 }
 0xf2c   :  { %7826 = vmatmul.msk.bf16.gmra.mxu3 %vm1128_vm2, %v3345_v9 }
 0xf2f   :  { %v3475_v44 = vpop.f32.mrf.mxu3  ;;  %2938 = vmax.xlane.f32.xlu1 %v2937_v62  ;;  %v8416_v46 = vpop.eup %8415 }
 0xf30   :  { %v3580_v43 = vmul.f32 %v9098_v30, %v3475_v44  ;;  %v2897_v54 = vpop.xlane.xlu0 %2896  ;;  %v8418_v22 = vpop.eup %8417  ;;  %v3308_v48 = vmul.f32 %v8416_v46, %v12226_v39 }
 0xf31   :  { %v2981_v55 = vsub.f32 %v12239_v5, %v2897_v54  ;;  %v3164_v57 = vpop.xlane.xlu1 %3163  ;;  %v3309_v28 = vmul.f32 %v8418_v22, %v12228_v26  ;;  %v2940_v5 = vsel %vm1128_vm2, %v12393_v63, -inf }
 0xf32   :  { %v12395_v25 = vadd.f32 %v3580_v43, %v3574_v32 }
 0xf33   :  { %v3058_v29 = vmul.f32 1.442695, %v2981_v55  ;;  %v3346_v38 = vpack.c.bf16 %v3309_v28, %v3308_v48  ;;  %v9103_v48 = vld [vmem:[%s16245_s3 + $0x70] sm:$0xff] }
 0xf35   :  { %8419 = vpow2.f32 %v3058_v29 }
 0xf36   :  { %8421 = vrcp.f32 %v3164_v57 }
 0xf37   :  { %v12401_v12 = vpop.f32.mrf.mxu3  ;;  %2941 = vmax.xlane.f32.xlu1 %v2940_v5 }
 0xf38   :  { %v2900_v47 = vpop.xlane.xlu0 %2899 }
 0xf39   :  { %v2982_v52 = vsub.f32 %v12263_v59, %v2900_v47  ;;  %v2903_v17 = vpop.xlane.xlu1 %2902  ;;  %v9104_v47 = vld [vmem:[%s16253_s26 + $0x148] sm:$0xff] }
 0xf3a   :  { %v2983_v37 = vsub.f32 %v12269_v50, %v2903_v17  ;;  %v9100_v50 = vld [vmem:[%s16245_s3 + $0x60] sm:$0xff] }
 0xf3b   :  { %v12405_v18 = vpop.eup %8419  ;;  %v3060_v20 = vmul.f32 1.442695, %v2982_v52 }
 0xf3c   :  { %v3062_v39 = vmul.f32 1.442695, %v2983_v37  ;;  %7827 = vmatmul.msk.bf16.gmra.mxu3 %vm1128_vm2, %v3346_v38  ;;  %v3183_v26 = vsel %vm1128_vm2, %v12405_v18, 0.0  ;;  %v8422_v31 = vpop.eup %8421 }
 0xf3d   :  { %8423 = vpow2.f32 %v3060_v20  ;;  %3184 = vadd.xlane.f32.xlu2 %v3183_v26  ;;  %v3310_v43 = vmul.f32 %v8422_v31, %v12242_v16 }
 0xf3e   :  { %8425 = vpow2.f32 %v3062_v39 }
 0xf3f   :  { %8427 = vrcp.f32 %v12339_v53  ;;  %v3480_v59 = vpop.f32.mrf.mxu3 }
 0xf40   :  { %v3582_v10 = vmul.f32 %v9100_v50, %v3480_v59  ;;  %v3173_v61 = vpop.xlane.xlu0 %3172  ;;  %v9105_v59 = vld [vmem:[%s16253_s26 + $0x150] sm:$0xff] }
 0xf41   :  { %v2906_v19 = vpop.xlane.xlu1 %2905  ;;  %v12475_v50 = vadd.f32 %v9105_v59, %v12350_v14 }
 0xf42   :  { %v12415_v9 = vadd.f32 %v12256_v0, %v3582_v10  ;;  %v2984_v62 = vsub.f32 %v12282_v27, %v2906_v19  ;;  %v9101_v27 = vld [vmem:[%s16253_s26 + $0x138] sm:$0xff] }
 0xf43   :  { %v12418_v15 = vpop.eup %8423  ;;  %v12433_v54 = vadd.f32 %v9101_v27, %v12335_v45 }
 0xf44   :  { %v12420_v44 = vpop.eup %8425  ;;  %v3064_v11 = vmul.f32 1.442695, %v2984_v62  ;;  %v3186_v53 = vsel %vm1128_vm2, %v12418_v15, 0.0 }
 0xf45   :  { %v8428_v32 = vpop.eup %8427  ;;  %3187 = vadd.xlane.f32.xlu2 %v3186_v53  ;;  %v3189_v30 = vsel %vm1128_vm2, %v12420_v44, 0.0  ;;  %v2925_v16 = vsel %vm1128_vm2, %v12433_v54, -inf }
 0xf46   :  { %8429 = vpow2.f32 %v3064_v11  ;;  %3190 = vadd.xlane.f32.xlu0 %v3189_v30  ;;  %v3311_v55 = vmul.f32 %v8428_v32, %v12179_v4  ;;  %v9102_v4 = vld [vmem:[%s16253_s26 + $0x140] sm:$0xff]  ;;  %v2800_v30 = vpop.f32.mrf.mxu2 }
 0xf47   :  { %v12427_v0 = vpop.f32.mrf.mxu3  ;;  %8431 = vrcp.f32 %v3173_v61  ;;  %v12448_v29 = vadd.f32 %v9102_v4, %v12341_v1 }
 0xf48   :  { %v3176_v57 = vpop.xlane.xlu0 %3175  ;;  %v3347_v46 = vpack.c.bf16 %v3311_v55, %v3310_v43  ;;  %8433 = vrcp.f32 %v12343_v6  ;;  %v12457_v6 = vadd.f32 %v9104_v47, %v12345_v2 }
 0xf49   :  { %v2928_v38 = vsel %vm1128_vm2, %v12448_v29, -inf }
 0xf4a   :  { %v2931_v39 = vsel %vm1128_vm2, %v12457_v6, -inf }
 0xf4c   :  { %v12436_v24 = vpop.eup %8429  ;;  %7828 = vmatmul.msk.bf16.gmra.mxu3 %vm1128_vm2, %v3347_v46 }
 0xf4d   :  { %2926 = vmax.xlane.f32.xlu2 %v2925_v16  ;;  %v3192_v22 = vsel %vm1128_vm2, %v12436_v24, 0.0  ;;  %v8432_v1 = vpop.eup %8431  ;;  %v9107_v16 = vld [vmem:[%s16253_s26 + $0x168] sm:$0xff] }
 0xf4e   :  { %3193 = vadd.xlane.f32.xlu0 %v3192_v22  ;;  %v8434_v20 = vpop.eup %8433  ;;  %v3313_v26 = vmul.f32 %v8432_v1, %v12285_v33  ;;  %v12499_v22 = vadd.f32 %v9107_v16, %v2800_v30 }
 0xf4f   :  { %v3485_v45 = vpop.f32.mrf.mxu3 }
 0xf50   :  { %v3584_v28 = vmul.f32 %v9103_v48, %v3485_v45  ;;  %v2915_v5 = vpop.xlane.xlu0 %2914  ;;  %v2943_v4 = vsel %vm1128_vm2, %v12499_v22, -inf  ;;  %v2803_v48 = vpop.f32.mrf.mxu2 }
 0xf51   :  { %v2987_v52 = vsub.f32 %v12300_v35, %v2915_v5  ;;  %v3312_v35 = vmul.f32 %v8434_v20, %v12185_v21  ;;  %v2934_v21 = vsel %vm1128_vm2, %v12475_v50, -inf }
 0xf52   :  { %v12461_v17 = vadd.f32 %v12364_v8, %v3584_v28 }
 0xf53   :  { %v3070_v37 = vmul.f32 1.442695, %v2987_v52  ;;  %v3348_v61 = vpack.c.bf16 %v3313_v26, %v3312_v35 }
 0xf55   :  { %8435 = vpow2.f32 %v3070_v37  ;;  %2929 = vmax.xlane.f32.xlu2 %v2928_v38 }
 0xf56   :  { %2932 = vmax.xlane.f32.xlu0 %v2931_v39 }
 0xf57   :  { %v12468_v2 = vpop.f32.mrf.mxu3 }
 0xf58   :  { %v2918_v8 = vpop.xlane.xlu0 %2917  ;;  %v2805_v35 = vpop.f32.mrf.mxu2 }
 0xf59   :  { %v2988_v10 = vsub.f32 %v12310_v36, %v2918_v8  ;;  %v9106_v36 = vld [vmem:[%s16245_s3 + $0x80] sm:$0xff]  ;;  %v9109_v8 = vld [vmem:[%s16253_s26 + $0x178] sm:$0xff] }
 0xf5b   :  { %v12478_v19 = vpop.eup %8435  ;;  %v3072_v31 = vmul.f32 1.442695, %v2988_v10 }
 0xf5c   :  { %7829 = vmatmul.msk.bf16.gmra.mxu3 %vm1128_vm2, %v3348_v61  ;;  %v3201_v33 = vsel %vm1128_vm2, %v12478_v19, 0.0 }
 0xf5d   :  { %8437 = vpow2.f32 %v3072_v31  ;;  %3202 = vadd.xlane.f32.xlu2 %v3201_v33  ;;  %v3179_v62 = vpop.xlane.xlu1 %3178  ;;  %v9110_v33 = vld [vmem:[%s16245_s3 + $0x90] sm:$0xff] }
 0xf5e   :  { %2935 = vmax.xlane.f32.xlu0 %v2934_v21  ;;  %8439 = vrcp.f32 %v3179_v62 }
 0xf5f   :  { %8441 = vrcp.f32 %v3176_v57  ;;  %v3490_v14 = vpop.f32.mrf.mxu3 }
 0xf60   :  { %v3586_v11 = vmul.f32 %v9106_v36, %v3490_v14 }
 0xf62   :  { %v12489_v53 = vadd.f32 %v12395_v25, %v3586_v11 }
 0xf63   :  { %v12491_v32 = vpop.eup %8437 }
 0xf64   :  { %v8440_v43 = vpop.eup %8439  ;;  %v3204_v27 = vsel %vm1128_vm2, %v12491_v32, 0.0 }
 0xf65   :  { %v8442_v55 = vpop.eup %8441  ;;  %3205 = vadd.xlane.f32.xlu2 %v3204_v27  ;;  %v3182_v46 = vpop.xlane.xlu1 %3181  ;;  %v3315_v57 = vmul.f32 %v8440_v43, %v12315_v40  ;;  %v9108_v40 = vld [vmem:[%s16253_s26 + $0x170] sm:$0xff] }
 0xf66   :  { %v3314_v25 = vmul.f32 %v8442_v55, %v12292_v34  ;;  %v12509_v47 = vadd.f32 %v9108_v40, %v2803_v48 }
 0xf67   :  { %v12529_v10 = vpop.f32.mrf.mxu3 }
 0xf68   :  { %v3349_v45 = vpack.c.bf16 %v3315_v57, %v3314_v25  ;;  %v2946_v34 = vsel %vm1128_vm2, %v12509_v47, -inf }
 0xf6c   :  { %7830 = vmatmul.msk.bf16.gmra.mxu3 %vm1128_vm2, %v3349_v45  ;;  %v9111_v45 = vld [vmem:[%s16245_s3 + $0xa0] sm:$0xff] }
 0xf6d   :  { %2944 = vmax.xlane.f32.xlu2 %v2943_v4  ;;  %v2921_v28 = vpop.xlane.xlu1 %2920 }
 0xf6e   :  { %v2989_v5 = vsub.f32 %v12326_v3, %v2921_v28 }
 0xf70   :  { %v3074_v52 = vmul.f32 1.442695, %v2989_v5 }
 0xf72   :  { %8443 = vpow2.f32 %v3074_v52 }
 0xf75   :  { %2947 = vmax.xlane.f32.xlu2 %v2946_v34  ;;  %v2924_v1 = vpop.xlane.xlu1 %2923 }
 0xf76   :  { %v2990_v37 = vsub.f32 %v12333_v23, %v2924_v1  ;;  %v12525_v23 = vadd.f32 %v9109_v8, %v2805_v35 }
 0xf78   :  { %v12514_v38 = vpop.eup %8443  ;;  %v3076_v20 = vmul.f32 1.442695, %v2990_v37  ;;  %v2949_v59 = vsel %vm1128_vm2, %v12525_v23, -inf }
 0xf79   :  { %v3207_v3 = vsel %vm1128_vm2, %v12514_v38, 0.0 }
 0xf7a   :  { %8445 = vpow2.f32 %v3076_v20  ;;  %3208 = vadd.xlane.f32.xlu0 %v3207_v3 }
 0xf7b   :  { %8447 = vrcp.f32 %v3182_v46 }
 0xf80   :  { %v12518_v39 = vpop.eup %8445 }
 0xf81   :  { %v3210_v26 = vsel %vm1128_vm2, %v12518_v39, 0.0  ;;  %v8448_v36 = vpop.eup %8447 }
 0xf82   :  { %3211 = vadd.xlane.f32.xlu0 %v3210_v26  ;;  %v3316_v27 = vmul.f32 %v8448_v36, %v12319_v60 }
 0xf8a   :  { %2950 = vmax.xlane.f32.xlu0 %v2949_v59 }
 0xf92   :  { %v3197_v61 = vpop.xlane.xlu1 %3196 }
 0xf9a   :  { %v12537_v11 = vpop.xlane.xlu1 %3199 }
 0xfa2   :  { %v2939_v25 = vpop.xlane.xlu1 %2938 }
 0xfaa   :  { %v2942_v3 = vpop.xlane.xlu1 %2941 }
 0xfaf   :  { %v3495_v31 = vpop.f32.mrf.mxu3 }
 0xfb0   :  { %v3588_v21 = vmul.f32 %v9110_v33, %v3495_v31  ;;  %v3185_v62 = vpop.xlane.xlu2 %3184  ;;  %v2996_v33 = vsub.f32 %v12393_v63, %v2942_v3 }
 0xfb1   :  { %8449 = vrcp.f32 %v3185_v62 }
 0xfb2   :  { %v12535_v14 = vadd.f32 %v12415_v9, %v3588_v21  ;;  %v3088_v21 = vmul.f32 1.442695, %v2996_v33 }
 0xfb7   :  { %v8450_v30 = vpop.eup %8449  ;;  %v12539_v43 = vpop.f32.mrf.mxu3 }
 0xfb8   :  { %v3317_v55 = vmul.f32 %v8450_v30, %v12405_v18  ;;  %v3188_v46 = vpop.xlane.xlu2 %3187 }
 0xfb9   :  { %v3191_v57 = vpop.xlane.xlu0 %3190  ;;  %8451 = vrcp.f32 %v3188_v46 }
 0xfba   :  { %v3350_v16 = vpack.c.bf16 %v3317_v55, %v3316_v27  ;;  %8453 = vrcp.f32 %v3191_v57 }
 0xfbc   :  { %7831 = vmatmul.msk.bf16.gmra.mxu3 %vm1128_vm2, %v3350_v16 }
 0xfbf   :  { %v3500_v9 = vpop.f32.mrf.mxu3  ;;  %v8452_v5 = vpop.eup %8451 }
 0xfc0   :  { %v3590_v4 = vmul.f32 %v9111_v45, %v3500_v9  ;;  %v2927_v48 = vpop.xlane.xlu2 %2926  ;;  %v8454_v40 = vpop.eup %8453  ;;  %v3318_v1 = vmul.f32 %v8452_v5, %v12418_v15 }
 0xfc1   :  { %v3194_v28 = vpop.xlane.xlu0 %3193  ;;  %v2991_v60 = vsub.f32 %v12433_v54, %v2927_v48  ;;  %v3319_v34 = vmul.f32 %v8454_v40, %v12420_v44 }
 0xfc2   :  { %v12549_v18 = vadd.f32 %v12461_v17, %v3590_v4  ;;  %v2995_v17 = vsub.f32 %v12377_v49, %v2939_v25  ;;  %v9112_v49 = vld [vmem:[%s16245_s3 + $0xb0] sm:$0xff] }
 0xfc3   :  { %v3078_v52 = vmul.f32 1.442695, %v2991_v60  ;;  %v3351_v8 = vpack.c.bf16 %v3319_v34, %v3318_v1  ;;  %v9113_v34 = vld [vmem:[%s16245_s3 + $0xc0] sm:$0xff] }
 0xfc5   :  { %8455 = vpow2.f32 %v3078_v52 }
 0xfc6   :  { %8457 = vrcp.f32 %v3194_v28 }
 0xfc7   :  { %v12553_v37 = vpop.f32.mrf.mxu3 }
 0xfc8   :  { %v2930_v20 = vpop.xlane.xlu2 %2929 }
 0xfc9   :  { %v2933_v26 = vpop.xlane.xlu0 %2932  ;;  %v2992_v35 = vsub.f32 %v12448_v29, %v2930_v20  ;;  %v3086_v29 = vmul.f32 1.442695, %v2995_v17 }
 0xfca   :  { %v2993_v54 = vsub.f32 %v12457_v6, %v2933_v26 }
 0xfcb   :  { %v12557_v59 = vpop.eup %8455  ;;  %v3080_v31 = vmul.f32 1.442695, %v2992_v35 }
 0xfcc   :  { %v3082_v44 = vmul.f32 1.442695, %v2993_v54  ;;  %7832 = vmatmul.msk.bf16.gmra.mxu3 %vm1128_vm2, %v3351_v8  ;;  %v3213_v15 = vsel %vm1128_vm2, %v12557_v59, 0.0  ;;  %v8458_v30 = vpop.eup %8457 }
 0xfcd   :  { %8459 = vpow2.f32 %v3080_v31  ;;  %3214 = vadd.xlane.f32.xlu1 %v3213_v15 }
 0xfce   :  { %8461 = vpow2.f32 %v3082_v44 }
 0xfcf   :  { %8463 = vrcp.f32 %v3197_v61  ;;  %v3505_v6 = vpop.f32.mrf.mxu3 }
 0xfd0   :  { %v3592_v62 = vmul.f32 %v9112_v49, %v3505_v6  ;;  %v3203_v63 = vpop.xlane.xlu2 %3202  ;;  %8465 = vpow2.f32 %v3086_v29 }
 0xfd1   :  { %v2936_v36 = vpop.xlane.xlu0 %2935  ;;  %8467 = vpow2.f32 %v3088_v21 }
 0xfd2   :  { %v12568_v27 = vadd.f32 %v12489_v53, %v3592_v62  ;;  %v2994_v55 = vsub.f32 %v12475_v50, %v2936_v36  ;;  %v3320_v53 = vmul.f32 %v8458_v30, %v12436_v24 }
 0xfd3   :  { %v12571_v46 = vpop.eup %8459 }
 0xfd4   :  { %v12573_v61 = vpop.eup %8461  ;;  %v3084_v57 = vmul.f32 1.442695, %v2994_v55  ;;  %v3216_v16 = vsel %vm1128_vm2, %v12571_v46, 0.0 }
 0xfd5   :  { %v8464_v25 = vpop.eup %8463  ;;  %v3219_v9 = vsel %vm1128_vm2, %v12573_v61, 0.0  ;;  %3217 = vadd.xlane.f32.xlu1 %v3216_v16 }
 0xfd6   :  { %8469 = vpow2.f32 %v3084_v57  ;;  %3220 = vadd.xlane.f32.xlu2 %v3219_v9  ;;  %v3321_v45 = vmul.f32 %v8464_v25, %v12353_v13  ;;  %v12583_v48 = vpop.eup %8465 }
 0xfd7   :  { %v12580_v50 = vpop.f32.mrf.mxu3  ;;  %v12585_v28 = vpop.eup %8467  ;;  %v3225_v40 = vsel %vm1128_vm2, %v12583_v48, 0.0  ;;  %8471 = vrcp.f32 %v3203_v63 }
 0xfd8   :  { %v3206_v4 = vpop.xlane.xlu2 %3205  ;;  %v3352_v60 = vpack.c.bf16 %v3321_v45, %v3320_v53  ;;  %v3228_v13 = vsel %vm1128_vm2, %v12585_v28, 0.0  ;;  %8473 = vrcp.f32 %v12537_v11 }
 0xfdc   :  { %v12587_v5 = vpop.eup %8469  ;;  %7833 = vmatmul.msk.bf16.gmra.mxu3 %vm1128_vm2, %v3352_v60 }
 0xfdd   :  { %v3222_v24 = vsel %vm1128_vm2, %v12587_v5, 0.0  ;;  %3226 = vadd.xlane.f32.xlu1 %v3225_v40  ;;  %v8472_v35 = vpop.eup %8471 }
 0xfde   :  { %3223 = vadd.xlane.f32.xlu0 %v3222_v24  ;;  %3229 = vadd.xlane.f32.xlu2 %v3228_v13  ;;  %v8474_v8 = vpop.eup %8473  ;;  %v3323_v17 = vmul.f32 %v8472_v35, %v12478_v19 }
 0xfdf   :  { %v3510_v52 = vpop.f32.mrf.mxu3  ;;  %v3322_v11 = vmul.f32 %v8474_v8, %v12366_v58  ;;  %v9114_v58 = vld [vmem:[%s16245_s3 + $0xd0] sm:$0xff] }
 0xfe0   :  { %v3594_v1 = vmul.f32 %v9113_v34, %v3510_v52  ;;  %v2945_v20 = vpop.xlane.xlu2 %2944 }
 0xfe1   :  { %v2997_v3 = vsub.f32 %v12499_v22, %v2945_v20  ;;  %v3353_v15 = vpack.c.bf16 %v3323_v17, %v3322_v11 }
 0xfe2   :  { %v12602_v26 = vadd.f32 %v12535_v14, %v3594_v1 }
 0xfe3   :  { %v3090_v54 = vmul.f32 1.442695, %v2997_v3 }
 0xfe5   :  { %8475 = vpow2.f32 %v3090_v54 }
 0xfe7   :  { %v12605_v31 = vpop.f32.mrf.mxu3 }
 0xfe8   :  { %v2948_v33 = vpop.xlane.xlu2 %2947 }
 0xfe9   :  { %v2998_v44 = vsub.f32 %v12509_v47, %v2948_v33 }
 0xfeb   :  { %v12609_v29 = vpop.eup %8475  ;;  %v3092_v22 = vmul.f32 1.442695, %v2998_v44 }
 0xfec   :  { %7834 = vmatmul.msk.bf16.gmra.mxu3 %vm1128_vm2, %v3353_v15  ;;  %v3231_v14 = vsel %vm1128_vm2, %v12609_v29, 0.0 }
 0xfed   :  { %8477 = vpow2.f32 %v3092_v22  ;;  %v3209_v6 = vpop.xlane.xlu0 %3208  ;;  %3232 = vadd.xlane.f32.xlu0 %v3231_v14 }
 0xfee   :  { %8479 = vrcp.f32 %v3209_v6 }
 0xfef   :  { %8481 = vrcp.f32 %v3206_v4  ;;  %v3515_v19 = vpop.f32.mrf.mxu3 }
 0xff0   :  { %v3596_v47 = vmul.f32 %v9114_v58, %v3515_v19 }
 0xff2   :  { %v3638_v21 = vadd.f32 %v12549_v18, %v3596_v47 }
 0xff3   :  { %v12618_v49 = vpop.eup %8477 }
 0xff4   :  { %v8480_v62 = vpop.eup %8479  ;;  %v3234_v63 = vsel %vm1128_vm2, %v12618_v49, 0.0 }
 0xff5   :  { %v8482_v36 = vpop.eup %8481  ;;  %v3212_v30 = vpop.xlane.xlu0 %3211  ;;  %3235 = vadd.xlane.f32.xlu1 %v3234_v63  ;;  %v3325_v55 = vmul.f32 %v8480_v62, %v12514_v38 }
 0xff6   :  { %v3324_v57 = vmul.f32 %v8482_v36, %v12491_v32  ;;  %v9115_v32 = vld [vmem:[%s16245_s3 + $0xe0] sm:$0xff] }
 0xff7   :  { %v12630_v4 = vpop.f32.mrf.mxu3 }
 0xff8   :  { %v3354_v16 = vpack.c.bf16 %v3325_v55, %v3324_v57 }
 0xffc   :  { %7835 = vmatmul.msk.bf16.gmra.mxu3 %vm1128_vm2, %v3354_v16 }
 0xffd   :  { %v2951_v25 = vpop.xlane.xlu0 %2950 }
 0xffe   :  { %v2999_v9 = vsub.f32 %v12525_v23, %v2951_v25 }
0x1000   :  { %v3094_v18 = vmul.f32 1.442695, %v2999_v9 }
0x1002   :  { %8483 = vpow2.f32 %v3094_v18 }
0x1003   :  { %8485 = vrcp.f32 %v3212_v30 }
0x1008   :  { %v12626_v53 = vpop.eup %8483 }
0x1009   :  { %v3237_v45 = vsel %vm1128_vm2, %v12626_v53, 0.0  ;;  %v8486_v24 = vpop.eup %8485 }
0x100a   :  { %3238 = vadd.xlane.f32.xlu2 %v3237_v45  ;;  %v3326_v34 = vmul.f32 %v8486_v24, %v12518_v39 }
0x103f   :  { %v3520_v38 = vpop.f32.mrf.mxu3 }
0x1040   :  { %v3598_v60 = vmul.f32 %v9115_v32, %v3520_v38  ;;  %v3215_v40 = vpop.xlane.xlu1 %3214 }
0x1041   :  { %8487 = vrcp.f32 %v3215_v40 }
0x1042   :  { %v3640_v23 = vadd.f32 %v12568_v27, %v3598_v60  ;;  %v12644_v27 = vld [vmem:[%s16245_s3 + $0xf0] sm:$0xff] }
0x1047   :  { %v8488_v13 = vpop.eup %8487  ;;  %v12636_v52 = vpop.f32.mrf.mxu3 }
0x1048   :  { %v3327_v1 = vmul.f32 %v8488_v13, %v12557_v59  ;;  %v3218_v20 = vpop.xlane.xlu1 %3217 }
0x1049   :  { %v3221_v3 = vpop.xlane.xlu2 %3220  ;;  %8489 = vrcp.f32 %v3218_v20 }
0x104a   :  { %v3355_v35 = vpack.c.bf16 %v3327_v1, %v3326_v34  ;;  %8491 = vrcp.f32 %v3221_v3 }
0x104c   :  { %7836 = vmatmul.msk.bf16.gmra.mxu3 %vm1128_vm2, %v3355_v35 }
0x104f   :  { %v3525_v54 = vpop.f32.mrf.mxu3  ;;  %v8490_v17 = vpop.eup %8489 }
0x1050   :  { %v3600_v8 = vmul.f32 %v12644_v27, %v3525_v54  ;;  %v8492_v59 = vpop.eup %8491  ;;  %v3328_v11 = vmul.f32 %v8490_v17, %v12571_v46  ;;  %v3227_v15 = vpop.xlane.xlu1 %3226  ;;  %v12685_v54 = vld [vmem:[%s16245_s3 + $0x38] sm:$0xff]  ;;  %v12699_v17 = vld [vmem:[%s16245_s3 + $0x68] sm:$0xff] }
0x1051   :  { %v3329_v33 = vmul.f32 %v8492_v59, %v12573_v61  ;;  %v3224_v22 = vpop.xlane.xlu0 %3223  ;;  %8493 = vrcp.f32 %v3227_v15  ;;  %v3230_v55 = vpop.xlane.xlu2 %3229  ;;  %v3583_v59 = vmul.f32 %v12699_v17, %v12427_v0 }
0x1052   :  { %v12648_v39 = vadd.f32 %v12602_v26, %v3600_v8  ;;  %8495 = vrcp.f32 %v3224_v22  ;;  %v9117_v26 = vld [vmem:[%s16245_s3 + $0x100] sm:$0xff] }
0x1053   :  { %v3356_v14 = vpack.c.bf16 %v3329_v33, %v3328_v11 }
0x1057   :  { %v12652_v44 = vpop.f32.mrf.mxu3  ;;  %v8494_v58 = vpop.eup %8493 }
0x1058   :  { %v8496_v46 = vpop.eup %8495  ;;  %v3331_v62 = vmul.f32 %v8494_v58, %v12583_v48 }
0x1059   :  { %v3330_v61 = vmul.f32 %v8496_v46, %v12587_v5 }
0x105b   :  { %v3357_v30 = vpack.c.bf16 %v3331_v62, %v3330_v61 }
0x105c   :  { %7837 = vmatmul.msk.bf16.gmra.mxu3 %vm1128_vm2, %v3356_v14 }
0x105f   :  { %v3530_v6 = vpop.f32.mrf.mxu3 }
0x1060   :  { %v3602_v19 = vmul.f32 %v9117_v26, %v3530_v6  ;;  %v3233_v36 = vpop.xlane.xlu0 %3232  ;;  %v12720_v6 = vld [vmem:[%s16245_s3 + $0xf8] sm:$0xff] }
0x1061   :  { %8497 = vrcp.f32 %v3233_v36  ;;  %v3601_v26 = vmul.f32 %v12720_v6, %v12652_v44  ;;  %v12739_v44 = vld [vmem:[%s16245_s3 + $0x150] sm:$0xff] }
0x1062   :  { %v12658_v47 = vadd.f32 %v3638_v21, %v3602_v19  ;;  %8499 = vrcp.f32 %v3230_v55  ;;  %v9118_v21 = vld [vmem:[%s16245_s3 + $0x110] sm:$0xff]  ;;  %v12727_v19 = vld [vmem:[%s16245_s3 + $0x120] sm:$0xff] }
0x1067   :  { %v12662_v63 = vpop.f32.mrf.mxu3  ;;  %v8498_v5 = vpop.eup %8497 }
0x1068   :  { %v8500_v9 = vpop.eup %8499  ;;  %v3333_v48 = vmul.f32 %v8498_v5, %v12609_v29  ;;  %v3236_v38 = vpop.xlane.xlu1 %3235 }
0x1069   :  { %v3332_v18 = vmul.f32 %v8500_v9, %v12585_v28 }
0x106b   :  { %v3358_v45 = vpack.c.bf16 %v3333_v48, %v3332_v18 }
0x106c   :  { %7838 = vmatmul.msk.bf16.gmra.mxu3 %vm1128_vm2, %v3357_v30 }
0x106f   :  { %v3535_v57 = vpop.f32.mrf.mxu3 }
0x1070   :  { %v3604_v16 = vmul.f32 %v9118_v21, %v3535_v57  ;;  %v12746_v57 = vld [vmem:[%s16245_s3 + $0x158] sm:$0xff] }
0x1072   :  { %v12668_v25 = vadd.f32 %v3640_v23, %v3604_v16  ;;  %v12752_v16 = vld [vmem:[%s16245_s3 + $0x48] sm:$0xff] }
0x1073   :  { %v3579_v5 = vmul.f32 %v12752_v16, %v12370_v41 }
0x1077   :  { %v12676_v34 = vpop.f32.mrf.mxu3 }
0x107c   :  { %7839 = vmatmul.msk.bf16.gmra.mxu3 %vm1128_vm2, %v3358_v45  ;;  %v12766_v45 = vld [vmem:[%s16245_s3 + $0x78] sm:$0xff] }
0x107d   :  { %v3239_v32 = vpop.xlane.xlu2 %3238 }
0x107e   :  { %8501 = vrcp.f32 %v3239_v32 }
0x107f   :  { %8503 = vrcp.f32 %v3236_v38  ;;  %v3540_v29 = vpop.f32.mrf.mxu3  ;;  %v3585_v38 = vmul.f32 %v12766_v45, %v12468_v2 }
0x1080   :  { %v3606_v58 = vmul.f32 %v12727_v19, %v3540_v29  ;;  %v12788_v29 = vld [vmem:[%s16245_s3 + $0x108] sm:$0xff] }
0x1082   :  { %v3648_v30 = vadd.f32 %v12648_v39, %v3606_v58  ;;  %v12759_v39 = vld [vmem:[%s16245_s3 + $0x18] sm:$0xff] }
0x1083   :  { %v3573_v18 = vmul.f32 %v12759_v39, %v12207_v51 }
0x1084   :  { %v8502_v60 = vpop.eup %8501 }
0x1085   :  { %v8504_v40 = vpop.eup %8503  ;;  %v3335_v24 = vmul.f32 %v8502_v60, %v12626_v53  ;;  %v12692_v53 = vld [vmem:[%s16245_s3 + $0x8] sm:$0xff]  ;;  %v3621_v41 = vadd.f32 %v3579_v5, %v3573_v18 }
0x1086   :  { %v3334_v23 = vmul.f32 %v8504_v40, %v12618_v49  ;;  %v3577_v49 = vmul.f32 %v12685_v54, %v12348_v56  ;;  %v3571_v8 = vmul.f32 %v12692_v53, %v12183_v7  ;;  %v12706_v56 = vld [vmem:[%s16245_s3 + $0x98] sm:$0xff]  ;;  %v12713_v7 = vld [vmem:[%s16245_s3 + $0xc8] sm:$0xff] }
0x1087   :  { %v3542_v28 = vpop.f32.mrf.mxu3  ;;  %v3589_v33 = vmul.f32 %v12706_v56, %v12539_v43  ;;  %v3595_v14 = vmul.f32 %v12713_v7, %v12605_v31  ;;  %v12733_v31 = vld [vmem:[%s16245_s3 + $0x128] sm:$0xff] }
0x1088   :  { %v3359_v13 = vpack.c.bf16 %v3335_v24, %v3334_v23  ;;  %v3619_v11 = vadd.f32 %v3577_v49, %v3571_v8  ;;  %v3607_v46 = vmul.f32 %v12733_v31, %v3542_v28  ;;  %v12773_v60 = vld [vmem:[%s16245_s3 + $0xa8] sm:$0xff]  ;;  %v3627_v24 = vadd.f32 %v3621_v41, %v3585_v38  ;;  %v12781_v23 = vld [vmem:[%s16245_s3 + $0xd8] sm:$0xff]  ;;  %v12795_v49 = vld [vmem:[%s16245_s3 + $0x130] sm:$0xff] }
0x1089   :  { %v3591_v40 = vmul.f32 %v12773_v60, %v12553_v37  ;;  %v3597_v2 = vmul.f32 %v12781_v23, %v12630_v4  ;;  %v3603_v37 = vmul.f32 %v12788_v29, %v12662_v63  ;;  %v12801_v4 = vld [vmem:[%s16245_s3 + $0x138] sm:$0xff]  ;;  %v12807_v63 = vld [vmem:[%s16245_s3 + $0x160] sm:$0xff]  ;;  %v12849_v5 = vld [vmem:[%s16245_s3 + $0xe8] sm:$0xff] }
0x108a   :  { %v3625_v22 = vadd.f32 %v3619_v11, %v3583_v59  ;;  %v12863_v38 = vld [vmem:[%s16245_s3 + $0x140] sm:$0xff] }
0x108c   :  { %7840 = vmatmul.msk.bf16.gmra.mxu3 %vm1128_vm2, %v3359_v13  ;;  %v3631_v0 = vadd.f32 %v3625_v22, %v3589_v33  ;;  %v3633_v13 = vadd.f32 %v3627_v24, %v3591_v40 }
0x108e   :  { %v3637_v43 = vadd.f32 %v3631_v0, %v3595_v14  ;;  %v3639_v28 = vadd.f32 %v3633_v13, %v3597_v2  ;;  %v12884_v13 = vld [vmem:[%s16245_s3 + $0x178] sm:$0xff] }
0x1090   :  { %v3643_v61 = vadd.f32 %v3637_v43, %v3601_v26  ;;  %v3645_v11 = vadd.f32 %v3639_v28, %v3603_v37 }
0x1092   :  { %v3649_v55 = vadd.f32 %v3643_v61, %v3607_v46  ;;  %v12834_v61 = vld [vmem:[%s16245_s3 + $0x88] sm:$0xff] }
0x10cf   :  { %v3545_v1 = vpop.f32.mrf.mxu3 }
0x10d0   :  { %v3608_v8 = vmul.f32 %v12795_v49, %v3545_v1  ;;  %v12814_v1 = vld [vmem:[%s16245_s3 + $0x168] sm:$0xff] }
0x10d2   :  { %v3650_v22 = vadd.f32 %v12658_v47, %v3608_v8  ;;  %v12827_v47 = vld [vmem:[%s16245_s3 + $0x28] sm:$0xff] }
0x10d3   :  { %v3575_v46 = vmul.f32 %v12827_v47, %v12224_v42 }
0x10d7   :  { %v3547_v20 = vpop.f32.mrf.mxu3 }
0x10d8   :  { %v3609_v59 = vmul.f32 %v12801_v4, %v3547_v20  ;;  %v12820_v20 = vld [vmem:[%s16245_s3 + $0x58] sm:$0xff] }
0x10d9   :  { %v3581_v26 = vmul.f32 %v12820_v20, %v12401_v12 }
0x10da   :  { %v3651_v14 = vadd.f32 %v3645_v11, %v3609_v59  ;;  %v9149_v11 = vld [vmem:[%s16179_s10] ss:$0 sm:$0xff] }
0x10db   :  { %v3623_v12 = vadd.f32 %v3581_v26, %v3575_v46  ;;  %v16296_v26 = vld [vmem:[#allocation3_spill] sm:$0xff] }
0x10df   :  { %v12678_v3 = vpop.f32.mrf.mxu3 }
0x10e7   :  { %v12680_v35 = vpop.f32.mrf.mxu3 }
0x10ef   :  { %v3555_v15 = vpop.f32.mrf.mxu3 }
0x10f0   :  { %v3612_v62 = vmul.f32 %v12739_v44, %v3555_v15 }
0x10f2   :  { %v3654_v9 = vadd.f32 %v3648_v30, %v3612_v62  ;;  %v3587_v62 = vmul.f32 %v12834_v61, %v12529_v10  ;;  %v12841_v30 = vld [vmem:[%s16245_s3 + $0xb8] sm:$0xff]  ;;  %v3599_v10 = vmul.f32 %v12849_v5, %v12636_v52  ;;  %v12870_v52 = vld [vmem:[%s16245_s3 + $0x148] sm:$0xff] }
0x10f3   :  { %v3611_v41 = vmul.f32 %v12870_v52, %v12680_v35 }
0x10f7   :  { %v3557_v36 = vpop.f32.mrf.mxu3 }
0x10f8   :  { %v3613_v21 = vmul.f32 %v12746_v57, %v3557_v36 }
0x10fa   :  { %v3655_v48 = vadd.f32 %v3649_v55, %v3613_v21  ;;  %v3593_v55 = vmul.f32 %v12841_v30, %v12580_v50  ;;  %v3629_v21 = vadd.f32 %v3623_v12, %v3587_v62 }
0x10fc   :  { %v3660_v32 = vpack.c.bf16 %v3655_v48, %v3654_v9  ;;  %v3635_v9 = vadd.f32 %v3629_v21, %v3593_v55  ;;  %v12856_v48 = vld [vmem:[%s16245_s3 + $0x118] sm:$0xff] }
0x10fd   :  { %v3605_v50 = vmul.f32 %v12856_v48, %v12676_v34  ;;  %v12877_v34 = vld [vmem:[%s16245_s3 + $0x170] sm:$0xff] }
0x10fe   :  { %7841 = vmatmul.msk.bf16.vlgmr.msrb.gmra.mxu1 %vm794_vm1, %v3660_v32  ;;  %v3641_v18 = vadd.f32 %v3635_v9, %v3599_v10  ;;  %v3610_v32 = vmul.f32 %v12863_v38, %v12678_v3  ;;  %v16298_v10 = vld [vmem:[#allocation5_spill] sm:$0xff] }
0x10ff   :  { %v3560_v51 = vpop.f32.mrf.mxu3 }
0x1100   :  { %v3614_v33 = vmul.f32 %v12807_v63, %v3560_v51  ;;  %v3647_v40 = vadd.f32 %v3641_v18, %v3605_v50  ;;  %v3652_v2 = vadd.f32 %v12668_v25, %v3610_v32  ;;  %v16295_v25 = vld [vmem:[#allocation2_spill] sm:$0xff] }
0x1102   :  { %v3656_v43 = vadd.f32 %v3650_v22, %v3614_v33  ;;  %v3653_v3 = vadd.f32 %v3647_v40, %v3611_v41  ;;  %v16299_v41 = vld [vmem:[#allocation6_spill] sm:$0xff] }
0x1107   :  { %v3562_v15 = vpop.f32.mrf.mxu3 }
0x1108   :  { %v3615_v0 = vmul.f32 %v12814_v1, %v3562_v15 }
0x110a   :  { %v3657_v58 = vadd.f32 %v3651_v14, %v3615_v0 }
0x110c   :  { %v3661_v36 = vpack.c.bf16 %v3657_v58, %v3656_v43 }
0x110e   :  { %7842 = vmatmul.msk.bf16.gmra.mxu1 %vm794_vm1, %v3661_v36  ;;  %v16297_v36 = vld [vmem:[#allocation4_spill] sm:$0xff] }
0x110f   :  { %v3565_v42 = vpop.f32.mrf.mxu3 }
0x1110   :  { %v3616_v51 = vmul.f32 %v12877_v34, %v3565_v42 }
0x1112   :  { %v3658_v35 = vadd.f32 %v3652_v2, %v3616_v51 }
0x1117   :  { %v3567_v24 = vpop.f32.mrf.mxu3 }
0x1118   :  { %v3617_v37 = vmul.f32 %v12884_v13, %v3567_v24 }
0x111a   :  { %v3659_v28 = vadd.f32 %v3653_v3, %v3617_v37  ;;  %v16300_v3 = vld [vmem:[#allocation7_spill] sm:$0xff] }
0x111c   :  { %v3662_v8 = vpack.c.bf16 %v3659_v28, %v3658_v35 }
0x111e   :  { %7843 = vmatmul.msk.bf16.gmra.mxu1 %vm794_vm1, %v3662_v8  ;;  %v16301_v8 = vld [vmem:[#allocation8_spill] sm:$0xff] }
0x117b   :  { %v3681_v59 = vpop.f32.mrf.mxu1 }
0x117c   :  { %v3682_v33 = vadd.f32 %v9149_v11, %v3681_v59 }
0x117e   :  { %v3696_v15 = vadd.f32 %v3682_v33, %v16295_v25 }
0x1180   :  { %v3702_v22 = vsel %vm794_vm1, %v3696_v15, 0.0 }
0x1181   :  { %3703 = vadd.xlane.f32.xlu0 %v3702_v22 }
0x1183   :  { %v3683_v14 = vpop.f32.mrf.mxu1 }
0x1184   :  { %v3684_v0 = vadd.f32 %v9149_v11, %v3683_v14 }
0x1186   :  { %v3697_v43 = vadd.f32 %v3684_v0, %v16296_v26 }
0x1188   :  { %v3705_v58 = vsel %vm794_vm1, %v3697_v43, 0.0 }
0x1189   :  { %3706 = vadd.xlane.f32.xlu1 %v3705_v58 }
0x118b   :  { %v3686_v46 = vpop.f32.mrf.mxu1 }
0x118c   :  { %v3687_v62 = vadd.f32 %v9149_v11, %v3686_v46 }
0x118e   :  { %v3698_v12 = vadd.f32 %v3687_v62, %v16297_v36 }
0x1190   :  { %v3708_v55 = vsel %vm794_vm1, %v3698_v12, 0.0 }
0x1191   :  { %3709 = vadd.xlane.f32.xlu2 %v3708_v55 }
0x1193   :  { %v3688_v42 = vpop.f32.mrf.mxu1 }
0x1194   :  { %v3689_v21 = vadd.f32 %v9149_v11, %v3688_v42 }
0x1196   :  { %v3699_v9 = vadd.f32 %v3689_v21, %v16298_v10 }
0x1198   :  { %v3711_v50 = vsel %vm794_vm1, %v3699_v9, 0.0 }
0x1199   :  { %3712 = vadd.xlane.f32.xlu0 %v3711_v50 }
0x119b   :  { %v3691_v18 = vpop.f32.mrf.mxu1 }
0x119c   :  { %v3692_v32 = vadd.f32 %v9149_v11, %v3691_v18 }
0x119e   :  { %v3700_v40 = vadd.f32 %v3692_v32, %v16299_v41 }
0x11a0   :  { %v3714_v51 = vsel %vm794_vm1, %v3700_v40, 0.0 }
0x11a1   :  { %3715 = vadd.xlane.f32.xlu1 %v3714_v51 }
0x11a3   :  { %v3693_v24 = vpop.f32.mrf.mxu1 }
0x11a4   :  { %v3694_v2 = vadd.f32 %v9149_v11, %v3693_v24 }
0x11a6   :  { %v3701_v37 = vadd.f32 %v3694_v2, %v16300_v3 }
0x11a8   :  { %v3717_v35 = vsel %vm794_vm1, %v3701_v37, 0.0 }
0x11a9   :  { %3718 = vadd.xlane.f32.xlu2 %v3717_v35 }
0x11f4   :  { %v3704_v28 = vpop.xlane.xlu0 %3703 }
0x11f5   :  { %v3720_v59 = vmul.f32 %v3704_v28, %v16301_v8 }
0x11f7   :  { %v12904_v33 = vsub.f32 %v3696_v15, %v3720_v59 }
0x11f9   :  { %v3732_v25 = vmul.f32 %v12904_v33, %v12904_v33 }
0x11fb   :  { %v3738_v22 = vsel %vm794_vm1, %v3732_v25, 0.0 }
0x11fc   :  { %v3707_v14 = vpop.xlane.xlu1 %3706  ;;  %3739 = vadd.xlane.f32.xlu0 %v3738_v22 }
0x11fd   :  { %v3721_v0 = vmul.f32 %v3707_v14, %v16301_v8 }
0x11ff   :  { %v12910_v11 = vsub.f32 %v3697_v43, %v3721_v0 }
0x1201   :  { %v3733_v26 = vmul.f32 %v12910_v11, %v12910_v11 }
0x1203   :  { %v3741_v58 = vsel %vm794_vm1, %v3733_v26, 0.0 }
0x1204   :  { %3742 = vadd.xlane.f32.xlu1 %v3741_v58  ;;  %v3710_v46 = vpop.xlane.xlu2 %3709 }
0x1205   :  { %v3722_v15 = vmul.f32 %v3710_v46, %v16301_v8 }
0x1207   :  { %v12916_v62 = vsub.f32 %v3698_v12, %v3722_v15 }
0x1209   :  { %v3734_v36 = vmul.f32 %v12916_v62, %v12916_v62 }
0x120b   :  { %v3744_v55 = vsel %vm794_vm1, %v3734_v36, 0.0 }
0x120c   :  { %v3713_v42 = vpop.xlane.xlu0 %3712  ;;  %3745 = vadd.xlane.f32.xlu2 %v3744_v55 }
0x120d   :  { %v3723_v43 = vmul.f32 %v3713_v42, %v16301_v8 }
0x120f   :  { %v12922_v21 = vsub.f32 %v3699_v9, %v3723_v43 }
0x1211   :  { %v3735_v10 = vmul.f32 %v12922_v21, %v12922_v21 }
0x1213   :  { %v3747_v50 = vsel %vm794_vm1, %v3735_v10, 0.0 }
0x1214   :  { %3748 = vadd.xlane.f32.xlu0 %v3747_v50  ;;  %v3716_v18 = vpop.xlane.xlu1 %3715 }
0x1215   :  { %v3724_v12 = vmul.f32 %v3716_v18, %v16301_v8 }
0x1217   :  { %v12928_v32 = vsub.f32 %v3700_v40, %v3724_v12 }
0x1219   :  { %v3736_v41 = vmul.f32 %v12928_v32, %v12928_v32 }
0x121b   :  { %v3750_v51 = vsel %vm794_vm1, %v3736_v41, 0.0 }
0x121c   :  { %3751 = vadd.xlane.f32.xlu1 %v3750_v51  ;;  %v3719_v24 = vpop.xlane.xlu2 %3718 }
0x121d   :  { %v3725_v9 = vmul.f32 %v3719_v24, %v16301_v8 }
0x121f   :  { %v12934_v2 = vsub.f32 %v3701_v37, %v3725_v9 }
0x1221   :  { %v3737_v3 = vmul.f32 %v12934_v2, %v12934_v2 }
0x1223   :  { %v3753_v35 = vsel %vm794_vm1, %v3737_v3, 0.0 }
0x1224   :  { %3754 = vadd.xlane.f32.xlu2 %v3753_v35 }
0x126f   :  { %v3740_v28 = vpop.xlane.xlu0 %3739 }
0x1270   :  { %v3756_v40 = vmul.f32 %v3740_v28, %v16301_v8 }
0x1272   :  { %v3762_v59 = vadd.f32 1e-05, %v3756_v40 }
0x1274   :  { %8505 = vrsqrt.f32 %v3762_v59  ;;  %vm3774_vm15 = vweird.f32 %v3762_v59 }
0x1277   :  { %v3743_v25 = vpop.xlane.xlu1 %3742 }
0x1278   :  { %v3757_v22 = vmul.f32 %v3743_v25, %v16301_v8 }
0x127a   :  { %v8506_v14 = vpop.eup %8505  ;;  %v3763_v0 = vadd.f32 1e-05, %v3757_v22  ;;  %v12947_v22 = vld [vmem:[%s16181_s11] ss:$0 sm:$0xff] }
0x127b   :  { %v3769_v26 = vmul.f32 %v8506_v14, %v3762_v59  ;;  %vm3775_vm14 = vweird.f32 %v8506_v14 }
0x127c   :  { %8507 = vrsqrt.f32 %v3763_v0  ;;  %vm3776_vm0 = vmor %vm3774_vm15, %vm3775_vm14  ;;  %vm3784_vm4 = vweird.f32 %v3763_v0 }
0x127d   :  { %v3770_v37 = vmul.f32 %v8506_v14, %v3769_v26 }
0x127f   :  { %v3771_v58 = vmul.f32 0.5, %v3770_v37  ;;  %v3746_v46 = vpop.xlane.xlu2 %3745 }
0x1280   :  { %v3758_v15 = vmul.f32 %v3746_v46, %v16301_v8 }
0x1281   :  { %v3772_v36 = vsub.f32 1.5, %v3771_v58 }
0x1282   :  { %v8508_v55 = vpop.eup %8507  ;;  %v3764_v42 = vadd.f32 1e-05, %v3758_v15 }
0x1283   :  { %v3773_v43 = vmul.f32 %v8506_v14, %v3772_v36  ;;  %v3779_v10 = vmul.f32 %v8508_v55, %v3763_v0  ;;  %vm3785_vm3 = vweird.f32 %v8508_v55  ;;  %v9151_v36 = vld [vmem:[%s16182_s12] ss:$0 sm:$0xff] }
0x1284   :  { %8509 = vrsqrt.f32 %v3764_v42  ;;  %vm3786_vm5 = vmor %vm3784_vm4, %vm3785_vm3  ;;  %vm3794_vm7 = vweird.f32 %v3764_v42 }
0x1285   :  { %v3780_v50 = vmul.f32 %v8508_v55, %v3779_v10  ;;  %v3777_v18 = vsel %vm3776_vm0, %v8506_v14, %v3773_v43 }
0x1286   :  { %v3828_v3 = vmul.f32 %v3777_v18, %v12904_v33 }
0x1287   :  { %v3781_v12 = vmul.f32 0.5, %v3780_v50  ;;  %v3749_v41 = vpop.xlane.xlu0 %3748 }
0x1288   :  { %v3759_v51 = vmul.f32 %v3749_v41, %v16301_v8  ;;  %v3834_v14 = vmul.f32 %v12947_v22, %v3828_v3 }
0x1289   :  { %v3782_v24 = vsub.f32 1.5, %v3781_v12 }
0x128a   :  { %v8510_v9 = vpop.eup %8509  ;;  %v3765_v35 = vadd.f32 1e-05, %v3759_v51 }
0x128b   :  { %v3783_v28 = vmul.f32 %v8508_v55, %v3782_v24  ;;  %v3789_v40 = vmul.f32 %v8510_v9, %v3764_v42  ;;  %vm3795_vm6 = vweird.f32 %v8510_v9 }
0x128c   :  { %8511 = vrsqrt.f32 %v3765_v35  ;;  %vm3796_vm9 = vmor %vm3794_vm7, %vm3795_vm6  ;;  %vm3804_vm11 = vweird.f32 %v3765_v35 }
0x128d   :  { %v3787_v25 = vsel %vm3786_vm5, %v8508_v55, %v3783_v28  ;;  %v3790_v59 = vmul.f32 %v8510_v9, %v3789_v40  ;;  %v12956_v55 = vadd.f32 %v9151_v36, %v3834_v14 }
0x128e   :  { %v3829_v26 = vmul.f32 %v3787_v25, %v12910_v11 }
0x128f   :  { %v3791_v37 = vmul.f32 0.5, %v3790_v59  ;;  %v3752_v58 = vpop.xlane.xlu1 %3751 }
0x1290   :  { %v3835_v33 = vmul.f32 %v12947_v22, %v3829_v26  ;;  %v3760_v0 = vmul.f32 %v3752_v58, %v16301_v8 }
0x1291   :  { %v3792_v46 = vsub.f32 1.5, %v3791_v37 }
0x1292   :  { %v8512_v15 = vpop.eup %8511  ;;  %v12958_v43 = vadd.f32 %v9151_v36, %v3835_v33  ;;  %v3766_v10 = vadd.f32 1e-05, %v3760_v0 }
0x1293   :  { %v3793_v50 = vmul.f32 %v8510_v9, %v3792_v46  ;;  %v3799_v11 = vmul.f32 %v8512_v15, %v3765_v35  ;;  %vm3805_vm10 = vweird.f32 %v8512_v15 }
0x1294   :  { %v3846_v18 = vpack.c.bf16 %v12958_v43, %v12956_v55  ;;  %8513 = vrsqrt.f32 %v3766_v10  ;;  %vm3806_vm12 = vmor %vm3804_vm11, %vm3805_vm10  ;;  %vm3814_vm14 = vweird.f32 %v3766_v10 }
0x1295   :  { %v3800_v12 = vmul.f32 %v8512_v15, %v3799_v11  ;;  %v3797_v41 = vsel %vm3796_vm9, %v8510_v9, %v3793_v50 }
0x1296   :  { %7844 = vmatmul.msk.bf16.vlgmr.msrb.gmra.mxu0 %vm794_vm1, %v3846_v18  ;;  %v3830_v25 = vmul.f32 %v3797_v41, %v12916_v62 }
0x1297   :  { %v3801_v51 = vmul.f32 0.5, %v3800_v12  ;;  %v3755_v24 = vpop.xlane.xlu2 %3754 }
0x1298   :  { %v3761_v3 = vmul.f32 %v3755_v24, %v16301_v8  ;;  %v3836_v9 = vmul.f32 %v12947_v22, %v3830_v25 }
0x1299   :  { %v3802_v28 = vsub.f32 1.5, %v3801_v51 }
0x129a   :  { %v8514_v40 = vpop.eup %8513  ;;  %v3767_v59 = vadd.f32 1e-05, %v3761_v3  ;;  %v12968_v11 = vadd.f32 %v9151_v36, %v3836_v9 }
0x129b   :  { %v3803_v14 = vmul.f32 %v8512_v15, %v3802_v28  ;;  %v3809_v26 = vmul.f32 %v8514_v40, %v3766_v10  ;;  %vm3815_vm13 = vweird.f32 %v8514_v40 }
0x129c   :  { %8515 = vrsqrt.f32 %v3767_v59  ;;  %vm3816_vm15 = vmor %vm3814_vm14, %vm3815_vm13  ;;  %vm3824_vm3 = vweird.f32 %v3767_v59 }
0x129d   :  { %v3807_v42 = vsel %vm3806_vm12, %v8512_v15, %v3803_v14  ;;  %v3810_v37 = vmul.f32 %v8514_v40, %v3809_v26 }
0x129e   :  { %v3831_v58 = vmul.f32 %v3807_v42, %v12922_v21 }
0x129f   :  { %v3811_v33 = vmul.f32 0.5, %v3810_v37 }
0x12a0   :  { %v3837_v0 = vmul.f32 %v12947_v22, %v3831_v58 }
0x12a1   :  { %v3812_v46 = vsub.f32 1.5, %v3811_v33 }
0x12a2   :  { %v8516_v50 = vpop.eup %8515  ;;  %v12970_v62 = vadd.f32 %v9151_v36, %v3837_v0 }
0x12a3   :  { %v3813_v18 = vmul.f32 %v8514_v40, %v3812_v46  ;;  %v3819_v35 = vmul.f32 %v8516_v50, %v3767_v59  ;;  %vm3825_vm0 = vweird.f32 %v8516_v50 }
0x12a4   :  { %v3847_v15 = vpack.c.bf16 %v12970_v62, %v12968_v11  ;;  %vm3826_vm4 = vmor %vm3824_vm3, %vm3825_vm0 }
0x12a5   :  { %v3820_v12 = vmul.f32 %v8516_v50, %v3819_v35  ;;  %v3817_v21 = vsel %vm3816_vm15, %v8514_v40, %v3813_v18 }
0x12a6   :  { %7845 = vmatmul.msk.bf16.gmra.mxu0 %vm794_vm1, %v3847_v15  ;;  %v3832_v24 = vmul.f32 %v3817_v21, %v12928_v32  ;;  %v9152_v32 = vld [vmem:[%s16183_s14] ss:$0 sm:$0xff] }
0x12a7   :  { %v3821_v41 = vmul.f32 0.5, %v3820_v12 }
0x12a8   :  { %v3838_v14 = vmul.f32 %v12947_v22, %v3832_v24 }
0x12a9   :  { %v3822_v51 = vsub.f32 1.5, %v3821_v41 }
0x12aa   :  { %v3844_v26 = vadd.f32 %v9151_v36, %v3838_v14  ;;  %v9153_v14 = vld [vmem:[%s16185_s16] ss:$0 sm:$0xff] }
0x12ab   :  { %v3823_v3 = vmul.f32 %v8516_v50, %v3822_v51 }
0x12ad   :  { %v3827_v28 = vsel %vm3826_vm4, %v8516_v50, %v3823_v3 }
0x12ae   :  { %v3833_v25 = vmul.f32 %v3827_v28, %v12934_v2 }
0x12b0   :  { %v3839_v10 = vmul.f32 %v12947_v22, %v3833_v25 }
0x12b2   :  { %v3845_v42 = vadd.f32 %v9151_v36, %v3839_v10 }
0x12b4   :  { %v3848_v37 = vpack.c.bf16 %v3845_v42, %v3844_v26 }
0x12b6   :  { %7846 = vmatmul.msk.bf16.gmra.mxu0 %vm794_vm1, %v3848_v37 }
0x1313   :  { %v3867_v40 = vpop.f32.mrf.mxu0 }
0x1314   :  { %v3868_v58 = vadd.f32 %v9152_v32, %v3867_v40 }
0x1316   :  { %v3882_v33 = vmax.f32 %v3868_v58, 0.0 }
0x131b   :  { %v3869_v59 = vpop.f32.mrf.mxu0 }
0x131c   :  { %v3870_v9 = vadd.f32 %v9152_v32, %v3869_v59 }
0x131e   :  { %v3883_v0 = vmax.f32 %v3870_v9, 0.0 }
0x1320   :  { %v3888_v2 = vpack.c.bf16 %v3883_v0, %v3882_v33 }
0x1322   :  { %7847 = vmatmul.msk.bf16.vlgmr.msra.gmra.mxu1 %vm2282_vm8, %v3888_v2 }
0x1323   :  { %v3872_v46 = vpop.f32.mrf.mxu0 }
0x1324   :  { %v3873_v22 = vadd.f32 %v9152_v32, %v3872_v46 }
0x1326   :  { %v3884_v18 = vmax.f32 %v3873_v22, 0.0 }
0x132b   :  { %v3874_v50 = vpop.f32.mrf.mxu0 }
0x132c   :  { %v3875_v36 = vadd.f32 %v9152_v32, %v3874_v50 }
0x132e   :  { %v3885_v35 = vmax.f32 %v3875_v36, 0.0 }
0x1330   :  { %v3889_v15 = vpack.c.bf16 %v3885_v35, %v3884_v18 }
0x1332   :  { %7848 = vmatmul.msk.bf16.gmra.mxu1 %vm2282_vm8, %v3889_v15 }
0x1333   :  { %v3877_v12 = vpop.f32.mrf.mxu0 }
0x1334   :  { %v3878_v21 = vadd.f32 %v9152_v32, %v3877_v12 }
0x1336   :  { %v3886_v24 = vmax.f32 %v3878_v21, 0.0 }
0x133b   :  { %v3879_v41 = vpop.f32.mrf.mxu0 }
0x133c   :  { %v3880_v51 = vadd.f32 %v9152_v32, %v3879_v41 }
0x133e   :  { %v3887_v3 = vmax.f32 %v3880_v51, 0.0 }
0x1340   :  { %v3890_v28 = vpack.c.bf16 %v3887_v3, %v3886_v24 }
0x1342   :  { %7849 = vmatmul.msk.bf16.gmra.mxu1 %vm2282_vm8, %v3890_v28 }
0x139f   :  { %v3909_v25 = vpop.f32.mrf.mxu1 }
0x13a0   :  { %v3910_v10 = vadd.f32 %v9153_v14, %v3909_v25 }
0x13a2   :  { %v3924_v37 = vadd.f32 %v3910_v10, %v12956_v55 }
0x13a4   :  { %v3930_v40 = vsel %vm794_vm1, %v3924_v37, 0.0 }
0x13a5   :  { %3931 = vadd.xlane.f32.xlu0 %v3930_v40 }
0x13a7   :  { %v3911_v58 = vpop.f32.mrf.mxu1 }
0x13a8   :  { %v3912_v59 = vadd.f32 %v9153_v14, %v3911_v58 }
0x13aa   :  { %v3925_v32 = vadd.f32 %v3912_v59, %v12958_v43 }
0x13ac   :  { %v3933_v9 = vsel %vm794_vm1, %v3925_v32, 0.0 }
0x13ad   :  { %3934 = vadd.xlane.f32.xlu1 %v3933_v9 }
0x13af   :  { %v3914_v33 = vpop.f32.mrf.mxu1 }
0x13b0   :  { %v3915_v0 = vadd.f32 %v9153_v14, %v3914_v33 }
0x13b2   :  { %v3926_v2 = vadd.f32 %v3915_v0, %v12968_v11 }
0x13b4   :  { %v3936_v46 = vsel %vm794_vm1, %v3926_v2, 0.0 }
0x13b5   :  { %3937 = vadd.xlane.f32.xlu2 %v3936_v46 }
0x13b7   :  { %v3916_v22 = vpop.f32.mrf.mxu1 }
0x13b8   :  { %v3917_v50 = vadd.f32 %v9153_v14, %v3916_v22 }
0x13ba   :  { %v3927_v55 = vadd.f32 %v3917_v50, %v12970_v62 }
0x13bc   :  { %v3939_v36 = vsel %vm794_vm1, %v3927_v55, 0.0 }
0x13bd   :  { %3940 = vadd.xlane.f32.xlu0 %v3939_v36 }
0x13bf   :  { %v3919_v18 = vpop.f32.mrf.mxu1 }
0x13c0   :  { %v3920_v35 = vadd.f32 %v9153_v14, %v3919_v18 }
0x13c2   :  { %v3928_v43 = vadd.f32 %v3920_v35, %v3844_v26 }
0x13c4   :  { %v3942_v15 = vsel %vm794_vm1, %v3928_v43, 0.0 }
0x13c5   :  { %3943 = vadd.xlane.f32.xlu1 %v3942_v15 }
0x13c7   :  { %v3921_v12 = vpop.f32.mrf.mxu1 }
0x13c8   :  { %v3922_v21 = vadd.f32 %v9153_v14, %v3921_v12 }
0x13ca   :  { %v3929_v41 = vadd.f32 %v3922_v21, %v3845_v42 }
0x13cc   :  { %v3945_v11 = vsel %vm794_vm1, %v3929_v41, 0.0 }
0x13cd   :  { %3946 = vadd.xlane.f32.xlu2 %v3945_v11 }
0x1418   :  { %v3932_v51 = vpop.xlane.xlu0 %3931 }
0x1419   :  { %v3948_v24 = vmul.f32 %v3932_v51, %v16301_v8 }
0x141b   :  { %v13000_v3 = vsub.f32 %v3924_v37, %v3948_v24 }
0x141d   :  { %v3960_v62 = vmul.f32 %v13000_v3, %v13000_v3 }
0x141f   :  { %v3966_v28 = vsel %vm794_vm1, %v3960_v62, 0.0 }
0x1420   :  { %v3935_v26 = vpop.xlane.xlu1 %3934  ;;  %3967 = vadd.xlane.f32.xlu0 %v3966_v28 }
0x1421   :  { %v3949_v25 = vmul.f32 %v3935_v26, %v16301_v8 }
0x1423   :  { %v13006_v10 = vsub.f32 %v3925_v32, %v3949_v25 }
0x1425   :  { %v3961_v42 = vmul.f32 %v13006_v10, %v13006_v10 }
0x1427   :  { %v3969_v14 = vsel %vm794_vm1, %v3961_v42, 0.0 }
0x1428   :  { %3970 = vadd.xlane.f32.xlu1 %v3969_v14  ;;  %v3938_v40 = vpop.xlane.xlu2 %3937 }
0x1429   :  { %v3950_v37 = vmul.f32 %v3938_v40, %v16301_v8 }
0x142b   :  { %v13012_v58 = vsub.f32 %v3926_v2, %v3950_v37 }
0x142d   :  { %v3962_v59 = vmul.f32 %v13012_v58, %v13012_v58 }
0x142f   :  { %v3972_v9 = vsel %vm794_vm1, %v3962_v59, 0.0 }
0x1430   :  { %v3941_v33 = vpop.xlane.xlu0 %3940  ;;  %3973 = vadd.xlane.f32.xlu2 %v3972_v9 }
0x1431   :  { %v3951_v32 = vmul.f32 %v3941_v33, %v16301_v8 }
0x1433   :  { %v13018_v0 = vsub.f32 %v3927_v55, %v3951_v32 }
0x1435   :  { %v3963_v46 = vmul.f32 %v13018_v0, %v13018_v0 }
0x1437   :  { %v3975_v22 = vsel %vm794_vm1, %v3963_v46, 0.0 }
0x1438   :  { %3976 = vadd.xlane.f32.xlu0 %v3975_v22  ;;  %v3944_v50 = vpop.xlane.xlu1 %3943 }
0x1439   :  { %v3952_v2 = vmul.f32 %v3944_v50, %v16301_v8 }
0x143b   :  { %v13024_v36 = vsub.f32 %v3928_v43, %v3952_v2 }
0x143d   :  { %v3964_v18 = vmul.f32 %v13024_v36, %v13024_v36 }
0x143f   :  { %v3978_v35 = vsel %vm794_vm1, %v3964_v18, 0.0 }
0x1440   :  { %3979 = vadd.xlane.f32.xlu1 %v3978_v35  ;;  %v3947_v15 = vpop.xlane.xlu2 %3946 }
0x1441   :  { %v3953_v55 = vmul.f32 %v3947_v15, %v16301_v8 }
0x1443   :  { %v13030_v12 = vsub.f32 %v3929_v41, %v3953_v55 }
0x1445   :  { %v3965_v21 = vmul.f32 %v13030_v12, %v13030_v12 }
0x1447   :  { %v3981_v11 = vsel %vm794_vm1, %v3965_v21, 0.0 }
0x1448   :  { %3982 = vadd.xlane.f32.xlu2 %v3981_v11 }
0x1493   :  { %v3968_v51 = vpop.xlane.xlu0 %3967 }
0x1494   :  { %v3984_v43 = vmul.f32 %v3968_v51, %v16301_v8 }
0x1496   :  { %v3990_v24 = vadd.f32 1e-05, %v3984_v43 }
0x1498   :  { %8517 = vrsqrt.f32 %v3990_v24  ;;  %vm4002_vm6 = vweird.f32 %v3990_v24 }
0x149b   :  { %v3971_v62 = vpop.xlane.xlu1 %3970 }
0x149c   :  { %v3985_v28 = vmul.f32 %v3971_v62, %v16301_v8 }
0x149e   :  { %v8518_v26 = vpop.eup %8517  ;;  %v3991_v25 = vadd.f32 1e-05, %v3985_v28  ;;  %v13043_v28 = vld [vmem:[%s16187_s17] ss:$0 sm:$0xff] }
0x149f   :  { %v3997_v42 = vmul.f32 %v8518_v26, %v3990_v24  ;;  %vm4003_vm5 = vweird.f32 %v8518_v26 }
0x14a0   :  { %8519 = vrsqrt.f32 %v3991_v25  ;;  %vm4004_vm7 = vmor %vm4002_vm6, %vm4003_vm5  ;;  %vm4012_vm10 = vweird.f32 %v3991_v25 }
0x14a1   :  { %v3998_v41 = vmul.f32 %v8518_v26, %v3997_v42 }
0x14a3   :  { %v3999_v14 = vmul.f32 0.5, %v3998_v41  ;;  %v3974_v40 = vpop.xlane.xlu2 %3973 }
0x14a4   :  { %v3986_v37 = vmul.f32 %v3974_v40, %v16301_v8 }
0x14a5   :  { %v4000_v59 = vsub.f32 1.5, %v3999_v14 }
0x14a6   :  { %v8520_v9 = vpop.eup %8519  ;;  %v3992_v33 = vadd.f32 1e-05, %v3986_v37 }
0x14a7   :  { %v4001_v32 = vmul.f32 %v8518_v26, %v4000_v59  ;;  %v4007_v46 = vmul.f32 %v8520_v9, %v3991_v25  ;;  %vm4013_vm9 = vweird.f32 %v8520_v9  ;;  %v9155_v59 = vld [vmem:[%s16188_s18] ss:$0 sm:$0xff] }
0x14a8   :  { %8521 = vrsqrt.f32 %v3992_v33  ;;  %vm4014_vm11 = vmor %vm4012_vm10, %vm4013_vm9  ;;  %vm4022_vm13 = vweird.f32 %v3992_v33 }
0x14a9   :  { %v4008_v22 = vmul.f32 %v8520_v9, %v4007_v46  ;;  %v4005_v50 = vsel %vm4004_vm7, %v8518_v26, %v4001_v32 }
0x14aa   :  { %v4056_v21 = vmul.f32 %v4005_v50, %v13000_v3 }
0x14ab   :  { %v4009_v2 = vmul.f32 0.5, %v4008_v22  ;;  %v3977_v18 = vpop.xlane.xlu0 %3976 }
0x14ac   :  { %v3987_v35 = vmul.f32 %v3977_v18, %v16301_v8  ;;  %v4062_v26 = vmul.f32 %v13043_v28, %v4056_v21 }
0x14ad   :  { %v4010_v15 = vsub.f32 1.5, %v4009_v2 }
0x14ae   :  { %v8522_v55 = vpop.eup %8521  ;;  %v3993_v11 = vadd.f32 1e-05, %v3987_v35 }
0x14af   :  { %v4011_v51 = vmul.f32 %v8520_v9, %v4010_v15  ;;  %v4017_v43 = vmul.f32 %v8522_v55, %v3992_v33  ;;  %vm4023_vm12 = vweird.f32 %v8522_v55 }
0x14b0   :  { %8523 = vrsqrt.f32 %v3993_v11  ;;  %vm4024_vm14 = vmor %vm4022_vm13, %vm4023_vm12  ;;  %vm4032_vm0 = vweird.f32 %v3993_v11 }
0x14b1   :  { %v4015_v62 = vsel %vm4014_vm11, %v8520_v9, %v4011_v51  ;;  %v4018_v24 = vmul.f32 %v8522_v55, %v4017_v43  ;;  %v13052_v9 = vadd.f32 %v9155_v59, %v4062_v26 }
0x14b2   :  { %v4057_v42 = vmul.f32 %v4015_v62, %v13006_v10 }
0x14b3   :  { %v4019_v41 = vmul.f32 0.5, %v4018_v24  ;;  %v3980_v14 = vpop.xlane.xlu1 %3979 }
0x14b4   :  { %v4063_v3 = vmul.f32 %v13043_v28, %v4057_v42  ;;  %v3988_v25 = vmul.f32 %v3980_v14, %v16301_v8 }
0x14b5   :  { %v4020_v40 = vsub.f32 1.5, %v4019_v41 }
0x14b6   :  { %v8524_v37 = vpop.eup %8523  ;;  %v13054_v32 = vadd.f32 %v9155_v59, %v4063_v3  ;;  %v3994_v46 = vadd.f32 1e-05, %v3988_v25 }
0x14b7   :  { %v4021_v22 = vmul.f32 %v8522_v55, %v4020_v40  ;;  %v4027_v10 = vmul.f32 %v8524_v37, %v3993_v11  ;;  %vm4033_vm15 = vweird.f32 %v8524_v37 }
0x14b8   :  { %v4074_v50 = vpack.c.bf16 %v13054_v32, %v13052_v9  ;;  %8525 = vrsqrt.f32 %v3994_v46  ;;  %vm4034_vm3 = vmor %vm4032_vm0, %vm4033_vm15  ;;  %vm4042_vm5 = vweird.f32 %v3994_v46 }
0x14b9   :  { %v4028_v2 = vmul.f32 %v8524_v37, %v4027_v10  ;;  %v4025_v18 = vsel %vm4024_vm14, %v8522_v55, %v4021_v22 }
0x14ba   :  { %7850 = vmatmul.msk.bf16.vlgmr.msra.gmra.mxu0 %vm794_vm1, %v4074_v50  ;;  %v4058_v62 = vmul.f32 %v4025_v18, %v13012_v58 }
0x14bb   :  { %v4029_v35 = vmul.f32 0.5, %v4028_v2  ;;  %v3983_v15 = vpop.xlane.xlu2 %3982 }
0x14bc   :  { %v3989_v21 = vmul.f32 %v3983_v15, %v16301_v8  ;;  %v4064_v55 = vmul.f32 %v13043_v28, %v4058_v62 }
0x14bd   :  { %v4030_v51 = vsub.f32 1.5, %v4029_v35 }
0x14be   :  { %v8526_v43 = vpop.eup %8525  ;;  %v3995_v24 = vadd.f32 1e-05, %v3989_v21  ;;  %v13064_v10 = vadd.f32 %v9155_v59, %v4064_v55 }
0x14bf   :  { %v4031_v26 = vmul.f32 %v8524_v37, %v4030_v51  ;;  %v4037_v42 = vmul.f32 %v8526_v43, %v3994_v46  ;;  %vm4043_vm4 = vweird.f32 %v8526_v43 }
0x14c0   :  { %8527 = vrsqrt.f32 %v3995_v24  ;;  %vm4044_vm6 = vmor %vm4042_vm5, %vm4043_vm4  ;;  %vm4052_vm9 = vweird.f32 %v3995_v24 }
0x14c1   :  { %v4035_v33 = vsel %vm4034_vm3, %v8524_v37, %v4031_v26  ;;  %v4038_v41 = vmul.f32 %v8526_v43, %v4037_v42 }
0x14c2   :  { %v4059_v14 = vmul.f32 %v4035_v33, %v13018_v0 }
0x14c3   :  { %v4039_v3 = vmul.f32 0.5, %v4038_v41 }
0x14c4   :  { %v4065_v25 = vmul.f32 %v13043_v28, %v4059_v14 }
0x14c5   :  { %v4040_v40 = vsub.f32 1.5, %v4039_v3  ;;  %v9158_v3 = vld [vmem:[%s16245_s3 + $0x30] sm:$0xff] }
0x14c6   :  { %v8528_v22 = vpop.eup %8527  ;;  %v13066_v58 = vadd.f32 %v9155_v59, %v4065_v25 }
0x14c7   :  { %v4041_v50 = vmul.f32 %v8526_v43, %v4040_v40  ;;  %v4047_v11 = vmul.f32 %v8528_v22, %v3995_v24  ;;  %vm4053_vm7 = vweird.f32 %v8528_v22  ;;  %v13085_v24 = vld [vmem:[%s16244_s29] ss:$0 sm:$0xff] }
0x14c8   :  { %16302 = vst [vmem:[#allocation2_spill] sm:$0xff] %v13066_v58  ;;  %v4075_v37 = vpack.c.bf16 %v13066_v58, %v13064_v10  ;;  %vm4054_vm10 = vmor %vm4052_vm9, %vm4053_vm7 }
0x14c9   :  { %v4048_v2 = vmul.f32 %v8528_v22, %v4047_v11  ;;  %v4045_v0 = vsel %vm4044_vm6, %v8526_v43, %v4041_v50  ;;  %v9159_v50 = vld [vmem:[%s16245_s3 + $0x60] sm:$0xff] }
0x14ca   :  { %7851 = vmatmul.msk.bf16.gmra.mxu0 %vm794_vm1, %v4075_v37  ;;  %v4060_v15 = vmul.f32 %v4045_v0, %v13024_v36  ;;  %v9160_v37 = vld [vmem:[%s16245_s3 + $0x90] sm:$0xff]  ;;  %v9161_v0 = vld [vmem:[%s16245_s3 + $0xc0] sm:$0xff] }
0x14cb   :  { %v4049_v18 = vmul.f32 0.5, %v4048_v2 }
0x14cc   :  { %v4066_v26 = vmul.f32 %v13043_v28, %v4060_v15 }
0x14cd   :  { %v4050_v35 = vsub.f32 1.5, %v4049_v18 }
0x14ce   :  { %v13075_v42 = vadd.f32 %v9155_v59, %v4066_v26 }
0x14cf   :  { %v4051_v21 = vmul.f32 %v8528_v22, %v4050_v35 }
0x14d0   :  { %16303 = vst [vmem:[#allocation3_spill] sm:$0xff] %v13075_v42 }
0x14d1   :  { %v4055_v51 = vsel %vm4054_vm10, %v8528_v22, %v4051_v21 }
0x14d2   :  { %v4061_v62 = vmul.f32 %v4055_v51, %v13030_v12 }
0x14d4   :  { %v4067_v46 = vmul.f32 %v13043_v28, %v4061_v62 }
0x14d6   :  { %v13077_v33 = vadd.f32 %v9155_v59, %v4067_v46  ;;  %v9157_v59 = vld [vmem:[%s16245_s3] sm:$0xff] }
0x14d8   :  { %16304 = vst [vmem:[#allocation4_spill] sm:$0xff] %v13077_v33  ;;  %v4076_v43 = vpack.c.bf16 %v13077_v33, %v13075_v42 }
0x14da   :  { %7852 = vmatmul.msk.bf16.gmra.mxu0 %vm794_vm1, %v4076_v43 }
0x1537   :  { %v4095_v36 = vpop.f32.mrf.mxu0 }
0x1538   :  { %v4096_v12 = vadd.f32 %v13085_v24, %v4095_v36 }
0x153a   :  { %v4110_v41 = vmul.f32 0.5, %v4096_v12 }
0x153c   :  { %v13092_v55 = vmul.f32 %v9157_v59, %v4110_v41  ;;  %v13097_v25 = vmul.f32 %v9158_v3, %v4110_v41  ;;  %v13104_v11 = vmul.f32 %v9159_v50, %v4110_v41  ;;  %v13109_v2 = vmul.f32 %v9160_v37, %v4110_v41  ;;  %v9162_v59 = vld [vmem:[%s16245_s3 + $0x10] sm:$0xff] }
0x153d   :  { %v13114_v18 = vmul.f32 %v9161_v0, %v4110_v41  ;;  %v13117_v35 = vmul.f32 %v12644_v27, %v4110_v41  ;;  %v13120_v15 = vmul.f32 %v12727_v19, %v4110_v41  ;;  %v13123_v21 = vmul.f32 %v12739_v44, %v4110_v41 }
0x153f   :  { %v4097_v14 = vpop.f32.mrf.mxu0 }
0x1540   :  { %v4098_v28 = vadd.f32 %v13085_v24, %v4097_v14 }
0x1542   :  { %v4111_v40 = vmul.f32 0.5, %v4098_v28  ;;  %v13099_v22 = vpack.c.bf16 %v4098_v28, %v4096_v12 }
0x1544   :  { %4194 = vrot.lane.b32.xlu2 %v13099_v22, %s9404_s7  ;;  %v13128_v51 = vmul.f32 %v12692_v53, %v4111_v40  ;;  %v13131_v62 = vmul.f32 %v12685_v54, %v4111_v40  ;;  %v13134_v26 = vmul.f32 %v12699_v17, %v4111_v40  ;;  %v13137_v27 = vmul.f32 %v12706_v56, %v4111_v40 }
0x1545   :  { %v13140_v19 = vmul.f32 %v12713_v7, %v4111_v40  ;;  %v13143_v44 = vmul.f32 %v12720_v6, %v4111_v40  ;;  %v13146_v46 = vmul.f32 %v12733_v31, %v4111_v40  ;;  %v13149_v53 = vmul.f32 %v12746_v57, %v4111_v40  ;;  %v9163_v40 = vld [vmem:[%s16245_s3 + $0x40] sm:$0xff] }
0x1547   :  { %v4100_v6 = vpop.f32.mrf.mxu0 }
0x1548   :  { %v4101_v12 = vadd.f32 %v13085_v24, %v4100_v6  ;;  %v9164_v6 = vld [vmem:[%s16245_s3 + $0x70] sm:$0xff] }
0x154a   :  { %v4112_v41 = vmul.f32 0.5, %v4101_v12 }
0x154c   :  { %v13172_v3 = vmul.f32 %v9162_v59, %v4112_v41  ;;  %v13177_v50 = vmul.f32 %v9163_v40, %v4112_v41  ;;  %v9165_v59 = vld [vmem:[%s16245_s3 + $0xa0] sm:$0xff]  ;;  %v9166_v40 = vld [vmem:[%s16245_s3 + $0xd0] sm:$0xff]  ;;  %v13205_v57 = vmul.f32 %v12807_v63, %v4112_v41 }
0x154d   :  { %v13189_v36 = vmul.f32 %v9165_v59, %v4112_v41  ;;  %v13194_v43 = vmul.f32 %v9166_v40, %v4112_v41 }
0x154f   :  { %v4102_v14 = vpop.f32.mrf.mxu0 }
0x1550   :  { %v4103_v28 = vadd.f32 %v13085_v24, %v4102_v14  ;;  %v13184_v14 = vmul.f32 %v9164_v6, %v4112_v41  ;;  %v13202_v6 = vmul.f32 %v12795_v49, %v4112_v41 }
0x1552   :  { %v4113_v37 = vmul.f32 0.5, %v4103_v28  ;;  %v13179_v0 = vpack.c.bf16 %v4103_v28, %v4101_v12  ;;  %v9167_v12 = vld [vmem:[%s16245_s3 + $0x100] sm:$0xff] }
0x1553   :  { %v13199_v28 = vmul.f32 %v9167_v12, %v4112_v41 }
0x1554   :  { %4196 = vrot.lane.b32.xlu1 %v13179_v0, %s9404_s7  ;;  %v13210_v59 = vmul.f32 %v12759_v39, %v4113_v37  ;;  %v13213_v40 = vmul.f32 %v12752_v16, %v4113_v37  ;;  %v13216_v31 = vmul.f32 %v12766_v45, %v4113_v37  ;;  %v13219_v12 = vmul.f32 %v12773_v60, %v4113_v37 }
0x1555   :  { %v13222_v49 = vmul.f32 %v12781_v23, %v4113_v37  ;;  %v13225_v63 = vmul.f32 %v12788_v29, %v4113_v37  ;;  %v13228_v41 = vmul.f32 %v12801_v4, %v4113_v37  ;;  %v13231_v39 = vmul.f32 %v12814_v1, %v4113_v37  ;;  %v9168_v23 = vld [vmem:[%s16245_s3 + $0x20] sm:$0xff]  ;;  %v9169_v1 = vld [vmem:[%s16245_s3 + $0x50] sm:$0xff] }
0x1557   :  { %v4105_v29 = vpop.f32.mrf.mxu0 }
0x1558   :  { %v4106_v56 = vadd.f32 %v13085_v24, %v4105_v29  ;;  %v9170_v29 = vld [vmem:[%s16245_s3 + $0x80] sm:$0xff] }
0x155a   :  { %v4114_v45 = vmul.f32 0.5, %v4106_v56 }
0x155c   :  { %v4120_v4 = vmul.f32 %v9168_v23, %v4114_v45  ;;  %v4126_v16 = vmul.f32 %v9169_v1, %v4114_v45  ;;  %v4132_v7 = vmul.f32 %v9170_v29, %v4114_v45  ;;  %v9172_v23 = vld [vmem:[%s16245_s3 + $0xe0] sm:$0xff]  ;;  %v13278_v1 = vmul.f32 %v12863_v38, %v4114_v45 }
0x155d   :  { %v13270_v8 = vmul.f32 %v9172_v23, %v4114_v45  ;;  %v13281_v29 = vmul.f32 %v12877_v34, %v4114_v45 }
0x155f   :  { %v4107_v60 = vpop.f32.mrf.mxu0 }
0x1560   :  { %v4108_v17 = vadd.f32 %v13085_v24, %v4107_v60  ;;  %v9171_v24 = vld [vmem:[%s16245_s3 + $0xb0] sm:$0xff] }
0x1561   :  { %v13265_v60 = vmul.f32 %v9171_v24, %v4114_v45 }
0x1562   :  { %v4115_v37 = vmul.f32 0.5, %v4108_v17  ;;  %v13257_v54 = vpack.c.bf16 %v4108_v17, %v4106_v56  ;;  %v9173_v17 = vld [vmem:[%s16245_s3 + $0x110] sm:$0xff] }
0x1563   :  { %v13275_v56 = vmul.f32 %v9173_v17, %v4114_v45 }
0x1564   :  { %4198 = vrot.lane.b32.xlu0 %v13257_v54, %s9404_s7  ;;  %v4121_v24 = vmul.f32 %v12827_v47, %v4115_v37  ;;  %v4127_v23 = vmul.f32 %v12820_v20, %v4115_v37  ;;  %v4133_v33 = vmul.f32 %v12834_v61, %v4115_v37  ;;  %v13289_v42 = vmul.f32 %v12841_v30, %v4115_v37 }
0x1565   :  { %v13292_v17 = vmul.f32 %v12849_v5, %v4115_v37  ;;  %v13295_v38 = vmul.f32 %v12856_v48, %v4115_v37  ;;  %v13298_v34 = vmul.f32 %v12870_v52, %v4115_v37  ;;  %v13301_v45 = vmul.f32 %v12884_v13, %v4115_v37 }
0x1566   :  { %v4166_v47 = vpack.c.bf16 %v4121_v24, %v4120_v4  ;;  %v4169_v58 = vpack.c.bf16 %v4127_v23, %v4126_v16  ;;  %v4172_v20 = vpack.c.bf16 %v4133_v33, %v4132_v7  ;;  %v4175_v61 = vpack.c.bf16 %v13289_v42, %v13265_v60  ;;  %v9174_v24 = vld [vmem:[%s16180_s9 + $0x8] sm:$0xff]  ;;  %v9175_v23 = vld [vmem:[%s16180_s9] sm:$0xff] }
0x1567   :  { %v4178_v30 = vpack.c.bf16 %v13292_v17, %v13270_v8  ;;  %v4181_v5 = vpack.c.bf16 %v13295_v38, %v13275_v56  ;;  %v4184_v48 = vpack.c.bf16 %v13298_v34, %v13278_v1  ;;  %v4187_v52 = vpack.c.bf16 %v13301_v45, %v13281_v29  ;;  %v9198_v45 = vld [vmem:[%s16253_s26 + $0x90] sm:$0xff] }
0x1568   :  { %v16314_v42 = vpack.c.bf16 %v13222_v49, %v13194_v43  ;;  %v16317_v38 = vpack.c.bf16 %v13146_v46, %v13120_v15 }
0x159e   :  { %v4195_v16 = vpop.permute.xlu2 %4194 }
0x159f   :  { %v4273_v37 = vsel %vm794_vm1, %v4195_v16, 0  ;;  %v16307_v16 = vpack.c.bf16 %v13131_v62, %v13097_v25  ;;  %v9180_v62 = vld [vmem:[%s16253_s26] sm:$0xff] }
0x15c6   :  { %v4197_v33 = vpop.permute.xlu1 %4196 }
0x15c7   :  { %v4276_v7 = vsel %vm794_vm1, %v4197_v33, 0  ;;  %v9177_v33 = vld [vmem:[%s16186_s15 + $0x10] sm:$0xff] }
0x15d6   :  { %v4199_v13 = vpop.permute.xlu0 %4198 }
0x15d7   :  { %v4279_v4 = vsel %vm794_vm1, %v4199_v13, 0  ;;  %v16305_v13 = vpack.c.bf16 %v13128_v51, %v13092_v55  ;;  %v9179_v55 = vld [vmem:[%s16186_s15] sm:$0xff]  ;;  %v16306_v51 = vpack.c.bf16 %v13210_v59, %v13172_v3  ;;  %v16310_v3 = vpack.c.bf16 %v13216_v31, %v13184_v14 }
0x15d8   :  { %4286 = vmatpush.bf16.xpose.msrb.mxu1 %v4279_v4  ;;  %v9176_v4 = vld [vmem:[%s16186_s15 + $0x18] sm:$0xff] }
0x15e0   :  { %4287 = vmatpush.bf16.xpose.msrb.mxu1 %v4276_v7  ;;  %v9178_v7 = vld [vmem:[%s16186_s15 + $0x8] sm:$0xff] }
0x15e8   :  { %4288 = vmatpush.bf16.xpose.msrb.mxu1 %v4273_v37  ;;  %v16308_v37 = vpack.c.bf16 %v13213_v40, %v13177_v50  ;;  %v9182_v40 = vld [vmem:[%s16253_s26 + $0x10] sm:$0xff] }
0x15ef   :  { %7853 = vmatmul.msk.bf16.vlgmr.msrb.gmra.mxu1 %vm794_vm1, %v16305_v13 }
0x15f0   :  { %6882 = vmatpush.bf16.msra.mxu1 %v9174_v24  ;;  %v16309_v24 = vpack.c.bf16 %v13134_v26, %v13104_v11  ;;  %v9181_v11 = vld [vmem:[%s16253_s26 + $0x8] sm:$0xff] }
0x15f4   :  { %6883 = vmatpush.bf16.msra.mxu1 %v9175_v23 }
0x15f8   :  { %7108 = vmatpush.bf16.msrb.mxu1 %v9176_v4  ;;  %v9183_v4 = vld [vmem:[%s16253_s26 + $0x18] sm:$0xff] }
0x15fc   :  { %7109 = vmatpush.bf16.msrb.mxu1 %v9177_v33 }
0x15ff   :  { %7854 = vmatmul.msk.bf16.gmra.mxu1 %vm794_vm1, %v16306_v51  ;;  %v16312_v51 = vpack.c.bf16 %v13219_v12, %v13189_v36  ;;  %v9186_v36 = vld [vmem:[%s16253_s26 + $0x30] sm:$0xff] }
0x1600   :  { %7110 = vmatpush.bf16.msrb.mxu1 %v9178_v7 }
0x1604   :  { %7111 = vmatpush.bf16.msrb.mxu1 %v9179_v55 }
0x160f   :  { %7855 = vmatmul.msk.bf16.gmra.mxu1 %vm794_vm1, %v4166_v47 }
0x161f   :  { %7856 = vmatmul.msk.bf16.gmra.mxu1 %vm794_vm1, %v16307_v16 }
0x162f   :  { %7857 = vmatmul.msk.bf16.gmra.mxu1 %vm794_vm1, %v16308_v37 }
0x163f   :  { %7858 = vmatmul.msk.bf16.gmra.mxu1 %vm794_vm1, %v4169_v58 }
0x164f   :  { %7859 = vmatmul.msk.bf16.gmra.mxu1 %vm794_vm1, %v16309_v24  ;;  %v9185_v24 = vld [vmem:[%s16253_s26 + $0x28] sm:$0xff] }
0x165f   :  { %7860 = vmatmul.msk.bf16.gmra.mxu1 %vm794_vm1, %v16310_v3 }
0x166c   :  { %v4290_v25 = vpop.f32.mrf.mxu1 }
0x166d   :  { %v4291_v50 = vadd.f32 %v9180_v62, %v4290_v25 }
0x166f   :  { %7861 = vmatmul.msk.bf16.gmra.mxu1 %vm794_vm1, %v4172_v20  ;;  %v4410_v58 = vsel %vm1128_vm2, %v4291_v50, -inf  ;;  %v16311_v20 = vpack.c.bf16 %v13137_v27, %v13109_v2  ;;  %v9184_v2 = vld [vmem:[%s16253_s26 + $0x20] sm:$0xff] }
0x1670   :  { %4411 = vmax.xlane.f32.xlu0 %v4410_v58 }
0x1674   :  { %v4292_v59 = vpop.f32.mrf.mxu1 }
0x1675   :  { %v4293_v26 = vadd.f32 %v9181_v11, %v4292_v59  ;;  %v9187_v11 = vld [vmem:[%s16253_s26 + $0x38] sm:$0xff] }
0x1677   :  { %v4413_v31 = vsel %vm1128_vm2, %v4293_v26, -inf }
0x1678   :  { %4414 = vmax.xlane.f32.xlu2 %v4413_v31 }
0x167c   :  { %v4295_v14 = vpop.f32.mrf.mxu1 }
0x167d   :  { %v13372_v47 = vadd.f32 %v9182_v40, %v4295_v14  ;;  %v16313_v40 = vpack.c.bf16 %v13140_v19, %v13114_v18  ;;  %v16315_v18 = vpack.c.bf16 %v13143_v44, %v13117_v35  ;;  %v9188_v19 = vld [vmem:[%s16253_s26 + $0x40] sm:$0xff] }
0x167f   :  { %7862 = vmatmul.msk.bf16.gmra.mxu1 %vm794_vm1, %v16311_v20  ;;  %v4416_v23 = vsel %vm1128_vm2, %v13372_v47, -inf }
0x1680   :  { %4417 = vmax.xlane.f32.xlu1 %v4416_v23 }
0x1684   :  { %v4297_v13 = vpop.f32.mrf.mxu1 }
0x1685   :  { %v4298_v33 = vadd.f32 %v9183_v4, %v4297_v13  ;;  %v16316_v4 = vpack.c.bf16 %v13225_v63, %v13199_v28 }
0x1687   :  { %v4419_v7 = vsel %vm1128_vm2, %v4298_v33, -inf }
0x1688   :  { %4420 = vmax.xlane.f32.xlu0 %v4419_v7 }
0x168c   :  { %v4300_v55 = vpop.f32.mrf.mxu1 }
0x168d   :  { %v13387_v27 = vadd.f32 %v9184_v2, %v4300_v55 }
0x168f   :  { %7863 = vmatmul.msk.bf16.gmra.mxu1 %vm794_vm1, %v16312_v51  ;;  %v4422_v16 = vsel %vm1128_vm2, %v13387_v27, -inf }
0x1690   :  { %4423 = vmax.xlane.f32.xlu0 %v4422_v16 }
0x1694   :  { %v4302_v37 = vpop.f32.mrf.mxu1 }
0x1695   :  { %v13398_v3 = vadd.f32 %v9185_v24, %v4302_v37 }
0x1697   :  { %v4425_v25 = vsel %vm1128_vm2, %v13398_v3, -inf }
0x1698   :  { %4426 = vmax.xlane.f32.xlu2 %v4425_v25 }
0x169c   :  { %v4305_v62 = vpop.f32.mrf.mxu1 }
0x169d   :  { %v13405_v12 = vadd.f32 %v9186_v36, %v4305_v62 }
0x169f   :  { %7864 = vmatmul.msk.bf16.gmra.mxu1 %vm794_vm1, %v4175_v61  ;;  %v4428_v58 = vsel %vm1128_vm2, %v13405_v12, -inf }
0x16a0   :  { %4429 = vmax.xlane.f32.xlu1 %v4428_v58 }
0x16a4   :  { %v4307_v59 = vpop.f32.mrf.mxu1 }
0x16a5   :  { %v4308_v31 = vadd.f32 %v9187_v11, %v4307_v59 }
0x16a7   :  { %v4431_v14 = vsel %vm1128_vm2, %v4308_v31, -inf }
0x16a8   :  { %4432 = vmax.xlane.f32.xlu0 %v4431_v14  ;;  %v16318_v14 = vpack.c.bf16 %v13228_v41, %v13202_v6 }
0x16ac   :  { %v4310_v60 = vpop.f32.mrf.mxu1 }
0x16af   :  { %7865 = vmatmul.msk.bf16.gmra.mxu1 %vm794_vm1, %v16313_v40 }
0x16b4   :  { %v4312_v61 = vpop.f32.mrf.mxu1 }
0x16bc   :  { %4966 = vrot.lane.b32.xlu0 %v13257_v54, %s9405_s6  ;;  %v13431_v20 = vpop.f32.mrf.mxu1  ;;  %v13440_v54 = vadd.f32 %v9188_v19, %v4310_v60 }
0x16be   :  { %v4434_v8 = vsel %vm1128_vm2, %v13440_v54, -inf }
0x16bf   :  { %7866 = vmatmul.msk.bf16.gmra.mxu1 %vm794_vm1, %v16314_v42 }
0x16cf   :  { %7867 = vmatmul.msk.bf16.gmra.mxu1 %vm794_vm1, %v4178_v30  ;;  %v4317_v30 = vpop.f32.mrf.mxu1 }
0x16d7   :  { %v4320_v7 = vpop.f32.mrf.mxu1 }
0x16df   :  { %7868 = vmatmul.msk.bf16.gmra.mxu1 %vm794_vm1, %v16315_v18 }
0x16e3   :  { %v4412_v43 = vpop.xlane.xlu0 %4411 }
0x16e4   :  { %v4554_v49 = vsub.f32 %v4291_v50, %v4412_v43 }
0x16e6   :  { %v4602_v17 = vmul.f32 1.442695, %v4554_v49  ;;  %4435 = vmax.xlane.f32.xlu0 %v4434_v8 }
0x16e8   :  { %8529 = vpow2.f32 %v4602_v17 }
0x16eb   :  { %v4415_v23 = vpop.xlane.xlu2 %4414 }
0x16ec   :  { %v4555_v13 = vsub.f32 %v4293_v26, %v4415_v23  ;;  %v13456_v26 = vpop.f32.mrf.mxu1 }
0x16ee   :  { %v13444_v35 = vpop.eup %8529  ;;  %v4604_v44 = vmul.f32 1.442695, %v4555_v13 }
0x16ef   :  { %7869 = vmatmul.msk.bf16.gmra.mxu1 %vm794_vm1, %v16316_v4  ;;  %v4698_v50 = vsel %vm1128_vm2, %v13444_v35, 0.0 }
0x16f0   :  { %8531 = vpow2.f32 %v4604_v44  ;;  %4699 = vadd.xlane.f32.xlu2 %v4698_v50 }
0x16f3   :  { %v4418_v42 = vpop.xlane.xlu1 %4417 }
0x16f4   :  { %v13462_v28 = vpop.f32.mrf.mxu1  ;;  %v4556_v18 = vsub.f32 %v13372_v47, %v4418_v42 }
0x16f6   :  { %v13452_v55 = vpop.eup %8531  ;;  %v4606_v41 = vmul.f32 1.442695, %v4556_v18 }
0x16f7   :  { %v4701_v2 = vsel %vm1128_vm2, %v13452_v55, 0.0 }
0x16f8   :  { %4702 = vadd.xlane.f32.xlu1 %v4701_v2 }
0x16fb   :  { %v4421_v51 = vpop.xlane.xlu0 %4420 }
0x16fc   :  { %v4557_v16 = vsub.f32 %v4298_v33, %v4421_v51  ;;  %v9189_v33 = vld [vmem:[%s16253_s26 + $0x58] sm:$0xff]  ;;  %v13475_v56 = vpop.f32.mrf.mxu1 }
0x16fd   :  { %v13473_v25 = vadd.f32 %v9189_v33, %v4317_v30  ;;  %v9192_v30 = vld [vmem:[%s16253_s26 + $0x50] sm:$0xff] }
0x16fe   :  { %v4608_v37 = vmul.f32 1.442695, %v4557_v16 }
0x16ff   :  { %7870 = vmatmul.msk.bf16.gmra.mxu1 %vm794_vm1, %v4181_v5  ;;  %v4443_v5 = vsel %vm1128_vm2, %v13473_v25, -inf }
0x1700   :  { %8533 = vpow2.f32 %v4608_v37  ;;  %v9193_v37 = vld [vmem:[%s16253_s26 + $0x68] sm:$0xff] }
0x1703   :  { %v4424_v36 = vpop.xlane.xlu0 %4423 }
0x1704   :  { %v13492_v15 = vpop.f32.mrf.mxu1 }
0x1706   :  { %v13464_v63 = vpop.eup %8533 }
0x1707   :  { %v4707_v24 = vsel %vm1128_vm2, %v13464_v63, 0.0 }
0x1708   :  { %4964 = vrot.lane.b32.xlu2 %v13179_v0, %s9405_s6  ;;  %4708 = vadd.xlane.f32.xlu0 %v4707_v24  ;;  %v9190_v0 = vld [vmem:[%s16253_s26 + $0x60] sm:$0xff] }
0x1709   :  { %v13488_v62 = vadd.f32 %v9190_v0, %v4320_v7  ;;  %v16319_v7 = vpack.c.bf16 %v13149_v53, %v13123_v21  ;;  %v13555_v21 = vadd.f32 %v9193_v37, %v13456_v26  ;;  %v9195_v26 = vld [vmem:[%s16253_s26 + $0x70] sm:$0xff]  ;;  %v9201_v37 = vld [vmem:[%s16253_s26 + $0xa8] sm:$0xff] }
0x170a   :  { %v13573_v0 = vadd.f32 %v9195_v26, %v13462_v28 }
0x170b   :  { %v4446_v58 = vsel %vm1128_vm2, %v13488_v62, -inf  ;;  %v4427_v6 = vpop.xlane.xlu2 %4426  ;;  %v4449_v24 = vsel %vm1128_vm2, %v13555_v21, -inf }
0x170c   :  { %v4559_v8 = vsub.f32 %v13398_v3, %v4427_v6  ;;  %v13524_v3 = vadd.f32 %v9192_v30, %v13431_v20 }
0x170e   :  { %v4612_v17 = vmul.f32 1.442695, %v4559_v8 }
0x170f   :  { %7871 = vmatmul.msk.bf16.gmra.mxu1 %vm794_vm1, %v16317_v38  ;;  %v9194_v38 = vld [vmem:[%s16253_s26 + $0x78] sm:$0xff] }
0x1710   :  { %4444 = vmax.xlane.f32.xlu0 %v4443_v5  ;;  %v13567_v5 = vadd.f32 %v9194_v38, %v13475_v56  ;;  %v4452_v56 = vsel %vm1128_vm2, %v13573_v0, -inf }
0x1711   :  { %4962 = vrot.lane.b32.xlu1 %v13099_v22, %s9405_s6  ;;  %v13498_v22 = vpop.f32.mrf.mxu1 }
0x1713   :  { %v4430_v23 = vpop.xlane.xlu1 %4429 }
0x1714   :  { %v4560_v13 = vsub.f32 %v13405_v12, %v4430_v23 }
0x1716   :  { %v4614_v4 = vmul.f32 1.442695, %v4560_v13  ;;  %v9199_v13 = vld [vmem:[%s16184_s13 + $0x8] sm:$0xff] }
0x1718   :  { %4447 = vmax.xlane.f32.xlu0 %v4446_v58  ;;  %v4455_v58 = vsel %vm1128_vm2, %v13567_v5, -inf }
0x1719   :  { %v13510_v43 = vpop.f32.mrf.mxu1 }
0x171b   :  { %v4433_v46 = vpop.xlane.xlu0 %4432 }
0x171c   :  { %v4561_v59 = vsub.f32 %v4308_v31, %v4433_v46  ;;  %v9191_v31 = vld [vmem:[%s16253_s26 + $0x48] sm:$0xff]  ;;  %v9196_v46 = vld [vmem:[%s16253_s26 + $0x80] sm:$0xff] }
0x171d   :  { %v13508_v19 = vadd.f32 %v9191_v31, %v4312_v61  ;;  %v4558_v61 = vsub.f32 %v13387_v27, %v4424_v36  ;;  %v4440_v27 = vsel %vm1128_vm2, %v13524_v3, -inf  ;;  %v16320_v36 = vpack.c.bf16 %v13231_v39, %v13205_v57 }
0x171e   :  { %v4616_v11 = vmul.f32 1.442695, %v4561_v59  ;;  %v13587_v28 = vadd.f32 %v9196_v46, %v13492_v15 }
0x171f   :  { %7872 = vmatmul.msk.bf16.gmra.mxu1 %vm794_vm1, %v16318_v14  ;;  %v4437_v47 = vsel %vm1128_vm2, %v13508_v19, -inf  ;;  %v4610_v1 = vmul.f32 1.442695, %v4558_v61 }
0x1720   :  { %8535 = vpow2.f32 %v4616_v11  ;;  %v4458_v57 = vsel %vm1128_vm2, %v13587_v28, -inf }
0x1721   :  { %8537 = vpow2.f32 %v4606_v41 }
0x1722   :  { %8539 = vpow2.f32 %v4612_v17 }
0x1723   :  { %8541 = vpow2.f32 %v4610_v1 }
0x1724   :  { %8543 = vpow2.f32 %v4614_v4 }
0x1726   :  { %v13500_v40 = vpop.eup %8535 }
0x1727   :  { %v4719_v60 = vsel %vm1128_vm2, %v13500_v40, 0.0  ;;  %v13526_v34 = vpop.eup %8537 }
0x1728   :  { %4720 = vadd.xlane.f32.xlu0 %v4719_v60  ;;  %v4704_v44 = vsel %vm1128_vm2, %v13526_v34, 0.0  ;;  %v13535_v20 = vpop.eup %8539 }
0x1729   :  { %v13537_v50 = vpop.eup %8541  ;;  %v4713_v12 = vsel %vm1128_vm2, %v13535_v20, 0.0 }
0x172a   :  { %v4710_v51 = vsel %vm1128_vm2, %v13537_v50, 0.0  ;;  %v13549_v16 = vpop.eup %8543 }
0x172b   :  { %v4716_v53 = vsel %vm1128_vm2, %v13549_v16, 0.0 }
0x172e   :  { %v4967_v49 = vpop.permute.xlu0 %4966 }
0x172f   :  { %7873 = vmatmul.msk.bf16.gmra.mxu1 %vm794_vm1, %v4184_v48  ;;  %5048 = vmatpush.bf16.msrb.mxu0 %v4967_v49  ;;  %v13528_v48 = vpop.f32.mrf.mxu1 }
0x1731   :  { %4438 = vmax.xlane.f32.xlu2 %v4437_v47 }
0x1737   :  { %v13545_v2 = vpop.f32.mrf.mxu1 }
0x1739   :  { %4441 = vmax.xlane.f32.xlu2 %v4440_v27 }
0x173b   :  { %4705 = vadd.xlane.f32.xlu1 %v4704_v44 }
0x173f   :  { %7874 = vmatmul.msk.bf16.gmra.mxu1 %vm794_vm1, %v16319_v7  ;;  %v13561_v33 = vpop.f32.mrf.mxu1 }
0x1741   :  { %4714 = vadd.xlane.f32.xlu2 %v4713_v12 }
0x1743   :  { %4711 = vadd.xlane.f32.xlu1 %v4710_v51 }
0x1747   :  { %v4345_v59 = vpop.f32.mrf.mxu1 }
0x1749   :  { %4717 = vadd.xlane.f32.xlu2 %v4716_v53 }
0x174b   :  { %4450 = vmax.xlane.f32.xlu1 %v4449_v24  ;;  %v9202_v24 = vld [vmem:[%s16253_s26 + $0xb0] sm:$0xff] }
0x174c   :  { %v13648_v38 = vadd.f32 %v9202_v24, %v4345_v59 }
0x174f   :  { %7875 = vmatmul.msk.bf16.gmra.mxu1 %vm794_vm1, %v16320_v36  ;;  %v13592_v42 = vpop.f32.mrf.mxu1 }
0x1751   :  { %4456 = vmax.xlane.f32.xlu2 %v4455_v58 }
0x1753   :  { %4453 = vmax.xlane.f32.xlu1 %v4452_v56  ;;  %v4476_v56 = vsel %vm1128_vm2, %v13648_v38, -inf }
0x1759   :  { %4459 = vmax.xlane.f32.xlu2 %v4458_v57  ;;  %v4436_v39 = vpop.xlane.xlu0 %4435 }
0x175a   :  { %v4562_v11 = vsub.f32 %v13440_v54, %v4436_v39  ;;  %v9197_v54 = vld [vmem:[%s16253_s26 + $0x88] sm:$0xff] }
0x175b   :  { %v13606_v31 = vadd.f32 %v9197_v54, %v13498_v22 }
0x175c   :  { %v4618_v14 = vmul.f32 1.442695, %v4562_v11 }
0x175d   :  { %v4461_v29 = vsel %vm1128_vm2, %v13606_v31, -inf }
0x175e   :  { %8545 = vpow2.f32 %v4618_v14 }
0x175f   :  { %7876 = vmatmul.msk.bf16.gmra.mxu1 %vm794_vm1, %v4187_v52  ;;  %v13614_v52 = vadd.f32 %v9198_v45, %v13510_v43 }
0x1761   :  { %v4464_v49 = vsel %vm1128_vm2, %v13614_v52, -inf }
0x1763   :  { %v4700_v60 = vpop.xlane.xlu2 %4699 }
0x1764   :  { %v13598_v15 = vpop.eup %8545 }
0x1765   :  { %v4722_v18 = vsel %vm1128_vm2, %v13598_v15, 0.0 }
0x1766   :  { %4723 = vadd.xlane.f32.xlu0 %v4722_v18 }
0x176b   :  { %v4965_v6 = vpop.permute.xlu2 %4964  ;;  %v4703_v41 = vpop.xlane.xlu1 %4702 }
0x176c   :  { %5049 = vmatpush.bf16.msrb.mxu0 %v4965_v6  ;;  %8547 = vrcp.f32 %v4703_v41  ;;  %v9203_v41 = vld [vmem:[%s16253_s26 + $0x98] sm:$0xff] }
0x176d   :  { %8549 = vrcp.f32 %v4700_v60 }
0x176e   :  { %4462 = vmax.xlane.f32.xlu0 %v4461_v29 }
0x1772   :  { %v8548_v8 = vpop.eup %8547 }
0x1773   :  { %v8550_v47 = vpop.eup %8549  ;;  %v4891_v61 = vmul.f32 %v8548_v8, %v13452_v55  ;;  %v9200_v55 = vld [vmem:[%s16184_s13] sm:$0xff] }
0x1774   :  { %v4890_v17 = vmul.f32 %v8550_v47, %v13444_v35 }
0x1776   :  { %4465 = vmax.xlane.f32.xlu0 %v4464_v49  ;;  %v4938_v43 = vpack.c.bf16 %v4891_v61, %v4890_v17  ;;  %v13669_v49 = vadd.f32 %v9203_v41, %v13528_v48 }
0x1778   :  { %v4467_v8 = vsel %vm1128_vm2, %v13669_v49, -inf }
0x177b   :  { %v4709_v22 = vpop.xlane.xlu0 %4708 }
0x1783   :  { %v4963_v30 = vpop.permute.xlu1 %4962  ;;  %v4445_v23 = vpop.xlane.xlu0 %4444 }
0x1784   :  { %v4565_v1 = vsub.f32 %v13473_v25, %v4445_v23  ;;  %5050 = vmatpush.bf16.msrb.mxu0 %v4963_v30  ;;  %v9204_v30 = vld [vmem:[%s16253_s26 + $0xa0] sm:$0xff] }
0x1785   :  { %v13678_v48 = vadd.f32 %v9204_v30, %v13545_v2 }
0x1786   :  { %v4624_v27 = vmul.f32 1.442695, %v4565_v1 }
0x1787   :  { %7877 = vmatmul.msk.bf16.vlgmr.msrb.gmra.mxu0 %vm1128_vm2, %v4938_v43 }
0x1788   :  { %7068 = vmatpush.bf16.msra.mxu0 %v9199_v13  ;;  %8551 = vpow2.f32 %v4624_v27 }
0x178b   :  { %v4448_v35 = vpop.xlane.xlu0 %4447 }
0x178c   :  { %7069 = vmatpush.bf16.msra.mxu0 %v9200_v55  ;;  %v4566_v44 = vsub.f32 %v13488_v62, %v4448_v35  ;;  %v13641_v62 = vadd.f32 %v9201_v37, %v13561_v33  ;;  %v4470_v35 = vsel %vm1128_vm2, %v13678_v48, -inf }
0x178e   :  { %v13629_v25 = vpop.eup %8551  ;;  %v4626_v4 = vmul.f32 1.442695, %v4566_v44  ;;  %v4473_v53 = vsel %vm1128_vm2, %v13641_v62, -inf }
0x178f   :  { %v4731_v7 = vsel %vm1128_vm2, %v13629_v25, 0.0 }
0x1790   :  { %8553 = vpow2.f32 %v4626_v4  ;;  %4732 = vadd.xlane.f32.xlu2 %v4731_v7 }
0x1796   :  { %v13633_v12 = vpop.eup %8553 }
0x1797   :  { %v4734_v51 = vsel %vm1128_vm2, %v13633_v12, 0.0 }
0x1798   :  { %4735 = vadd.xlane.f32.xlu2 %v4734_v51 }
0x179b   :  { %v4721_v7 = vpop.xlane.xlu0 %4720 }
0x17a0   :  { %4474 = vmax.xlane.f32.xlu2 %v4473_v53 }
0x17a4   :  { %v4439_v26 = vpop.xlane.xlu2 %4438 }
0x17a5   :  { %v4563_v36 = vsub.f32 %v13508_v19, %v4439_v26 }
0x17a7   :  { %v4620_v58 = vmul.f32 1.442695, %v4563_v36 }
0x17a8   :  { %4477 = vmax.xlane.f32.xlu2 %v4476_v56 }
0x17a9   :  { %8555 = vpow2.f32 %v4620_v58 }
0x17aa   :  { %8557 = vrcp.f32 %v4709_v22 }
0x17ac   :  { %v4442_v33 = vpop.xlane.xlu2 %4441 }
0x17ad   :  { %v4564_v46 = vsub.f32 %v13524_v3, %v4442_v33 }
0x17ae   :  { %v4706_v57 = vpop.xlane.xlu1 %4705 }
0x17af   :  { %v13654_v39 = vpop.eup %8555  ;;  %v4622_v11 = vmul.f32 1.442695, %v4564_v46  ;;  %8559 = vrcp.f32 %v4706_v57 }
0x17b0   :  { %v4725_v59 = vsel %vm1128_vm2, %v13654_v39, 0.0  ;;  %v8558_v19 = vpop.eup %8557 }
0x17b1   :  { %8561 = vpow2.f32 %v4622_v11  ;;  %4726 = vadd.xlane.f32.xlu1 %v4725_v59  ;;  %v4893_v18 = vmul.f32 %v8558_v19, %v13464_v63 }
0x17b4   :  { %v4715_v14 = vpop.xlane.xlu2 %4714 }
0x17b5   :  { %v8560_v60 = vpop.eup %8559 }
0x17b6   :  { %v4892_v54 = vmul.f32 %v8560_v60, %v13526_v34  ;;  %v4712_v6 = vpop.xlane.xlu1 %4711  ;;  %v9207_v60 = vld [vmem:[%s16253_s26 + $0xc0] sm:$0xff] }
0x17b7   :  { %v13660_v29 = vpop.eup %8561  ;;  %8563 = vrcp.f32 %v4712_v6 }
0x17b8   :  { %v4728_v3 = vsel %vm1128_vm2, %v13660_v29, 0.0  ;;  %v4939_v45 = vpack.c.bf16 %v4893_v18, %v4892_v54  ;;  %8565 = vrcp.f32 %v4715_v14 }
0x17b9   :  { %4729 = vadd.xlane.f32.xlu1 %v4728_v3 }
0x17ba   :  { %7878 = vmatmul.msk.bf16.gmra.mxu0 %vm1128_vm2, %v4939_v45 }
0x17bc   :  { %v4718_v63 = vpop.xlane.xlu2 %4717 }
0x17bd   :  { %v8564_v47 = vpop.eup %8563 }
0x17be   :  { %v4451_v34 = vpop.xlane.xlu1 %4450  ;;  %v8566_v17 = vpop.eup %8565  ;;  %v4894_v23 = vmul.f32 %v8564_v47, %v13537_v50 }
0x17bf   :  { %v4567_v22 = vsub.f32 %v13555_v21, %v4451_v34  ;;  %v4895_v43 = vmul.f32 %v8566_v17, %v13535_v20 }
0x17c1   :  { %v4628_v61 = vmul.f32 1.442695, %v4567_v22  ;;  %4468 = vmax.xlane.f32.xlu1 %v4467_v8  ;;  %v4940_v44 = vpack.c.bf16 %v4895_v43, %v4894_v23  ;;  %v9209_v43 = vld [vmem:[%s16253_s26 + $0xd8] sm:$0xff] }
0x17c3   :  { %8567 = vpow2.f32 %v4628_v61 }
0x17c4   :  { %v4457_v1 = vpop.xlane.xlu2 %4456 }
0x17c5   :  { %v4569_v21 = vsub.f32 %v13567_v5, %v4457_v1  ;;  %v4350_v5 = vpop.f32.mrf.mxu1 }
0x17c6   :  { %v4454_v13 = vpop.xlane.xlu1 %4453  ;;  %v13723_v18 = vadd.f32 %v9207_v60, %v4350_v5 }
0x17c7   :  { %v4632_v27 = vmul.f32 1.442695, %v4569_v21  ;;  %v4568_v55 = vsub.f32 %v13573_v0, %v4454_v13 }
0x17c8   :  { %v4482_v41 = vsel %vm1128_vm2, %v13723_v18, -inf }
0x17c9   :  { %v13686_v4 = vpop.eup %8567  ;;  %8569 = vpow2.f32 %v4632_v27  ;;  %v4630_v2 = vmul.f32 1.442695, %v4568_v55  ;;  %4471 = vmax.xlane.f32.xlu1 %v4470_v35  ;;  %v9210_v55 = vld [vmem:[%s16253_s26 + $0xe0] sm:$0xff] }
0x17ca   :  { %8571 = vrcp.f32 %v4718_v63  ;;  %7879 = vmatmul.msk.bf16.gmra.mxu0 %vm1128_vm2, %v4940_v44  ;;  %v4737_v20 = vsel %vm1128_vm2, %v13686_v4, 0.0  ;;  %v9208_v63 = vld [vmem:[%s16253_s26 + $0xd0] sm:$0xff] }
0x17cb   :  { %8573 = vpow2.f32 %v4630_v2  ;;  %4738 = vadd.xlane.f32.xlu0 %v4737_v20 }
0x17cc   :  { %v4460_v50 = vpop.xlane.xlu2 %4459  ;;  %8575 = vrcp.f32 %v4721_v7 }
0x17cd   :  { %v4570_v0 = vsub.f32 %v13587_v28, %v4460_v50  ;;  %v9205_v28 = vld [vmem:[%s16253_s26 + $0xb8] sm:$0xff]  ;;  %v4352_v11 = vpop.f32.mrf.mxu1 }
0x17ce   :  { %v13705_v33 = vadd.f32 %v9205_v28, %v13592_v42  ;;  %v9206_v42 = vld [vmem:[%s16253_s26 + $0xc8] sm:$0xff] }
0x17cf   :  { %v13692_v51 = vpop.eup %8569  ;;  %v4634_v37 = vmul.f32 1.442695, %v4570_v0 }
0x17d0   :  { %v8572_v53 = vpop.eup %8571  ;;  %v4743_v24 = vsel %vm1128_vm2, %v13692_v51, 0.0 }
0x17d1   :  { %v13696_v26 = vpop.eup %8573  ;;  %8577 = vpow2.f32 %v4634_v37  ;;  %4744 = vadd.xlane.f32.xlu1 %v4743_v24  ;;  %v4896_v56 = vmul.f32 %v8572_v53, %v13549_v16  ;;  %v4479_v16 = vsel %vm1128_vm2, %v13705_v33, -inf }
0x17d2   :  { %v4740_v36 = vsel %vm1128_vm2, %v13696_v26, 0.0  ;;  %v8576_v58 = vpop.eup %8575 }
0x17d3   :  { %4741 = vadd.xlane.f32.xlu0 %v4740_v36  ;;  %v4897_v46 = vmul.f32 %v8576_v58, %v13500_v40  ;;  %v13718_v40 = vadd.f32 %v9206_v42, %v4352_v11 }
0x17d5   :  { %v4941_v19 = vpack.c.bf16 %v4897_v46, %v4896_v56  ;;  %v4485_v54 = vsel %vm1128_vm2, %v13718_v40, -inf  ;;  %v4355_v6 = vpop.f32.mrf.mxu1 }
0x17d6   :  { %v13733_v34 = vadd.f32 %v9208_v63, %v4355_v6  ;;  %v9212_v63 = vld [vmem:[%s16253_s26 + $0x100] sm:$0xff] }
0x17d7   :  { %v13708_v57 = vpop.eup %8577 }
0x17d8   :  { %v4746_v59 = vsel %vm1128_vm2, %v13708_v57, 0.0  ;;  %v4488_v8 = vsel %vm1128_vm2, %v13733_v34, -inf }
0x17d9   :  { %4747 = vadd.xlane.f32.xlu1 %v4746_v59  ;;  %v4724_v14 = vpop.xlane.xlu0 %4723 }
0x17da   :  { %7880 = vmatmul.msk.bf16.gmra.mxu0 %vm1128_vm2, %v4941_v19 }
0x17db   :  { %4480 = vmax.xlane.f32.xlu0 %v4479_v16  ;;  %v9211_v16 = vld [vmem:[%s16253_s26 + $0xf8] sm:$0xff] }
0x17dd   :  { %v4357_v1 = vpop.f32.mrf.mxu1 }
0x17e1   :  { %4486 = vmax.xlane.f32.xlu1 %v4485_v54  ;;  %v4463_v3 = vpop.xlane.xlu0 %4462 }
0x17e2   :  { %v4571_v45 = vsub.f32 %v13606_v31, %v4463_v3 }
0x17e3   :  { %4483 = vmax.xlane.f32.xlu0 %v4482_v41 }
0x17e4   :  { %v4636_v22 = vmul.f32 1.442695, %v4571_v45 }
0x17e5   :  { %v4360_v27 = vpop.f32.mrf.mxu1 }
0x17e6   :  { %8579 = vpow2.f32 %v4636_v22  ;;  %v13756_v35 = vadd.f32 %v9210_v55, %v4360_v27 }
0x17e8   :  { %v4494_v2 = vsel %vm1128_vm2, %v13756_v35, -inf }
0x17e9   :  { %4489 = vmax.xlane.f32.xlu1 %v4488_v8  ;;  %v4466_v47 = vpop.xlane.xlu0 %4465 }
0x17ea   :  { %v4572_v61 = vsub.f32 %v13614_v52, %v4466_v47  ;;  %v13749_v52 = vadd.f32 %v9209_v43, %v4357_v1 }
0x17ec   :  { %v13738_v31 = vpop.eup %8579  ;;  %v4638_v17 = vmul.f32 1.442695, %v4572_v61  ;;  %v4491_v13 = vsel %vm1128_vm2, %v13749_v52, -inf }
0x17ed   :  { %v4749_v30 = vsel %vm1128_vm2, %v13738_v31, 0.0  ;;  %v13760_v20 = vpop.f32.mrf.mxu1 }
0x17ee   :  { %8581 = vpow2.f32 %v4638_v17  ;;  %4750 = vadd.xlane.f32.xlu2 %v4749_v30 }
0x17f4   :  { %v13742_v23 = vpop.eup %8581 }
0x17f5   :  { %v4752_v21 = vsel %vm1128_vm2, %v13742_v23, 0.0  ;;  %v13763_v53 = vpop.f32.mrf.mxu1 }
0x17f6   :  { %4753 = vadd.xlane.f32.xlu2 %v4752_v21 }
0x17fd   :  { %v4367_v11 = vpop.f32.mrf.mxu1 }
0x17fe   :  { %4492 = vmax.xlane.f32.xlu2 %v4491_v13  ;;  %v13779_v42 = vadd.f32 %v9211_v16, %v4367_v11 }
0x1800   :  { %v4503_v45 = vsel %vm1128_vm2, %v13779_v42, -inf }
0x1803   :  { %v4733_v44 = vpop.xlane.xlu2 %4732 }
0x1804   :  { %v13770_v46 = vpop.f32.mrf.mxu0 }
0x1805   :  { %v4370_v41 = vpop.f32.mrf.mxu1 }
0x1806   :  { %4495 = vmax.xlane.f32.xlu2 %v4494_v2  ;;  %v13791_v22 = vadd.f32 %v9212_v63, %v4370_v41 }
0x1808   :  { %v4506_v17 = vsel %vm1128_vm2, %v13791_v22, -inf }
0x180b   :  { %v4736_v7 = vpop.xlane.xlu2 %4735 }
0x180c   :  { %v13783_v3 = vpop.f32.mrf.mxu0 }
0x1813   :  { %v4475_v50 = vpop.xlane.xlu2 %4474 }
0x1814   :  { %v4575_v5 = vsub.f32 %v13641_v62, %v4475_v50 }
0x1816   :  { %v4644_v0 = vmul.f32 1.442695, %v4575_v5 }
0x1818   :  { %8583 = vpow2.f32 %v4644_v0 }
0x181b   :  { %v4478_v37 = vpop.xlane.xlu2 %4477 }
0x181c   :  { %v4576_v24 = vsub.f32 %v13648_v38, %v4478_v37 }
0x181e   :  { %v13766_v36 = vpop.eup %8583  ;;  %v4646_v58 = vmul.f32 1.442695, %v4576_v24 }
0x181f   :  { %v4761_v56 = vsel %vm1128_vm2, %v13766_v36, 0.0 }
0x1820   :  { %8585 = vpow2.f32 %v4646_v58  ;;  %4762 = vadd.xlane.f32.xlu1 %v4761_v56  ;;  %v9213_v56 = vld [vmem:[%s16253_s26 + $0xe8] sm:$0xff] }
0x1821   :  { %8587 = vrcp.f32 %v4724_v14 }
0x1824   :  { %v4727_v28 = vpop.xlane.xlu1 %4726 }
0x1825   :  { %8589 = vrcp.f32 %v4727_v28 }
0x1826   :  { %v13772_v62 = vpop.eup %8585 }
0x1827   :  { %v4764_v59 = vsel %vm1128_vm2, %v13772_v62, 0.0  ;;  %v8588_v38 = vpop.eup %8587 }
0x1828   :  { %4765 = vadd.xlane.f32.xlu1 %v4764_v59  ;;  %v4898_v14 = vmul.f32 %v8588_v38, %v13598_v15 }
0x182b   :  { %v8590_v19 = vpop.eup %8589 }
0x182c   :  { %v4899_v60 = vmul.f32 %v8590_v19, %v13654_v39  ;;  %v4730_v54 = vpop.xlane.xlu1 %4729 }
0x182d   :  { %8591 = vrcp.f32 %v4730_v54 }
0x182e   :  { %v4942_v6 = vpack.c.bf16 %v4899_v60, %v4898_v14  ;;  %8593 = vrcp.f32 %v4733_v44 }
0x1830   :  { %4504 = vmax.xlane.f32.xlu1 %v4503_v45  ;;  %7881 = vmatmul.msk.bf16.gmra.mxu0 %vm1128_vm2, %v4942_v6 }
0x1833   :  { %v8592_v8 = vpop.eup %8591 }
0x1834   :  { %v4469_v15 = vpop.xlane.xlu1 %4468  ;;  %v8594_v30 = vpop.eup %8593  ;;  %v4900_v1 = vmul.f32 %v8592_v8, %v13660_v29  ;;  %v9215_v8 = vld [vmem:[%s16245_s3] sm:$0xff] }
0x1835   :  { %v4573_v39 = vsub.f32 %v13669_v49, %v4469_v15  ;;  %v4901_v21 = vmul.f32 %v8594_v30, %v13629_v25 }
0x1837   :  { %v4640_v47 = vmul.f32 1.442695, %v4573_v39  ;;  %v13794_v61 = vpop.f32.mrf.mxu0  ;;  %v4943_v55 = vpack.c.bf16 %v4901_v21, %v4900_v1 }
0x1838   :  { %4507 = vmax.xlane.f32.xlu1 %v4506_v17 }
0x1839   :  { %8595 = vpow2.f32 %v4640_v47  ;;  %v5172_v47 = vmul.f32 %v9215_v8, %v13770_v46 }
0x183c   :  { %v4472_v43 = vpop.xlane.xlu1 %4471 }
0x183d   :  { %v4574_v13 = vsub.f32 %v13678_v48, %v4472_v43 }
0x183e   :  { %v4739_v27 = vpop.xlane.xlu0 %4738 }
0x183f   :  { %v13801_v49 = vpop.eup %8595  ;;  %v4642_v44 = vmul.f32 1.442695, %v4574_v13  ;;  %v13803_v2 = vpop.f32.mrf.mxu0  ;;  %8597 = vrcp.f32 %v4739_v27 }
0x1840   :  { %7882 = vmatmul.msk.bf16.gmra.mxu0 %vm1128_vm2, %v4943_v55  ;;  %v4755_v50 = vsel %vm1128_vm2, %v13801_v49, 0.0 }
0x1841   :  { %8599 = vpow2.f32 %v4642_v44  ;;  %4756 = vadd.xlane.f32.xlu0 %v4755_v50 }
0x1842   :  { %8601 = vrcp.f32 %v4736_v7  ;;  %v13819_v7 = vadd.f32 %v9213_v56, %v13760_v20  ;;  %v4372_v20 = vpop.f32.mrf.mxu1 }
0x1844   :  { %v4745_v25 = vpop.xlane.xlu1 %4744 }
0x1845   :  { %v8598_v29 = vpop.eup %8597 }
0x1846   :  { %v4742_v5 = vpop.xlane.xlu0 %4741  ;;  %v4903_v58 = vmul.f32 %v8598_v29, %v13686_v4  ;;  %v4497_v4 = vsel %vm1128_vm2, %v13819_v7, -inf }
0x1847   :  { %v13808_v48 = vpop.eup %8599  ;;  %v13810_v0 = vpop.f32.mrf.mxu0  ;;  %8603 = vrcp.f32 %v4742_v5 }
0x1848   :  { %v4758_v37 = vsel %vm1128_vm2, %v13808_v48, 0.0  ;;  %v8602_v24 = vpop.eup %8601  ;;  %8605 = vrcp.f32 %v4745_v25 }
0x1849   :  { %4759 = vadd.xlane.f32.xlu0 %v4758_v37  ;;  %v4902_v28 = vmul.f32 %v8602_v24, %v13633_v12  ;;  %v9214_v12 = vld [vmem:[%s16253_s26 + $0xf0] sm:$0xff] }
0x184a   :  { %v13832_v60 = vadd.f32 %v9214_v12, %v13763_v53  ;;  %v9216_v53 = vld [vmem:[%s16245_s3 + $0x30] sm:$0xff]  ;;  %v4375_v27 = vpop.f32.mrf.mxu1 }
0x184b   :  { %v4944_v38 = vpack.c.bf16 %v4903_v58, %v4902_v28  ;;  %v9219_v12 = vld [vmem:[%s16253_s26 + $0x110] sm:$0xff] }
0x184c   :  { %v4748_v11 = vpop.xlane.xlu1 %4747 }
0x184d   :  { %v8604_v45 = vpop.eup %8603 }
0x184e   :  { %v4481_v59 = vpop.xlane.xlu0 %4480  ;;  %v8606_v39 = vpop.eup %8605  ;;  %v4904_v1 = vmul.f32 %v8604_v45, %v13696_v26 }
0x184f   :  { %v4577_v19 = vsub.f32 %v13705_v33, %v4481_v59  ;;  %v13823_v16 = vpop.f32.mrf.mxu0  ;;  %v4905_v43 = vmul.f32 %v8606_v39, %v13692_v51 }
0x1850   :  { %7883 = vmatmul.msk.bf16.gmra.mxu0 %vm1128_vm2, %v4944_v38 }
0x1851   :  { %v4648_v14 = vmul.f32 1.442695, %v4577_v19  ;;  %4498 = vmax.xlane.f32.xlu0 %v4497_v4  ;;  %v4945_v44 = vpack.c.bf16 %v4905_v43, %v4904_v1  ;;  %v9218_v4 = vld [vmem:[%s16253_s26 + $0x118] sm:$0xff]  ;;  %v9221_v43 = vld [vmem:[%s16253_s26 + $0x128] sm:$0xff] }
0x1852   :  { %v4377_v58 = vpop.f32.mrf.mxu1 }
0x1853   :  { %8607 = vpow2.f32 %v4648_v14  ;;  %v13880_v14 = vadd.f32 %v9218_v4, %v4377_v58 }
0x1854   :  { %v4487_v33 = vpop.xlane.xlu1 %4486 }
0x1855   :  { %v4579_v54 = vsub.f32 %v13718_v40, %v4487_v33  ;;  %v4500_v40 = vsel %vm1128_vm2, %v13832_v60, -inf  ;;  %v13886_v33 = vadd.f32 %v9219_v12, %v4375_v27  ;;  %v9223_v12 = vld [vmem:[%s16245_s3 + $0x10] sm:$0xff] }
0x1856   :  { %v4484_v6 = vpop.xlane.xlu0 %4483 }
0x1857   :  { %v4652_v41 = vmul.f32 1.442695, %v4579_v54  ;;  %v4578_v63 = vsub.f32 %v13723_v18, %v4484_v6  ;;  %v5067_v15 = vpop.f32.mrf.mxu0 }
0x1858   :  { %v5178_v17 = vmul.f32 %v9216_v53, %v5067_v15 }
0x1859   :  { %v13845_v30 = vpop.eup %8607  ;;  %8609 = vpow2.f32 %v4652_v41  ;;  %v4650_v18 = vmul.f32 1.442695, %v4578_v63  ;;  %4501 = vmax.xlane.f32.xlu0 %v4500_v40  ;;  %v9220_v63 = vld [vmem:[%s16253_s26 + $0x120] sm:$0xff] }
0x185a   :  { %v13848_v21 = vadd.f32 %v5178_v17, %v5172_v47  ;;  %v4767_v46 = vsel %vm1128_vm2, %v13845_v30, 0.0  ;;  %v4380_v6 = vpop.f32.mrf.mxu1 }
0x185b   :  { %8611 = vpow2.f32 %v4650_v18  ;;  %4768 = vadd.xlane.f32.xlu2 %v4767_v46  ;;  %v13897_v15 = vadd.f32 %v9220_v63, %v4380_v6 }
0x185c   :  { %v4490_v13 = vpop.xlane.xlu1 %4489 }
0x185d   :  { %v4580_v55 = vsub.f32 %v13733_v34, %v4490_v13  ;;  %v9217_v34 = vld [vmem:[%s16253_s26 + $0x108] sm:$0xff]  ;;  %v4518_v8 = vsel %vm1128_vm2, %v13897_v15, -inf }
0x185e   :  { %v13866_v37 = vadd.f32 %v9217_v34, %v4372_v20 }
0x185f   :  { %v13854_v50 = vpop.eup %8609  ;;  %v4654_v25 = vmul.f32 1.442695, %v4580_v55  ;;  %v9222_v55 = vld [vmem:[%s16253_s26 + $0x130] sm:$0xff] }
0x1860   :  { %7884 = vmatmul.msk.bf16.gmra.mxu0 %vm1128_vm2, %v4945_v44  ;;  %v4773_v26 = vsel %vm1128_vm2, %v13854_v50, 0.0  ;;  %v4509_v19 = vsel %vm1128_vm2, %v13866_v37, -inf }
0x1861   :  { %v13859_v29 = vpop.eup %8611  ;;  %8613 = vpow2.f32 %v4654_v25  ;;  %4774 = vadd.xlane.f32.xlu0 %v4773_v26  ;;  %v4751_v5 = vpop.xlane.xlu2 %4750 }
0x1862   :  { %8615 = vrcp.f32 %v4751_v5  ;;  %v4770_v51 = vsel %vm1128_vm2, %v13859_v29, 0.0  ;;  %v4382_v1 = vpop.f32.mrf.mxu1 }
0x1863   :  { %8617 = vrcp.f32 %v4748_v11  ;;  %4771 = vadd.xlane.f32.xlu2 %v4770_v51 }
0x1867   :  { %v13868_v24 = vpop.eup %8613 }
0x1868   :  { %v8616_v56 = vpop.eup %8615  ;;  %v4776_v28 = vsel %vm1128_vm2, %v13868_v24, 0.0 }
0x1869   :  { %v8618_v59 = vpop.eup %8617  ;;  %4777 = vadd.xlane.f32.xlu0 %v4776_v28  ;;  %v13872_v38 = vpop.xlane.xlu2 %4753  ;;  %v4907_v11 = vmul.f32 %v8616_v56, %v13738_v31  ;;  %v4515_v31 = vsel %vm1128_vm2, %v13880_v14, -inf }
0x186a   :  { %v4906_v20 = vmul.f32 %v8618_v59, %v13708_v57  ;;  %v4512_v57 = vsel %vm1128_vm2, %v13886_v33, -inf  ;;  %v4385_v27 = vpop.f32.mrf.mxu1  ;;  %v13929_v56 = vpop.f32.mrf.mxu0 }
0x186b   :  { %4510 = vmax.xlane.f32.xlu2 %v4509_v19  ;;  %v13920_v44 = vadd.f32 %v9222_v55, %v4385_v27  ;;  %v9227_v27 = vld [vmem:[%s16245_s3 + $0x50] sm:$0xff] }
0x186c   :  { %v4946_v54 = vpack.c.bf16 %v4907_v11, %v4906_v20 }
0x186d   :  { %v4524_v26 = vsel %vm1128_vm2, %v13920_v44, -inf }
0x1870   :  { %7885 = vmatmul.msk.bf16.gmra.mxu0 %vm1128_vm2, %v4946_v54  ;;  %v5174_v54 = vmul.f32 %v9223_v12, %v13794_v61 }
0x1871   :  { %4516 = vmax.xlane.f32.xlu0 %v4515_v31  ;;  %v4493_v45 = vpop.xlane.xlu2 %4492 }
0x1872   :  { %v4581_v41 = vsub.f32 %v13749_v52, %v4493_v45  ;;  %v13926_v51 = vpop.f32.mrf.mxu1 }
0x1873   :  { %4513 = vmax.xlane.f32.xlu2 %v4512_v57 }
0x1874   :  { %v4656_v39 = vmul.f32 1.442695, %v4581_v41 }
0x1876   :  { %8619 = vpow2.f32 %v4656_v39 }
0x1879   :  { %4519 = vmax.xlane.f32.xlu0 %v4518_v8  ;;  %v4496_v47 = vpop.xlane.xlu2 %4495 }
0x187a   :  { %v4582_v53 = vsub.f32 %v13756_v35, %v4496_v47  ;;  %v13913_v35 = vadd.f32 %v9221_v43, %v4382_v1  ;;  %v13931_v11 = vpop.f32.mrf.mxu1  ;;  %v9226_v43 = vld [vmem:[%s16245_s3 + $0x20] sm:$0xff] }
0x187c   :  { %v13902_v52 = vpop.eup %8619  ;;  %v4658_v17 = vmul.f32 1.442695, %v4582_v53  ;;  %v4521_v13 = vsel %vm1128_vm2, %v13913_v35, -inf  ;;  %v9225_v53 = vld [vmem:[%s16253_s26 + $0x148] sm:$0xff] }
0x187d   :  { %v4779_v40 = vsel %vm1128_vm2, %v13902_v52, 0.0 }
0x187e   :  { %8621 = vpow2.f32 %v4658_v17  ;;  %4780 = vadd.xlane.f32.xlu1 %v4779_v40 }
0x1882   :  { %v4392_v63 = vpop.f32.mrf.mxu1 }
0x1883   :  { %v13957_v17 = vadd.f32 %v9225_v53, %v4392_v63 }
0x1884   :  { %v13906_v18 = vpop.eup %8621 }
0x1885   :  { %v4782_v46 = vsel %vm1128_vm2, %v13906_v18, 0.0 }
0x1886   :  { %4783 = vadd.xlane.f32.xlu1 %v4782_v46 }
0x188e   :  { %4522 = vmax.xlane.f32.xlu1 %v4521_v13  ;;  %v5176_v13 = vmul.f32 %v9226_v43, %v13810_v0 }
0x1893   :  { %v4763_v25 = vpop.xlane.xlu1 %4762 }
0x1896   :  { %4525 = vmax.xlane.f32.xlu1 %v4524_v26 }
0x189b   :  { %v13924_v5 = vpop.xlane.xlu1 %4765 }
0x18a3   :  { %v4505_v34 = vpop.xlane.xlu1 %4504 }
0x18a4   :  { %v4585_v58 = vsub.f32 %v13779_v42, %v4505_v34  ;;  %v9224_v42 = vld [vmem:[%s16245_s3 + $0x40] sm:$0xff]  ;;  %v4533_v34 = vsel %vm1128_vm2, %v13957_v17, -inf }
0x18a6   :  { %v4664_v28 = vmul.f32 1.442695, %v4585_v58 }
0x18a8   :  { %8623 = vpow2.f32 %v4664_v28 }
0x18ab   :  { %v4508_v59 = vpop.xlane.xlu1 %4507 }
0x18ac   :  { %v4586_v19 = vsub.f32 %v13791_v22, %v4508_v59 }
0x18ad   :  { %v5072_v4 = vpop.f32.mrf.mxu0 }
0x18ae   :  { %v13934_v20 = vpop.eup %8623  ;;  %v4666_v31 = vmul.f32 1.442695, %v4586_v19  ;;  %v5180_v6 = vmul.f32 %v9224_v42, %v5072_v4 }
0x18af   :  { %v4791_v45 = vsel %vm1128_vm2, %v13934_v20, 0.0 }
0x18b0   :  { %8625 = vpow2.f32 %v4666_v31  ;;  %v13945_v22 = vadd.f32 %v5180_v6, %v5174_v54  ;;  %4792 = vadd.xlane.f32.xlu0 %v4791_v45 }
0x18b1   :  { %8627 = vrcp.f32 %v13872_v38 }
0x18b4   :  { %v4757_v41 = vpop.xlane.xlu0 %4756 }
0x18b5   :  { %8629 = vrcp.f32 %v4757_v41  ;;  %v13948_v57 = vpop.f32.mrf.mxu0 }
0x18b6   :  { %v13950_v61 = vpop.eup %8625 }
0x18b7   :  { %v4794_v39 = vsel %vm1128_vm2, %v13950_v61, 0.0  ;;  %v8628_v8 = vpop.eup %8627 }
0x18b8   :  { %4795 = vadd.xlane.f32.xlu0 %v4794_v39  ;;  %v4908_v38 = vmul.f32 %v8628_v8, %v13742_v23  ;;  %v4395_v23 = vpop.f32.mrf.mxu1 }
0x18bb   :  { %v8630_v47 = vpop.eup %8629 }
0x18bc   :  { %v4909_v40 = vmul.f32 %v8630_v47, %v13801_v49  ;;  %v4760_v1 = vpop.xlane.xlu0 %4759  ;;  %v9228_v49 = vld [vmem:[%s16253_s26 + $0x150] sm:$0xff] }
0x18bd   :  { %v5077_v46 = vpop.f32.mrf.mxu0  ;;  %8631 = vrcp.f32 %v4760_v1  ;;  %v13976_v0 = vadd.f32 %v9228_v49, %v4395_v23  ;;  %v9231_v23 = vld [vmem:[%s16245_s3 + $0x70] sm:$0xff] }
0x18be   :  { %v5182_v55 = vmul.f32 %v9227_v27, %v5077_v46  ;;  %v4947_v26 = vpack.c.bf16 %v4909_v40, %v4908_v38  ;;  %8633 = vrcp.f32 %v4763_v25  ;;  %v9230_v27 = vld [vmem:[%s16253_s26 + $0x138] sm:$0xff] }
0x18bf   :  { %v4536_v54 = vsel %vm1128_vm2, %v13976_v0, -inf }
0x18c0   :  { %v13970_v58 = vadd.f32 %v5182_v55, %v5176_v13  ;;  %4534 = vmax.xlane.f32.xlu0 %v4533_v34  ;;  %7886 = vmatmul.msk.bf16.gmra.mxu0 %vm1128_vm2, %v4947_v26 }
0x18c3   :  { %v8632_v4 = vpop.eup %8631 }
0x18c4   :  { %v4499_v28 = vpop.xlane.xlu0 %4498  ;;  %v8634_v31 = vpop.eup %8633  ;;  %v4910_v42 = vmul.f32 %v8632_v4, %v13808_v48 }
0x18c5   :  { %v4583_v59 = vsub.f32 %v13819_v7, %v4499_v28  ;;  %v13979_v19 = vpop.f32.mrf.mxu0  ;;  %v4911_v6 = vmul.f32 %v8634_v31, %v13766_v36  ;;  %v9229_v7 = vld [vmem:[%s16245_s3 + $0x60] sm:$0xff] }
0x18c7   :  { %v4660_v12 = vmul.f32 1.442695, %v4583_v59  ;;  %v4948_v8 = vpack.c.bf16 %v4911_v6, %v4910_v42 }
0x18c8   :  { %4537 = vmax.xlane.f32.xlu0 %v4536_v54  ;;  %v9232_v54 = vld [vmem:[%s16253_s26 + $0x140] sm:$0xff] }
0x18c9   :  { %8635 = vpow2.f32 %v4660_v12  ;;  %v4397_v12 = vpop.f32.mrf.mxu1 }
0x18cc   :  { %v4502_v45 = vpop.xlane.xlu0 %4501 }
0x18cd   :  { %v4584_v25 = vsub.f32 %v13832_v60, %v4502_v45  ;;  %v5082_v41 = vpop.f32.mrf.mxu0 }
0x18ce   :  { %v5184_v63 = vmul.f32 %v9229_v7, %v5082_v41  ;;  %v4769_v39 = vpop.xlane.xlu2 %4768 }
0x18cf   :  { %v13989_v47 = vpop.eup %8635  ;;  %v4662_v53 = vmul.f32 1.442695, %v4584_v25  ;;  %8637 = vrcp.f32 %v4769_v39 }
0x18d0   :  { %v13992_v38 = vadd.f32 %v13848_v21, %v5184_v63  ;;  %7887 = vmatmul.msk.bf16.gmra.mxu0 %vm1128_vm2, %v4948_v8  ;;  %v4785_v36 = vsel %vm1128_vm2, %v13989_v47, 0.0 }
0x18d1   :  { %8639 = vpow2.f32 %v4662_v53  ;;  %4786 = vadd.xlane.f32.xlu2 %v4785_v36 }
0x18d2   :  { %8641 = vrcp.f32 %v13924_v5  ;;  %v14009_v5 = vadd.f32 %v9230_v27, %v13926_v51 }
0x18d4   :  { %v4775_v48 = vpop.xlane.xlu0 %4774  ;;  %v4527_v51 = vsel %vm1128_vm2, %v14009_v5, -inf }
0x18d5   :  { %v13998_v60 = vpop.f32.mrf.mxu0  ;;  %v8638_v40 = vpop.eup %8637 }
0x18d6   :  { %v4772_v1 = vpop.xlane.xlu2 %4771  ;;  %v4913_v13 = vmul.f32 %v8638_v40, %v13845_v30 }
0x18d7   :  { %v14000_v46 = vpop.eup %8639  ;;  %8643 = vrcp.f32 %v4772_v1  ;;  %v9233_v1 = vld [vmem:[%s16245_s3 + $0x80] sm:$0xff] }
0x18d8   :  { %v4788_v21 = vsel %vm1128_vm2, %v14000_v46, 0.0  ;;  %v8642_v43 = vpop.eup %8641  ;;  %8645 = vrcp.f32 %v4775_v48 }
0x18d9   :  { %4789 = vadd.xlane.f32.xlu2 %v4788_v21  ;;  %v4912_v55 = vmul.f32 %v8642_v43, %v13772_v62 }
0x18db   :  { %v4949_v59 = vpack.c.bf16 %v4913_v13, %v4912_v55 }
0x18dc   :  { %v4778_v26 = vpop.xlane.xlu0 %4777 }
0x18dd   :  { %v5087_v34 = vpop.f32.mrf.mxu0  ;;  %v8644_v45 = vpop.eup %8643 }
0x18de   :  { %v5186_v49 = vmul.f32 %v9231_v23, %v5087_v34  ;;  %v4511_v28 = vpop.xlane.xlu2 %4510  ;;  %v8646_v7 = vpop.eup %8645 }
0x18df   :  { %v4587_v30 = vsub.f32 %v13866_v37, %v4511_v28  ;;  %v14026_v37 = vadd.f32 %v9232_v54, %v13931_v11  ;;  %v4914_v11 = vmul.f32 %v8644_v45, %v13859_v29  ;;  %v4915_v53 = vmul.f32 %v8646_v7, %v13854_v50 }
0x18e0   :  { %v14017_v4 = vadd.f32 %v13945_v22, %v5186_v49  ;;  %7888 = vmatmul.msk.bf16.gmra.mxu0 %vm1128_vm2, %v4949_v59 }
0x18e1   :  { %v4668_v62 = vmul.f32 1.442695, %v4587_v30  ;;  %4528 = vmax.xlane.f32.xlu2 %v4527_v51  ;;  %v4530_v63 = vsel %vm1128_vm2, %v14026_v37, -inf  ;;  %v4950_v43 = vpack.c.bf16 %v4915_v53, %v4914_v11 }
0x18e3   :  { %8647 = vpow2.f32 %v4668_v62 }
0x18e4   :  { %v4517_v22 = vpop.xlane.xlu0 %4516 }
0x18e5   :  { %v4589_v31 = vsub.f32 %v13880_v14, %v4517_v22  ;;  %v14029_v42 = vpop.f32.mrf.mxu0 }
0x18e6   :  { %v4514_v6 = vpop.xlane.xlu2 %4513 }
0x18e7   :  { %v4672_v25 = vmul.f32 1.442695, %v4589_v31  ;;  %v4588_v41 = vsub.f32 %v13886_v33, %v4514_v6  ;;  %v4400_v33 = vpop.f32.mrf.mxu1  ;;  %v9236_v6 = vld [vmem:[%s16253_s26 + $0x160] sm:$0xff] }
0x18e8   :  { %v14077_v45 = vadd.f32 %v9236_v6, %v4400_v33  ;;  %v9239_v6 = vld [vmem:[%s16245_s3 + $0x90] sm:$0xff] }
0x18e9   :  { %v14034_v39 = vpop.eup %8647  ;;  %8649 = vpow2.f32 %v4672_v25  ;;  %v4670_v8 = vmul.f32 1.442695, %v4588_v41  ;;  %4531 = vmax.xlane.f32.xlu2 %v4530_v63 }
0x18ea   :  { %v4797_v14 = vsel %vm1128_vm2, %v14034_v39, 0.0 }
0x18eb   :  { %8651 = vpow2.f32 %v4670_v8  ;;  %4798 = vadd.xlane.f32.xlu1 %v4797_v14  ;;  %v9237_v8 = vld [vmem:[%s16253_s26 + $0x170] sm:$0xff] }
0x18ec   :  { %v4520_v36 = vpop.xlane.xlu0 %4519 }
0x18ed   :  { %v4590_v48 = vsub.f32 %v13897_v15, %v4520_v36  ;;  %v5092_v40 = vpop.f32.mrf.mxu0 }
0x18ee   :  { %v5188_v21 = vmul.f32 %v9233_v1, %v5092_v40 }
0x18ef   :  { %v14044_v13 = vpop.eup %8649  ;;  %v4674_v29 = vmul.f32 1.442695, %v4590_v48  ;;  %v4402_v28 = vpop.f32.mrf.mxu1 }
0x18f0   :  { %v14047_v27 = vadd.f32 %v13970_v58, %v5188_v21  ;;  %7889 = vmatmul.msk.bf16.gmra.mxu0 %vm1128_vm2, %v4950_v43  ;;  %v4803_v50 = vsel %vm1128_vm2, %v14044_v13, 0.0  ;;  %v9234_v58 = vld [vmem:[%s16253_s26 + $0x158] sm:$0xff] }
0x18f1   :  { %v14052_v55 = vpop.eup %8651  ;;  %8653 = vpow2.f32 %v4674_v29  ;;  %v4781_v15 = vpop.xlane.xlu1 %4780  ;;  %4804 = vadd.xlane.f32.xlu2 %v4803_v50  ;;  %v14059_v23 = vadd.f32 %v9234_v58, %v4397_v12  ;;  %v9235_v12 = vld [vmem:[%s16253_s26 + $0x168] sm:$0xff]  ;;  %v9238_v29 = vld [vmem:[%s16253_s26 + $0x178] sm:$0xff] }
0x18f2   :  { %8655 = vrcp.f32 %v4781_v15  ;;  %v4800_v34 = vsel %vm1128_vm2, %v14052_v55, 0.0  ;;  %v14071_v22 = vadd.f32 %v9235_v12, %v4402_v28 }
0x18f3   :  { %8657 = vrcp.f32 %v4778_v26  ;;  %4801 = vadd.xlane.f32.xlu1 %v4800_v34  ;;  %v4539_v26 = vsel %vm1128_vm2, %v14059_v23, -inf }
0x18f7   :  { %v14061_v49 = vpop.eup %8653  ;;  %v4405_v41 = vpop.f32.mrf.mxu1 }
0x18f8   :  { %v8656_v59 = vpop.eup %8655  ;;  %v4806_v30 = vsel %vm1128_vm2, %v14061_v49, 0.0  ;;  %v14088_v11 = vadd.f32 %v9237_v8, %v4405_v41 }
0x18f9   :  { %v8658_v51 = vpop.eup %8657  ;;  %v4784_v62 = vpop.xlane.xlu1 %4783  ;;  %4807 = vadd.xlane.f32.xlu2 %v4806_v30  ;;  %v4917_v54 = vmul.f32 %v8656_v59, %v13902_v52  ;;  %v4545_v52 = vsel %vm1128_vm2, %v14071_v22, -inf }
0x18fa   :  { %v4916_v31 = vmul.f32 %v8658_v51, %v13868_v24  ;;  %v4542_v24 = vsel %vm1128_vm2, %v14077_v45, -inf  ;;  %v4548_v53 = vsel %vm1128_vm2, %v14088_v11, -inf  ;;  %v14109_v59 = vpop.f32.mrf.mxu0 }
0x18fb   :  { %4540 = vmax.xlane.f32.xlu1 %v4539_v26 }
0x18fc   :  { %v4951_v25 = vpack.c.bf16 %v4917_v54, %v4916_v31 }
0x18ff   :  { %v4407_v43 = vpop.f32.mrf.mxu1 }
0x1900   :  { %7890 = vmatmul.msk.bf16.gmra.mxu0 %vm1128_vm2, %v4951_v25 }
0x1901   :  { %v4523_v7 = vpop.xlane.xlu1 %4522  ;;  %4546 = vmax.xlane.f32.xlu2 %v4545_v52 }
0x1902   :  { %v4591_v63 = vsub.f32 %v13913_v35, %v4523_v7 }
0x1903   :  { %4543 = vmax.xlane.f32.xlu1 %v4542_v24 }
0x1904   :  { %v4676_v14 = vmul.f32 1.442695, %v4591_v63 }
0x1906   :  { %8659 = vpow2.f32 %v4676_v14 }
0x1909   :  { %v4526_v36 = vpop.xlane.xlu1 %4525  ;;  %4549 = vmax.xlane.f32.xlu2 %v4548_v53 }
0x190a   :  { %v4592_v33 = vsub.f32 %v13920_v44, %v4526_v36  ;;  %v14104_v44 = vadd.f32 %v9238_v29, %v4407_v43 }
0x190c   :  { %v14093_v35 = vpop.eup %8659  ;;  %v4678_v48 = vmul.f32 1.442695, %v4592_v33  ;;  %v4551_v50 = vsel %vm1128_vm2, %v14104_v44, -inf }
0x190d   :  { %v4809_v40 = vsel %vm1128_vm2, %v14093_v35, 0.0 }
0x190e   :  { %8661 = vpow2.f32 %v4678_v48  ;;  %4810 = vadd.xlane.f32.xlu0 %v4809_v40 }
0x1914   :  { %v14097_v1 = vpop.eup %8661 }
0x1915   :  { %v4812_v21 = vsel %vm1128_vm2, %v14097_v1, 0.0 }
0x1916   :  { %4813 = vadd.xlane.f32.xlu0 %v4812_v21 }
0x191e   :  { %4552 = vmax.xlane.f32.xlu0 %v4551_v50 }
0x1923   :  { %v4793_v15 = vpop.xlane.xlu0 %4792 }
0x192b   :  { %v4796_v34 = vpop.xlane.xlu0 %4795 }
0x1933   :  { %v4535_v58 = vpop.xlane.xlu0 %4534 }
0x1934   :  { %v4595_v28 = vsub.f32 %v13957_v17, %v4535_v58 }
0x1936   :  { %v4684_v30 = vmul.f32 1.442695, %v4595_v28 }
0x1938   :  { %8663 = vpow2.f32 %v4684_v30 }
0x193b   :  { %v4538_v51 = vpop.xlane.xlu0 %4537 }
0x193c   :  { %v4596_v54 = vsub.f32 %v13976_v0, %v4538_v51 }
0x193d   :  { %v5097_v26 = vpop.f32.mrf.mxu0 }
0x193e   :  { %v14112_v12 = vpop.eup %8663  ;;  %v4686_v31 = vmul.f32 1.442695, %v4596_v54  ;;  %v5190_v25 = vmul.f32 %v9239_v6, %v5097_v26 }
0x193f   :  { %v4821_v52 = vsel %vm1128_vm2, %v14112_v12, 0.0 }
0x1940   :  { %8665 = vpow2.f32 %v4686_v31  ;;  %v14120_v17 = vadd.f32 %v13992_v38, %v5190_v25  ;;  %4822 = vadd.xlane.f32.xlu2 %v4821_v52 }
0x1941   :  { %8667 = vrcp.f32 %v4784_v62  ;;  %v9240_v62 = vld [vmem:[%s16245_s3 + $0xa0] sm:$0xff] }
0x1944   :  { %v4787_v41 = vpop.xlane.xlu2 %4786 }
0x1945   :  { %8669 = vrcp.f32 %v4787_v41  ;;  %v14122_v0 = vpop.f32.mrf.mxu0 }
0x1946   :  { %v14124_v7 = vpop.eup %8665 }
0x1947   :  { %v4824_v63 = vsel %vm1128_vm2, %v14124_v7, 0.0  ;;  %v8668_v24 = vpop.eup %8667 }
0x1948   :  { %4825 = vadd.xlane.f32.xlu0 %v4824_v63  ;;  %v4918_v14 = vmul.f32 %v8668_v24, %v13906_v18 }
0x194b   :  { %v8670_v8 = vpop.eup %8669 }
0x194c   :  { %v4919_v53 = vmul.f32 %v8670_v8, %v13989_v47  ;;  %v4790_v38 = vpop.xlane.xlu2 %4789 }
0x194d   :  { %v5102_v36 = vpop.f32.mrf.mxu0  ;;  %8671 = vrcp.f32 %v4790_v38 }
0x194e   :  { %v5192_v33 = vmul.f32 %v9240_v62, %v5102_v36  ;;  %v4952_v48 = vpack.c.bf16 %v4919_v53, %v4918_v14  ;;  %8673 = vrcp.f32 %v4793_v15  ;;  %v9241_v15 = vld [vmem:[%s16245_s3 + $0xb0] sm:$0xff] }
0x1950   :  { %v14134_v40 = vadd.f32 %v14017_v4, %v5192_v33  ;;  %7891 = vmatmul.msk.bf16.gmra.mxu0 %vm1128_vm2, %v4952_v48 }
0x1953   :  { %v8672_v47 = vpop.eup %8671 }
0x1954   :  { %v4529_v21 = vpop.xlane.xlu2 %4528  ;;  %v8674_v50 = vpop.eup %8673  ;;  %v4920_v58 = vmul.f32 %v8672_v47, %v14000_v46 }
0x1955   :  { %v4593_v18 = vsub.f32 %v14009_v5, %v4529_v21  ;;  %v14138_v43 = vpop.f32.mrf.mxu0  ;;  %v4921_v28 = vmul.f32 %v8674_v50, %v13934_v20 }
0x1957   :  { %v4680_v29 = vmul.f32 1.442695, %v4593_v18  ;;  %v4953_v26 = vpack.c.bf16 %v4921_v28, %v4920_v58 }
0x1959   :  { %8675 = vpow2.f32 %v4680_v29 }
0x195c   :  { %v4532_v30 = vpop.xlane.xlu2 %4531 }
0x195d   :  { %v4594_v4 = vsub.f32 %v14026_v37, %v4532_v30  ;;  %v5107_v51 = vpop.f32.mrf.mxu0 }
0x195e   :  { %v5194_v54 = vmul.f32 %v9241_v15, %v5107_v51  ;;  %v4799_v5 = vpop.xlane.xlu1 %4798 }
0x195f   :  { %v14146_v31 = vpop.eup %8675  ;;  %v4682_v6 = vmul.f32 1.442695, %v4594_v4  ;;  %8677 = vrcp.f32 %v4799_v5 }
0x1960   :  { %v14149_v25 = vadd.f32 %v14047_v27, %v5194_v54  ;;  %7892 = vmatmul.msk.bf16.gmra.mxu0 %vm1128_vm2, %v4953_v26  ;;  %v4815_v20 = vsel %vm1128_vm2, %v14146_v31, 0.0 }
0x1961   :  { %8679 = vpow2.f32 %v4682_v6  ;;  %4816 = vadd.xlane.f32.xlu1 %v4815_v20 }
0x1962   :  { %8681 = vrcp.f32 %v4796_v34  ;;  %v9242_v34 = vld [vmem:[%s16245_s3 + $0xc0] sm:$0xff] }
0x1964   :  { %v4805_v46 = vpop.xlane.xlu2 %4804 }
0x1965   :  { %v14154_v37 = vpop.f32.mrf.mxu0  ;;  %v8678_v52 = vpop.eup %8677 }
0x1966   :  { %v4802_v41 = vpop.xlane.xlu1 %4801  ;;  %v4923_v8 = vmul.f32 %v8678_v52, %v14034_v39 }
0x1967   :  { %v14156_v63 = vpop.eup %8679  ;;  %8683 = vrcp.f32 %v4802_v41 }
0x1968   :  { %v4818_v27 = vsel %vm1128_vm2, %v14156_v63, 0.0  ;;  %v8682_v24 = vpop.eup %8681  ;;  %8685 = vrcp.f32 %v4805_v46 }
0x1969   :  { %4819 = vadd.xlane.f32.xlu1 %v4818_v27  ;;  %v4922_v14 = vmul.f32 %v8682_v24, %v13950_v61 }
0x196b   :  { %v4954_v33 = vpack.c.bf16 %v4923_v8, %v4922_v14 }
0x196c   :  { %v4808_v53 = vpop.xlane.xlu2 %4807 }
0x196d   :  { %v5112_v38 = vpop.f32.mrf.mxu0  ;;  %v8684_v50 = vpop.eup %8683 }
0x196e   :  { %v5196_v36 = vmul.f32 %v9242_v34, %v5112_v38  ;;  %v4541_v62 = vpop.xlane.xlu1 %4540  ;;  %v4924_v4 = vmul.f32 %v8684_v50, %v14052_v55 }
0x196f   :  { %v4597_v48 = vsub.f32 %v14059_v23, %v4541_v62  ;;  %v8686_v23 = vpop.eup %8685 }
0x1970   :  { %v14167_v21 = vadd.f32 %v14120_v17, %v5196_v36  ;;  %7893 = vmatmul.msk.bf16.gmra.mxu0 %vm1128_vm2, %v4954_v33 }
0x1971   :  { %v4688_v39 = vmul.f32 1.442695, %v4597_v48 }
0x1973   :  { %8687 = vpow2.f32 %v4688_v39 }
0x1974   :  { %v4547_v61 = vpop.xlane.xlu2 %4546 }
0x1975   :  { %v4599_v18 = vsub.f32 %v14071_v22, %v4547_v61  ;;  %v14171_v47 = vpop.f32.mrf.mxu0  ;;  %v4925_v22 = vmul.f32 %v8686_v23, %v14044_v13 }
0x1976   :  { %v4544_v29 = vpop.xlane.xlu1 %4543 }
0x1977   :  { %v4692_v58 = vmul.f32 1.442695, %v4599_v18  ;;  %v4598_v28 = vsub.f32 %v14077_v45, %v4544_v29  ;;  %v9243_v45 = vld [vmem:[%s16245_s3 + $0xd0] sm:$0xff]  ;;  %v4955_v6 = vpack.c.bf16 %v4925_v22, %v4924_v4 }
0x1979   :  { %v14174_v30 = vpop.eup %8687  ;;  %8689 = vpow2.f32 %v4692_v58  ;;  %v4690_v17 = vmul.f32 1.442695, %v4598_v28 }
0x197a   :  { %v4827_v51 = vsel %vm1128_vm2, %v14174_v30, 0.0 }
0x197b   :  { %8691 = vpow2.f32 %v4690_v17  ;;  %4828 = vadd.xlane.f32.xlu1 %v4827_v51 }
0x197c   :  { %v4550_v15 = vpop.xlane.xlu2 %4549 }
0x197d   :  { %v4600_v54 = vsub.f32 %v14088_v11, %v4550_v15  ;;  %v5117_v5 = vpop.f32.mrf.mxu0 }
0x197e   :  { %v5198_v26 = vmul.f32 %v9243_v45, %v5117_v5 }
0x197f   :  { %v14184_v20 = vpop.eup %8689  ;;  %v4694_v55 = vmul.f32 1.442695, %v4600_v54 }
0x1980   :  { %v14187_v46 = vadd.f32 %v14134_v40, %v5198_v26  ;;  %7894 = vmatmul.msk.bf16.gmra.mxu0 %vm1128_vm2, %v4955_v6  ;;  %v4833_v13 = vsel %vm1128_vm2, %v14184_v20, 0.0 }
0x1981   :  { %v14192_v52 = vpop.eup %8691  ;;  %8693 = vpow2.f32 %v4694_v55  ;;  %4834 = vadd.xlane.f32.xlu0 %v4833_v13  ;;  %v4811_v11 = vpop.xlane.xlu0 %4810 }
0x1982   :  { %8695 = vrcp.f32 %v4811_v11  ;;  %v4830_v41 = vsel %vm1128_vm2, %v14192_v52, 0.0 }
0x1983   :  { %8697 = vrcp.f32 %v4808_v53  ;;  %4831 = vadd.xlane.f32.xlu2 %v4830_v41 }
0x1985   :  { %v14205_v61 = vpop.f32.mrf.mxu0 }
0x1987   :  { %v14196_v27 = vpop.eup %8693 }
0x1988   :  { %v8696_v40 = vpop.eup %8695  ;;  %v4836_v24 = vsel %vm1128_vm2, %v14196_v27, 0.0 }
0x1989   :  { %v8698_v8 = vpop.eup %8697  ;;  %4837 = vadd.xlane.f32.xlu1 %v4836_v24  ;;  %v4814_v14 = vpop.xlane.xlu0 %4813  ;;  %v4927_v38 = vmul.f32 %v8696_v40, %v14093_v35  ;;  %v9244_v35 = vld [vmem:[%s16245_s3 + $0xe0] sm:$0xff] }
0x198a   :  { %v4926_v34 = vmul.f32 %v8698_v8, %v14061_v49 }
0x198c   :  { %v4956_v36 = vpack.c.bf16 %v4927_v38, %v4926_v34 }
0x1990   :  { %7895 = vmatmul.msk.bf16.gmra.mxu0 %vm1128_vm2, %v4956_v36 }
0x1991   :  { %v4553_v62 = vpop.xlane.xlu0 %4552 }
0x1992   :  { %v4601_v53 = vsub.f32 %v14104_v44, %v4553_v62 }
0x1994   :  { %v4696_v33 = vmul.f32 1.442695, %v4601_v53 }
0x1996   :  { %8699 = vpow2.f32 %v4696_v33 }
0x1997   :  { %8701 = vrcp.f32 %v4814_v14 }
0x199c   :  { %v8700_v48 = vpop.eup %8699 }
0x199d   :  { %v4839_v39 = vsel %vm1128_vm2, %v8700_v48, 0.0  ;;  %v8702_v44 = vpop.eup %8701 }
0x199e   :  { %4840 = vadd.xlane.f32.xlu2 %v4839_v39  ;;  %v4928_v28 = vmul.f32 %v8702_v44, %v14097_v1 }
0x19b3   :  { %v4823_v51 = vpop.xlane.xlu2 %4822 }
0x19bb   :  { %v4826_v26 = vpop.xlane.xlu0 %4825 }
0x19cd   :  { %v5122_v18 = vpop.f32.mrf.mxu0 }
0x19ce   :  { %v5200_v49 = vmul.f32 %v9244_v35, %v5122_v18 }
0x19d0   :  { %v14211_v29 = vadd.f32 %v14149_v25, %v5200_v49 }
0x19d4   :  { %v4817_v50 = vpop.xlane.xlu1 %4816 }
0x19d5   :  { %8703 = vrcp.f32 %v4817_v50 }
0x19db   :  { %v8704_v58 = vpop.eup %8703 }
0x19dc   :  { %v4929_v23 = vmul.f32 %v8704_v58, %v14146_v31  ;;  %v4820_v17 = vpop.xlane.xlu1 %4819 }
0x19dd   :  { %8705 = vrcp.f32 %v4820_v17  ;;  %v14247_v17 = vld [vmem:[%s16245_s3 + $0x8] sm:$0xff] }
0x19de   :  { %v4957_v4 = vpack.c.bf16 %v4929_v23, %v4928_v28  ;;  %8707 = vrcp.f32 %v4823_v51  ;;  %v14254_v51 = vld [vmem:[%s16245_s3 + $0x68] sm:$0xff] }
0x19e0   :  { %7896 = vmatmul.msk.bf16.gmra.mxu0 %vm1128_vm2, %v4957_v4  ;;  %v5173_v4 = vmul.f32 %v14247_v17, %v13783_v3  ;;  %v14268_v3 = vld [vmem:[%s16245_s3 + $0xc8] sm:$0xff] }
0x19e3   :  { %v8706_v22 = vpop.eup %8705 }
0x19e4   :  { %v8708_v15 = vpop.eup %8707  ;;  %v4930_v25 = vmul.f32 %v8706_v22, %v14156_v63  ;;  %v5185_v22 = vmul.f32 %v14254_v51, %v13998_v60 }
0x19e5   :  { %v4931_v54 = vmul.f32 %v8708_v15, %v14112_v12  ;;  %v14222_v12 = vpop.f32.mrf.mxu0 }
0x19e7   :  { %v4958_v45 = vpack.c.bf16 %v4931_v54, %v4930_v25 }
0x19ed   :  { %v5127_v38 = vpop.f32.mrf.mxu0 }
0x19ee   :  { %v4829_v5 = vpop.xlane.xlu1 %4828 }
0x19ef   :  { %8709 = vrcp.f32 %v4829_v5 }
0x19f0   :  { %7897 = vmatmul.msk.bf16.gmra.mxu0 %vm1128_vm2, %v4958_v45  ;;  %8711 = vrcp.f32 %v4826_v26  ;;  %v5197_v45 = vmul.f32 %v14268_v3, %v14171_v47  ;;  %v14275_v26 = vld [vmem:[%s16245_s3 + $0xf0] sm:$0xff]  ;;  %v14287_v47 = vld [vmem:[%s16245_s3 + $0x120] sm:$0xff] }
0x19f4   :  { %v4835_v41 = vpop.xlane.xlu0 %4834 }
0x19f5   :  { %v8710_v1 = vpop.eup %8709  ;;  %v5129_v62 = vpop.f32.mrf.mxu0 }
0x19f6   :  { %v8712_v31 = vpop.eup %8711  ;;  %v4933_v6 = vmul.f32 %v8710_v1, %v14174_v30  ;;  %v4832_v13 = vpop.xlane.xlu2 %4831  ;;  %v5202_v1 = vmul.f32 %v14275_v26, %v5127_v38 }
0x19f7   :  { %v4932_v55 = vmul.f32 %v8712_v31, %v14124_v7  ;;  %8713 = vrcp.f32 %v4832_v13  ;;  %v14293_v13 = vld [vmem:[%s16245_s3 + $0x128] sm:$0xff] }
0x19f8   :  { %8715 = vrcp.f32 %v4835_v41  ;;  %v5244_v41 = vadd.f32 %v14167_v21, %v5202_v1  ;;  %v14312_v21 = vld [vmem:[%s16245_s3 + $0x48] sm:$0xff] }
0x19f9   :  { %v4959_v11 = vpack.c.bf16 %v4933_v6, %v4932_v55 }
0x19fc   :  { %v4838_v30 = vpop.xlane.xlu1 %4837 }
0x19fd   :  { %v8714_v63 = vpop.eup %8713 }
0x19fe   :  { %v8716_v40 = vpop.eup %8715  ;;  %v4934_v24 = vmul.f32 %v8714_v63, %v14192_v52  ;;  %v5132_v52 = vpop.f32.mrf.mxu0 }
0x19ff   :  { %v4935_v8 = vmul.f32 %v8716_v40, %v14184_v20  ;;  %v14300_v40 = vld [vmem:[%s16245_s3 + $0x150] sm:$0xff] }
0x1a00   :  { %7898 = vmatmul.msk.bf16.gmra.mxu0 %vm1128_vm2, %v4959_v11 }
0x1a01   :  { %v4960_v14 = vpack.c.bf16 %v4935_v8, %v4934_v24 }
0x1a06   :  { %v5134_v18 = vpop.f32.mrf.mxu0 }
0x1a0e   :  { %v14229_v20 = vpop.f32.mrf.mxu0 }
0x1a10   :  { %7899 = vmatmul.msk.bf16.gmra.mxu0 %vm1128_vm2, %v4960_v14 }
0x1a11   :  { %v4841_v7 = vpop.xlane.xlu2 %4840 }
0x1a12   :  { %8717 = vrcp.f32 %v4841_v7 }
0x1a13   :  { %8719 = vrcp.f32 %v4838_v30  ;;  %v14306_v30 = vld [vmem:[%s16245_s3 + $0x158] sm:$0xff] }
0x1a16   :  { %v14231_v35 = vpop.f32.mrf.mxu0 }
0x1a18   :  { %v8718_v34 = vpop.eup %8717 }
0x1a19   :  { %v8720_v36 = vpop.eup %8719  ;;  %v4937_v53 = vmul.f32 %v8718_v34, %v8700_v48  ;;  %v5181_v34 = vmul.f32 %v14312_v21, %v13948_v57 }
0x1a1a   :  { %v4936_v33 = vmul.f32 %v8720_v36, %v14196_v27  ;;  %v14240_v27 = vld [vmem:[%s16245_s3 + $0x38] sm:$0xff] }
0x1a1b   :  { %v5179_v48 = vmul.f32 %v14240_v27, %v13929_v56  ;;  %v14261_v56 = vld [vmem:[%s16245_s3 + $0x98] sm:$0xff] }
0x1a1c   :  { %v4961_v39 = vpack.c.bf16 %v4937_v53, %v4936_v33  ;;  %v5191_v25 = vmul.f32 %v14261_v56, %v14122_v0  ;;  %v14281_v0 = vld [vmem:[%s16245_s3 + $0xf8] sm:$0xff] }
0x1a1d   :  { %v5221_v15 = vadd.f32 %v5179_v48, %v5173_v4  ;;  %v5203_v31 = vmul.f32 %v14281_v0, %v5129_v62  ;;  %v14319_v53 = vld [vmem:[%s16245_s3 + $0x18] sm:$0xff]  ;;  %v14333_v48 = vld [vmem:[%s16245_s3 + $0xa8] sm:$0xff] }
0x1a1e   :  { %v5142_v49 = vpop.f32.mrf.mxu0  ;;  %v5175_v33 = vmul.f32 %v14319_v53, %v13803_v2  ;;  %v5193_v4 = vmul.f32 %v14333_v48, %v14138_v43 }
0x1a1f   :  { %v5227_v5 = vadd.f32 %v5221_v15, %v5185_v22  ;;  %v5208_v55 = vmul.f32 %v14287_v47, %v5142_v49  ;;  %v14341_v15 = vld [vmem:[%s16245_s3 + $0xd8] sm:$0xff] }
0x1a20   :  { %7900 = vmatmul.msk.bf16.gmra.mxu0 %vm1128_vm2, %v4961_v39  ;;  %v14326_v39 = vld [vmem:[%s16245_s3 + $0x78] sm:$0xff]  ;;  %v5223_v57 = vadd.f32 %v5181_v34, %v5175_v33 }
0x1a21   :  { %v5233_v60 = vadd.f32 %v5227_v5, %v5191_v25  ;;  %v5250_v14 = vadd.f32 %v5244_v41, %v5208_v55  ;;  %v5187_v49 = vmul.f32 %v14326_v39, %v14029_v42  ;;  %v5199_v42 = vmul.f32 %v14341_v15, %v14205_v61  ;;  %v14354_v5 = vld [vmem:[%s16245_s3 + $0x108] sm:$0xff]  ;;  %v14360_v61 = vld [vmem:[%s16245_s3 + $0x130] sm:$0xff] }
0x1a23   :  { %v5239_v6 = vadd.f32 %v5233_v60, %v5197_v45  ;;  %v5229_v22 = vadd.f32 %v5223_v57, %v5187_v49  ;;  %v5205_v45 = vmul.f32 %v14354_v5, %v5134_v18  ;;  %v14373_v18 = vld [vmem:[%s16245_s3 + $0x160] sm:$0xff]  ;;  %v14406_v49 = vld [vmem:[%s16245_s3 + $0xb8] sm:$0xff] }
0x1a25   :  { %v5245_v63 = vadd.f32 %v5239_v6, %v5203_v31  ;;  %v5235_v25 = vadd.f32 %v5229_v22, %v5193_v4  ;;  %v14366_v31 = vld [vmem:[%s16245_s3 + $0x138] sm:$0xff]  ;;  %v14414_v4 = vld [vmem:[%s16245_s3 + $0xe8] sm:$0xff]  ;;  %v14421_v22 = vld [vmem:[%s16245_s3 + $0x110] sm:$0xff] }
0x1a26   :  { %v5144_v50 = vpop.f32.mrf.mxu0 }
0x1a27   :  { %v5209_v11 = vmul.f32 %v14293_v13, %v5144_v50  ;;  %v5241_v60 = vadd.f32 %v5235_v25, %v5199_v42  ;;  %v14428_v42 = vld [vmem:[%s16245_s3 + $0x118] sm:$0xff] }
0x1a28   :  { %v5207_v25 = vmul.f32 %v14428_v42, %v14231_v35 }
0x1a29   :  { %v5251_v38 = vadd.f32 %v5245_v63, %v5209_v11  ;;  %v5247_v55 = vadd.f32 %v5241_v60, %v5205_v45 }
0x1a5d   :  { %v5147_v44 = vpop.f32.mrf.mxu0 }
0x1a5e   :  { %v5210_v1 = vmul.f32 %v14360_v61, %v5147_v44 }
0x1a65   :  { %v5149_v58 = vpop.f32.mrf.mxu0 }
0x1a6d   :  { %v14233_v28 = vpop.f32.mrf.mxu0 }
0x1a75   :  { %v14235_v23 = vpop.f32.mrf.mxu0 }
0x1a7d   :  { %v5157_v54 = vpop.f32.mrf.mxu0 }
0x1a7e   :  { %v5214_v24 = vmul.f32 %v14300_v40, %v5157_v54  ;;  %v14348_v54 = vld [vmem:[%s16245_s3 + $0x100] sm:$0xff] }
0x1a7f   :  { %v5204_v43 = vmul.f32 %v14348_v54, %v5132_v52  ;;  %v5211_v52 = vmul.f32 %v14366_v31, %v5149_v58 }
0x1a80   :  { %v5256_v36 = vadd.f32 %v5250_v14, %v5214_v24  ;;  %v14379_v24 = vld [vmem:[%s16245_s3 + $0x168] sm:$0xff] }
0x1a81   :  { %v5246_v6 = vadd.f32 %v14187_v46, %v5204_v43  ;;  %v5253_v44 = vadd.f32 %v5247_v55, %v5211_v52  ;;  %v14385_v46 = vld [vmem:[%s16245_s3 + $0x58] sm:$0xff]  ;;  %v14450_v52 = vld [vmem:[%s16245_s3 + $0x170] sm:$0xff] }
0x1a83   :  { %v5252_v63 = vadd.f32 %v5246_v6, %v5210_v1 }
0x1a85   :  { %v5159_v8 = vpop.f32.mrf.mxu0 }
0x1a86   :  { %v5215_v7 = vmul.f32 %v14306_v30, %v5159_v8  ;;  %v5183_v8 = vmul.f32 %v14385_v46, %v13979_v19 }
0x1a88   :  { %v5257_v62 = vadd.f32 %v5251_v38, %v5215_v7  ;;  %v14392_v7 = vld [vmem:[%s16245_s3 + $0x28] sm:$0xff] }
0x1a89   :  { %v5177_v34 = vmul.f32 %v14392_v7, %v13823_v16 }
0x1a8a   :  { %v5262_v50 = vpack.c.bf16 %v5257_v62, %v5256_v36  ;;  %v14399_v36 = vld [vmem:[%s16245_s3 + $0x88] sm:$0xff] }
0x1a8b   :  { %v5189_v62 = vmul.f32 %v14399_v36, %v14109_v59  ;;  %v5225_v19 = vadd.f32 %v5183_v8, %v5177_v34  ;;  %v5201_v59 = vmul.f32 %v14414_v4, %v14222_v12  ;;  %v14435_v12 = vld [vmem:[%s16245_s3 + $0x140] sm:$0xff] }
0x1a8c   :  { %7901 = vmatmul.msk.bf16.vlgmr.msrb.gmra.mxu2 %vm794_vm1, %v5262_v50  ;;  %v5195_v50 = vmul.f32 %v14406_v49, %v14154_v37  ;;  %v5206_v37 = vmul.f32 %v14421_v22, %v14229_v20  ;;  %v5212_v45 = vmul.f32 %v14435_v12, %v14233_v28  ;;  %v14442_v20 = vld [vmem:[%s16245_s3 + $0x148] sm:$0xff]  ;;  %v9278_v8 = vld [vmem:[%s16179_s10] ss:$0 sm:$0xff] }
0x1a8d   :  { %v5162_v2 = vpop.f32.mrf.mxu0  ;;  %v5231_v57 = vadd.f32 %v5225_v19, %v5189_v62  ;;  %v5213_v60 = vmul.f32 %v14442_v20, %v14235_v23 }
0x1a8e   :  { %v5216_v11 = vmul.f32 %v14373_v18, %v5162_v2  ;;  %v5248_v1 = vadd.f32 %v14211_v29, %v5206_v37 }
0x1a8f   :  { %v5237_v2 = vadd.f32 %v5231_v57, %v5195_v50 }
0x1a90   :  { %v5258_v14 = vadd.f32 %v5252_v63, %v5216_v11  ;;  %v5254_v28 = vadd.f32 %v5248_v1, %v5212_v45 }
0x1a91   :  { %v5243_v43 = vadd.f32 %v5237_v2, %v5201_v59 }
0x1a93   :  { %v5249_v35 = vadd.f32 %v5243_v43, %v5207_v25 }
0x1a95   :  { %v5164_v41 = vpop.f32.mrf.mxu0  ;;  %v5255_v11 = vadd.f32 %v5249_v35, %v5213_v60 }
0x1a96   :  { %v5217_v58 = vmul.f32 %v14379_v24, %v5164_v41  ;;  %v14456_v41 = vld [vmem:[%s16245_s3 + $0x178] sm:$0xff] }
0x1a98   :  { %v5259_v38 = vadd.f32 %v5253_v44, %v5217_v58 }
0x1a9a   :  { %v5263_v33 = vpack.c.bf16 %v5259_v38, %v5258_v14 }
0x1a9c   :  { %7902 = vmatmul.msk.bf16.gmra.mxu2 %vm794_vm1, %v5263_v33 }
0x1a9d   :  { %v5167_v16 = vpop.f32.mrf.mxu0 }
0x1a9e   :  { %v5218_v6 = vmul.f32 %v14450_v52, %v5167_v16 }
0x1aa0   :  { %v5260_v63 = vadd.f32 %v5254_v28, %v5218_v6 }
0x1aa5   :  { %v5169_v55 = vpop.f32.mrf.mxu0 }
0x1aa6   :  { %v5219_v23 = vmul.f32 %v14456_v41, %v5169_v55 }
0x1aa8   :  { %v5261_v29 = vadd.f32 %v5255_v11, %v5219_v23 }
0x1aaa   :  { %v5264_v44 = vpack.c.bf16 %v5261_v29, %v5260_v63  ;;  %v16324_v29 = vld [vmem:[#allocation8_spill] sm:$0xff] }
0x1aac   :  { %7903 = vmatmul.msk.bf16.gmra.mxu2 %vm794_vm1, %v5264_v44 }
0x1b0f   :  { %v5283_v58 = vpop.f32.mrf.mxu2 }
0x1b10   :  { %v5284_v14 = vadd.f32 %v9278_v8, %v5283_v58 }
0x1b12   :  { %v5298_v38 = vadd.f32 %v5284_v14, %v13052_v9  ;;  %v16321_v9 = vld [vmem:[#allocation2_spill] sm:$0xff] }
0x1b14   :  { %v5304_v34 = vsel %vm794_vm1, %v5298_v38, 0.0 }
0x1b15   :  { %5305 = vadd.xlane.f32.xlu0 %v5304_v34 }
0x1b17   :  { %v5285_v62 = vpop.f32.mrf.mxu2 }
0x1b18   :  { %v5286_v33 = vadd.f32 %v9278_v8, %v5285_v62 }
0x1b1a   :  { %v5299_v19 = vadd.f32 %v5286_v33, %v13054_v32  ;;  %v16322_v32 = vld [vmem:[#allocation3_spill] sm:$0xff] }
0x1b1c   :  { %v5307_v50 = vsel %vm794_vm1, %v5299_v19, 0.0 }
0x1b1d   :  { %5308 = vadd.xlane.f32.xlu1 %v5307_v50 }
0x1b1f   :  { %v5288_v16 = vpop.f32.mrf.mxu2 }
0x1b20   :  { %v5289_v57 = vadd.f32 %v9278_v8, %v5288_v16 }
0x1b22   :  { %v5300_v59 = vadd.f32 %v5289_v57, %v13064_v10  ;;  %v16323_v10 = vld [vmem:[#allocation4_spill] sm:$0xff] }
0x1b24   :  { %v5310_v2 = vsel %vm794_vm1, %v5300_v59, 0.0 }
0x1b25   :  { %5311 = vadd.xlane.f32.xlu2 %v5310_v2 }
0x1b27   :  { %v5290_v37 = vpop.f32.mrf.mxu2 }
0x1b28   :  { %v5291_v25 = vadd.f32 %v9278_v8, %v5290_v37 }
0x1b2a   :  { %v5301_v43 = vadd.f32 %v5291_v25, %v16321_v9 }
0x1b2c   :  { %v5313_v45 = vsel %vm794_vm1, %v5301_v43, 0.0 }
0x1b2d   :  { %5314 = vadd.xlane.f32.xlu0 %v5313_v45 }
0x1b2f   :  { %v5293_v60 = vpop.f32.mrf.mxu2 }
0x1b30   :  { %v5294_v1 = vadd.f32 %v9278_v8, %v5293_v60 }
0x1b32   :  { %v5302_v35 = vadd.f32 %v5294_v1, %v16322_v32 }
0x1b34   :  { %v5316_v6 = vsel %vm794_vm1, %v5302_v35, 0.0 }
0x1b35   :  { %5317 = vadd.xlane.f32.xlu1 %v5316_v6 }
0x1b37   :  { %v5295_v55 = vpop.f32.mrf.mxu2 }
0x1b38   :  { %v5296_v28 = vadd.f32 %v9278_v8, %v5295_v55 }
0x1b3a   :  { %v5303_v11 = vadd.f32 %v5296_v28, %v16323_v10 }
0x1b3c   :  { %v5319_v23 = vsel %vm794_vm1, %v5303_v11, 0.0 }
0x1b3d   :  { %5320 = vadd.xlane.f32.xlu2 %v5319_v23 }
0x1b88   :  { %v5306_v63 = vpop.xlane.xlu0 %5305 }
0x1b89   :  { %v5322_v44 = vmul.f32 %v5306_v63, %v16324_v29 }
0x1b8b   :  { %v14476_v58 = vsub.f32 %v5298_v38, %v5322_v44 }
0x1b8d   :  { %v5334_v14 = vmul.f32 %v14476_v58, %v14476_v58 }
0x1b8f   :  { %v5340_v34 = vsel %vm794_vm1, %v5334_v14, 0.0 }
0x1b90   :  { %v5309_v62 = vpop.xlane.xlu1 %5308  ;;  %5341 = vadd.xlane.f32.xlu0 %v5340_v34 }
0x1b91   :  { %v5323_v33 = vmul.f32 %v5309_v62, %v16324_v29 }
0x1b93   :  { %v14482_v8 = vsub.f32 %v5299_v19, %v5323_v33 }
0x1b95   :  { %v5335_v50 = vmul.f32 %v14482_v8, %v14482_v8 }
0x1b97   :  { %v5343_v16 = vsel %vm794_vm1, %v5335_v50, 0.0 }
0x1b98   :  { %v5312_v57 = vpop.xlane.xlu2 %5311  ;;  %5344 = vadd.xlane.f32.xlu1 %v5343_v16 }
0x1b99   :  { %v5324_v38 = vmul.f32 %v5312_v57, %v16324_v29 }
0x1b9b   :  { %v14488_v2 = vsub.f32 %v5300_v59, %v5324_v38 }
0x1b9d   :  { %v5336_v37 = vmul.f32 %v14488_v2, %v14488_v2 }
0x1b9f   :  { %v5346_v25 = vsel %vm794_vm1, %v5336_v37, 0.0 }
0x1ba0   :  { %5347 = vadd.xlane.f32.xlu2 %v5346_v25  ;;  %v5315_v9 = vpop.xlane.xlu0 %5314 }
0x1ba1   :  { %v5325_v19 = vmul.f32 %v5315_v9, %v16324_v29 }
0x1ba3   :  { %v14494_v45 = vsub.f32 %v5301_v43, %v5325_v19 }
0x1ba5   :  { %v5337_v60 = vmul.f32 %v14494_v45, %v14494_v45 }
0x1ba7   :  { %v5349_v1 = vsel %vm794_vm1, %v5337_v60, 0.0 }
0x1ba8   :  { %v5318_v32 = vpop.xlane.xlu1 %5317  ;;  %5350 = vadd.xlane.f32.xlu0 %v5349_v1 }
0x1ba9   :  { %v5326_v59 = vmul.f32 %v5318_v32, %v16324_v29 }
0x1bab   :  { %v14500_v6 = vsub.f32 %v5302_v35, %v5326_v59 }
0x1bad   :  { %v5338_v55 = vmul.f32 %v14500_v6, %v14500_v6 }
0x1baf   :  { %v5352_v28 = vsel %vm794_vm1, %v5338_v55, 0.0 }
0x1bb0   :  { %v5321_v10 = vpop.xlane.xlu2 %5320  ;;  %5353 = vadd.xlane.f32.xlu1 %v5352_v28 }
0x1bb1   :  { %v5327_v43 = vmul.f32 %v5321_v10, %v16324_v29 }
0x1bb3   :  { %v14506_v23 = vsub.f32 %v5303_v11, %v5327_v43 }
0x1bb5   :  { %v5339_v63 = vmul.f32 %v14506_v23, %v14506_v23 }
0x1bb7   :  { %v5355_v44 = vsel %vm794_vm1, %v5339_v63, 0.0 }
0x1bb8   :  { %5356 = vadd.xlane.f32.xlu2 %v5355_v44 }
0x1c03   :  { %v5342_v14 = vpop.xlane.xlu0 %5341 }
0x1c04   :  { %v5358_v35 = vmul.f32 %v5342_v14, %v16324_v29 }
0x1c06   :  { %v5364_v34 = vadd.f32 1e-05, %v5358_v35 }
0x1c08   :  { %8721 = vrsqrt.f32 %v5364_v34  ;;  %vm5376_vm12 = vweird.f32 %v5364_v34 }
0x1c0b   :  { %v5345_v62 = vpop.xlane.xlu1 %5344 }
0x1c0c   :  { %v5359_v33 = vmul.f32 %v5345_v62, %v16324_v29 }
0x1c0e   :  { %v8722_v50 = vpop.eup %8721  ;;  %v5365_v16 = vadd.f32 1e-05, %v5359_v33 }
0x1c0f   :  { %v5371_v57 = vmul.f32 %v8722_v50, %v5364_v34  ;;  %vm5377_vm11 = vweird.f32 %v8722_v50 }
0x1c10   :  { %8723 = vrsqrt.f32 %v5365_v16  ;;  %vm5378_vm13 = vmor %vm5376_vm12, %vm5377_vm11  ;;  %vm5386_vm15 = vweird.f32 %v5365_v16 }
0x1c11   :  { %v5372_v11 = vmul.f32 %v8722_v50, %v5371_v57 }
0x1c13   :  { %v5373_v38 = vmul.f32 0.5, %v5372_v11  ;;  %v5348_v37 = vpop.xlane.xlu2 %5347 }
0x1c14   :  { %v5360_v25 = vmul.f32 %v5348_v37, %v16324_v29 }
0x1c15   :  { %v5374_v9 = vsub.f32 1.5, %v5373_v38 }
0x1c16   :  { %v8724_v19 = vpop.eup %8723  ;;  %v5366_v60 = vadd.f32 1e-05, %v5360_v25 }
0x1c17   :  { %v5375_v1 = vmul.f32 %v8722_v50, %v5374_v9  ;;  %v5381_v32 = vmul.f32 %v8724_v19, %v5365_v16  ;;  %vm5387_vm14 = vweird.f32 %v8724_v19 }
0x1c18   :  { %8725 = vrsqrt.f32 %v5366_v60  ;;  %vm5388_vm0 = vmor %vm5386_vm15, %vm5387_vm14  ;;  %vm5396_vm4 = vweird.f32 %v5366_v60 }
0x1c19   :  { %v5382_v59 = vmul.f32 %v8724_v19, %v5381_v32  ;;  %v5379_v55 = vsel %vm5378_vm13, %v8722_v50, %v5375_v1  ;;  %v14519_v50 = vld [vmem:[%s16181_s11] ss:$0 sm:$0xff] }
0x1c1a   :  { %v5430_v14 = vmul.f32 %v5379_v55, %v14476_v58 }
0x1c1b   :  { %v5383_v28 = vmul.f32 0.5, %v5382_v59  ;;  %v5351_v10 = vpop.xlane.xlu0 %5350 }
0x1c1c   :  { %v5361_v43 = vmul.f32 %v5351_v10, %v16324_v29  ;;  %v5436_v11 = vmul.f32 %v14519_v50, %v5430_v14 }
0x1c1d   :  { %v5384_v63 = vsub.f32 1.5, %v5383_v28 }
0x1c1e   :  { %v8726_v44 = vpop.eup %8725  ;;  %v5367_v35 = vadd.f32 1e-05, %v5361_v43 }
0x1c1f   :  { %v5385_v62 = vmul.f32 %v8724_v19, %v5384_v63  ;;  %v5391_v33 = vmul.f32 %v8726_v44, %v5366_v60  ;;  %vm5397_vm3 = vweird.f32 %v8726_v44 }
0x1c20   :  { %8727 = vrsqrt.f32 %v5367_v35  ;;  %vm5398_vm5 = vmor %vm5396_vm4, %vm5397_vm3  ;;  %vm5406_vm7 = vweird.f32 %v5367_v35 }
0x1c21   :  { %v5389_v57 = vsel %vm5388_vm0, %v8724_v19, %v5385_v62  ;;  %v5392_v34 = vmul.f32 %v8726_v44, %v5391_v33  ;;  %v9280_v19 = vld [vmem:[%s16182_s12] ss:$0 sm:$0xff] }
0x1c22   :  { %v5431_v38 = vmul.f32 %v5389_v57, %v14482_v8  ;;  %v14528_v32 = vadd.f32 %v9280_v19, %v5436_v11 }
0x1c23   :  { %v5393_v37 = vmul.f32 0.5, %v5392_v34  ;;  %v5354_v25 = vpop.xlane.xlu1 %5353 }
0x1c24   :  { %v5437_v58 = vmul.f32 %v14519_v50, %v5431_v38  ;;  %v5362_v16 = vmul.f32 %v5354_v25, %v16324_v29 }
0x1c25   :  { %v5394_v9 = vsub.f32 1.5, %v5393_v37 }
0x1c26   :  { %v8728_v1 = vpop.eup %8727  ;;  %v14530_v59 = vadd.f32 %v9280_v19, %v5437_v58  ;;  %v5368_v55 = vadd.f32 1e-05, %v5362_v16 }
0x1c27   :  { %v5395_v28 = vmul.f32 %v8726_v44, %v5394_v9  ;;  %v5401_v8 = vmul.f32 %v8728_v1, %v5367_v35  ;;  %vm5407_vm6 = vweird.f32 %v8728_v1 }
0x1c28   :  { %v5448_v10 = vpack.c.bf16 %v14530_v59, %v14528_v32  ;;  %8729 = vrsqrt.f32 %v5368_v55  ;;  %vm5408_vm9 = vmor %vm5406_vm7, %vm5407_vm6  ;;  %vm5416_vm11 = vweird.f32 %v5368_v55 }
0x1c29   :  { %v5402_v43 = vmul.f32 %v8728_v1, %v5401_v8  ;;  %v5399_v63 = vsel %vm5398_vm5, %v8726_v44, %v5395_v28 }
0x1c2a   :  { %7904 = vmatmul.msk.bf16.vlgmr.msrb.gmra.mxu3 %vm794_vm1, %v5448_v10  ;;  %v5432_v11 = vmul.f32 %v5399_v63, %v14488_v2 }
0x1c2b   :  { %v5403_v14 = vmul.f32 0.5, %v5402_v43  ;;  %v5357_v62 = vpop.xlane.xlu2 %5356 }
0x1c2c   :  { %v5363_v33 = vmul.f32 %v5357_v62, %v16324_v29  ;;  %v5438_v44 = vmul.f32 %v14519_v50, %v5432_v11 }
0x1c2d   :  { %v5404_v57 = vsub.f32 1.5, %v5403_v14 }
0x1c2e   :  { %v8730_v34 = vpop.eup %8729  ;;  %v5369_v38 = vadd.f32 1e-05, %v5363_v33  ;;  %v14540_v43 = vadd.f32 %v9280_v19, %v5438_v44 }
0x1c2f   :  { %v5405_v37 = vmul.f32 %v8728_v1, %v5404_v57  ;;  %v5411_v25 = vmul.f32 %v8730_v34, %v5368_v55  ;;  %vm5417_vm10 = vweird.f32 %v8730_v34 }
0x1c30   :  { %8731 = vrsqrt.f32 %v5369_v38  ;;  %vm5418_vm12 = vmor %vm5416_vm11, %vm5417_vm10  ;;  %vm5426_vm14 = vweird.f32 %v5369_v38 }
0x1c31   :  { %v5409_v60 = vsel %vm5408_vm9, %v8728_v1, %v5405_v37  ;;  %v5412_v58 = vmul.f32 %v8730_v34, %v5411_v25 }
0x1c32   :  { %v5433_v16 = vmul.f32 %v5409_v60, %v14494_v45 }
0x1c33   :  { %v5413_v9 = vmul.f32 0.5, %v5412_v58 }
0x1c34   :  { %v5439_v28 = vmul.f32 %v14519_v50, %v5433_v16 }
0x1c35   :  { %v5414_v8 = vsub.f32 1.5, %v5413_v9 }
0x1c36   :  { %v8732_v10 = vpop.eup %8731  ;;  %v14542_v2 = vadd.f32 %v9280_v19, %v5439_v28 }
0x1c37   :  { %v5415_v63 = vmul.f32 %v8730_v34, %v5414_v8  ;;  %v5421_v35 = vmul.f32 %v8732_v10, %v5369_v38  ;;  %vm5427_vm13 = vweird.f32 %v8732_v10 }
0x1c38   :  { %v5449_v1 = vpack.c.bf16 %v14542_v2, %v14540_v43  ;;  %vm5428_vm15 = vmor %vm5426_vm14, %vm5427_vm13 }
0x1c39   :  { %v5422_v14 = vmul.f32 %v8732_v10, %v5421_v35  ;;  %v5419_v45 = vsel %vm5418_vm12, %v8730_v34, %v5415_v63 }
0x1c3a   :  { %7905 = vmatmul.msk.bf16.gmra.mxu3 %vm794_vm1, %v5449_v1  ;;  %v5434_v57 = vmul.f32 %v5419_v45, %v14500_v6  ;;  %v9281_v6 = vld [vmem:[%s16183_s14] ss:$0 sm:$0xff] }
0x1c3b   :  { %v5423_v62 = vmul.f32 0.5, %v5422_v14 }
0x1c3c   :  { %v5440_v60 = vmul.f32 %v14519_v50, %v5434_v57 }
0x1c3d   :  { %v5424_v33 = vsub.f32 1.5, %v5423_v62 }
0x1c3e   :  { %v5446_v58 = vadd.f32 %v9280_v19, %v5440_v60 }
0x1c3f   :  { %v5425_v11 = vmul.f32 %v8732_v10, %v5424_v33 }
0x1c41   :  { %v5429_v37 = vsel %vm5428_vm15, %v8732_v10, %v5425_v11 }
0x1c42   :  { %v5435_v25 = vmul.f32 %v5429_v37, %v14506_v23 }
0x1c44   :  { %v5441_v55 = vmul.f32 %v14519_v50, %v5435_v25 }
0x1c46   :  { %v5447_v16 = vadd.f32 %v9280_v19, %v5441_v55 }
0x1c48   :  { %v5450_v44 = vpack.c.bf16 %v5447_v16, %v5446_v58 }
0x1c4a   :  { %7906 = vmatmul.msk.bf16.gmra.mxu3 %vm794_vm1, %v5450_v44  ;;  %v9282_v44 = vld [vmem:[%s16185_s16] ss:$0 sm:$0xff] }
0x1cad   :  { %v5469_v34 = vpop.f32.mrf.mxu3 }
0x1cae   :  { %v5470_v9 = vadd.f32 %v9281_v6, %v5469_v34 }
0x1cb0   :  { %v5484_v8 = vmax.f32 %v5470_v9, 0.0 }
0x1cb5   :  { %v5471_v38 = vpop.f32.mrf.mxu3 }
0x1cb6   :  { %v5472_v28 = vadd.f32 %v9281_v6, %v5471_v38 }
0x1cb8   :  { %v5485_v10 = vmax.f32 %v5472_v28, 0.0 }
0x1cba   :  { %v5490_v23 = vpack.c.bf16 %v5485_v10, %v5484_v8 }
0x1cbc   :  { %7907 = vmatmul.msk.bf16.vlgmr.msra.gmra.mxu2 %vm2282_vm8, %v5490_v23 }
0x1cbd   :  { %v5474_v63 = vpop.f32.mrf.mxu3 }
0x1cbe   :  { %v5475_v50 = vadd.f32 %v9281_v6, %v5474_v63 }
0x1cc0   :  { %v5486_v1 = vmax.f32 %v5475_v50, 0.0 }
0x1cc5   :  { %v5476_v35 = vpop.f32.mrf.mxu3 }
0x1cc6   :  { %v5477_v19 = vadd.f32 %v9281_v6, %v5476_v35 }
0x1cc8   :  { %v5487_v14 = vmax.f32 %v5477_v19, 0.0 }
0x1cca   :  { %v5491_v45 = vpack.c.bf16 %v5487_v14, %v5486_v1 }
0x1ccc   :  { %7908 = vmatmul.msk.bf16.gmra.mxu2 %vm2282_vm8, %v5491_v45 }
0x1ccd   :  { %v5479_v62 = vpop.f32.mrf.mxu3 }
0x1cce   :  { %v5480_v33 = vadd.f32 %v9281_v6, %v5479_v62 }
0x1cd0   :  { %v5488_v37 = vmax.f32 %v5480_v33, 0.0 }
0x1cd5   :  { %v5481_v57 = vpop.f32.mrf.mxu3 }
0x1cd6   :  { %v5482_v11 = vadd.f32 %v9281_v6, %v5481_v57 }
0x1cd8   :  { %v5489_v25 = vmax.f32 %v5482_v11, 0.0 }
0x1cda   :  { %v5492_v60 = vpack.c.bf16 %v5489_v25, %v5488_v37 }
0x1cdc   :  { %7909 = vmatmul.msk.bf16.gmra.mxu2 %vm2282_vm8, %v5492_v60 }
0x1d3f   :  { %v5511_v55 = vpop.f32.mrf.mxu2 }
0x1d40   :  { %v5512_v34 = vadd.f32 %v9282_v44, %v5511_v55 }
0x1d42   :  { %v5526_v9 = vadd.f32 %v5512_v34, %v14528_v32 }
0x1d44   :  { %v5532_v38 = vsel %vm794_vm1, %v5526_v9, 0.0 }
0x1d45   :  { %5533 = vadd.xlane.f32.xlu0 %v5532_v38 }
0x1d47   :  { %v5513_v28 = vpop.f32.mrf.mxu2 }
0x1d48   :  { %v5514_v8 = vadd.f32 %v9282_v44, %v5513_v28 }
0x1d4a   :  { %v5527_v6 = vadd.f32 %v5514_v8, %v14530_v59 }
0x1d4c   :  { %v5535_v10 = vsel %vm794_vm1, %v5527_v6, 0.0 }
0x1d4d   :  { %5536 = vadd.xlane.f32.xlu1 %v5535_v10 }
0x1d4f   :  { %v5516_v23 = vpop.f32.mrf.mxu2 }
0x1d50   :  { %v5517_v63 = vadd.f32 %v9282_v44, %v5516_v23 }
0x1d52   :  { %v5528_v50 = vadd.f32 %v5517_v63, %v14540_v43 }
0x1d54   :  { %v5538_v35 = vsel %vm794_vm1, %v5528_v50, 0.0 }
0x1d55   :  { %5539 = vadd.xlane.f32.xlu2 %v5538_v35 }
0x1d57   :  { %v5518_v19 = vpop.f32.mrf.mxu2 }
0x1d58   :  { %v5519_v1 = vadd.f32 %v9282_v44, %v5518_v19 }
0x1d5a   :  { %v5529_v32 = vadd.f32 %v5519_v1, %v14542_v2 }
0x1d5c   :  { %v5541_v14 = vsel %vm794_vm1, %v5529_v32, 0.0 }
0x1d5d   :  { %5542 = vadd.xlane.f32.xlu0 %v5541_v14 }
0x1d5f   :  { %v5521_v45 = vpop.f32.mrf.mxu2 }
0x1d60   :  { %v5522_v62 = vadd.f32 %v9282_v44, %v5521_v45 }
0x1d62   :  { %v5530_v59 = vadd.f32 %v5522_v62, %v5446_v58 }
0x1d64   :  { %v5544_v33 = vsel %vm794_vm1, %v5530_v59, 0.0 }
0x1d65   :  { %5545 = vadd.xlane.f32.xlu1 %v5544_v33 }
0x1d67   :  { %v5523_v57 = vpop.f32.mrf.mxu2 }
0x1d68   :  { %v5524_v11 = vadd.f32 %v9282_v44, %v5523_v57 }
0x1d6a   :  { %v5531_v37 = vadd.f32 %v5524_v11, %v5447_v16 }
0x1d6c   :  { %v5547_v43 = vsel %vm794_vm1, %v5531_v37, 0.0 }
0x1d6d   :  { %5548 = vadd.xlane.f32.xlu2 %v5547_v43 }
0x1db8   :  { %v5534_v25 = vpop.xlane.xlu0 %5533 }
0x1db9   :  { %v5550_v60 = vmul.f32 %v5534_v25, %v16324_v29 }
0x1dbb   :  { %v14572_v55 = vsub.f32 %v5526_v9, %v5550_v60 }
0x1dbd   :  { %v5562_v2 = vmul.f32 %v14572_v55, %v14572_v55 }
0x1dbf   :  { %v5568_v34 = vsel %vm794_vm1, %v5562_v2, 0.0 }
0x1dc0   :  { %v5537_v58 = vpop.xlane.xlu1 %5536  ;;  %5569 = vadd.xlane.f32.xlu0 %v5568_v34 }
0x1dc1   :  { %v5551_v38 = vmul.f32 %v5537_v58, %v16324_v29 }
0x1dc3   :  { %v14578_v28 = vsub.f32 %v5527_v6, %v5551_v38 }
0x1dc5   :  { %v5563_v16 = vmul.f32 %v14578_v28, %v14578_v28 }
0x1dc7   :  { %v5571_v44 = vsel %vm794_vm1, %v5563_v16, 0.0 }
0x1dc8   :  { %5572 = vadd.xlane.f32.xlu1 %v5571_v44  ;;  %v5540_v8 = vpop.xlane.xlu2 %5539 }
0x1dc9   :  { %v5552_v9 = vmul.f32 %v5540_v8, %v16324_v29 }
0x1dcb   :  { %v14584_v10 = vsub.f32 %v5528_v50, %v5552_v9 }
0x1dcd   :  { %v5564_v23 = vmul.f32 %v14584_v10, %v14584_v10 }
0x1dcf   :  { %v5574_v63 = vsel %vm794_vm1, %v5564_v23, 0.0 }
0x1dd0   :  { %5575 = vadd.xlane.f32.xlu2 %v5574_v63  ;;  %v5543_v35 = vpop.xlane.xlu0 %5542 }
0x1dd1   :  { %v5553_v6 = vmul.f32 %v5543_v35, %v16324_v29 }
0x1dd3   :  { %v14590_v19 = vsub.f32 %v5529_v32, %v5553_v6 }
0x1dd5   :  { %v5565_v1 = vmul.f32 %v14590_v19, %v14590_v19 }
0x1dd7   :  { %v5577_v14 = vsel %vm794_vm1, %v5565_v1, 0.0 }
0x1dd8   :  { %v5546_v45 = vpop.xlane.xlu1 %5545  ;;  %5578 = vadd.xlane.f32.xlu0 %v5577_v14 }
0x1dd9   :  { %v5554_v50 = vmul.f32 %v5546_v45, %v16324_v29 }
0x1ddb   :  { %v14596_v62 = vsub.f32 %v5530_v59, %v5554_v50 }
0x1ddd   :  { %v5566_v33 = vmul.f32 %v14596_v62, %v14596_v62 }
0x1ddf   :  { %v5580_v57 = vsel %vm794_vm1, %v5566_v33, 0.0 }
0x1de0   :  { %5581 = vadd.xlane.f32.xlu1 %v5580_v57  ;;  %v5549_v11 = vpop.xlane.xlu2 %5548 }
0x1de1   :  { %v5555_v32 = vmul.f32 %v5549_v11, %v16324_v29 }
0x1de3   :  { %v14602_v43 = vsub.f32 %v5531_v37, %v5555_v32 }
0x1de5   :  { %v5567_v25 = vmul.f32 %v14602_v43, %v14602_v43 }
0x1de7   :  { %v5583_v60 = vsel %vm794_vm1, %v5567_v25, 0.0 }
0x1de8   :  { %5584 = vadd.xlane.f32.xlu2 %v5583_v60 }
0x1e33   :  { %v5570_v2 = vpop.xlane.xlu0 %5569 }
0x1e34   :  { %v5586_v59 = vmul.f32 %v5570_v2, %v16324_v29 }
0x1e36   :  { %v5592_v34 = vadd.f32 1e-05, %v5586_v59 }
0x1e38   :  { %8733 = vrsqrt.f32 %v5592_v34  ;;  %vm5604_vm3 = vweird.f32 %v5592_v34 }
0x1e3b   :  { %v5573_v58 = vpop.xlane.xlu1 %5572 }
0x1e3c   :  { %v5587_v38 = vmul.f32 %v5573_v58, %v16324_v29 }
0x1e3e   :  { %v8734_v16 = vpop.eup %8733  ;;  %v5593_v44 = vadd.f32 1e-05, %v5587_v38 }
0x1e3f   :  { %v5599_v8 = vmul.f32 %v8734_v16, %v5592_v34  ;;  %vm5605_vm0 = vweird.f32 %v8734_v16 }
0x1e40   :  { %8735 = vrsqrt.f32 %v5593_v44  ;;  %vm5606_vm4 = vmor %vm5604_vm3, %vm5605_vm0  ;;  %vm5614_vm6 = vweird.f32 %v5593_v44 }
0x1e41   :  { %v5600_v37 = vmul.f32 %v8734_v16, %v5599_v8 }
0x1e43   :  { %v5601_v9 = vmul.f32 0.5, %v5600_v37  ;;  %v5576_v23 = vpop.xlane.xlu2 %5575 }
0x1e44   :  { %v5588_v63 = vmul.f32 %v5576_v23, %v16324_v29 }
0x1e45   :  { %v5602_v35 = vsub.f32 1.5, %v5601_v9 }
0x1e46   :  { %v8736_v6 = vpop.eup %8735  ;;  %v5594_v1 = vadd.f32 1e-05, %v5588_v63 }
0x1e47   :  { %v5603_v14 = vmul.f32 %v8734_v16, %v5602_v35  ;;  %v5609_v45 = vmul.f32 %v8736_v6, %v5593_v44  ;;  %vm5615_vm5 = vweird.f32 %v8736_v6 }
0x1e48   :  { %8737 = vrsqrt.f32 %v5594_v1  ;;  %vm5616_vm7 = vmor %vm5614_vm6, %vm5615_vm5  ;;  %vm5624_vm10 = vweird.f32 %v5594_v1 }
0x1e49   :  { %v5610_v50 = vmul.f32 %v8736_v6, %v5609_v45  ;;  %v5607_v33 = vsel %vm5606_vm4, %v8734_v16, %v5603_v14  ;;  %v14615_v16 = vld [vmem:[%s16187_s17] ss:$0 sm:$0xff] }
0x1e4a   :  { %v5658_v2 = vmul.f32 %v5607_v33, %v14572_v55 }
0x1e4b   :  { %v5611_v57 = vmul.f32 0.5, %v5610_v50  ;;  %v5579_v11 = vpop.xlane.xlu0 %5578 }
0x1e4c   :  { %v5589_v32 = vmul.f32 %v5579_v11, %v16324_v29  ;;  %v5664_v37 = vmul.f32 %v14615_v16, %v5658_v2 }
0x1e4d   :  { %v5612_v25 = vsub.f32 1.5, %v5611_v57 }
0x1e4e   :  { %v8738_v60 = vpop.eup %8737  ;;  %v5595_v59 = vadd.f32 1e-05, %v5589_v32 }
0x1e4f   :  { %v5613_v58 = vmul.f32 %v8736_v6, %v5612_v25  ;;  %v5619_v38 = vmul.f32 %v8738_v60, %v5594_v1  ;;  %vm5625_vm9 = vweird.f32 %v8738_v60 }
0x1e50   :  { %8739 = vrsqrt.f32 %v5595_v59  ;;  %vm5626_vm11 = vmor %vm5624_vm10, %vm5625_vm9  ;;  %vm5634_vm13 = vweird.f32 %v5595_v59 }
0x1e51   :  { %v5617_v8 = vsel %vm5616_vm7, %v8736_v6, %v5613_v58  ;;  %v5620_v34 = vmul.f32 %v8738_v60, %v5619_v38  ;;  %v9284_v6 = vld [vmem:[%s16188_s18] ss:$0 sm:$0xff] }
0x1e52   :  { %v5659_v9 = vmul.f32 %v5617_v8, %v14578_v28  ;;  %v14624_v45 = vadd.f32 %v9284_v6, %v5664_v37 }
0x1e53   :  { %v5621_v23 = vmul.f32 0.5, %v5620_v34  ;;  %v5582_v63 = vpop.xlane.xlu1 %5581 }
0x1e54   :  { %v5665_v55 = vmul.f32 %v14615_v16, %v5659_v9  ;;  %v5590_v44 = vmul.f32 %v5582_v63, %v16324_v29 }
0x1e55   :  { %v5622_v35 = vsub.f32 1.5, %v5621_v23 }
0x1e56   :  { %v8740_v14 = vpop.eup %8739  ;;  %v14626_v50 = vadd.f32 %v9284_v6, %v5665_v55  ;;  %v5596_v33 = vadd.f32 1e-05, %v5590_v44 }
0x1e57   :  { %v5623_v57 = vmul.f32 %v8738_v60, %v5622_v35  ;;  %v5629_v28 = vmul.f32 %v8740_v14, %v5595_v59  ;;  %vm5635_vm12 = vweird.f32 %v8740_v14 }
0x1e58   :  { %v5676_v11 = vpack.c.bf16 %v14626_v50, %v14624_v45  ;;  %8741 = vrsqrt.f32 %v5596_v33  ;;  %vm5636_vm14 = vmor %vm5634_vm13, %vm5635_vm12  ;;  %vm5644_vm0 = vweird.f32 %v5596_v33 }
0x1e59   :  { %v5630_v32 = vmul.f32 %v8740_v14, %v5629_v28  ;;  %v5627_v25 = vsel %vm5626_vm11, %v8738_v60, %v5623_v57 }
0x1e5a   :  { %7910 = vmatmul.msk.bf16.vlgmr.msra.gmra.mxu3 %vm794_vm1, %v5676_v11  ;;  %v5660_v37 = vmul.f32 %v5627_v25, %v14584_v10 }
0x1e5b   :  { %v5631_v2 = vmul.f32 0.5, %v5630_v32  ;;  %v5585_v58 = vpop.xlane.xlu2 %5584 }
0x1e5c   :  { %v5591_v38 = vmul.f32 %v5585_v58, %v16324_v29  ;;  %v5666_v60 = vmul.f32 %v14615_v16, %v5660_v37 }
0x1e5d   :  { %v5632_v8 = vsub.f32 1.5, %v5631_v2 }
0x1e5e   :  { %v8742_v34 = vpop.eup %8741  ;;  %v5597_v9 = vadd.f32 1e-05, %v5591_v38  ;;  %v14636_v32 = vadd.f32 %v9284_v6, %v5666_v60 }
0x1e5f   :  { %v5633_v23 = vmul.f32 %v8740_v14, %v5632_v8  ;;  %v5639_v63 = vmul.f32 %v8742_v34, %v5596_v33  ;;  %vm5645_vm15 = vweird.f32 %v8742_v34 }
0x1e60   :  { %8743 = vrsqrt.f32 %v5597_v9  ;;  %vm5646_vm3 = vmor %vm5644_vm0, %vm5645_vm15  ;;  %vm5654_vm5 = vweird.f32 %v5597_v9 }
0x1e61   :  { %v5637_v1 = vsel %vm5636_vm14, %v8740_v14, %v5633_v23  ;;  %v5640_v55 = vmul.f32 %v8742_v34, %v5639_v63 }
0x1e62   :  { %v5661_v44 = vmul.f32 %v5637_v1, %v14590_v19 }
0x1e63   :  { %v5641_v35 = vmul.f32 0.5, %v5640_v55 }
0x1e64   :  { %v5667_v57 = vmul.f32 %v14615_v16, %v5661_v44 }
0x1e65   :  { %v5642_v28 = vsub.f32 1.5, %v5641_v35 }
0x1e66   :  { %v8744_v11 = vpop.eup %8743  ;;  %v14638_v10 = vadd.f32 %v9284_v6, %v5667_v57 }
0x1e67   :  { %v5643_v25 = vmul.f32 %v8742_v34, %v5642_v28  ;;  %v5649_v59 = vmul.f32 %v8744_v11, %v5597_v9  ;;  %vm5655_vm4 = vweird.f32 %v8744_v11  ;;  %v14657_v9 = vld [vmem:[%s16244_s29] ss:$0 sm:$0xff]  ;;  %v9287_v28 = vld [vmem:[%s16245_s3 + $0x30] sm:$0xff] }
0x1e68   :  { %v5677_v14 = vpack.c.bf16 %v14638_v10, %v14636_v32  ;;  %vm5656_vm6 = vmor %vm5654_vm5, %vm5655_vm4 }
0x1e69   :  { %v5650_v2 = vmul.f32 %v8744_v11, %v5649_v59  ;;  %v5647_v19 = vsel %vm5646_vm3, %v8742_v34, %v5643_v25 }
0x1e6a   :  { %7911 = vmatmul.msk.bf16.gmra.mxu3 %vm794_vm1, %v5677_v14  ;;  %v5662_v8 = vmul.f32 %v5647_v19, %v14596_v62  ;;  %v9288_v14 = vld [vmem:[%s16245_s3 + $0x60] sm:$0xff]  ;;  %v9289_v19 = vld [vmem:[%s16245_s3 + $0x90] sm:$0xff] }
0x1e6b   :  { %v5651_v58 = vmul.f32 0.5, %v5650_v2 }
0x1e6c   :  { %v5668_v1 = vmul.f32 %v14615_v16, %v5662_v8 }
0x1e6d   :  { %v5652_v38 = vsub.f32 1.5, %v5651_v58 }
0x1e6e   :  { %v14647_v55 = vadd.f32 %v9284_v6, %v5668_v1 }
0x1e6f   :  { %v5653_v37 = vmul.f32 %v8744_v11, %v5652_v38  ;;  %v9290_v38 = vld [vmem:[%s16245_s3 + $0xc0] sm:$0xff] }
0x1e71   :  { %v5657_v23 = vsel %vm5656_vm6, %v8744_v11, %v5653_v37 }
0x1e72   :  { %v5663_v63 = vmul.f32 %v5657_v23, %v14602_v43 }
0x1e74   :  { %v5669_v33 = vmul.f32 %v14615_v16, %v5663_v63 }
0x1e76   :  { %v14649_v44 = vadd.f32 %v9284_v6, %v5669_v33  ;;  %v9286_v6 = vld [vmem:[%s16245_s3] sm:$0xff] }
0x1e78   :  { %v5678_v34 = vpack.c.bf16 %v14649_v44, %v14647_v55 }
0x1e7a   :  { %7912 = vmatmul.msk.bf16.gmra.mxu3 %vm794_vm1, %v5678_v34 }
0x1edd   :  { %v5697_v62 = vpop.f32.mrf.mxu3 }
0x1ede   :  { %v5698_v43 = vadd.f32 %v14657_v9, %v5697_v62 }
0x1ee0   :  { %v5712_v60 = vmul.f32 0.5, %v5698_v43 }
0x1ee2   :  { %v14664_v57 = vmul.f32 %v9286_v6, %v5712_v60  ;;  %v14669_v11 = vmul.f32 %v9287_v28, %v5712_v60  ;;  %v14676_v2 = vmul.f32 %v9288_v14, %v5712_v60  ;;  %v14681_v58 = vmul.f32 %v9289_v19, %v5712_v60  ;;  %v9292_v19 = vld [vmem:[%s16245_s3 + $0x40] sm:$0xff] }
0x1ee3   :  { %v14686_v8 = vmul.f32 %v9290_v38, %v5712_v60  ;;  %v14689_v37 = vmul.f32 %v14275_v26, %v5712_v60  ;;  %v14692_v23 = vmul.f32 %v14287_v47, %v5712_v60  ;;  %v14695_v63 = vmul.f32 %v14300_v40, %v5712_v60 }
0x1ee5   :  { %v5699_v35 = vpop.f32.mrf.mxu3 }
0x1ee6   :  { %v5700_v16 = vadd.f32 %v14657_v9, %v5699_v35 }
0x1ee8   :  { %v5713_v25 = vmul.f32 0.5, %v5700_v16  ;;  %v14671_v59 = vpack.c.bf16 %v5700_v16, %v5698_v43 }
0x1eea   :  { %5796 = vrot.lane.b32.xlu2 %v14671_v59, %s9404_s7  ;;  %v14700_v1 = vmul.f32 %v14247_v17, %v5713_v25  ;;  %v14703_v33 = vmul.f32 %v14240_v27, %v5713_v25  ;;  %v14706_v34 = vmul.f32 %v14254_v51, %v5713_v25  ;;  %v14709_v26 = vmul.f32 %v14261_v56, %v5713_v25 }
0x1eeb   :  { %v14712_v47 = vmul.f32 %v14268_v3, %v5713_v25  ;;  %v14715_v40 = vmul.f32 %v14281_v0, %v5713_v25  ;;  %v14718_v62 = vmul.f32 %v14293_v13, %v5713_v25  ;;  %v14721_v17 = vmul.f32 %v14306_v30, %v5713_v25  ;;  %v9291_v25 = vld [vmem:[%s16245_s3 + $0x10] sm:$0xff] }
0x1eed   :  { %v5702_v0 = vpop.f32.mrf.mxu3 }
0x1eee   :  { %v5703_v35 = vadd.f32 %v14657_v9, %v5702_v0  ;;  %v9293_v0 = vld [vmem:[%s16245_s3 + $0x70] sm:$0xff] }
0x1ef0   :  { %v5714_v16 = vmul.f32 0.5, %v5703_v35 }
0x1ef2   :  { %v14744_v14 = vmul.f32 %v9291_v25, %v5714_v16  ;;  %v14749_v38 = vmul.f32 %v9292_v19, %v5714_v16  ;;  %v9294_v25 = vld [vmem:[%s16245_s3 + $0xa0] sm:$0xff]  ;;  %v9295_v19 = vld [vmem:[%s16245_s3 + $0xd0] sm:$0xff] }
0x1ef3   :  { %v14761_v30 = vmul.f32 %v9294_v25, %v5714_v16  ;;  %v14766_v13 = vmul.f32 %v9295_v19, %v5714_v16 }
0x1ef5   :  { %v5704_v6 = vpop.f32.mrf.mxu3 }
0x1ef6   :  { %v5705_v28 = vadd.f32 %v14657_v9, %v5704_v6  ;;  %v14756_v6 = vmul.f32 %v9293_v0, %v5714_v16  ;;  %v14775_v0 = vmul.f32 %v14373_v18, %v5714_v16 }
0x1ef8   :  { %v5715_v43 = vmul.f32 0.5, %v5705_v28  ;;  %v14751_v60 = vpack.c.bf16 %v5705_v28, %v5703_v35  ;;  %v14769_v35 = vmul.f32 %v14348_v54, %v5714_v16  ;;  %v14772_v28 = vmul.f32 %v14360_v61, %v5714_v16 }
0x1efa   :  { %5798 = vrot.lane.b32.xlu1 %v14751_v60, %s9404_s7  ;;  %v14780_v25 = vmul.f32 %v14319_v53, %v5715_v43  ;;  %v14783_v3 = vmul.f32 %v14312_v21, %v5715_v43  ;;  %v14786_v19 = vmul.f32 %v14326_v39, %v5715_v43  ;;  %v14789_v54 = vmul.f32 %v14333_v48, %v5715_v43 }
0x1efb   :  { %v14792_v61 = vmul.f32 %v14341_v15, %v5715_v43  ;;  %v14795_v18 = vmul.f32 %v14354_v5, %v5715_v43  ;;  %v14798_v16 = vmul.f32 %v14366_v31, %v5715_v43  ;;  %v14801_v53 = vmul.f32 %v14379_v24, %v5715_v43  ;;  %v9297_v24 = vld [vmem:[%s16245_s3 + $0x50] sm:$0xff] }
0x1efc   :  { %v5767_v21 = vpack.c.bf16 %v14780_v25, %v14744_v14  ;;  %v5770_v39 = vpack.c.bf16 %v14783_v3, %v14749_v38  ;;  %v5773_v48 = vpack.c.bf16 %v14786_v19, %v14756_v6  ;;  %v9296_v19 = vld [vmem:[%s16245_s3 + $0x20] sm:$0xff] }
0x1efd   :  { %v5707_v5 = vpop.f32.mrf.mxu3 }
0x1efe   :  { %v5708_v3 = vadd.f32 %v14657_v9, %v5707_v5  ;;  %v9298_v5 = vld [vmem:[%s16245_s3 + $0x80] sm:$0xff] }
0x1f00   :  { %v5716_v38 = vmul.f32 0.5, %v5708_v3 }
0x1f02   :  { %v5722_v31 = vmul.f32 %v9296_v19, %v5716_v38  ;;  %v5728_v15 = vmul.f32 %v9297_v24, %v5716_v38  ;;  %v5734_v14 = vmul.f32 %v9298_v5, %v5716_v38  ;;  %v9300_v19 = vld [vmem:[%s16245_s3 + $0xe0] sm:$0xff]  ;;  %v14843_v24 = vmul.f32 %v14421_v22, %v5716_v38 }
0x1f03   :  { %v14840_v51 = vmul.f32 %v9300_v19, %v5716_v38 }
0x1f05   :  { %v5709_v6 = vpop.f32.mrf.mxu3 }
0x1f06   :  { %v5710_v25 = vadd.f32 %v14657_v9, %v5709_v6  ;;  %v9299_v9 = vld [vmem:[%s16245_s3 + $0xb0] sm:$0xff] }
0x1f07   :  { %v14835_v6 = vmul.f32 %v9299_v9, %v5716_v38 }
0x1f08   :  { %v5717_v43 = vmul.f32 0.5, %v5710_v25  ;;  %v14827_v56 = vpack.c.bf16 %v5710_v25, %v5708_v3  ;;  %v14846_v3 = vmul.f32 %v14435_v12, %v5716_v38  ;;  %v14849_v25 = vmul.f32 %v14450_v52, %v5716_v38 }
0x1f0a   :  { %5800 = vrot.lane.b32.xlu0 %v14827_v56, %s9404_s7  ;;  %v5723_v5 = vmul.f32 %v14392_v7, %v5717_v43  ;;  %v5729_v9 = vmul.f32 %v14385_v46, %v5717_v43  ;;  %v5735_v27 = vmul.f32 %v14399_v36, %v5717_v43  ;;  %v14857_v19 = vmul.f32 %v14406_v49, %v5717_v43 }
0x1f0b   :  { %v14860_v22 = vmul.f32 %v14414_v4, %v5717_v43  ;;  %v14863_v12 = vmul.f32 %v14428_v42, %v5717_v43  ;;  %v14866_v52 = vmul.f32 %v14442_v20, %v5717_v43  ;;  %v14869_v38 = vmul.f32 %v14456_v41, %v5717_v43 }
0x1f0c   :  { %v5768_v7 = vpack.c.bf16 %v5723_v5, %v5722_v31  ;;  %v5771_v29 = vpack.c.bf16 %v5729_v9, %v5728_v15  ;;  %v5774_v46 = vpack.c.bf16 %v5735_v27, %v5734_v14  ;;  %v5777_v36 = vpack.c.bf16 %v14857_v19, %v14835_v6  ;;  %v9303_v19 = vld [vmem:[%s16253_s26 + $0x10] sm:$0xff] }
0x1f0d   :  { %v5780_v49 = vpack.c.bf16 %v14860_v22, %v14840_v51  ;;  %v5783_v4 = vpack.c.bf16 %v14863_v12, %v14843_v24  ;;  %v5786_v42 = vpack.c.bf16 %v14866_v52, %v14846_v3  ;;  %v5789_v20 = vpack.c.bf16 %v14869_v38, %v14849_v25 }
0x1f0e   :  { %v16325_v6 = vpack.c.bf16 %v14700_v1, %v14664_v57  ;;  %v16326_v5 = vpack.c.bf16 %v14703_v33, %v14669_v11  ;;  %v16327_v9 = vpack.c.bf16 %v14706_v34, %v14676_v2  ;;  %v9301_v11 = vld [vmem:[%s16253_s26] sm:$0xff]  ;;  %v16333_v22 = vpack.c.bf16 %v14795_v18, %v14769_v35 }
0x1f0f   :  { %v16334_v12 = vpack.c.bf16 %v14718_v62, %v14692_v23  ;;  %v9312_v23 = vld [vmem:[%s16253_s26 + $0x68] sm:$0xff] }
0x1f44   :  { %v5797_v43 = vpop.permute.xlu2 %5796 }
0x1f45   :  { %v5875_v14 = vsel %vm794_vm1, %v5797_v43, 0  ;;  %v9305_v43 = vld [vmem:[%s16253_s26 + $0x20] sm:$0xff] }
0x1f6c   :  { %v5799_v27 = vpop.permute.xlu1 %5798 }
0x1f6d   :  { %v5878_v15 = vsel %vm794_vm1, %v5799_v27, 0 }
0x1f7c   :  { %v5801_v41 = vpop.permute.xlu0 %5800 }
0x1f7d   :  { %v5881_v31 = vsel %vm794_vm1, %v5801_v41, 0 }
0x1f7e   :  { %5888 = vmatpush.bf16.xpose.msrb.mxu2 %v5881_v31  ;;  %v9304_v31 = vld [vmem:[%s16253_s26 + $0x18] sm:$0xff] }
0x1f86   :  { %5889 = vmatpush.bf16.xpose.msrb.mxu2 %v5878_v15 }
0x1f8e   :  { %5890 = vmatpush.bf16.xpose.msrb.mxu2 %v5875_v14 }
0x1f95   :  { %7913 = vmatmul.msk.bf16.vlgmr.msrb.gmra.mxu2 %vm794_vm1, %v16325_v6 }
0x1fa5   :  { %7914 = vmatmul.msk.bf16.gmra.mxu2 %vm794_vm1, %v5767_v21 }
0x1fb5   :  { %7915 = vmatmul.msk.bf16.gmra.mxu2 %vm794_vm1, %v5768_v7 }
0x1fc5   :  { %7916 = vmatmul.msk.bf16.gmra.mxu2 %vm794_vm1, %v16326_v5 }
0x1fd5   :  { %7917 = vmatmul.msk.bf16.gmra.mxu2 %vm794_vm1, %v5770_v39  ;;  %v16328_v39 = vpack.c.bf16 %v14709_v26, %v14681_v58  ;;  %v16329_v26 = vpack.c.bf16 %v14789_v54, %v14761_v30 }
0x1fe5   :  { %7918 = vmatmul.msk.bf16.gmra.mxu2 %vm794_vm1, %v5771_v29  ;;  %v9302_v29 = vld [vmem:[%s16253_s26 + $0x8] sm:$0xff] }
0x1ff5   :  { %7919 = vmatmul.msk.bf16.gmra.mxu2 %vm794_vm1, %v16327_v9  ;;  %v9306_v9 = vld [vmem:[%s16253_s26 + $0x28] sm:$0xff] }
0x2005   :  { %7920 = vmatmul.msk.bf16.gmra.mxu2 %vm794_vm1, %v5773_v48 }
0x2015   :  { %7921 = vmatmul.msk.bf16.gmra.mxu2 %vm794_vm1, %v5774_v46 }
0x2018   :  { %v5892_v57 = vpop.f32.mrf.mxu2 }
0x2019   :  { %v5893_v1 = vadd.f32 %v9301_v11, %v5892_v57  ;;  %v9307_v11 = vld [vmem:[%s16253_s26 + $0x30] sm:$0xff] }
0x201b   :  { %v6012_v33 = vsel %vm1128_vm2, %v5893_v1, -inf }
0x201c   :  { %6013 = vmax.xlane.f32.xlu0 %v6012_v33 }
0x2020   :  { %v5894_v21 = vpop.f32.mrf.mxu2 }
0x2021   :  { %v5895_v2 = vadd.f32 %v9302_v29, %v5894_v21 }
0x2023   :  { %v6015_v34 = vsel %vm1128_vm2, %v5895_v2, -inf }
0x2024   :  { %6016 = vmax.xlane.f32.xlu1 %v6015_v34  ;;  %v9308_v34 = vld [vmem:[%s16253_s26 + $0x38] sm:$0xff] }
0x2025   :  { %7922 = vmatmul.msk.bf16.gmra.mxu2 %vm794_vm1, %v16328_v39 }
0x2028   :  { %v5897_v48 = vpop.f32.mrf.mxu2 }
0x2029   :  { %v14917_v7 = vadd.f32 %v9303_v19, %v5897_v48  ;;  %v16330_v48 = vpack.c.bf16 %v14712_v47, %v14686_v8  ;;  %v16331_v19 = vpack.c.bf16 %v14792_v61, %v14766_v13 }
0x202b   :  { %v6018_v46 = vsel %vm1128_vm2, %v14917_v7, -inf }
0x202c   :  { %6019 = vmax.xlane.f32.xlu2 %v6018_v46 }
0x2030   :  { %v5899_v41 = vpop.f32.mrf.mxu2 }
0x2031   :  { %v14924_v27 = vadd.f32 %v9304_v31, %v5899_v41  ;;  %v16332_v41 = vpack.c.bf16 %v14715_v40, %v14689_v37 }
0x2033   :  { %v6021_v58 = vsel %vm1128_vm2, %v14924_v27, -inf }
0x2034   :  { %6022 = vmax.xlane.f32.xlu0 %v6021_v58 }
0x2035   :  { %7923 = vmatmul.msk.bf16.gmra.mxu2 %vm794_vm1, %v16329_v26  ;;  %v9310_v26 = vld [vmem:[%s16253_s26 + $0x50] sm:$0xff] }
0x2038   :  { %v5902_v15 = vpop.f32.mrf.mxu2 }
0x2039   :  { %v14935_v14 = vadd.f32 %v9305_v43, %v5902_v15 }
0x203b   :  { %v6024_v6 = vsel %vm1128_vm2, %v14935_v14, -inf }
0x203c   :  { %6025 = vmax.xlane.f32.xlu1 %v6024_v6 }
0x2040   :  { %v5904_v5 = vpop.f32.mrf.mxu2 }
0x2041   :  { %v14942_v57 = vadd.f32 %v9306_v9, %v5904_v5 }
0x2043   :  { %v6027_v30 = vsel %vm1128_vm2, %v14942_v57, -inf }
0x2044   :  { %6028 = vmax.xlane.f32.xlu0 %v6027_v30 }
0x2045   :  { %7924 = vmatmul.msk.bf16.gmra.mxu2 %vm794_vm1, %v5777_v36 }
0x2048   :  { %v5907_v54 = vpop.f32.mrf.mxu2 }
0x2049   :  { %v14950_v33 = vadd.f32 %v9307_v11, %v5907_v54 }
0x204b   :  { %v6030_v21 = vsel %vm1128_vm2, %v14950_v33, -inf }
0x204c   :  { %6031 = vmax.xlane.f32.xlu2 %v6030_v21 }
0x2050   :  { %v5909_v29 = vpop.f32.mrf.mxu2 }
0x2051   :  { %v14957_v39 = vadd.f32 %v9308_v34, %v5909_v29 }
0x2053   :  { %v6033_v36 = vsel %vm1128_vm2, %v14957_v39, -inf }
0x2054   :  { %6034 = vmax.xlane.f32.xlu1 %v6033_v36 }
0x2055   :  { %7925 = vmatmul.msk.bf16.gmra.mxu2 %vm794_vm1, %v16330_v48 }
0x2058   :  { %6566 = vrot.lane.b32.xlu0 %v14751_v60, %s9405_s6  ;;  %v5912_v46 = vpop.f32.mrf.mxu2 }
0x2060   :  { %v5914_v8 = vpop.f32.mrf.mxu2 }
0x2065   :  { %7926 = vmatmul.msk.bf16.gmra.mxu2 %vm794_vm1, %v16331_v19 }
0x2068   :  { %v5917_v47 = vpop.f32.mrf.mxu2 }
0x2069   :  { %v15001_v15 = vadd.f32 %v9310_v26, %v5917_v47 }
0x206b   :  { %v6042_v18 = vsel %vm1128_vm2, %v15001_v15, -inf }
0x206d   :  { %6568 = vrot.lane.b32.xlu1 %v14827_v56, %s9405_s6  ;;  %v9309_v56 = vld [vmem:[%s16253_s26 + $0x48] sm:$0xff] }
0x206e   :  { %v14986_v31 = vadd.f32 %v9309_v56, %v5914_v8 }
0x2070   :  { %v14981_v60 = vpop.f32.mrf.mxu2  ;;  %v6039_v37 = vsel %vm1128_vm2, %v14986_v31, -inf }
0x2075   :  { %7927 = vmatmul.msk.bf16.gmra.mxu2 %vm794_vm1, %v5780_v49 }
0x2078   :  { %v14994_v40 = vpop.f32.mrf.mxu2 }
0x2080   :  { %v5924_v5 = vpop.f32.mrf.mxu2 }
0x2081   :  { %v15042_v62 = vadd.f32 %v9312_v23, %v5924_v5 }
0x2085   :  { %7928 = vmatmul.msk.bf16.gmra.mxu2 %vm794_vm1, %v16332_v41 }
0x2088   :  { %v5927_v34 = vpop.f32.mrf.mxu2 }
0x208f   :  { %v6014_v13 = vpop.xlane.xlu0 %6013 }
0x2090   :  { %v6156_v61 = vsub.f32 %v5893_v1, %v6014_v13  ;;  %v5929_v24 = vpop.f32.mrf.mxu2 }
0x2092   :  { %v6204_v51 = vmul.f32 1.442695, %v6156_v61 }
0x2094   :  { %8745 = vpow2.f32 %v6204_v51 }
0x2095   :  { %7929 = vmatmul.msk.bf16.gmra.mxu2 %vm794_vm1, %v16333_v22 }
0x2097   :  { %v6017_v49 = vpop.xlane.xlu1 %6016  ;;  %6040 = vmax.xlane.f32.xlu1 %v6039_v37  ;;  %v6051_v37 = vsel %vm1128_vm2, %v15042_v62, -inf }
0x2098   :  { %v6157_v1 = vsub.f32 %v5895_v2, %v6017_v49  ;;  %v9311_v2 = vld [vmem:[%s16253_s26 + $0x40] sm:$0xff]  ;;  %v5932_v61 = vpop.f32.mrf.mxu2 }
0x2099   :  { %v15010_v6 = vadd.f32 %v9311_v2, %v5912_v46 }
0x209a   :  { %v14996_v58 = vpop.eup %8745  ;;  %v6206_v43 = vmul.f32 1.442695, %v6157_v1 }
0x209b   :  { %v6300_v35 = vsel %vm1128_vm2, %v14996_v58, 0.0  ;;  %v6036_v30 = vsel %vm1128_vm2, %v15010_v6, -inf }
0x209c   :  { %8747 = vpow2.f32 %v6206_v43  ;;  %6301 = vadd.xlane.f32.xlu0 %v6300_v35 }
0x209f   :  { %6043 = vmax.xlane.f32.xlu1 %v6042_v18 }
0x20a0   :  { %v15060_v26 = vpop.f32.mrf.mxu2 }
0x20a2   :  { %v15012_v9 = vpop.eup %8747 }
0x20a3   :  { %v6303_v54 = vsel %vm1128_vm2, %v15012_v9, 0.0 }
0x20a4   :  { %6037 = vmax.xlane.f32.xlu0 %v6036_v30  ;;  %6304 = vadd.xlane.f32.xlu2 %v6303_v54  ;;  %v9315_v54 = vld [vmem:[%s16253_s26 + $0x80] sm:$0xff] }
0x20a5   :  { %7930 = vmatmul.msk.bf16.gmra.mxu2 %vm794_vm1, %v5783_v4  ;;  %v6020_v4 = vpop.xlane.xlu2 %6019 }
0x20a6   :  { %v6158_v2 = vsub.f32 %v14917_v7, %v6020_v4 }
0x20a7   :  { %v6023_v11 = vpop.xlane.xlu0 %6022 }
0x20a8   :  { %v6159_v21 = vsub.f32 %v14924_v27, %v6023_v11  ;;  %v15074_v5 = vpop.f32.mrf.mxu2  ;;  %v15085_v11 = vadd.f32 %v9315_v54, %v5932_v61 }
0x20aa   :  { %v6210_v29 = vmul.f32 1.442695, %v6159_v21  ;;  %v6208_v21 = vmul.f32 1.442695, %v6158_v2  ;;  %v6060_v7 = vsel %vm1128_vm2, %v15085_v11, -inf }
0x20ac   :  { %8749 = vpow2.f32 %v6210_v29 }
0x20af   :  { %v6026_v36 = vpop.xlane.xlu1 %6025 }
0x20b0   :  { %v6160_v48 = vsub.f32 %v14935_v14, %v6026_v36 }
0x20b2   :  { %v15024_v19 = vpop.eup %8749  ;;  %v6212_v46 = vmul.f32 1.442695, %v6160_v48 }
0x20b3   :  { %v6309_v8 = vsel %vm1128_vm2, %v15024_v19, 0.0 }
0x20b4   :  { %8751 = vpow2.f32 %v6212_v46  ;;  %6310 = vadd.xlane.f32.xlu0 %v6309_v8  ;;  %v9316_v8 = vld [vmem:[%s16253_s26 + $0x58] sm:$0xff] }
0x20b5   :  { %7931 = vmatmul.msk.bf16.gmra.mxu2 %vm794_vm1, %v16334_v12 }
0x20b7   :  { %v6029_v27 = vpop.xlane.xlu0 %6028 }
0x20b8   :  { %v6161_v47 = vsub.f32 %v14942_v57, %v6029_v27 }
0x20ba   :  { %v15033_v41 = vpop.eup %8751  ;;  %v6214_v14 = vmul.f32 1.442695, %v6161_v47 }
0x20bb   :  { %v6312_v13 = vsel %vm1128_vm2, %v15033_v41, 0.0 }
0x20bc   :  { %8753 = vpow2.f32 %v6214_v14  ;;  %6313 = vadd.xlane.f32.xlu0 %v6312_v13  ;;  %6564 = vrot.lane.b32.xlu2 %v14671_v59, %s9405_s6  ;;  %v16335_v59 = vpack.c.bf16 %v14798_v16, %v14772_v28  ;;  %v9314_v28 = vld [vmem:[%s16253_s26 + $0x78] sm:$0xff] }
0x20bd   :  { %v15071_v16 = vadd.f32 %v9314_v28, %v5929_v24  ;;  %v15101_v24 = vadd.f32 %v9316_v8, %v14981_v60 }
0x20bf   :  { %v6032_v56 = vpop.xlane.xlu2 %6031  ;;  %v6057_v30 = vsel %vm1128_vm2, %v15071_v16, -inf  ;;  %v6045_v4 = vsel %vm1128_vm2, %v15101_v24, -inf }
0x20c0   :  { %v6162_v57 = vsub.f32 %v14950_v33, %v6032_v56  ;;  %v9313_v33 = vld [vmem:[%s16253_s26 + $0x70] sm:$0xff] }
0x20c1   :  { %v15058_v1 = vadd.f32 %v9313_v33, %v5927_v34  ;;  %v5939_v34 = vpop.f32.mrf.mxu2 }
0x20c2   :  { %v15045_v51 = vpop.eup %8753  ;;  %v6216_v22 = vmul.f32 1.442695, %v6162_v57 }
0x20c3   :  { %v6315_v49 = vsel %vm1128_vm2, %v15045_v51, 0.0  ;;  %v6054_v35 = vsel %vm1128_vm2, %v15058_v1, -inf }
0x20c4   :  { %8755 = vpow2.f32 %v6216_v22  ;;  %6052 = vmax.xlane.f32.xlu0 %v6051_v37  ;;  %6316 = vadd.xlane.f32.xlu1 %v6315_v49 }
0x20c5   :  { %7932 = vmatmul.msk.bf16.gmra.mxu2 %vm794_vm1, %v16335_v59  ;;  %8757 = vpow2.f32 %v6208_v21 }
0x20c7   :  { %v6035_v29 = vpop.xlane.xlu1 %6034 }
0x20c8   :  { %v6163_v12 = vsub.f32 %v14957_v39, %v6035_v29  ;;  %v16337_v39 = vpack.c.bf16 %v14801_v53, %v14775_v0 }
0x20c9   :  { %v5942_v46 = vpop.f32.mrf.mxu2 }
0x20ca   :  { %v15062_v43 = vpop.eup %8755  ;;  %v6567_v3 = vpop.permute.xlu0 %6566  ;;  %v6218_v27 = vmul.f32 1.442695, %v6163_v12 }
0x20cb   :  { %v6318_v18 = vsel %vm1128_vm2, %v15062_v43, 0.0  ;;  %v15089_v48 = vpop.eup %8757 }
0x20cc   :  { %6055 = vmax.xlane.f32.xlu0 %v6054_v35  ;;  %6319 = vadd.xlane.f32.xlu1 %v6318_v18  ;;  %v6306_v52 = vsel %vm1128_vm2, %v15089_v48, 0.0  ;;  %8759 = vpow2.f32 %v6218_v27 }
0x20d1   :  { %v15112_v47 = vpop.f32.mrf.mxu2 }
0x20d2   :  { %v15120_v14 = vpop.eup %8759 }
0x20d4   :  { %6058 = vmax.xlane.f32.xlu1 %v6057_v30 }
0x20d5   :  { %7933 = vmatmul.msk.bf16.gmra.mxu2 %vm794_vm1, %v5786_v42  ;;  %v16336_v42 = vpack.c.bf16 %v14721_v17, %v14695_v63  ;;  %v9317_v63 = vld [vmem:[%s16253_s26 + $0x60] sm:$0xff] }
0x20d6   :  { %v15110_v17 = vadd.f32 %v9317_v63, %v14994_v40  ;;  %v6321_v40 = vsel %vm1128_vm2, %v15120_v14, 0.0 }
0x20d8   :  { %v6048_v60 = vsel %vm1128_vm2, %v15110_v17, -inf }
0x20d9   :  { %v15122_v13 = vpop.f32.mrf.mxu2 }
0x20dc   :  { %6061 = vmax.xlane.f32.xlu1 %v6060_v7 }
0x20df   :  { %v6569_v36 = vpop.permute.xlu1 %6568 }
0x20e0   :  { %6650 = vmatpush.bf16.msrb.mxu3 %v6569_v36 }
0x20e1   :  { %v15126_v23 = vpop.f32.mrf.mxu2 }
0x20e4   :  { %6651 = vmatpush.bf16.msrb.mxu3 %v6567_v3 }
0x20e5   :  { %7934 = vmatmul.msk.bf16.gmra.mxu2 %vm794_vm1, %v16336_v42  ;;  %6307 = vadd.xlane.f32.xlu2 %v6306_v52 }
0x20ed   :  { %6046 = vmax.xlane.f32.xlu2 %v6045_v4 }
0x20f5   :  { %7935 = vmatmul.msk.bf16.gmra.mxu2 %vm794_vm1, %v16337_v39  ;;  %6049 = vmax.xlane.f32.xlu2 %v6048_v60 }
0x20fd   :  { %6322 = vadd.xlane.f32.xlu2 %v6321_v40 }
0x2105   :  { %7936 = vmatmul.msk.bf16.gmra.mxu2 %vm794_vm1, %v5789_v20 }
0x210a   :  { %v6041_v61 = vpop.xlane.xlu1 %6040 }
0x210b   :  { %v6165_v0 = vsub.f32 %v14986_v31, %v6041_v61 }
0x210d   :  { %v6222_v53 = vmul.f32 1.442695, %v6165_v0 }
0x210f   :  { %8761 = vpow2.f32 %v6222_v53  ;;  %v6302_v56 = vpop.xlane.xlu0 %6301 }
0x2110   :  { %8763 = vrcp.f32 %v6302_v56 }
0x2112   :  { %v6044_v57 = vpop.xlane.xlu1 %6043 }
0x2113   :  { %v6166_v22 = vsub.f32 %v15001_v15, %v6044_v57 }
0x2115   :  { %v15134_v37 = vpop.eup %8761  ;;  %v6224_v49 = vmul.f32 1.442695, %v6166_v22 }
0x2116   :  { %v6327_v59 = vsel %vm1128_vm2, %v15134_v37, 0.0  ;;  %v8764_v33 = vpop.eup %8763 }
0x2117   :  { %8765 = vpow2.f32 %v6224_v49  ;;  %6328 = vadd.xlane.f32.xlu0 %v6327_v59  ;;  %v6038_v25 = vpop.xlane.xlu0 %6037  ;;  %v6305_v38 = vpop.xlane.xlu2 %6304  ;;  %v6492_v28 = vmul.f32 %v8764_v33, %v14996_v58 }
0x2118   :  { %v6164_v20 = vsub.f32 %v15010_v6, %v6038_v25  ;;  %8767 = vrcp.f32 %v6305_v38  ;;  %v9318_v6 = vld [vmem:[%s16253_s26 + $0x98] sm:$0xff] }
0x2119   :  { %v15150_v29 = vadd.f32 %v9318_v6, %v5939_v34  ;;  %v9320_v34 = vld [vmem:[%s16253_s26 + $0xa0] sm:$0xff] }
0x211a   :  { %v6220_v31 = vmul.f32 1.442695, %v6164_v20  ;;  %v15166_v52 = vadd.f32 %v9320_v34, %v5942_v46  ;;  %v5952_v20 = vpop.f32.mrf.mxu2 }
0x211b   :  { %v6069_v58 = vsel %vm1128_vm2, %v15150_v29, -inf }
0x211c   :  { %8769 = vpow2.f32 %v6220_v31  ;;  %v6072_v8 = vsel %vm1128_vm2, %v15166_v52, -inf }
0x211d   :  { %v15139_v35 = vpop.eup %8765 }
0x211e   :  { %v8768_v15 = vpop.eup %8767  ;;  %v6330_v18 = vsel %vm1128_vm2, %v15139_v35, 0.0 }
0x211f   :  { %v6493_v2 = vmul.f32 %v8768_v15, %v15012_v9  ;;  %6331 = vadd.xlane.f32.xlu0 %v6330_v18  ;;  %v6565_v30 = vpop.permute.xlu2 %6564  ;;  %v9319_v9 = vld [vmem:[%s16253_s26 + $0x88] sm:$0xff] }
0x2120   :  { %6652 = vmatpush.bf16.msrb.mxu3 %v6565_v30  ;;  %v15161_v36 = vadd.f32 %v9319_v9, %v15060_v26  ;;  %v9321_v26 = vld [vmem:[%s16253_s26 + $0x90] sm:$0xff]  ;;  %v9324_v9 = vld [vmem:[%s16253_s26 + $0xc8] sm:$0xff] }
0x2121   :  { %v6540_v54 = vpack.c.bf16 %v6493_v2, %v6492_v28  ;;  %v15176_v12 = vadd.f32 %v9321_v26, %v15074_v5 }
0x2122   :  { %v15145_v21 = vpop.eup %8769  ;;  %v6063_v42 = vsel %vm1128_vm2, %v15161_v36, -inf  ;;  %v5954_v30 = vpop.f32.mrf.mxu2 }
0x2123   :  { %7937 = vmatmul.msk.bf16.vlgmr.msrb.gmra.mxu3 %vm1128_vm2, %v6540_v54  ;;  %v6324_v7 = vsel %vm1128_vm2, %v15145_v21, 0.0  ;;  %v6066_v46 = vsel %vm1128_vm2, %v15176_v12, -inf }
0x2124   :  { %6325 = vadd.xlane.f32.xlu2 %v6324_v7 }
0x2127   :  { %6070 = vmax.xlane.f32.xlu0 %v6069_v58  ;;  %v6311_v3 = vpop.xlane.xlu0 %6310 }
0x212c   :  { %6064 = vmax.xlane.f32.xlu2 %v6063_v42 }
0x212f   :  { %6073 = vmax.xlane.f32.xlu0 %v6072_v8  ;;  %v15178_v4 = vpop.xlane.xlu0 %6313 }
0x2134   :  { %6067 = vmax.xlane.f32.xlu2 %v6066_v46 }
0x2137   :  { %v6317_v27 = vpop.xlane.xlu1 %6316  ;;  %v6053_v63 = vpop.xlane.xlu0 %6052 }
0x2138   :  { %v6169_v60 = vsub.f32 %v15042_v62, %v6053_v63 }
0x213a   :  { %v6230_v39 = vmul.f32 1.442695, %v6169_v60 }
0x213c   :  { %8771 = vpow2.f32 %v6230_v39  ;;  %v5957_v39 = vpop.f32.mrf.mxu2 }
0x213f   :  { %v6056_v40 = vpop.xlane.xlu0 %6055  ;;  %v15183_v61 = vpop.xlane.xlu1 %6319 }
0x2140   :  { %v6170_v0 = vsub.f32 %v15058_v1, %v6056_v40  ;;  %v9322_v1 = vld [vmem:[%s16253_s26 + $0xb8] sm:$0xff] }
0x2141   :  { %v15199_v25 = vadd.f32 %v9322_v1, %v15126_v23  ;;  %v9323_v23 = vld [vmem:[%s16253_s26 + $0xc0] sm:$0xff] }
0x2142   :  { %v15186_v5 = vpop.eup %8771  ;;  %v6232_v53 = vmul.f32 1.442695, %v6170_v0  ;;  %v15211_v28 = vadd.f32 %v9323_v23, %v5952_v20  ;;  %v9326_v20 = vld [vmem:[%s16253_s26 + $0xa8] sm:$0xff] }
0x2143   :  { %v6339_v56 = vsel %vm1128_vm2, %v15186_v5, 0.0  ;;  %v6081_v15 = vsel %vm1128_vm2, %v15199_v25, -inf }
0x2144   :  { %8773 = vpow2.f32 %v6232_v53  ;;  %6340 = vadd.xlane.f32.xlu2 %v6339_v56  ;;  %v6084_v54 = vsel %vm1128_vm2, %v15211_v28, -inf }
0x2147   :  { %v6059_v57 = vpop.xlane.xlu1 %6058 }
0x2148   :  { %v6171_v22 = vsub.f32 %v15071_v16, %v6059_v57 }
0x214a   :  { %v15191_v49 = vpop.eup %8773  ;;  %v6234_v62 = vmul.f32 1.442695, %v6171_v22 }
0x214b   :  { %v6342_v59 = vsel %vm1128_vm2, %v15191_v49, 0.0 }
0x214c   :  { %8775 = vpow2.f32 %v6234_v62  ;;  %6343 = vadd.xlane.f32.xlu2 %v6342_v59 }
0x214f   :  { %v6062_v38 = vpop.xlane.xlu1 %6061 }
0x2150   :  { %v6172_v31 = vsub.f32 %v15085_v11, %v6062_v38 }
0x2152   :  { %v15202_v16 = vpop.eup %8775  ;;  %v6236_v33 = vmul.f32 1.442695, %v6172_v31 }
0x2153   :  { %v6345_v18 = vsel %vm1128_vm2, %v15202_v16, 0.0 }
0x2154   :  { %8777 = vpow2.f32 %v6236_v33  ;;  %6082 = vmax.xlane.f32.xlu2 %v6081_v15  ;;  %6346 = vadd.xlane.f32.xlu0 %v6345_v18  ;;  %v9327_v18 = vld [vmem:[%s16253_s26 + $0xb0] sm:$0xff] }
0x2155   :  { %8779 = vrcp.f32 %v6311_v3  ;;  %v15222_v3 = vadd.f32 %v9324_v9, %v5954_v30 }
0x2157   :  { %v6087_v60 = vsel %vm1128_vm2, %v15222_v3, -inf }
0x2158   :  { %v6308_v11 = vpop.xlane.xlu2 %6307 }
0x2159   :  { %8781 = vrcp.f32 %v6308_v11 }
0x215a   :  { %v15213_v2 = vpop.eup %8777  ;;  %8783 = vrcp.f32 %v6317_v27 }
0x215b   :  { %v6348_v6 = vsel %vm1128_vm2, %v15213_v2, 0.0  ;;  %v8780_v7 = vpop.eup %8779 }
0x215c   :  { %6085 = vmax.xlane.f32.xlu2 %v6084_v54  ;;  %6349 = vadd.xlane.f32.xlu0 %v6348_v6  ;;  %v6495_v34 = vmul.f32 %v8780_v7, %v15024_v19  ;;  %v9325_v19 = vld [vmem:[%s16253_s26 + $0xd0] sm:$0xff]  ;;  %v5959_v6 = vpop.f32.mrf.mxu2 }
0x215d   :  { %v15233_v40 = vadd.f32 %v9325_v19, %v5957_v39 }
0x215f   :  { %v8782_v58 = vpop.eup %8781  ;;  %v6090_v27 = vsel %vm1128_vm2, %v15233_v40, -inf }
0x2160   :  { %v6494_v42 = vmul.f32 %v8782_v58, %v15089_v48  ;;  %v6047_v8 = vpop.xlane.xlu2 %6046  ;;  %v8784_v0 = vpop.eup %8783 }
0x2161   :  { %v6167_v26 = vsub.f32 %v15101_v24, %v6047_v8  ;;  %v6497_v62 = vmul.f32 %v8784_v0, %v15045_v51  ;;  %v15255_v51 = vadd.f32 %v9326_v20, %v15112_v47 }
0x2162   :  { %v6541_v46 = vpack.c.bf16 %v6495_v34, %v6494_v42 }
0x2163   :  { %v6226_v63 = vmul.f32 1.442695, %v6167_v26  ;;  %v6075_v31 = vsel %vm1128_vm2, %v15255_v51, -inf }
0x2164   :  { %6088 = vmax.xlane.f32.xlu0 %v6087_v60  ;;  %7938 = vmatmul.msk.bf16.gmra.mxu3 %vm1128_vm2, %v6541_v46  ;;  %v5962_v39 = vpop.f32.mrf.mxu2 }
0x2165   :  { %8785 = vpow2.f32 %v6226_v63 }
0x2166   :  { %8787 = vrcp.f32 %v15178_v4 }
0x2168   :  { %v6050_v48 = vpop.xlane.xlu2 %6049 }
0x2169   :  { %v6168_v24 = vsub.f32 %v15110_v17, %v6050_v48 }
0x216b   :  { %v15237_v53 = vpop.eup %8785  ;;  %v6228_v56 = vmul.f32 1.442695, %v6168_v24 }
0x216c   :  { %6091 = vmax.xlane.f32.xlu0 %v6090_v27  ;;  %v6333_v57 = vsel %vm1128_vm2, %v15237_v53, 0.0  ;;  %v8788_v22 = vpop.eup %8787  ;;  %v5964_v27 = vpop.f32.mrf.mxu2 }
0x216d   :  { %8789 = vpow2.f32 %v6228_v56  ;;  %6334 = vadd.xlane.f32.xlu1 %v6333_v57  ;;  %v6496_v4 = vmul.f32 %v8788_v22, %v15033_v41 }
0x216f   :  { %v6542_v17 = vpack.c.bf16 %v6497_v62, %v6496_v4 }
0x2170   :  { %v6323_v59 = vpop.xlane.xlu2 %6322 }
0x2171   :  { %8791 = vrcp.f32 %v6323_v59 }
0x2172   :  { %8793 = vrcp.f32 %v15183_v61  ;;  %v15264_v61 = vadd.f32 %v9327_v18, %v15122_v13 }
0x2173   :  { %v15245_v1 = vpop.eup %8789 }
0x2174   :  { %7939 = vmatmul.msk.bf16.gmra.mxu3 %vm1128_vm2, %v6542_v17  ;;  %v6336_v38 = vsel %vm1128_vm2, %v15245_v1, 0.0  ;;  %v6078_v47 = vsel %vm1128_vm2, %v15264_v61, -inf  ;;  %v9329_v17 = vld [vmem:[%s16253_s26 + $0xd8] sm:$0xff]  ;;  %v5967_v20 = vpop.f32.mrf.mxu2 }
0x2175   :  { %6337 = vadd.xlane.f32.xlu1 %v6336_v38  ;;  %v15305_v38 = vadd.f32 %v9329_v17, %v5959_v6 }
0x2177   :  { %v8792_v41 = vpop.eup %8791 }
0x2178   :  { %v8794_v33 = vpop.eup %8793  ;;  %v6499_v15 = vmul.f32 %v8792_v41, %v15120_v14 }
0x2179   :  { %v6498_v23 = vmul.f32 %v8794_v33, %v15062_v43 }
0x217b   :  { %v6543_v11 = vpack.c.bf16 %v6499_v15, %v6498_v23  ;;  %v6093_v15 = vsel %vm1128_vm2, %v15305_v38, -inf  ;;  %v9331_v23 = vld [vmem:[%s16253_s26 + $0xe0] sm:$0xff] }
0x217d   :  { %6076 = vmax.xlane.f32.xlu1 %v6075_v31  ;;  %v9330_v31 = vld [vmem:[%s16253_s26 + $0xf0] sm:$0xff] }
0x217e   :  { %v15312_v33 = vadd.f32 %v9330_v31, %v5967_v20 }
0x2180   :  { %v6102_v18 = vsel %vm1128_vm2, %v15312_v33, -inf }
0x2184   :  { %7940 = vmatmul.msk.bf16.gmra.mxu3 %vm1128_vm2, %v6543_v11  ;;  %v15321_v11 = vadd.f32 %v9331_v23, %v5962_v39 }
0x2185   :  { %6079 = vmax.xlane.f32.xlu1 %v6078_v47 }
0x218a   :  { %v6329_v30 = vpop.xlane.xlu0 %6328 }
0x218b   :  { %8795 = vrcp.f32 %v6329_v30  ;;  %v15325_v30 = vpop.f32.mrf.mxu2 }
0x2191   :  { %v8796_v58 = vpop.eup %8795 }
0x2192   :  { %v15270_v54 = vpop.xlane.xlu0 %6331  ;;  %v6501_v34 = vmul.f32 %v8796_v58, %v15134_v37 }
0x2197   :  { %v6326_v14 = vpop.xlane.xlu2 %6325 }
0x2198   :  { %8797 = vrcp.f32 %v6326_v14  ;;  %v6096_v14 = vsel %vm1128_vm2, %v15321_v11, -inf }
0x219a   :  { %v6071_v7 = vpop.xlane.xlu0 %6070 }
0x219b   :  { %v6175_v13 = vsub.f32 %v15150_v29, %v6071_v7 }
0x219d   :  { %v6242_v9 = vmul.f32 1.442695, %v6175_v13 }
0x219e   :  { %v8798_v43 = vpop.eup %8797 }
0x219f   :  { %v6500_v42 = vmul.f32 %v8798_v43, %v15145_v21  ;;  %8799 = vpow2.f32 %v6242_v9  ;;  %v6065_v8 = vpop.xlane.xlu2 %6064  ;;  %v15332_v9 = vpop.f32.mrf.mxu2 }
0x21a0   :  { %v6173_v26 = vsub.f32 %v15161_v36, %v6065_v8 }
0x21a1   :  { %v6544_v46 = vpack.c.bf16 %v6501_v34, %v6500_v42 }
0x21a2   :  { %v6238_v63 = vmul.f32 1.442695, %v6173_v26  ;;  %v6074_v60 = vpop.xlane.xlu0 %6073 }
0x21a3   :  { %v6176_v19 = vsub.f32 %v15166_v52, %v6074_v60  ;;  %7941 = vmatmul.msk.bf16.gmra.mxu3 %vm1128_vm2, %v6544_v46 }
0x21a4   :  { %8801 = vpow2.f32 %v6238_v63 }
0x21a5   :  { %v15278_v29 = vpop.eup %8799  ;;  %v6244_v48 = vmul.f32 1.442695, %v6176_v19 }
0x21a6   :  { %v6357_v37 = vsel %vm1128_vm2, %v15278_v29, 0.0  ;;  %v15341_v63 = vpop.f32.mrf.mxu3 }
0x21a7   :  { %8803 = vpow2.f32 %v6244_v48  ;;  %6358 = vadd.xlane.f32.xlu2 %v6357_v37  ;;  %v6068_v21 = vpop.xlane.xlu2 %6067  ;;  %v9332_v37 = vld [vmem:[%s16253_s26 + $0x108] sm:$0xff] }
0x21a8   :  { %v6174_v36 = vsub.f32 %v15176_v12, %v6068_v21  ;;  %v9328_v12 = vld [vmem:[%s16253_s26 + $0xe8] sm:$0xff] }
0x21a9   :  { %v15296_v62 = vadd.f32 %v9328_v12, %v5964_v27 }
0x21aa   :  { %v15283_v24 = vpop.eup %8801  ;;  %v6240_v0 = vmul.f32 1.442695, %v6174_v36 }
0x21ab   :  { %v6351_v52 = vsel %vm1128_vm2, %v15283_v24, 0.0  ;;  %v6099_v59 = vsel %vm1128_vm2, %v15296_v62, -inf }
0x21ac   :  { %8805 = vpow2.f32 %v6240_v0  ;;  %6352 = vadd.xlane.f32.xlu1 %v6351_v52 }
0x21ad   :  { %v15287_v56 = vpop.eup %8803 }
0x21ae   :  { %v6360_v57 = vsel %vm1128_vm2, %v15287_v56, 0.0  ;;  %v15354_v36 = vpop.f32.mrf.mxu3 }
0x21af   :  { %6361 = vadd.xlane.f32.xlu2 %v6360_v57 }
0x21b2   :  { %v15291_v22 = vpop.eup %8805 }
0x21b3   :  { %v6354_v4 = vsel %vm1128_vm2, %v15291_v22, 0.0 }
0x21b4   :  { %6355 = vadd.xlane.f32.xlu1 %v6354_v4 }
0x21b7   :  { %6100 = vmax.xlane.f32.xlu2 %v6099_v59  ;;  %v15307_v41 = vpop.xlane.xlu2 %6340 }
0x21bc   :  { %6094 = vmax.xlane.f32.xlu1 %v6093_v15 }
0x21bf   :  { %6103 = vmax.xlane.f32.xlu2 %v6102_v18  ;;  %v15323_v47 = vpop.xlane.xlu2 %6343 }
0x21c4   :  { %6097 = vmax.xlane.f32.xlu1 %v6096_v14 }
0x21c7   :  { %v15329_v6 = vpop.xlane.xlu0 %6346  ;;  %v6083_v7 = vpop.xlane.xlu2 %6082 }
0x21c8   :  { %v6179_v13 = vsub.f32 %v15199_v25, %v6083_v7  ;;  %v5974_v25 = vpop.f32.mrf.mxu2 }
0x21c9   :  { %v15351_v21 = vadd.f32 %v9332_v37, %v5974_v25 }
0x21ca   :  { %v6250_v58 = vmul.f32 1.442695, %v6179_v13 }
0x21cb   :  { %v6111_v59 = vsel %vm1128_vm2, %v15351_v21, -inf }
0x21cc   :  { %8807 = vpow2.f32 %v6250_v58 }
0x21cf   :  { %v15334_v43 = vpop.xlane.xlu0 %6349  ;;  %v6086_v34 = vpop.xlane.xlu2 %6085 }
0x21d0   :  { %v6180_v42 = vsub.f32 %v15211_v28, %v6086_v34 }
0x21d2   :  { %v15337_v8 = vpop.eup %8807  ;;  %v6252_v26 = vmul.f32 1.442695, %v6180_v42 }
0x21d3   :  { %v6369_v46 = vsel %vm1128_vm2, %v15337_v8, 0.0 }
0x21d4   :  { %8809 = vpow2.f32 %v6252_v26  ;;  %6370 = vadd.xlane.f32.xlu1 %v6369_v46 }
0x21d7   :  { %v6089_v60 = vpop.xlane.xlu0 %6088 }
0x21d8   :  { %v6181_v39 = vsub.f32 %v15222_v3, %v6089_v60  ;;  %v5977_v3 = vpop.f32.mrf.mxu2 }
0x21da   :  { %v15344_v19 = vpop.eup %8809  ;;  %v6254_v48 = vmul.f32 1.442695, %v6181_v39 }
0x21db   :  { %v6372_v28 = vsel %vm1128_vm2, %v15344_v19, 0.0 }
0x21dc   :  { %8811 = vpow2.f32 %v6254_v48  ;;  %6373 = vadd.xlane.f32.xlu1 %v6372_v28 }
0x21dd   :  { %8813 = vrcp.f32 %v15270_v54 }
0x21df   :  { %v6092_v0 = vpop.xlane.xlu0 %6091 }
0x21e0   :  { %v6182_v52 = vsub.f32 %v15233_v40, %v6092_v0  ;;  %v6335_v27 = vpop.xlane.xlu1 %6334  ;;  %v9333_v40 = vld [vmem:[%s16253_s26 + $0x110] sm:$0xff]  ;;  %v5979_v7 = vpop.f32.mrf.mxu2 }
0x21e1   :  { %8815 = vrcp.f32 %v6335_v27  ;;  %v15368_v31 = vadd.f32 %v9333_v40, %v5977_v3 }
0x21e2   :  { %v15357_v57 = vpop.eup %8811  ;;  %v6256_v12 = vmul.f32 1.442695, %v6182_v52 }
0x21e3   :  { %v6375_v4 = vsel %vm1128_vm2, %v15357_v57, 0.0  ;;  %v8814_v54 = vpop.eup %8813  ;;  %v6114_v34 = vsel %vm1128_vm2, %v15368_v31, -inf }
0x21e4   :  { %8817 = vpow2.f32 %v6256_v12  ;;  %6376 = vadd.xlane.f32.xlu2 %v6375_v4  ;;  %6112 = vmax.xlane.f32.xlu1 %v6111_v59  ;;  %v6502_v15 = vmul.f32 %v8814_v54, %v15139_v35  ;;  %v9334_v35 = vld [vmem:[%s16253_s26 + $0x118] sm:$0xff] }
0x21e7   :  { %v8816_v17 = vpop.eup %8815  ;;  %v15363_v20 = vpop.f32.mrf.mxu3 }
0x21e8   :  { %v6503_v18 = vmul.f32 %v8816_v17, %v15237_v53  ;;  %v6338_v23 = vpop.xlane.xlu1 %6337  ;;  %v15382_v53 = vadd.f32 %v9334_v35, %v5979_v7  ;;  %v5982_v48 = vpop.f32.mrf.mxu2 }
0x21e9   :  { %8819 = vrcp.f32 %v6338_v23  ;;  %v9336_v23 = vld [vmem:[%s16253_s26 + $0xf8] sm:$0xff] }
0x21ea   :  { %v15372_v14 = vpop.eup %8817  ;;  %v6545_v13 = vpack.c.bf16 %v6503_v18, %v6502_v15  ;;  %8821 = vrcp.f32 %v15307_v41  ;;  %v6117_v39 = vsel %vm1128_vm2, %v15382_v53, -inf  ;;  %v9335_v41 = vld [vmem:[%s16253_s26 + $0x120] sm:$0xff]  ;;  %v15420_v7 = vadd.f32 %v9336_v23, %v15325_v30 }
0x21eb   :  { %v6378_v58 = vsel %vm1128_vm2, %v15372_v14, 0.0  ;;  %v15394_v0 = vadd.f32 %v9335_v41, %v5982_v48 }
0x21ec   :  { %6379 = vadd.xlane.f32.xlu2 %v6378_v58  ;;  %7942 = vmatmul.msk.bf16.gmra.mxu3 %vm1128_vm2, %v6545_v13  ;;  %v6105_v30 = vsel %vm1128_vm2, %v15420_v7, -inf }
0x21ed   :  { %6115 = vmax.xlane.f32.xlu1 %v6114_v34 }
0x21ef   :  { %v15385_v42 = vpop.f32.mrf.mxu3  ;;  %v8820_v25 = vpop.eup %8819 }
0x21f0   :  { %v6077_v26 = vpop.xlane.xlu1 %6076  ;;  %v8822_v28 = vpop.eup %8821  ;;  %v6504_v37 = vmul.f32 %v8820_v25, %v15245_v1  ;;  %v6120_v1 = vsel %vm1128_vm2, %v15394_v0, -inf }
0x21f1   :  { %v6177_v46 = vsub.f32 %v15255_v51, %v6077_v26  ;;  %v6505_v51 = vmul.f32 %v8822_v28, %v15186_v5 }
0x21f3   :  { %v6246_v60 = vmul.f32 1.442695, %v6177_v46  ;;  %v6546_v12 = vpack.c.bf16 %v6505_v51, %v6504_v37 }
0x21f4   :  { %6118 = vmax.xlane.f32.xlu2 %v6117_v39 }
0x21f5   :  { %8823 = vpow2.f32 %v6246_v60 }
0x21f6   :  { %8825 = vrcp.f32 %v15329_v6 }
0x21f7   :  { %v15396_v3 = vpop.f32.mrf.mxu3 }
0x21f8   :  { %v6080_v52 = vpop.xlane.xlu1 %6079 }
0x21f9   :  { %v6178_v27 = vsub.f32 %v15264_v61, %v6080_v52 }
0x21fb   :  { %v15400_v4 = vpop.eup %8823  ;;  %v6248_v59 = vmul.f32 1.442695, %v6178_v27 }
0x21fc   :  { %6121 = vmax.xlane.f32.xlu2 %v6120_v1  ;;  %7943 = vmatmul.msk.bf16.gmra.mxu3 %vm1128_vm2, %v6546_v12  ;;  %v6363_v54 = vsel %vm1128_vm2, %v15400_v4, 0.0  ;;  %v8826_v61 = vpop.eup %8825  ;;  %v5984_v1 = vpop.f32.mrf.mxu2 }
0x21fd   :  { %8827 = vpow2.f32 %v6248_v59  ;;  %6364 = vadd.xlane.f32.xlu0 %v6363_v54  ;;  %v6507_v6 = vmul.f32 %v8826_v61, %v15202_v16  ;;  %v9338_v16 = vld [vmem:[%s16245_s3 + $0x30] sm:$0xff] }
0x21fe   :  { %8829 = vrcp.f32 %v15323_v47  ;;  %v9337_v47 = vld [vmem:[%s16245_s3] sm:$0xff] }
0x21ff   :  { %v15409_v5 = vpop.f32.mrf.mxu3  ;;  %v6774_v13 = vmul.f32 %v9337_v47, %v15341_v63  ;;  %v9339_v63 = vld [vmem:[%s16253_s26 + $0x100] sm:$0xff]  ;;  %8831 = vrcp.f32 %v15334_v43 }
0x2200   :  { %v9341_v43 = vld [vmem:[%s16245_s3 + $0x40] sm:$0xff] }
0x2203   :  { %v15411_v17 = vpop.eup %8827 }
0x2204   :  { %v6366_v40 = vsel %vm1128_vm2, %v15411_v17, 0.0  ;;  %v8830_v15 = vpop.eup %8829  ;;  %v5987_v47 = vpop.f32.mrf.mxu2 }
0x2205   :  { %6367 = vadd.xlane.f32.xlu0 %v6366_v40  ;;  %v6506_v58 = vmul.f32 %v8830_v15, %v15191_v49  ;;  %v15439_v49 = vadd.f32 %v9339_v63, %v15332_v9  ;;  %v8832_v28 = vpop.eup %8831  ;;  %v9340_v9 = vld [vmem:[%s16245_s3 + $0x10] sm:$0xff] }
0x2206   :  { %v6508_v51 = vmul.f32 %v8832_v28, %v15213_v2  ;;  %v6776_v52 = vmul.f32 %v9340_v9, %v15363_v20 }
0x2207   :  { %v6669_v18 = vpop.f32.mrf.mxu3  ;;  %v6547_v26 = vpack.c.bf16 %v6507_v6, %v6506_v58  ;;  %v6108_v46 = vsel %vm1128_vm2, %v15439_v49, -inf }
0x2208   :  { %v6780_v34 = vmul.f32 %v9338_v16, %v6669_v18 }
0x220a   :  { %v15430_v35 = vadd.f32 %v6780_v34, %v6774_v13 }
0x220c   :  { %7944 = vmatmul.msk.bf16.gmra.mxu3 %vm1128_vm2, %v6547_v26  ;;  %v5989_v28 = vpop.f32.mrf.mxu2 }
0x220d   :  { %6106 = vmax.xlane.f32.xlu0 %v6105_v30 }
0x220f   :  { %v15444_v60 = vpop.f32.mrf.mxu3 }
0x2215   :  { %6109 = vmax.xlane.f32.xlu0 %v6108_v46 }
0x221a   :  { %v6359_v25 = vpop.xlane.xlu2 %6358 }
0x221f   :  { %v6353_v39 = vpop.xlane.xlu1 %6352 }
0x2220   :  { %8833 = vrcp.f32 %v6353_v39 }
0x2222   :  { %v15446_v48 = vpop.xlane.xlu2 %6361 }
0x2226   :  { %v8834_v37 = vpop.eup %8833  ;;  %v6674_v41 = vpop.f32.mrf.mxu3 }
0x2227   :  { %v6509_v27 = vmul.f32 %v8834_v37, %v15283_v24  ;;  %v6782_v12 = vmul.f32 %v9341_v43, %v6674_v41  ;;  %v6356_v59 = vpop.xlane.xlu1 %6355  ;;  %v5992_v43 = vpop.f32.mrf.mxu2 }
0x2228   :  { %8835 = vrcp.f32 %v6356_v59  ;;  %v9344_v59 = vld [vmem:[%s16253_s26 + $0x140] sm:$0xff] }
0x2229   :  { %v15457_v54 = vadd.f32 %v6782_v12, %v6776_v52  ;;  %v6548_v61 = vpack.c.bf16 %v6509_v27, %v6508_v51  ;;  %8837 = vrcp.f32 %v6359_v25  ;;  %v9343_v52 = vld [vmem:[%s16253_s26 + $0x128] sm:$0xff] }
0x222a   :  { %v6101_v40 = vpop.xlane.xlu2 %6100  ;;  %v15493_v27 = vadd.f32 %v9343_v52, %v5984_v1  ;;  %v9345_v1 = vld [vmem:[%s16253_s26 + $0x130] sm:$0xff] }
0x222b   :  { %v6185_v2 = vsub.f32 %v15296_v62, %v6101_v40  ;;  %7945 = vmatmul.msk.bf16.gmra.mxu3 %vm1128_vm2, %v6548_v61  ;;  %v15500_v61 = vadd.f32 %v9344_v59, %v5992_v43 }
0x222c   :  { %v6123_v40 = vsel %vm1128_vm2, %v15493_v27, -inf }
0x222d   :  { %v6262_v15 = vmul.f32 1.442695, %v6185_v2  ;;  %v6132_v2 = vsel %vm1128_vm2, %v15500_v61, -inf }
0x222e   :  { %v8836_v6 = vpop.eup %8835 }
0x222f   :  { %8839 = vpow2.f32 %v6262_v15  ;;  %v6095_v24 = vpop.xlane.xlu1 %6094  ;;  %v8838_v58 = vpop.eup %8837  ;;  %v6510_v62 = vmul.f32 %v8836_v6, %v15291_v22  ;;  %v15509_v15 = vadd.f32 %v9345_v1, %v5987_v47 }
0x2230   :  { %v6183_v20 = vsub.f32 %v15305_v38, %v6095_v24  ;;  %v6511_v30 = vmul.f32 %v8838_v58, %v15278_v29 }
0x2231   :  { %v6126_v6 = vsel %vm1128_vm2, %v15509_v15, -inf }
0x2232   :  { %v6258_v18 = vmul.f32 1.442695, %v6183_v20  ;;  %v6104_v23 = vpop.xlane.xlu2 %6103  ;;  %v6549_v46 = vpack.c.bf16 %v6511_v30, %v6510_v62  ;;  %v15513_v20 = vpop.f32.mrf.mxu2 }
0x2233   :  { %v6186_v13 = vsub.f32 %v15312_v33, %v6104_v23 }
0x2234   :  { %8841 = vpow2.f32 %v6258_v18 }
0x2235   :  { %v15463_v16 = vpop.eup %8839  ;;  %v6264_v34 = vmul.f32 1.442695, %v6186_v13 }
0x2236   :  { %v6387_v26 = vsel %vm1128_vm2, %v15463_v16, 0.0 }
0x2237   :  { %8843 = vpow2.f32 %v6264_v34  ;;  %v6098_v38 = vpop.xlane.xlu1 %6097  ;;  %6388 = vadd.xlane.f32.xlu1 %v6387_v26 }
0x2238   :  { %v6184_v63 = vsub.f32 %v15321_v11, %v6098_v38  ;;  %v9342_v11 = vld [vmem:[%s16253_s26 + $0x138] sm:$0xff] }
0x2239   :  { %v15484_v41 = vadd.f32 %v9342_v11, %v5989_v28 }
0x223a   :  { %v15470_v25 = vpop.eup %8841  ;;  %v6260_v33 = vmul.f32 1.442695, %v6184_v63  ;;  %v15520_v62 = vpop.f32.mrf.mxu2 }
0x223b   :  { %7946 = vmatmul.msk.bf16.gmra.mxu3 %vm1128_vm2, %v6549_v46  ;;  %v6381_v22 = vsel %vm1128_vm2, %v15470_v25, 0.0  ;;  %v6129_v9 = vsel %vm1128_vm2, %v15484_v41, -inf }
0x223c   :  { %8845 = vpow2.f32 %v6260_v33  ;;  %6382 = vadd.xlane.f32.xlu0 %v6381_v22  ;;  %v15529_v33 = vpop.f32.mrf.mxu3 }
0x223d   :  { %v15475_v39 = vpop.eup %8843 }
0x223e   :  { %v6390_v29 = vsel %vm1128_vm2, %v15475_v39, 0.0 }
0x223f   :  { %6391 = vadd.xlane.f32.xlu1 %v6390_v29 }
0x2242   :  { %v15479_v37 = vpop.eup %8845  ;;  %v5999_v46 = vpop.f32.mrf.mxu2 }
0x2243   :  { %v6384_v51 = vsel %vm1128_vm2, %v15479_v37, 0.0 }
0x2244   :  { %6385 = vadd.xlane.f32.xlu0 %v6384_v51 }
0x2247   :  { %v15495_v12 = vpop.xlane.xlu1 %6370  ;;  %6130 = vmax.xlane.f32.xlu1 %v6129_v9  ;;  %v9346_v9 = vld [vmem:[%s16253_s26 + $0x158] sm:$0xff] }
0x2248   :  { %v15540_v52 = vadd.f32 %v9346_v9, %v5999_v46 }
0x224a   :  { %v6002_v43 = vpop.f32.mrf.mxu2 }
0x224c   :  { %6124 = vmax.xlane.f32.xlu0 %v6123_v40  ;;  %v9348_v40 = vld [vmem:[%s16245_s3 + $0x50] sm:$0xff] }
0x224f   :  { %v15511_v24 = vpop.xlane.xlu1 %6373  ;;  %6133 = vmax.xlane.f32.xlu1 %v6132_v2 }
0x2254   :  { %6127 = vmax.xlane.f32.xlu0 %v6126_v6 }
0x2257   :  { %v6113_v18 = vpop.xlane.xlu1 %6112  ;;  %v15517_v23 = vpop.xlane.xlu2 %6376 }
0x2258   :  { %v6189_v13 = vsub.f32 %v15351_v21, %v6113_v18 }
0x225a   :  { %v6270_v58 = vmul.f32 1.442695, %v6189_v13 }
0x225c   :  { %8847 = vpow2.f32 %v6270_v58 }
0x225f   :  { %v15522_v47 = vpop.xlane.xlu2 %6379 }
0x2260   :  { %v6116_v34 = vpop.xlane.xlu1 %6115 }
0x2261   :  { %v6190_v26 = vsub.f32 %v15368_v31, %v6116_v34 }
0x2262   :  { %v15525_v30 = vpop.eup %8847 }
0x2263   :  { %v6272_v38 = vmul.f32 1.442695, %v6190_v26  ;;  %v6399_v63 = vsel %vm1128_vm2, %v15525_v30, 0.0 }
0x2264   :  { %6400 = vadd.xlane.f32.xlu0 %v6399_v63 }
0x2265   :  { %8849 = vpow2.f32 %v6272_v38 }
0x2267   :  { %v6119_v21 = vpop.xlane.xlu2 %6118 }
0x2268   :  { %v6191_v22 = vsub.f32 %v15382_v53, %v6119_v21  ;;  %v9347_v53 = vld [vmem:[%s16245_s3 + $0x20] sm:$0xff] }
0x2269   :  { %v6778_v59 = vmul.f32 %v9347_v53, %v15396_v3  ;;  %v6141_v3 = vsel %vm1128_vm2, %v15540_v52, -inf  ;;  %v9351_v53 = vld [vmem:[%s16245_s3 + $0x60] sm:$0xff] }
0x226a   :  { %v6274_v28 = vmul.f32 1.442695, %v6191_v22 }
0x226b   :  { %v15532_v29 = vpop.eup %8849 }
0x226c   :  { %8851 = vpow2.f32 %v6274_v28  ;;  %v6402_v31 = vsel %vm1128_vm2, %v15532_v29, 0.0 }
0x226d   :  { %6403 = vadd.xlane.f32.xlu0 %v6402_v31  ;;  %8853 = vrcp.f32 %v15446_v48  ;;  %v6004_v31 = vpop.f32.mrf.mxu2 }
0x226f   :  { %v6679_v11 = vpop.f32.mrf.mxu3  ;;  %v6122_v51 = vpop.xlane.xlu2 %6121 }
0x2270   :  { %v6784_v48 = vmul.f32 %v9348_v40, %v6679_v11  ;;  %v6192_v2 = vsub.f32 %v15394_v0, %v6122_v51  ;;  %v6365_v1 = vpop.xlane.xlu0 %6364  ;;  %v9349_v0 = vld [vmem:[%s16253_s26 + $0x160] sm:$0xff] }
0x2271   :  { %8855 = vrcp.f32 %v6365_v1  ;;  %v15563_v63 = vadd.f32 %v9349_v0, %v6002_v43 }
0x2272   :  { %v15550_v6 = vpop.eup %8851  ;;  %v15552_v18 = vadd.f32 %v6784_v48, %v6778_v59  ;;  %v6276_v13 = vmul.f32 1.442695, %v6192_v2 }
0x2273   :  { %v6405_v58 = vsel %vm1128_vm2, %v15550_v6, 0.0  ;;  %v8854_v34 = vpop.eup %8853  ;;  %v6144_v9 = vsel %vm1128_vm2, %v15563_v63, -inf }
0x2274   :  { %8857 = vpow2.f32 %v6276_v13  ;;  %6406 = vadd.xlane.f32.xlu1 %v6405_v58  ;;  %v6512_v46 = vmul.f32 %v8854_v34, %v15287_v56  ;;  %v9350_v56 = vld [vmem:[%s16253_s26 + $0x168] sm:$0xff] }
0x2275   :  { %6142 = vmax.xlane.f32.xlu0 %v6141_v3  ;;  %v6007_v3 = vpop.f32.mrf.mxu2 }
0x2277   :  { %v8856_v26 = vpop.eup %8855  ;;  %v15558_v38 = vpop.f32.mrf.mxu3 }
0x2278   :  { %v6513_v21 = vmul.f32 %v8856_v26, %v15400_v4  ;;  %v6368_v22 = vpop.xlane.xlu0 %6367  ;;  %v15577_v4 = vadd.f32 %v9350_v56, %v6004_v31  ;;  %v9352_v26 = vld [vmem:[%s16253_s26 + $0x170] sm:$0xff] }
0x2279   :  { %8859 = vrcp.f32 %v6368_v22  ;;  %v15593_v0 = vadd.f32 %v9352_v26, %v6007_v3 }
0x227a   :  { %v15567_v28 = vpop.eup %8857  ;;  %v6550_v11 = vpack.c.bf16 %v6513_v21, %v6512_v46  ;;  %8861 = vrcp.f32 %v15495_v12  ;;  %v6147_v58 = vsel %vm1128_vm2, %v15577_v4, -inf }
0x227b   :  { %v6408_v51 = vsel %vm1128_vm2, %v15567_v28, 0.0 }
0x227c   :  { %7947 = vmatmul.msk.bf16.gmra.mxu3 %vm1128_vm2, %v6550_v11  ;;  %6409 = vadd.xlane.f32.xlu1 %v6408_v51 }
0x227d   :  { %6145 = vmax.xlane.f32.xlu0 %v6144_v9 }
0x227f   :  { %v6684_v43 = vpop.f32.mrf.mxu3  ;;  %v8860_v1 = vpop.eup %8859 }
0x2280   :  { %v6786_v59 = vmul.f32 %v9351_v53, %v6684_v43  ;;  %v6107_v40 = vpop.xlane.xlu0 %6106  ;;  %v8862_v12 = vpop.eup %8861  ;;  %v6514_v34 = vmul.f32 %v8860_v1, %v15411_v17  ;;  %v6150_v17 = vsel %vm1128_vm2, %v15593_v0, -inf }
0x2281   :  { %v6187_v48 = vsub.f32 %v15420_v7, %v6107_v40 }
0x2282   :  { %v15585_v2 = vadd.f32 %v15430_v35, %v6786_v59  ;;  %v6515_v35 = vmul.f32 %v8862_v12, %v15337_v8 }
0x2283   :  { %v6266_v13 = vmul.f32 1.442695, %v6187_v48 }
0x2284   :  { %6148 = vmax.xlane.f32.xlu1 %v6147_v58  ;;  %v6551_v22 = vpack.c.bf16 %v6515_v35, %v6514_v34  ;;  %v9356_v34 = vld [vmem:[%s16245_s3 + $0x80] sm:$0xff] }
0x2285   :  { %8863 = vpow2.f32 %v6266_v13 }
0x2286   :  { %8865 = vrcp.f32 %v15517_v23 }
0x2287   :  { %v15595_v7 = vpop.f32.mrf.mxu3 }
0x2288   :  { %v6110_v46 = vpop.xlane.xlu0 %6109 }
0x2289   :  { %v6188_v21 = vsub.f32 %v15439_v49, %v6110_v46  ;;  %v9353_v49 = vld [vmem:[%s16245_s3 + $0x70] sm:$0xff] }
0x228b   :  { %v15599_v31 = vpop.eup %8863  ;;  %v6268_v11 = vmul.f32 1.442695, %v6188_v21 }
0x228c   :  { %7948 = vmatmul.msk.bf16.gmra.mxu3 %vm1128_vm2, %v6551_v22  ;;  %6151 = vmax.xlane.f32.xlu1 %v6150_v17  ;;  %v6393_v51 = vsel %vm1128_vm2, %v15599_v31, 0.0  ;;  %v8866_v56 = vpop.eup %8865 }
0x228d   :  { %8867 = vpow2.f32 %v6268_v11  ;;  %6394 = vadd.xlane.f32.xlu2 %v6393_v51  ;;  %v6517_v40 = vmul.f32 %v8866_v56, %v15357_v57  ;;  %v9355_v57 = vld [vmem:[%s16253_s26 + $0x150] sm:$0xff] }
0x228e   :  { %8869 = vrcp.f32 %v15511_v24  ;;  %v9354_v24 = vld [vmem:[%s16253_s26 + $0x148] sm:$0xff]  ;;  %v15633_v58 = vadd.f32 %v9355_v57, %v15520_v62 }
0x228f   :  { %v6689_v8 = vpop.f32.mrf.mxu3  ;;  %v15623_v48 = vadd.f32 %v9354_v24, %v15513_v20  ;;  %8871 = vrcp.f32 %v15522_v47 }
0x2290   :  { %v6788_v9 = vmul.f32 %v9353_v49, %v6689_v8  ;;  %v6138_v20 = vsel %vm1128_vm2, %v15633_v58, -inf }
0x2291   :  { %v6135_v13 = vsel %vm1128_vm2, %v15623_v48, -inf }
0x2292   :  { %v15612_v43 = vadd.f32 %v15457_v54, %v6788_v9 }
0x2293   :  { %v15614_v23 = vpop.eup %8867 }
0x2294   :  { %v6396_v53 = vsel %vm1128_vm2, %v15614_v23, 0.0  ;;  %v8870_v59 = vpop.eup %8869 }
0x2295   :  { %6397 = vadd.xlane.f32.xlu2 %v6396_v53  ;;  %v6516_v1 = vmul.f32 %v8870_v59, %v15344_v19  ;;  %v8872_v21 = vpop.eup %8871  ;;  %v9357_v53 = vld [vmem:[%s16245_s3 + $0x90] sm:$0xff] }
0x2296   :  { %v6518_v17 = vmul.f32 %v8872_v21, %v15372_v14 }
0x2297   :  { %v6552_v54 = vpack.c.bf16 %v6517_v40, %v6516_v1  ;;  %v15637_v3 = vpop.f32.mrf.mxu3 }
0x229c   :  { %7949 = vmatmul.msk.bf16.gmra.mxu3 %vm1128_vm2, %v6552_v54 }
0x229d   :  { %6136 = vmax.xlane.f32.xlu2 %v6135_v13 }
0x22a5   :  { %6139 = vmax.xlane.f32.xlu2 %v6138_v20 }
0x22aa   :  { %v6389_v19 = vpop.xlane.xlu1 %6388 }
0x22ae   :  { %v6694_v12 = vpop.f32.mrf.mxu3 }
0x22af   :  { %v6790_v26 = vmul.f32 %v9356_v34, %v6694_v12  ;;  %v6383_v35 = vpop.xlane.xlu0 %6382 }
0x22b0   :  { %8873 = vrcp.f32 %v6383_v35 }
0x22b1   :  { %v15644_v62 = vadd.f32 %v15552_v18, %v6790_v26 }
0x22b2   :  { %v15646_v46 = vpop.xlane.xlu1 %6391 }
0x22b6   :  { %v8874_v22 = vpop.eup %8873  ;;  %v15648_v11 = vpop.f32.mrf.mxu3 }
0x22b7   :  { %v6519_v47 = vmul.f32 %v8874_v22, %v15470_v25  ;;  %v6386_v51 = vpop.xlane.xlu0 %6385 }
0x22b8   :  { %8875 = vrcp.f32 %v6386_v51 }
0x22b9   :  { %v6553_v8 = vpack.c.bf16 %v6519_v47, %v6518_v17  ;;  %8877 = vrcp.f32 %v6389_v19  ;;  %v6009_v17 = vpop.f32.mrf.mxu2  ;;  %v9358_v47 = vld [vmem:[%s16253_s26 + $0x178] sm:$0xff] }
0x22ba   :  { %v6131_v49 = vpop.xlane.xlu1 %6130  ;;  %v15685_v51 = vadd.f32 %v9358_v47, %v6009_v17 }
0x22bb   :  { %v6195_v9 = vsub.f32 %v15484_v41, %v6131_v49  ;;  %7950 = vmatmul.msk.bf16.gmra.mxu3 %vm1128_vm2, %v6553_v8 }
0x22bc   :  { %v6153_v49 = vsel %vm1128_vm2, %v15685_v51, -inf }
0x22bd   :  { %v6282_v18 = vmul.f32 1.442695, %v6195_v9 }
0x22be   :  { %v6699_v56 = vpop.f32.mrf.mxu3  ;;  %v8876_v24 = vpop.eup %8875 }
0x22bf   :  { %8879 = vpow2.f32 %v6282_v18  ;;  %v6792_v59 = vmul.f32 %v9357_v53, %v6699_v56  ;;  %v6125_v14 = vpop.xlane.xlu0 %6124  ;;  %v8878_v13 = vpop.eup %8877  ;;  %v6520_v20 = vmul.f32 %v8876_v24, %v15479_v37 }
0x22c0   :  { %v6193_v25 = vsub.f32 %v15493_v27, %v6125_v14  ;;  %v6521_v27 = vmul.f32 %v8878_v13, %v15463_v16 }
0x22c1   :  { %v15659_v40 = vadd.f32 %v15585_v2, %v6792_v59 }
0x22c2   :  { %v6278_v41 = vmul.f32 1.442695, %v6193_v25  ;;  %v6134_v1 = vpop.xlane.xlu1 %6133  ;;  %v6554_v26 = vpack.c.bf16 %v6521_v27, %v6520_v20 }
0x22c3   :  { %v6196_v54 = vsub.f32 %v15500_v61, %v6134_v1 }
0x22c4   :  { %8881 = vpow2.f32 %v6278_v41 }
0x22c5   :  { %v15662_v57 = vpop.eup %8879  ;;  %v6284_v19 = vmul.f32 1.442695, %v6196_v54 }
0x22c6   :  { %v6417_v12 = vsel %vm1128_vm2, %v15662_v57, 0.0  ;;  %v15698_v41 = vpop.f32.mrf.mxu3 }
0x22c7   :  { %8883 = vpow2.f32 %v6284_v19  ;;  %v6128_v2 = vpop.xlane.xlu0 %6127  ;;  %6418 = vadd.xlane.f32.xlu0 %v6417_v12 }
0x22c8   :  { %v6194_v34 = vsub.f32 %v15509_v15, %v6128_v2 }
0x22ca   :  { %v15669_v35 = vpop.eup %8881  ;;  %v6280_v61 = vmul.f32 1.442695, %v6194_v34 }
0x22cb   :  { %7951 = vmatmul.msk.bf16.gmra.mxu3 %vm1128_vm2, %v6554_v26  ;;  %v6411_v37 = vsel %vm1128_vm2, %v15669_v35, 0.0 }
0x22cc   :  { %8885 = vpow2.f32 %v6280_v61  ;;  %6412 = vadd.xlane.f32.xlu2 %v6411_v37 }
0x22cd   :  { %v15674_v21 = vpop.eup %8883 }
0x22ce   :  { %v6420_v16 = vsel %vm1128_vm2, %v15674_v21, 0.0 }
0x22cf   :  { %6421 = vadd.xlane.f32.xlu0 %v6420_v16 }
0x22d2   :  { %v15678_v22 = vpop.eup %8885 }
0x22d3   :  { %v6414_v15 = vsel %vm1128_vm2, %v15678_v22, 0.0 }
0x22d4   :  { %6415 = vadd.xlane.f32.xlu2 %v6414_v15 }
0x22d7   :  { %v6401_v8 = vpop.xlane.xlu0 %6400 }
0x22dc   :  { %6154 = vmax.xlane.f32.xlu2 %v6153_v49 }
0x22e0   :  { %v15689_v9 = vpop.xlane.xlu0 %6403 }
0x22e7   :  { %v6407_v18 = vpop.xlane.xlu1 %6406 }
0x22e8   :  { %v6143_v56 = vpop.xlane.xlu0 %6142 }
0x22e9   :  { %v6199_v53 = vsub.f32 %v15540_v52, %v6143_v56  ;;  %v9359_v52 = vld [vmem:[%s16245_s3 + $0xa0] sm:$0xff] }
0x22eb   :  { %v6290_v59 = vmul.f32 1.442695, %v6199_v53 }
0x22ed   :  { %8887 = vpow2.f32 %v6290_v59 }
0x22ee   :  { %8889 = vrcp.f32 %v15646_v46 }
0x22ef   :  { %v15692_v14 = vpop.xlane.xlu1 %6409 }
0x22f0   :  { %v6146_v47 = vpop.xlane.xlu0 %6145 }
0x22f3   :  { %v15694_v25 = vpop.eup %8887 }
0x22f4   :  { %v6429_v24 = vsel %vm1128_vm2, %v15694_v25, 0.0  ;;  %v8890_v34 = vpop.eup %8889 }
0x22f5   :  { %6430 = vadd.xlane.f32.xlu0 %v6429_v24  ;;  %v6522_v46 = vmul.f32 %v8890_v34, %v15475_v39  ;;  %v9360_v39 = vld [vmem:[%s16245_s3 + $0xb0] sm:$0xff]  ;;  %v6200_v24 = vsub.f32 %v15563_v63, %v6146_v47 }
0x22f7   :  { %v6149_v1 = vpop.xlane.xlu1 %6148 }
0x22ff   :  { %v6704_v54 = vpop.f32.mrf.mxu3  ;;  %v6152_v13 = vpop.xlane.xlu1 %6151 }
0x2300   :  { %v6794_v20 = vmul.f32 %v9359_v52, %v6704_v54  ;;  %v6202_v19 = vsub.f32 %v15593_v0, %v6152_v13  ;;  %v6395_v12 = vpop.xlane.xlu2 %6394  ;;  %v6292_v52 = vmul.f32 1.442695, %v6200_v24 }
0x2301   :  { %8891 = vrcp.f32 %v6395_v12 }
0x2302   :  { %v15706_v27 = vadd.f32 %v15612_v43, %v6794_v20  ;;  %v6296_v2 = vmul.f32 1.442695, %v6202_v19 }
0x2304   :  { %8893 = vpow2.f32 %v6296_v2 }
0x2307   :  { %v8892_v26 = vpop.eup %8891  ;;  %v15708_v61 = vpop.f32.mrf.mxu3 }
0x2308   :  { %v6523_v37 = vmul.f32 %v8892_v26, %v15599_v31  ;;  %v6398_v16 = vpop.xlane.xlu2 %6397 }
0x2309   :  { %8895 = vrcp.f32 %v6398_v16 }
0x230a   :  { %v15712_v15 = vpop.eup %8893  ;;  %v6555_v17 = vpack.c.bf16 %v6523_v37, %v6522_v46  ;;  %8897 = vrcp.f32 %v6401_v8 }
0x230b   :  { %v6438_v0 = vsel %vm1128_vm2, %v15712_v15, 0.0 }
0x230c   :  { %6439 = vadd.xlane.f32.xlu0 %v6438_v0  ;;  %7952 = vmatmul.msk.bf16.gmra.mxu3 %vm1128_vm2, %v6555_v17 }
0x230f   :  { %v6709_v43 = vpop.f32.mrf.mxu3  ;;  %v8896_v59 = vpop.eup %8895 }
0x2310   :  { %v6796_v49 = vmul.f32 %v9360_v39, %v6709_v43  ;;  %v6137_v31 = vpop.xlane.xlu2 %6136  ;;  %v8898_v13 = vpop.eup %8897  ;;  %v6524_v8 = vmul.f32 %v8896_v59, %v15614_v23 }
0x2311   :  { %v6197_v56 = vsub.f32 %v15623_v48, %v6137_v31  ;;  %v6525_v19 = vmul.f32 %v8898_v13, %v15525_v30 }
0x2312   :  { %v15722_v53 = vadd.f32 %v15644_v62, %v6796_v49  ;;  %v6201_v62 = vsub.f32 %v15577_v4, %v6149_v1 }
0x2313   :  { %v6286_v54 = vmul.f32 1.442695, %v6197_v56  ;;  %v6556_v48 = vpack.c.bf16 %v6525_v19, %v6524_v8  ;;  %v9362_v56 = vld [vmem:[%s16245_s3 + $0xd0] sm:$0xff] }
0x2314   :  { %v6294_v30 = vmul.f32 1.442695, %v6201_v62 }
0x2315   :  { %8899 = vpow2.f32 %v6286_v54 }
0x2316   :  { %8901 = vpow2.f32 %v6292_v52 }
0x2317   :  { %v15726_v20 = vpop.f32.mrf.mxu3  ;;  %8903 = vrcp.f32 %v6407_v18 }
0x2318   :  { %v6140_v12 = vpop.xlane.xlu2 %6139 }
0x2319   :  { %v6198_v2 = vsub.f32 %v15633_v58, %v6140_v12  ;;  %v9361_v58 = vld [vmem:[%s16245_s3 + $0xc0] sm:$0xff] }
0x231b   :  { %v15730_v34 = vpop.eup %8899  ;;  %v6288_v63 = vmul.f32 1.442695, %v6198_v2 }
0x231c   :  { %7953 = vmatmul.msk.bf16.gmra.mxu3 %vm1128_vm2, %v6556_v48  ;;  %v6423_v23 = vsel %vm1128_vm2, %v15730_v34, 0.0  ;;  %v15740_v37 = vpop.eup %8901 }
0x231d   :  { %8905 = vpow2.f32 %v6288_v63  ;;  %6424 = vadd.xlane.f32.xlu1 %v6423_v23  ;;  %v8904_v4 = vpop.eup %8903  ;;  %v6432_v16 = vsel %vm1128_vm2, %v15740_v37, 0.0 }
0x231e   :  { %8907 = vrcp.f32 %v15689_v9  ;;  %v6527_v0 = vmul.f32 %v8904_v4, %v15550_v6 }
0x231f   :  { %v6714_v26 = vpop.f32.mrf.mxu3  ;;  %8909 = vpow2.f32 %v6294_v30 }
0x2320   :  { %v6798_v46 = vmul.f32 %v9361_v58, %v6714_v26  ;;  %8911 = vrcp.f32 %v15692_v14 }
0x2322   :  { %v15743_v18 = vadd.f32 %v15659_v40, %v6798_v46 }
0x2323   :  { %v15745_v1 = vpop.eup %8905 }
0x2324   :  { %v6426_v9 = vsel %vm1128_vm2, %v15745_v1, 0.0  ;;  %v8908_v17 = vpop.eup %8907 }
0x2325   :  { %6433 = vadd.xlane.f32.xlu1 %v6432_v16  ;;  %6427 = vadd.xlane.f32.xlu2 %v6426_v9  ;;  %v6526_v43 = vmul.f32 %v8908_v17, %v15532_v29  ;;  %v15753_v47 = vpop.eup %8909  ;;  %v9364_v9 = vld [vmem:[%s16245_s3 + $0x38] sm:$0xff]  ;;  %v9365_v17 = vld [vmem:[%s16245_s3 + $0x8] sm:$0xff] }
0x2326   :  { %v6435_v39 = vsel %vm1128_vm2, %v15753_v47, 0.0  ;;  %v8912_v24 = vpop.eup %8911 }
0x2327   :  { %v6557_v40 = vpack.c.bf16 %v6527_v0, %v6526_v43  ;;  %v6716_v49 = vpop.f32.mrf.mxu3  ;;  %v6528_v8 = vmul.f32 %v8912_v24, %v15567_v28  ;;  %v6775_v0 = vmul.f32 %v9365_v17, %v15354_v36  ;;  %v9366_v43 = vld [vmem:[%s16245_s3 + $0x68] sm:$0xff] }
0x232c   :  { %7954 = vmatmul.msk.bf16.gmra.mxu3 %vm1128_vm2, %v6557_v40  ;;  %v6787_v40 = vmul.f32 %v9366_v43, %v15595_v7  ;;  %v9369_v7 = vld [vmem:[%s16245_s3 + $0xc8] sm:$0xff] }
0x232d   :  { %6436 = vadd.xlane.f32.xlu2 %v6435_v39  ;;  %v9367_v39 = vld [vmem:[%s16245_s3 + $0xf0] sm:$0xff] }
0x233a   :  { %v6419_v12 = vpop.xlane.xlu0 %6418 }
0x233e   :  { %v6719_v31 = vpop.f32.mrf.mxu3 }
0x233f   :  { %v6800_v6 = vmul.f32 %v9362_v56, %v6719_v31  ;;  %v6413_v59 = vpop.xlane.xlu2 %6412 }
0x2340   :  { %8913 = vrcp.f32 %v6413_v59 }
0x2341   :  { %v15763_v29 = vadd.f32 %v15706_v27, %v6800_v6  ;;  %v9363_v27 = vld [vmem:[%s16245_s3 + $0xe0] sm:$0xff]  ;;  %v9368_v6 = vld [vmem:[%s16245_s3 + $0x98] sm:$0xff] }
0x2342   :  { %v6793_v36 = vmul.f32 %v9368_v6, %v15698_v41  ;;  %v9370_v41 = vld [vmem:[%s16245_s3 + $0xf8] sm:$0xff] }
0x2346   :  { %v8914_v54 = vpop.eup %8913  ;;  %v15765_v13 = vpop.f32.mrf.mxu3 }
0x2347   :  { %v6529_v52 = vmul.f32 %v8914_v54, %v15669_v35  ;;  %v6416_v14 = vpop.xlane.xlu2 %6415  ;;  %v6799_v54 = vmul.f32 %v9369_v7, %v6716_v49  ;;  %v9371_v49 = vld [vmem:[%s16245_s3 + $0x48] sm:$0xff] }
0x2348   :  { %8915 = vrcp.f32 %v6416_v14  ;;  %v9379_v7 = vld [vmem:[%s16245_s3 + $0x28] sm:$0xff] }
0x2349   :  { %v6558_v19 = vpack.c.bf16 %v6529_v52, %v6528_v8  ;;  %8917 = vrcp.f32 %v6419_v12 }
0x234b   :  { %7955 = vmatmul.msk.bf16.gmra.mxu3 %vm1128_vm2, %v6558_v19 }
0x234e   :  { %v6724_v2 = vpop.f32.mrf.mxu3  ;;  %v8916_v35 = vpop.eup %8915 }
0x234f   :  { %v6802_v48 = vmul.f32 %v9363_v27, %v6724_v2  ;;  %v6155_v62 = vpop.xlane.xlu2 %6154  ;;  %v8918_v30 = vpop.eup %8917  ;;  %v6530_v26 = vmul.f32 %v8916_v35, %v15678_v22  ;;  %v6781_v22 = vmul.f32 %v9364_v9, %v15444_v60 }
0x2350   :  { %v6203_v63 = vsub.f32 %v15685_v51, %v6155_v62  ;;  %v6531_v58 = vmul.f32 %v8918_v30, %v15662_v57 }
0x2351   :  { %v15775_v28 = vadd.f32 %v15722_v53, %v6802_v48  ;;  %v6422_v53 = vpop.xlane.xlu0 %6421  ;;  %v6823_v56 = vadd.f32 %v6781_v22, %v6775_v0 }
0x2352   :  { %v6298_v23 = vmul.f32 1.442695, %v6203_v63  ;;  %v6559_v46 = vpack.c.bf16 %v6531_v58, %v6530_v26  ;;  %v9373_v26 = vld [vmem:[%s16245_s3 + $0x78] sm:$0xff] }
0x2353   :  { %v6829_v24 = vadd.f32 %v6823_v56, %v6787_v40  ;;  %v6789_v58 = vmul.f32 %v9373_v26, %v15637_v3  ;;  %v9376_v3 = vld [vmem:[%s16245_s3 + $0xd8] sm:$0xff] }
0x2354   :  { %8919 = vpow2.f32 %v6298_v23  ;;  %v9372_v23 = vld [vmem:[%s16245_s3 + $0x18] sm:$0xff]  ;;  %v6801_v17 = vmul.f32 %v9376_v3, %v15765_v13  ;;  %v9385_v3 = vld [vmem:[%s16245_s3 + $0x140] sm:$0xff] }
0x2355   :  { %8921 = vrcp.f32 %v6422_v53  ;;  %v6835_v52 = vadd.f32 %v6829_v24, %v6793_v36  ;;  %v6777_v30 = vmul.f32 %v9372_v23, %v15385_v42  ;;  %v9375_v53 = vld [vmem:[%s16245_s3 + $0xa8] sm:$0xff] }
0x2356   :  { %v15784_v51 = vpop.f32.mrf.mxu3  ;;  %v6795_v9 = vmul.f32 %v9375_v53, %v15708_v61  ;;  %v9377_v61 = vld [vmem:[%s16245_s3 + $0x108] sm:$0xff] }
0x2357   :  { %v6841_v12 = vadd.f32 %v6835_v52, %v6799_v54  ;;  %v6779_v54 = vmul.f32 %v9379_v7, %v15409_v5 }
0x235a   :  { %v15779_v4 = vpop.eup %8919 }
0x235b   :  { %7956 = vmatmul.msk.bf16.gmra.mxu3 %vm1128_vm2, %v6559_v46  ;;  %v6441_v16 = vsel %vm1128_vm2, %v15779_v4, 0.0  ;;  %v8922_v8 = vpop.eup %8921  ;;  %v9374_v46 = vld [vmem:[%s16245_s3 + $0x100] sm:$0xff] }
0x235c   :  { %6442 = vadd.xlane.f32.xlu1 %v6441_v16  ;;  %v6532_v2 = vmul.f32 %v8922_v8, %v15674_v21  ;;  %v6783_v21 = vmul.f32 %v9371_v49, %v15529_v33  ;;  %v9380_v8 = vld [vmem:[%s16245_s3 + $0x88] sm:$0xff] }
0x235d   :  { %v6791_v52 = vmul.f32 %v9380_v8, %v15648_v11  ;;  %v9383_v11 = vld [vmem:[%s16245_s3 + $0xe8] sm:$0xff]  ;;  %v9390_v8 = vld [vmem:[%s16245_s3 + $0x130] sm:$0xff] }
0x235e   :  { %v6825_v33 = vadd.f32 %v6783_v21, %v6777_v30 }
0x2368   :  { %v6431_v35 = vpop.xlane.xlu0 %6430 }
0x237f   :  { %v6440_v26 = vpop.xlane.xlu0 %6439 }
0x238f   :  { %v6729_v57 = vpop.f32.mrf.mxu3 }
0x2390   :  { %v6804_v31 = vmul.f32 %v9367_v39, %v6729_v57  ;;  %v6425_v60 = vpop.xlane.xlu1 %6424  ;;  %v6831_v57 = vadd.f32 %v6825_v33, %v6789_v58 }
0x2391   :  { %8923 = vrcp.f32 %v6425_v60 }
0x2392   :  { %v15806_v59 = vadd.f32 %v15743_v18, %v6804_v31  ;;  %v6837_v43 = vadd.f32 %v6831_v57, %v6795_v9 }
0x2394   :  { %v6843_v31 = vadd.f32 %v6837_v43, %v6801_v17 }
0x2397   :  { %v8924_v14 = vpop.eup %8923  ;;  %v6731_v19 = vpop.f32.mrf.mxu3 }
0x2398   :  { %v6533_v27 = vmul.f32 %v8924_v14, %v15730_v34  ;;  %v6805_v18 = vmul.f32 %v9370_v41, %v6731_v19  ;;  %v6428_v62 = vpop.xlane.xlu2 %6427  ;;  %v6434_v24 = vpop.xlane.xlu1 %6433  ;;  %v9381_v14 = vld [vmem:[%s16245_s3 + $0x110] sm:$0xff] }
0x2399   :  { %8925 = vrcp.f32 %v6428_v62 }
0x239a   :  { %v15816_v48 = vadd.f32 %v6841_v12, %v6805_v18  ;;  %v6560_v63 = vpack.c.bf16 %v6533_v27, %v6532_v2  ;;  %8927 = vrcp.f32 %v6431_v35  ;;  %v9382_v12 = vld [vmem:[%s16245_s3 + $0xb8] sm:$0xff]  ;;  %v6803_v18 = vmul.f32 %v9383_v11, %v15784_v51 }
0x239b   :  { %v6797_v2 = vmul.f32 %v9382_v12, %v15726_v20  ;;  %v9384_v20 = vld [vmem:[%s16245_s3 + $0x118] sm:$0xff] }
0x239c   :  { %7957 = vmatmul.msk.bf16.gmra.mxu3 %vm1128_vm2, %v6560_v63 }
0x239f   :  { %v6734_v34 = vpop.f32.mrf.mxu3  ;;  %v8926_v22 = vpop.eup %8925 }
0x23a0   :  { %v6806_v16 = vmul.f32 %v9374_v46, %v6734_v34  ;;  %v8928_v0 = vpop.eup %8927  ;;  %v6534_v40 = vmul.f32 %v8926_v22, %v15745_v1  ;;  %v6437_v56 = vpop.xlane.xlu2 %6436  ;;  %v9378_v1 = vld [vmem:[%s16245_s3 + $0x58] sm:$0xff] }
0x23a1   :  { %v6535_v60 = vmul.f32 %v8928_v0, %v15694_v25  ;;  %8929 = vrcp.f32 %v6437_v56  ;;  %v6785_v13 = vmul.f32 %v9378_v1, %v15558_v38 }
0x23a2   :  { %v15839_v42 = vadd.f32 %v15763_v29, %v6806_v16  ;;  %8931 = vrcp.f32 %v6434_v24  ;;  %v9389_v24 = vld [vmem:[%s16245_s3 + $0x158] sm:$0xff] }
0x23a3   :  { %v6561_v36 = vpack.c.bf16 %v6535_v60, %v6534_v40  ;;  %v6827_v38 = vadd.f32 %v6785_v13, %v6779_v54  ;;  %8933 = vrcp.f32 %v6440_v26  ;;  %v9388_v60 = vld [vmem:[%s16245_s3 + $0x150] sm:$0xff] }
0x23a5   :  { %v6833_v41 = vadd.f32 %v6827_v38, %v6791_v52 }
0x23a7   :  { %v6736_v39 = vpop.f32.mrf.mxu3  ;;  %v8930_v27 = vpop.eup %8929  ;;  %v6839_v63 = vadd.f32 %v6833_v41, %v6797_v2 }
0x23a8   :  { %v6807_v29 = vmul.f32 %v9377_v61, %v6736_v39  ;;  %v8932_v62 = vpop.eup %8931  ;;  %v6537_v35 = vmul.f32 %v8930_v27, %v15753_v47  ;;  %v9387_v39 = vld [vmem:[%s16245_s3 + $0x128] sm:$0xff] }
0x23a9   :  { %v6845_v21 = vadd.f32 %v6839_v63, %v6803_v18  ;;  %v6536_v34 = vmul.f32 %v8932_v62, %v15740_v37  ;;  %v8934_v58 = vpop.eup %8933  ;;  %v9394_v63 = vld [vmem:[%s16245_s3 + $0x148] sm:$0xff] }
0x23aa   :  { %v15850_v6 = vadd.f32 %v6843_v31, %v6807_v29  ;;  %v6538_v47 = vmul.f32 %v8934_v58, %v15712_v15  ;;  %v9386_v15 = vld [vmem:[%s16245_s3 + $0x120] sm:$0xff] }
0x23ab   :  { %v6562_v30 = vpack.c.bf16 %v6537_v35, %v6536_v34  ;;  %v9396_v34 = vld [vmem:[%s16245_s3 + $0x178] sm:$0xff]  ;;  %v9397_v58 = vld [vmem:[%s16179_s10] ss:$0 sm:$0xff] }
0x23ac   :  { %7958 = vmatmul.msk.bf16.gmra.mxu3 %vm1128_vm2, %v6561_v36 }
0x23af   :  { %v6739_v25 = vpop.f32.mrf.mxu3 }
0x23b0   :  { %v6808_v19 = vmul.f32 %v9381_v14, %v6739_v25  ;;  %v9392_v14 = vld [vmem:[%s16245_s3 + $0x160] sm:$0xff] }
0x23b2   :  { %v6850_v5 = vadd.f32 %v15775_v28, %v6808_v19 }
0x23b7   :  { %v6741_v49 = vpop.f32.mrf.mxu3 }
0x23b8   :  { %v6809_v28 = vmul.f32 %v9384_v20, %v6741_v49 }
0x23ba   :  { %v6851_v23 = vadd.f32 %v6845_v21, %v6809_v28 }
0x23bc   :  { %7959 = vmatmul.msk.bf16.gmra.mxu3 %vm1128_vm2, %v6562_v30 }
0x23ce   :  { %v6744_v33 = vpop.f32.mrf.mxu3 }
0x23cf   :  { %v6443_v51 = vpop.xlane.xlu1 %6442 }
0x23d0   :  { %8935 = vrcp.f32 %v6443_v51 }
0x23d6   :  { %v8936_v46 = vpop.eup %8935  ;;  %v6746_v53 = vpop.f32.mrf.mxu3 }
0x23d7   :  { %v6539_v16 = vmul.f32 %v8936_v46, %v15779_v4  ;;  %v6810_v4 = vmul.f32 %v9386_v15, %v6744_v33  ;;  %v6811_v31 = vmul.f32 %v9387_v39, %v6746_v53 }
0x23d9   :  { %v6563_v37 = vpack.c.bf16 %v6539_v16, %v6538_v47  ;;  %v6852_v56 = vadd.f32 %v15806_v59, %v6810_v4  ;;  %v6853_v36 = vadd.f32 %v15816_v48, %v6811_v31  ;;  %v9391_v59 = vld [vmem:[%s16245_s3 + $0x138] sm:$0xff] }
0x23db   :  { %7960 = vmatmul.msk.bf16.gmra.mxu3 %vm1128_vm2, %v6563_v37 }
0x23de   :  { %v6749_v9 = vpop.f32.mrf.mxu3 }
0x23df   :  { %v6812_v52 = vmul.f32 %v9390_v8, %v6749_v9 }
0x23e1   :  { %v6854_v12 = vadd.f32 %v15839_v42, %v6812_v52  ;;  %v9395_v42 = vld [vmem:[%s16245_s3 + $0x170] sm:$0xff] }
0x23e6   :  { %v6751_v22 = vpop.f32.mrf.mxu3 }
0x23e7   :  { %v6813_v48 = vmul.f32 %v9391_v59, %v6751_v22 }
0x23e9   :  { %v6855_v2 = vadd.f32 %v15850_v6, %v6813_v48 }
0x241f   :  { %v6754_v57 = vpop.f32.mrf.mxu3 }
0x2420   :  { %v6814_v17 = vmul.f32 %v9385_v3, %v6754_v57 }
0x2422   :  { %v6856_v0 = vadd.f32 %v6850_v5, %v6814_v17  ;;  %v9393_v5 = vld [vmem:[%s16245_s3 + $0x168] sm:$0xff] }
0x2427   :  { %v6756_v43 = vpop.f32.mrf.mxu3 }
0x2428   :  { %v6815_v35 = vmul.f32 %v9394_v63, %v6756_v43 }
0x242a   :  { %v6857_v21 = vadd.f32 %v6851_v23, %v6815_v35 }
0x242f   :  { %v6759_v40 = vpop.f32.mrf.mxu3 }
0x2430   :  { %v6816_v61 = vmul.f32 %v9388_v60, %v6759_v40 }
0x2432   :  { %v6858_v13 = vadd.f32 %v6852_v56, %v6816_v61 }
0x2437   :  { %v6761_v29 = vpop.f32.mrf.mxu3 }
0x2438   :  { %v6817_v1 = vmul.f32 %v9389_v24, %v6761_v29  ;;  %v16338_v29 = vld [vmem:[#allocation8_spill] sm:$0xff] }
0x243a   :  { %v6859_v25 = vadd.f32 %v6853_v36, %v6817_v1 }
0x243c   :  { %v6864_v7 = vpack.c.bf16 %v6859_v25, %v6858_v13 }
0x243e   :  { %7961 = vmatmul.msk.bf16.vlgmr.msra.gmra.mxu1 %vm794_vm1, %v6864_v7 }
0x243f   :  { %v6764_v54 = vpop.f32.mrf.mxu3 }
0x2440   :  { %v6818_v19 = vmul.f32 %v9392_v14, %v6764_v54 }
0x2442   :  { %v6860_v41 = vadd.f32 %v6854_v12, %v6818_v19 }
0x2447   :  { %v6766_v38 = vpop.f32.mrf.mxu3 }
0x2448   :  { %v6819_v27 = vmul.f32 %v9393_v5, %v6766_v38 }
0x244a   :  { %v6861_v11 = vadd.f32 %v6855_v2, %v6819_v27 }
0x244c   :  { %v6865_v18 = vpack.c.bf16 %v6861_v11, %v6860_v41 }
0x244e   :  { %7962 = vmatmul.msk.bf16.gmra.mxu1 %vm794_vm1, %v6865_v18 }
0x245e   :  { %v6769_v62 = vpop.f32.mrf.mxu3 }
0x245f   :  { %v6820_v6 = vmul.f32 %v9395_v42, %v6769_v62 }
0x2461   :  { %v6862_v28 = vadd.f32 %v6856_v0, %v6820_v6 }
0x2466   :  { %v6771_v49 = vpop.f32.mrf.mxu3 }
0x2467   :  { %v6821_v20 = vmul.f32 %v9396_v34, %v6771_v49 }
0x2469   :  { %v6863_v30 = vadd.f32 %v6857_v21, %v6821_v20 }
0x246b   :  { %v6866_v26 = vpack.c.bf16 %v6863_v30, %v6862_v28 }
0x246d   :  { %7963 = vmatmul.msk.bf16.gmra.mxu1 %vm794_vm1, %v6866_v26 }
0x24bb   :  { %v6885_v51 = vpop.f32.mrf.mxu1 }
0x24bc   :  { %v6886_v46 = vadd.f32 %v9397_v58, %v6885_v51 }
0x24be   :  { %v6900_v47 = vadd.f32 %v6886_v46, %v14624_v45 }
0x24c0   :  { %v6906_v23 = vsel %vm794_vm1, %v6900_v47, 0.0 }
0x24c1   :  { %6907 = vadd.xlane.f32.xlu2 %v6906_v23 }
0x24c3   :  { %v6887_v16 = vpop.f32.mrf.mxu1 }
0x24c4   :  { %v6888_v37 = vadd.f32 %v9397_v58, %v6887_v16 }
0x24c6   :  { %v6901_v33 = vadd.f32 %v6888_v37, %v14626_v50 }
0x24c8   :  { %v6909_v53 = vsel %vm794_vm1, %v6901_v33, 0.0 }
0x24c9   :  { %6910 = vadd.xlane.f32.xlu0 %v6909_v53 }
0x24cb   :  { %v6890_v9 = vpop.f32.mrf.mxu1 }
0x24cc   :  { %v6891_v22 = vadd.f32 %v9397_v58, %v6890_v9 }
0x24ce   :  { %v6902_v57 = vadd.f32 %v6891_v22, %v14636_v32 }
0x24d0   :  { %v6912_v3 = vsel %vm794_vm1, %v6902_v57, 0.0 }
0x24d1   :  { %6913 = vadd.xlane.f32.xlu1 %v6912_v3 }
0x24d3   :  { %v6892_v17 = vpop.f32.mrf.mxu1 }
0x24d4   :  { %v6893_v0 = vadd.f32 %v9397_v58, %v6892_v17 }
0x24d6   :  { %v6903_v45 = vadd.f32 %v6893_v0, %v14638_v10 }
0x24d8   :  { %v6915_v43 = vsel %vm794_vm1, %v6903_v45, 0.0 }
0x24d9   :  { %6916 = vadd.xlane.f32.xlu2 %v6915_v43 }
0x24ea   :  { %v6895_v40 = vpop.f32.mrf.mxu1 }
0x24eb   :  { %v6896_v15 = vadd.f32 %v9397_v58, %v6895_v40 }
0x24ed   :  { %v6904_v50 = vadd.f32 %v6896_v15, %v14647_v55 }
0x24ef   :  { %v6918_v4 = vsel %vm794_vm1, %v6904_v50, 0.0 }
0x24f0   :  { %6919 = vadd.xlane.f32.xlu0 %v6918_v4 }
0x24f2   :  { %v6897_v39 = vpop.f32.mrf.mxu1 }
0x24f3   :  { %v6898_v31 = vadd.f32 %v9397_v58, %v6897_v39 }
0x24f5   :  { %v6905_v32 = vadd.f32 %v6898_v31, %v14649_v44  ;;  %v15988_v31 = vld [vmem:[%s16181_s11] ss:$0 sm:$0xff] }
0x24f7   :  { %v6921_v60 = vsel %vm794_vm1, %v6905_v32, 0.0 }
0x24f8   :  { %6922 = vadd.xlane.f32.xlu1 %v6921_v60 }
0x2534   :  { %v6908_v61 = vpop.xlane.xlu2 %6907 }
0x2535   :  { %v6924_v10 = vmul.f32 %v6908_v61, %v16338_v29 }
0x2537   :  { %v15945_v56 = vsub.f32 %v6900_v47, %v6924_v10 }
0x2539   :  { %v6936_v36 = vmul.f32 %v15945_v56, %v15945_v56 }
0x253b   :  { %v6942_v55 = vsel %vm794_vm1, %v6936_v36, 0.0 }
0x253c   :  { %v6911_v24 = vpop.xlane.xlu0 %6910  ;;  %6943 = vadd.xlane.f32.xlu2 %v6942_v55  ;;  %v9399_v55 = vld [vmem:[%s16182_s12] ss:$0 sm:$0xff] }
0x253d   :  { %v6925_v1 = vmul.f32 %v6911_v24, %v16338_v29 }
0x253f   :  { %v15951_v13 = vsub.f32 %v6901_v33, %v6925_v1 }
0x2541   :  { %v6937_v44 = vmul.f32 %v15951_v13, %v15951_v13 }
0x2543   :  { %v6945_v25 = vsel %vm794_vm1, %v6937_v44, 0.0 }
0x2544   :  { %v6914_v7 = vpop.xlane.xlu1 %6913  ;;  %6946 = vadd.xlane.f32.xlu0 %v6945_v25 }
0x2545   :  { %v6926_v54 = vmul.f32 %v6914_v7, %v16338_v29 }
0x2547   :  { %v15957_v8 = vsub.f32 %v6902_v57, %v6926_v54 }
0x2549   :  { %v6938_v52 = vmul.f32 %v15957_v8, %v15957_v8 }
0x254b   :  { %v6948_v59 = vsel %vm794_vm1, %v6938_v52, 0.0 }
0x254c   :  { %6949 = vadd.xlane.f32.xlu1 %v6948_v59  ;;  %v6917_v48 = vpop.xlane.xlu2 %6916 }
0x254d   :  { %v6927_v14 = vmul.f32 %v6917_v48, %v16338_v29 }
0x254f   :  { %v15963_v19 = vsub.f32 %v6903_v45, %v6927_v14 }
0x2551   :  { %v6939_v38 = vmul.f32 %v15963_v19, %v15963_v19 }
0x2553   :  { %v6951_v12 = vsel %vm794_vm1, %v6939_v38, 0.0 }
0x2554   :  { %6952 = vadd.xlane.f32.xlu2 %v6951_v12 }
0x2563   :  { %v6920_v2 = vpop.xlane.xlu0 %6919 }
0x2564   :  { %v6928_v5 = vmul.f32 %v6920_v2, %v16338_v29 }
0x2566   :  { %v15969_v27 = vsub.f32 %v6904_v50, %v6928_v5 }
0x2568   :  { %v6940_v41 = vmul.f32 %v15969_v27, %v15969_v27 }
0x256a   :  { %v6954_v11 = vsel %vm794_vm1, %v6940_v41, 0.0 }
0x256b   :  { %v6923_v18 = vpop.xlane.xlu1 %6922  ;;  %6955 = vadd.xlane.f32.xlu0 %v6954_v11 }
0x256c   :  { %v6929_v62 = vmul.f32 %v6923_v18, %v16338_v29 }
0x256e   :  { %v15975_v63 = vsub.f32 %v6905_v32, %v6929_v62 }
0x2570   :  { %v6941_v35 = vmul.f32 %v15975_v63, %v15975_v63 }
0x2572   :  { %v6957_v42 = vsel %vm794_vm1, %v6941_v35, 0.0 }
0x2573   :  { %6958 = vadd.xlane.f32.xlu1 %v6957_v42 }
0x25af   :  { %v6944_v6 = vpop.xlane.xlu2 %6943 }
0x25b0   :  { %v6960_v49 = vmul.f32 %v6944_v6, %v16338_v29 }
0x25b2   :  { %v6966_v21 = vadd.f32 1e-05, %v6960_v49 }
0x25b4   :  { %8937 = vrsqrt.f32 %v6966_v21  ;;  %vm6978_vm9 = vweird.f32 %v6966_v21 }
0x25b7   :  { %v6947_v34 = vpop.xlane.xlu0 %6946 }
0x25b8   :  { %v6961_v20 = vmul.f32 %v6947_v34, %v16338_v29 }
0x25ba   :  { %v8938_v28 = vpop.eup %8937  ;;  %v6967_v30 = vadd.f32 1e-05, %v6961_v20 }
0x25bb   :  { %v6973_v26 = vmul.f32 %v8938_v28, %v6966_v21  ;;  %vm6979_vm7 = vweird.f32 %v8938_v28 }
0x25bc   :  { %8939 = vrsqrt.f32 %v6967_v30  ;;  %vm6980_vm10 = vmor %vm6978_vm9, %vm6979_vm7  ;;  %vm6988_vm12 = vweird.f32 %v6967_v30 }
0x25bd   :  { %v6974_v51 = vmul.f32 %v8938_v28, %v6973_v26 }
0x25bf   :  { %v6975_v58 = vmul.f32 0.5, %v6974_v51  ;;  %v6950_v46 = vpop.xlane.xlu1 %6949 }
0x25c0   :  { %v6962_v47 = vmul.f32 %v6950_v46, %v16338_v29 }
0x25c1   :  { %v6976_v23 = vsub.f32 1.5, %v6975_v58 }
0x25c2   :  { %v8940_v16 = vpop.eup %8939  ;;  %v6968_v37 = vadd.f32 1e-05, %v6962_v47 }
0x25c3   :  { %v6977_v33 = vmul.f32 %v8938_v28, %v6976_v23  ;;  %v6983_v53 = vmul.f32 %v8940_v16, %v6967_v30  ;;  %vm6989_vm11 = vweird.f32 %v8940_v16 }
0x25c4   :  { %8941 = vrsqrt.f32 %v6968_v37  ;;  %vm6990_vm13 = vmor %vm6988_vm12, %vm6989_vm11  ;;  %vm6998_vm15 = vweird.f32 %v6968_v37 }
0x25c5   :  { %v6984_v9 = vmul.f32 %v8940_v16, %v6983_v53  ;;  %v6981_v22 = vsel %vm6980_vm10, %v8938_v28, %v6977_v33 }
0x25c6   :  { %v7032_v43 = vmul.f32 %v6981_v22, %v15945_v56 }
0x25c7   :  { %v6985_v57 = vmul.f32 0.5, %v6984_v9  ;;  %v6953_v3 = vpop.xlane.xlu2 %6952 }
0x25c8   :  { %v6963_v17 = vmul.f32 %v6953_v3, %v16338_v29  ;;  %v7038_v32 = vmul.f32 %v15988_v31, %v7032_v43 }
0x25c9   :  { %v6986_v0 = vsub.f32 1.5, %v6985_v57 }
0x25ca   :  { %v8942_v45 = vpop.eup %8941  ;;  %v6969_v40 = vadd.f32 1e-05, %v6963_v17  ;;  %v15996_v24 = vadd.f32 %v9399_v55, %v7038_v32 }
0x25cb   :  { %v6987_v15 = vmul.f32 %v8940_v16, %v6986_v0  ;;  %v6993_v50 = vmul.f32 %v8942_v45, %v6968_v37  ;;  %vm6999_vm14 = vweird.f32 %v8942_v45 }
0x25cc   :  { %8943 = vrsqrt.f32 %v6969_v40  ;;  %vm7000_vm0 = vmor %vm6998_vm15, %vm6999_vm14  ;;  %vm7008_vm4 = vweird.f32 %v6969_v40 }
0x25cd   :  { %v6991_v4 = vsel %vm6990_vm13, %v8940_v16, %v6987_v15  ;;  %v6994_v39 = vmul.f32 %v8942_v45, %v6993_v50 }
0x25ce   :  { %v7033_v60 = vmul.f32 %v6991_v4, %v15951_v13 }
0x25cf   :  { %v6995_v61 = vmul.f32 0.5, %v6994_v39 }
0x25d0   :  { %v7039_v10 = vmul.f32 %v15988_v31, %v7033_v60 }
0x25d1   :  { %v6996_v56 = vsub.f32 1.5, %v6995_v61 }
0x25d2   :  { %v8944_v36 = vpop.eup %8943  ;;  %v15998_v1 = vadd.f32 %v9399_v55, %v7039_v10 }
0x25d3   :  { %v6997_v44 = vmul.f32 %v8942_v45, %v6996_v56  ;;  %v7003_v25 = vmul.f32 %v8944_v36, %v6969_v40  ;;  %vm7009_vm3 = vweird.f32 %v8944_v36 }
0x25d4   :  { %v7050_v7 = vpack.c.bf16 %v15998_v1, %v15996_v24  ;;  %vm7010_vm5 = vmor %vm7008_vm4, %vm7009_vm3 }
0x25d5   :  { %v7004_v13 = vmul.f32 %v8944_v36, %v7003_v25  ;;  %v7001_v54 = vsel %vm7000_vm0, %v8942_v45, %v6997_v44 }
0x25d6   :  { %7964 = vmatmul.msk.bf16.vlgmr.msra.gmra.mxu0 %vm794_vm1, %v7050_v7  ;;  %v7034_v48 = vmul.f32 %v7001_v54, %v15957_v8 }
0x25d7   :  { %v7005_v52 = vmul.f32 0.5, %v7004_v13 }
0x25d8   :  { %v7040_v5 = vmul.f32 %v15988_v31, %v7034_v48 }
0x25d9   :  { %v7006_v59 = vsub.f32 1.5, %v7005_v52 }
0x25da   :  { %v16008_v62 = vadd.f32 %v9399_v55, %v7040_v5 }
0x25db   :  { %v7007_v14 = vmul.f32 %v8944_v36, %v7006_v59 }
0x25dd   :  { %v7011_v38 = vsel %vm7010_vm5, %v8944_v36, %v7007_v14  ;;  %v9401_v14 = vld [vmem:[%s16185_s16] ss:$0 sm:$0xff] }
0x25de   :  { %v7035_v12 = vmul.f32 %v7011_v38, %v15963_v19  ;;  %v6956_v2 = vpop.xlane.xlu0 %6955 }
0x25df   :  { %v6964_v41 = vmul.f32 %v6956_v2, %v16338_v29 }
0x25e0   :  { %v7041_v11 = vmul.f32 %v15988_v31, %v7035_v12 }
0x25e1   :  { %v6970_v18 = vadd.f32 1e-05, %v6964_v41 }
0x25e2   :  { %v16010_v35 = vadd.f32 %v9399_v55, %v7041_v11 }
0x25e3   :  { %8945 = vrsqrt.f32 %v6970_v18  ;;  %vm7018_vm7 = vweird.f32 %v6970_v18 }
0x25e4   :  { %v7051_v8 = vpack.c.bf16 %v16010_v35, %v16008_v62 }
0x25e6   :  { %v6959_v42 = vpop.xlane.xlu1 %6958  ;;  %7965 = vmatmul.msk.bf16.gmra.mxu0 %vm794_vm1, %v7051_v8 }
0x25e7   :  { %v6965_v19 = vmul.f32 %v6959_v42, %v16338_v29 }
0x25e9   :  { %v8946_v6 = vpop.eup %8945  ;;  %v6971_v49 = vadd.f32 1e-05, %v6965_v19 }
0x25ea   :  { %v7013_v21 = vmul.f32 %v8946_v6, %v6970_v18  ;;  %vm7019_vm6 = vweird.f32 %v8946_v6 }
0x25eb   :  { %8947 = vrsqrt.f32 %v6971_v49  ;;  %vm7020_vm9 = vmor %vm7018_vm7, %vm7019_vm6  ;;  %vm7028_vm11 = vweird.f32 %v6971_v49 }
0x25ec   :  { %v7014_v34 = vmul.f32 %v8946_v6, %v7013_v21 }
0x25ee   :  { %v7015_v20 = vmul.f32 0.5, %v7014_v34 }
0x25f0   :  { %v7016_v28 = vsub.f32 1.5, %v7015_v20 }
0x25f1   :  { %v8948_v30 = vpop.eup %8947 }
0x25f2   :  { %v7017_v26 = vmul.f32 %v8946_v6, %v7016_v28  ;;  %v7023_v51 = vmul.f32 %v8948_v30, %v6971_v49  ;;  %vm7029_vm10 = vweird.f32 %v8948_v30 }
0x25f3   :  { %vm7030_vm12 = vmor %vm7028_vm11, %vm7029_vm10 }
0x25f4   :  { %v7024_v58 = vmul.f32 %v8948_v30, %v7023_v51  ;;  %v7021_v46 = vsel %vm7020_vm9, %v8946_v6, %v7017_v26 }
0x25f5   :  { %v7036_v16 = vmul.f32 %v7021_v46, %v15969_v27  ;;  %v9400_v27 = vld [vmem:[%s16183_s14] ss:$0 sm:$0xff] }
0x25f6   :  { %v7025_v47 = vmul.f32 0.5, %v7024_v58 }
0x25f7   :  { %v7042_v9 = vmul.f32 %v15988_v31, %v7036_v16 }
0x25f8   :  { %v7026_v23 = vsub.f32 1.5, %v7025_v47 }
0x25f9   :  { %v7048_v57 = vadd.f32 %v9399_v55, %v7042_v9 }
0x25fa   :  { %v7027_v37 = vmul.f32 %v8948_v30, %v7026_v23 }
0x25fc   :  { %v7031_v33 = vsel %vm7030_vm12, %v8948_v30, %v7027_v37 }
0x25fd   :  { %v7037_v53 = vmul.f32 %v7031_v33, %v15975_v63 }
0x25ff   :  { %v7043_v22 = vmul.f32 %v15988_v31, %v7037_v53 }
0x2601   :  { %v7049_v3 = vadd.f32 %v9399_v55, %v7043_v22 }
0x2603   :  { %v7052_v17 = vpack.c.bf16 %v7049_v3, %v7048_v57 }
0x2605   :  { %7966 = vmatmul.msk.bf16.gmra.mxu0 %vm794_vm1, %v7052_v17 }
0x2653   :  { %v7071_v0 = vpop.f32.mrf.mxu0 }
0x2654   :  { %v7072_v45 = vadd.f32 %v9400_v27, %v7071_v0 }
0x2656   :  { %v7086_v15 = vmax.f32 %v7072_v45, 0.0 }
0x265b   :  { %v7073_v43 = vpop.f32.mrf.mxu0 }
0x265c   :  { %v7074_v40 = vadd.f32 %v9400_v27, %v7073_v43 }
0x265e   :  { %v7087_v50 = vmax.f32 %v7074_v40, 0.0 }
0x2660   :  { %v7092_v63 = vpack.c.bf16 %v7087_v50, %v7086_v15 }
0x2662   :  { %7967 = vmatmul.msk.bf16.vlgmr.msrb.gmra.mxu1 %vm2282_vm8, %v7092_v63 }
0x2663   :  { %v7076_v4 = vpop.f32.mrf.mxu0 }
0x2664   :  { %v7077_v39 = vadd.f32 %v9400_v27, %v7076_v4 }
0x2666   :  { %v7088_v60 = vmax.f32 %v7077_v39, 0.0 }
0x266b   :  { %v7078_v31 = vpop.f32.mrf.mxu0 }
0x266c   :  { %v7079_v32 = vadd.f32 %v9400_v27, %v7078_v31 }
0x266e   :  { %v7089_v61 = vmax.f32 %v7079_v32, 0.0 }
0x2670   :  { %v7093_v10 = vpack.c.bf16 %v7089_v61, %v7088_v60 }
0x2672   :  { %7968 = vmatmul.msk.bf16.gmra.mxu1 %vm2282_vm8, %v7093_v10 }
0x2682   :  { %v7081_v56 = vpop.f32.mrf.mxu0 }
0x2683   :  { %v7082_v36 = vadd.f32 %v9400_v27, %v7081_v56 }
0x2685   :  { %v7090_v25 = vmax.f32 %v7082_v36, 0.0 }
0x268a   :  { %v7083_v55 = vpop.f32.mrf.mxu0 }
0x268b   :  { %v7084_v44 = vadd.f32 %v9400_v27, %v7083_v55 }
0x268d   :  { %v7091_v7 = vmax.f32 %v7084_v44, 0.0 }
0x268f   :  { %v7094_v13 = vpack.c.bf16 %v7091_v7, %v7090_v25 }
0x2691   :  { %7969 = vmatmul.msk.bf16.gmra.mxu1 %vm2282_vm8, %v7094_v13 }
0x26df   :  { %v7113_v54 = vpop.f32.mrf.mxu1 }
0x26e0   :  { %v7114_v2 = vadd.f32 %v9401_v14, %v7113_v54 }
0x26e2   :  { %v7128_v41 = vadd.f32 %v7114_v2, %v15996_v24 }
0x26e4   :  { %v7134_v11 = vsel %vm794_vm1, %v7128_v41, 0.0 }
0x26e7   :  { %v7115_v52 = vpop.f32.mrf.mxu1 }
0x26e8   :  { %v7116_v19 = vadd.f32 %v9401_v14, %v7115_v52 }
0x26ea   :  { %v7129_v21 = vadd.f32 %v7116_v19, %v15998_v1 }
0x26ec   :  { %v7137_v24 = vsel %vm794_vm1, %v7129_v21, 0.0 }
0x26ef   :  { %v7118_v59 = vpop.f32.mrf.mxu1 }
0x26f0   :  { %v7119_v20 = vadd.f32 %v9401_v14, %v7118_v59 }
0x26f2   :  { %v7130_v30 = vadd.f32 %v7119_v20, %v16008_v62 }
0x26f4   :  { %v7140_v26 = vsel %vm794_vm1, %v7130_v30, 0.0 }
0x26f7   :  { %v7120_v48 = vpop.f32.mrf.mxu1 }
0x26f8   :  { %v7121_v38 = vadd.f32 %v9401_v14, %v7120_v48 }
0x26fa   :  { %v7131_v12 = vadd.f32 %v7121_v38, %v16010_v35 }
0x26fc   :  { %v7143_v5 = vsel %vm794_vm1, %v7131_v12, 0.0 }
0x26fd   :  { %7144 = vadd.xlane.f32.xlu1 %v7143_v5 }
0x2705   :  { %7135 = vadd.xlane.f32.xlu1 %v7134_v11 }
0x270e   :  { %v7123_v18 = vpop.f32.mrf.mxu1 }
0x270f   :  { %v7124_v8 = vadd.f32 %v9401_v14, %v7123_v18 }
0x2711   :  { %v7132_v42 = vadd.f32 %v7124_v8, %v7048_v57 }
0x2713   :  { %v7146_v6 = vsel %vm794_vm1, %v7132_v42, 0.0 }
0x2714   :  { %7147 = vadd.xlane.f32.xlu0 %v7146_v6 }
0x2716   :  { %v7125_v49 = vpop.f32.mrf.mxu1 }
0x2717   :  { %v7126_v35 = vadd.f32 %v9401_v14, %v7125_v49 }
0x2719   :  { %v7133_v34 = vadd.f32 %v7126_v35, %v7049_v3 }
0x271b   :  { %v7149_v28 = vsel %vm794_vm1, %v7133_v34, 0.0 }
0x271c   :  { %7150 = vadd.xlane.f32.xlu2 %v7149_v28  ;;  %7138 = vadd.xlane.f32.xlu0 %v7137_v24 }
0x2724   :  { %7141 = vadd.xlane.f32.xlu2 %v7140_v26 }
0x2770   :  { %v7145_v51 = vpop.xlane.xlu1 %7144 }
0x2771   :  { %v7155_v58 = vmul.f32 %v7145_v51, %v16338_v29 }
0x2773   :  { %v16041_v46 = vsub.f32 %v7131_v12, %v7155_v58 }
0x2775   :  { %v7167_v1 = vmul.f32 %v16041_v46, %v16041_v46 }
0x2777   :  { %v7179_v47 = vsel %vm794_vm1, %v7167_v1, 0.0 }
0x2778   :  { %7180 = vadd.xlane.f32.xlu1 %v7179_v47  ;;  %v7136_v23 = vpop.xlane.xlu1 %7135 }
0x2779   :  { %v7152_v16 = vmul.f32 %v7136_v23, %v16338_v29 }
0x277b   :  { %v16047_v37 = vsub.f32 %v7128_v41, %v7152_v16 }
0x277d   :  { %v7164_v62 = vmul.f32 %v16047_v37, %v16047_v37 }
0x277f   :  { %v7170_v33 = vsel %vm794_vm1, %v7164_v62, 0.0 }
0x2780   :  { %7171 = vadd.xlane.f32.xlu1 %v7170_v33 }
0x2787   :  { %v7148_v53 = vpop.xlane.xlu0 %7147 }
0x2788   :  { %v7156_v9 = vmul.f32 %v7148_v53, %v16338_v29 }
0x278a   :  { %v16053_v22 = vsub.f32 %v7132_v42, %v7156_v9 }
0x278c   :  { %v7168_v57 = vmul.f32 %v16053_v22, %v16053_v22 }
0x278e   :  { %v7182_v3 = vsel %vm794_vm1, %v7168_v57, 0.0 }
0x278f   :  { %v7151_v17 = vpop.xlane.xlu2 %7150  ;;  %7183 = vadd.xlane.f32.xlu0 %v7182_v3  ;;  %v7139_v0 = vpop.xlane.xlu0 %7138 }
0x2790   :  { %v7157_v27 = vmul.f32 %v7151_v17, %v16338_v29  ;;  %v7153_v45 = vmul.f32 %v7139_v0, %v16338_v29 }
0x2792   :  { %v16060_v43 = vsub.f32 %v7133_v34, %v7157_v27  ;;  %v16062_v40 = vsub.f32 %v7129_v21, %v7153_v45 }
0x2794   :  { %v7165_v15 = vmul.f32 %v16062_v40, %v16062_v40  ;;  %v7169_v50 = vmul.f32 %v16060_v43, %v16060_v43 }
0x2796   :  { %v7173_v63 = vsel %vm794_vm1, %v7165_v15, 0.0  ;;  %v7185_v4 = vsel %vm794_vm1, %v7169_v50, 0.0 }
0x2797   :  { %7174 = vadd.xlane.f32.xlu0 %v7173_v63  ;;  %7186 = vadd.xlane.f32.xlu2 %v7185_v4  ;;  %v7142_v39 = vpop.xlane.xlu2 %7141 }
0x2798   :  { %v7154_v31 = vmul.f32 %v7142_v39, %v16338_v29 }
0x279a   :  { %v16071_v32 = vsub.f32 %v7130_v30, %v7154_v31 }
0x279c   :  { %v7166_v60 = vmul.f32 %v16071_v32, %v16071_v32 }
0x279e   :  { %v7176_v61 = vsel %vm794_vm1, %v7166_v60, 0.0 }
0x279f   :  { %7177 = vadd.xlane.f32.xlu2 %v7176_v61 }
0x27eb   :  { %v7181_v10 = vpop.xlane.xlu1 %7180 }
0x27ec   :  { %v7191_v56 = vmul.f32 %v7181_v10, %v16338_v29 }
0x27ee   :  { %v7197_v36 = vadd.f32 1e-05, %v7191_v56 }
0x27f0   :  { %8949 = vrsqrt.f32 %v7197_v36  ;;  %vm7236_vm3 = vweird.f32 %v7197_v36 }
0x27f3   :  { %v7172_v55 = vpop.xlane.xlu1 %7171 }
0x27f4   :  { %v7188_v44 = vmul.f32 %v7172_v55, %v16338_v29 }
0x27f6   :  { %v16079_v13 = vadd.f32 1e-05, %v7188_v44  ;;  %v8950_v52 = vpop.eup %8949 }
0x27f7   :  { %v7231_v59 = vmul.f32 %v8950_v52, %v7197_v36  ;;  %vm7237_vm14 = vweird.f32 %v8950_v52 }
0x27f8   :  { %vm7238_vm4 = vmor %vm7236_vm3, %vm7237_vm14  ;;  %vm7206_vm12 = vweird.f32 %v16079_v13 }
0x27f9   :  { %v7232_v11 = vmul.f32 %v8950_v52, %v7231_v59 }
0x27fb   :  { %v7233_v19 = vmul.f32 0.5, %v7232_v11 }
0x27fd   :  { %v7234_v30 = vsub.f32 1.5, %v7233_v19  ;;  %v7341_v19 = vld [vmem:[%s16191_s21 + $0x8] sm:$0xff] }
0x27ff   :  { %v7235_v16 = vmul.f32 %v8950_v52, %v7234_v30  ;;  %v8070_v30 = vld [vmem:[%s16193_s22 + $0x28] sm:$0xff] }
0x2800   :  { %7450 = vmatpush.bf16.msra.mxu1 %v8070_v30 }
0x2801   :  { %v7239_v17 = vsel %vm7238_vm4, %v8950_v52, %v7235_v16 }
0x2802   :  { %v7184_v25 = vpop.xlane.xlu0 %7183  ;;  %v7263_v39 = vmul.f32 %v7239_v17, %v16041_v46 }
0x2803   :  { %v7192_v7 = vmul.f32 %v7184_v25, %v16338_v29 }
0x2805   :  { %v7198_v54 = vadd.f32 1e-05, %v7192_v7  ;;  %v9403_v7 = vld [vmem:[%s16188_s18] ss:$0 sm:$0xff] }
0x2807   :  { %8951 = vrsqrt.f32 %v7198_v54  ;;  %vm7246_vm15 = vweird.f32 %v7198_v54 }
0x2808   :  { %8953 = vrsqrt.f32 %v16079_v13 }
0x280a   :  { %v7175_v48 = vpop.xlane.xlu0 %7174  ;;  %v7187_v14 = vpop.xlane.xlu2 %7186 }
0x280b   :  { %v7189_v38 = vmul.f32 %v7175_v48, %v16338_v29  ;;  %v7193_v12 = vmul.f32 %v7187_v14, %v16338_v29 }
0x280d   :  { %v8952_v2 = vpop.eup %8951  ;;  %v7195_v5 = vadd.f32 1e-05, %v7189_v38  ;;  %v7199_v41 = vadd.f32 1e-05, %v7193_v12 }
0x280e   :  { %v7241_v18 = vmul.f32 %v8952_v2, %v7198_v54  ;;  %v16084_v8 = vpop.eup %8953  ;;  %vm7247_vm13 = vweird.f32 %v8952_v2 }
0x280f   :  { %8955 = vrsqrt.f32 %v7195_v5  ;;  %v7201_v6 = vmul.f32 %v16084_v8, %v16079_v13  ;;  %vm7248_vm0 = vmor %vm7246_vm15, %vm7247_vm13  ;;  %vm7256_vm6 = vweird.f32 %v7199_v41  ;;  %vm7207_vm10 = vweird.f32 %v16084_v8 }
0x2810   :  { %v7242_v42 = vmul.f32 %v8952_v2, %v7241_v18  ;;  %8957 = vrsqrt.f32 %v7199_v41  ;;  %vm7216_vm11 = vweird.f32 %v7195_v5  ;;  %vm7208_vm15 = vmor %vm7206_vm12, %vm7207_vm10 }
0x2811   :  { %v7202_v26 = vmul.f32 %v16084_v8, %v7201_v6 }
0x2812   :  { %v7243_v49 = vmul.f32 0.5, %v7242_v42  ;;  %v7178_v21 = vpop.xlane.xlu2 %7177  ;;  %v7340_v42 = vld [vmem:[%s16191_s21] sm:$0xff] }
0x2813   :  { %v7190_v35 = vmul.f32 %v7178_v21, %v16338_v29  ;;  %v7203_v62 = vmul.f32 0.5, %v7202_v26  ;;  %v8069_v26 = vld [vmem:[%s16193_s22 + $0x20] sm:$0xff] }
0x2814   :  { %v7244_v34 = vsub.f32 1.5, %v7243_v49  ;;  %7451 = vmatpush.bf16.msra.mxu1 %v8069_v26 }
0x2815   :  { %v8956_v20 = vpop.eup %8955  ;;  %v7196_v28 = vadd.f32 1e-05, %v7190_v35  ;;  %v7204_v0 = vsub.f32 1.5, %v7203_v62 }
0x2816   :  { %v8958_v24 = vpop.eup %8957  ;;  %v7211_v51 = vmul.f32 %v8956_v20, %v7195_v5  ;;  %v7245_v1 = vmul.f32 %v8952_v2, %v7244_v34  ;;  %vm7217_vm7 = vweird.f32 %v8956_v20 }
0x2817   :  { %v7251_v58 = vmul.f32 %v8958_v24, %v7199_v41  ;;  %8959 = vrsqrt.f32 %v7196_v28  ;;  %vm7257_vm5 = vweird.f32 %v8958_v24  ;;  %v7205_v31 = vmul.f32 %v16084_v8, %v7204_v0  ;;  %vm16096_vm13 = vmor %vm7216_vm11, %vm7217_vm7 }
0x2818   :  { %v7212_v47 = vmul.f32 %v8956_v20, %v7211_v51  ;;  %v7249_v53 = vsel %vm7248_vm0, %v8952_v2, %v7245_v1  ;;  %vm7258_vm9 = vmor %vm7256_vm6, %vm7257_vm5  ;;  %vm7226_vm0 = vweird.f32 %v7196_v28  ;;  %v8068_v51 = vld [vmem:[%s16193_s22 + $0x18] sm:$0xff]  ;;  %v8066_v1 = vld [vmem:[%s16193_s22 + $0x8] sm:$0xff] }
0x2819   :  { %v7252_v23 = vmul.f32 %v8958_v24, %v7251_v58  ;;  %v7264_v15 = vmul.f32 %v7249_v53, %v16053_v22  ;;  %v9402_v22 = vld [vmem:[%s16187_s17] ss:$0 sm:$0xff]  ;;  %v7209_v44 = vsel %vm7208_vm15, %v16084_v8, %v7205_v31  ;;  %v7310_v8 = vld [vmem:[%s16190_s20 + $0x8] sm:$0xff]  ;;  %7452 = vmatpush.bf16.msra.mxu1 %v8068_v51  ;;  %v8067_v58 = vld [vmem:[%s16193_s22 + $0x10] sm:$0xff] }
0x281a   :  { %v7213_v33 = vmul.f32 0.5, %v7212_v47  ;;  %v7260_v14 = vmul.f32 %v7209_v44, %v16047_v37  ;;  %v7279_v37 = vld [vmem:[%s16189_s19 + $0x8] sm:$0xff]  ;;  %v8065_v47 = vld [vmem:[%s16193_s22] sm:$0xff] }
0x281b   :  { %v7253_v29 = vmul.f32 0.5, %v7252_v23  ;;  %v7270_v56 = vmul.f32 %v9402_v22, %v7264_v15 }
0x281c   :  { %v7214_v9 = vsub.f32 1.5, %v7213_v33  ;;  %v7266_v41 = vmul.f32 %v9402_v22, %v7260_v14 }
0x281d   :  { %v8960_v57 = vpop.eup %8959  ;;  %v7254_v3 = vsub.f32 1.5, %v7253_v29  ;;  %v7276_v59 = vadd.f32 %v9403_v7, %v7270_v56  ;;  %7453 = vmatpush.bf16.msra.mxu1 %v8067_v58 }
0x281e   :  { %v7221_v27 = vmul.f32 %v8960_v57, %v7196_v28  ;;  %v7215_v50 = vmul.f32 %v8956_v20, %v7214_v9  ;;  %vm7227_vm14 = vweird.f32 %v8960_v57  ;;  %v7272_v18 = vadd.f32 %v9403_v7, %v7266_v41 }
0x281f   :  { %v7255_v45 = vmul.f32 %v8958_v24, %v7254_v3  ;;  %vm7228_vm3 = vmor %vm7226_vm0, %vm7227_vm14 }
0x2820   :  { %v7222_v63 = vmul.f32 %v8960_v57, %v7221_v27  ;;  %v7219_v46 = vsel %vm16096_vm13, %v8956_v20, %v7215_v50  ;;  %v8094_v27 = vld [vmem:[%s16192_s23] ss:$0 sm:$0xff] }
0x2821   :  { %v7259_v4 = vsel %vm7258_vm9, %v8958_v24, %v7255_v45  ;;  %v7261_v54 = vmul.f32 %v7219_v46, %v16062_v40  ;;  %v7278_v40 = vld [vmem:[%s16189_s19] sm:$0xff]  ;;  %7454 = vmatpush.bf16.msra.mxu1 %v8066_v1 }
0x2822   :  { %v7265_v60 = vmul.f32 %v7259_v4, %v16060_v43  ;;  %v7223_v61 = vmul.f32 0.5, %v7222_v63  ;;  %v7269_v43 = vmul.f32 %v9402_v22, %v7263_v39 }
0x2823   :  { %v7267_v2 = vmul.f32 %v9402_v22, %v7261_v54 }
0x2824   :  { %v7224_v36 = vsub.f32 1.5, %v7223_v61  ;;  %v7271_v55 = vmul.f32 %v9402_v22, %v7265_v60  ;;  %v7275_v38 = vadd.f32 %v9403_v7, %v7269_v43 }
0x2825   :  { %v7273_v11 = vadd.f32 %v9403_v7, %v7267_v2  ;;  %7455 = vmatpush.bf16.msra.mxu1 %v8065_v47 }
0x2826   :  { %v7225_v25 = vmul.f32 %v8960_v57, %v7224_v36  ;;  %v7277_v13 = vadd.f32 %v9403_v7, %v7271_v55 }
0x2828   :  { %v7229_v52 = vsel %vm7228_vm3, %v8960_v57, %v7225_v25  ;;  %7296 = vmatpush.msrb.mxu0 %v7277_v13 }
0x2829   :  { %v7262_v48 = vmul.f32 %v7229_v52, %v16071_v32  ;;  %v7309_v32 = vld [vmem:[%s16190_s20] sm:$0xff]  ;;  %s9407_s20 = smov 32  }
0x282a   :  { %7297 = vmatpush.msrb.mxu0 %v7276_v59 }
0x282b   :  { %v7268_v12 = vmul.f32 %v9402_v22, %v7262_v48 }
0x282c   :  { %7298 = vmatpush.msrb.mxu0 %v7275_v38 }
0x282d   :  { %v7274_v5 = vadd.f32 %v9403_v7, %v7268_v12 }
0x282f   :  { %7299 = vmatpush.msrb.mxu0 %v7274_v5 }
0x2831   :  { %7300 = vmatpush.msrb.mxu0 %v7273_v11 }
0x2833   :  { %7301 = vmatpush.msrb.mxu0 %v7272_v18 }
0x2834   :  { %7970 = vmatmul.msk.f32.vlgmr.msrb.gmra.mxu0 %vm1128_vm2, %v7278_v40 }
0x2835   :  { %7327 = vmatpush.msra.mxu0 %v7277_v13 }
0x2837   :  { %7328 = vmatpush.msra.mxu0 %v7276_v59 }
0x2839   :  { %7329 = vmatpush.msra.mxu0 %v7275_v38 }
0x283b   :  { %7330 = vmatpush.msra.mxu0 %v7274_v5 }
0x283c   :  { %7971 = vmatmul.msk.f32.gmra.mxu0 %vm1128_vm2, %v7279_v37 }
0x283d   :  { %7331 = vmatpush.msra.mxu0 %v7273_v11 }
0x283f   :  { %7332 = vmatpush.msra.mxu0 %v7272_v18 }
0x2841   :  { %7358 = vmatpush.msrb.mxu0 %v7277_v13 }
0x2843   :  { %7359 = vmatpush.msrb.mxu0 %v7276_v59 }
0x2844   :  { %7972 = vmatmul.msk.f32.vlgmr.msra.gmra.mxu0 %vm1128_vm2, %v7309_v32 }
0x2845   :  { %7360 = vmatpush.msrb.mxu0 %v7275_v38 }
0x2847   :  { %7361 = vmatpush.msrb.mxu0 %v7274_v5 }
0x2849   :  { %7362 = vmatpush.msrb.mxu0 %v7273_v11 }
0x284b   :  { %7363 = vmatpush.msrb.mxu0 %v7272_v18 }
0x284c   :  { %7973 = vmatmul.msk.f32.gmra.mxu0 %vm1128_vm2, %v7310_v8 }
0x2854   :  { %7974 = vmatmul.msk.f32.vlgmr.msrb.gmra.mxu0 %vm1128_vm2, %v7340_v42 }
0x285c   :  { %7975 = vmatmul.msk.f32.gmra.mxu0 %vm1128_vm2, %v7341_v19  ;;  %vm7444_vm2 = vcmask 785408  }
0x28b1   :  { %v7303_v6 = vpop.f32.mrf.mxu0 }
0x28b9   :  { %v7306_v49 = vpop.f32.mrf.mxu0 }
0x28c1   :  { %v7334_v21 = vpop.f32.mrf.mxu0 }
0x28c9   :  { %v7337_v35 = vpop.f32.mrf.mxu0 }
0x28ca   :  { %v8075_v34 = vpack.i.bf16 %v7337_v35, %v7334_v21 }
0x28cc   :  { %8076 = vrot.lane.b32.xlu2 %v8075_v34, %s9407_s20 }
0x28d1   :  { %v7365_v20 = vpop.f32.mrf.mxu0 }
0x28d9   :  { %v7368_v28 = vpop.f32.mrf.mxu0 }
0x28da   :  { %v8080_v24 = vpack.i.bf16 %v7368_v28, %v7365_v20 }
0x28dc   :  { %8081 = vrot.lane.b32.xlu0 %v8080_v24, %s9405_s6 }
0x2926   :  { %v8077_v23 = vpop.permute.xlu2 %8076 }
0x2927   :  { %v8079_v16 = vunpack.i.h.bf16 %v8077_v23  ;;  %v8078_v62 = vunpack.i.l.bf16 %v8077_v23 }
0x2929   :  { %v7388_v9 = vsel %vm794_vm1, %v7306_v49, %v8079_v16  ;;  %v7387_v57 = vsel %vm794_vm1, %v7303_v6, %v8078_v62 }
0x294e   :  { %v8082_v33 = vpop.permute.xlu0 %8081 }
0x294f   :  { %v8084_v29 = vunpack.i.h.bf16 %v8082_v33  ;;  %v8083_v53 = vunpack.i.l.bf16 %v8082_v33 }
0x2951   :  { %v7390_v3 = vsel %vm2282_vm8, %v7388_v9, %v8084_v29  ;;  %v7389_v17 = vsel %vm2282_vm8, %v7387_v57, %v8083_v53 }
0x2952   :  { %v7403_v0 = vpack.c.bf16 %v7390_v3, %v7389_v17 }
0x2954   :  { %8000 = vmatmul.msk.bf16.vlgmr.msra.gmra.mxu1 %vm7444_vm2, %v7403_v0 }
0x29d1   :  { %v7457_v45 = vpop.f32.mrf.mxu1 }
0x29d2   :  { %v7458_v15 = vadd.f32 %v8094_v27, %v7457_v45 }
0x29d4   :  { %7462 = vst [vmem:[%s16194_s24] sm:$0xff] %v7458_v15 }
0x29d9   :  { %v7459_v50 = vpop.f32.mrf.mxu1 }
0x29da   :  { %v7460_v63 = vadd.f32 %v8094_v27, %v7459_v50 }
0x29dc   :  { %7463 = vst [vmem:[%s16194_s24 + $0x8] sm:$0xff] %v7460_v63 }

</bundles_post_ra>
